<compile_context>
chip_gen: v7x
topology: tpu7x:2x2x1
jax: 0.10.0
libtpu: 0.0.40
codegen_flags: <defaults>
</compile_context>

<pallas_src>
import functools
import math

import jax
import jax.numpy as jnp
from jax.experimental import pallas as pl
from jax.experimental.pallas import tpu as pltpu


_N_ATTN_W = 8
_N_BLOCK_W = 3 * _N_ATTN_W + 4 + 8   # 3 attentions + MLP + 4 LayerNorms = 36
_N_FINAL_W = _N_ATTN_W + 2           # final attention + final LayerNorm = 10


# -----------------------------------------------------------------------------
# In-kernel building blocks (take weight Refs; index them at point of use)
# -----------------------------------------------------------------------------
def _attention(q, k, v, w, ht):
    """ExtraHeadAttention with main+extra heads packed on the channel axis.

    q: (Nq, C) f32, k/v: (Nk, C) f32.
    w = (wq, bq, wk, bk, wv, bv, wo, bo) refs, each with a leading size-1
    layer axis:
      wq/wk/wv: (1, C, Ht*cph) bf16   (wq/bq are pre-scaled by 1/sqrt(cph)),
      bq/bk/bv: (1, 1, Ht*cph) f32,
      wo:       (1, Ht*cph, C) bf16,  bo: (1, 1, C) f32
                (wo/bo already fold out_proj + extra_out_proj).
    Returns (Nq, C) f32.
    """
    wq_ref, bq_ref, wk_ref, bk_ref, wv_ref, bv_ref, wo_ref, bo_ref = w
    hd = wq_ref.shape[-1]          # Ht * cph  (main + extra heads packed)
    cph = hd // ht

    # Packed projections: one full-lane-width (N, C) x (C, Ht*cph) matmul each.
    qh = (jnp.dot(q.astype(jnp.bfloat16), wq_ref[0],
                  preferred_element_type=jnp.float32) + bq_ref[0]
          ).astype(jnp.bfloat16)                                   # (Nq, hd)
    kh = (jnp.dot(k.astype(jnp.bfloat16), wk_ref[0],
                  preferred_element_type=jnp.float32) + bk_ref[0]
          ).astype(jnp.bfloat16)                                   # (Nk, hd)
    vh = (jnp.dot(v.astype(jnp.bfloat16), wv_ref[0],
                  preferred_element_type=jnp.float32) + bv_ref[0]
          ).astype(jnp.bfloat16)                                   # (Nk, hd)

    # Per-head attention via static lane slices (heads = num_heads + extra).
    # The 1/sqrt(cph) scale is already folded into wq/bq.
    heads = []
    for h in range(ht):
        sl = slice(h * cph, (h + 1) * cph)
        s = jnp.einsum("qd,kd->qk", qh[:, sl], kh[:, sl],
                       preferred_element_type=jnp.float32)         # (Nq, Nk)
        s = s - jnp.max(s, axis=-1, keepdims=True)
        p = jnp.exp(s)                                             # f32 softmax
        p = p * pl.reciprocal(jnp.sum(p, axis=-1, keepdims=True), approx=True)
        heads.append(jnp.dot(p.astype(jnp.bfloat16), vh[:, sl],
                             preferred_element_type=jnp.float32))  # (Nq, cph)
    o = jnp.concatenate(heads, axis=-1)                            # (Nq, hd)

    # Packed output projection == out_proj(origin) + extra_out_proj(extra).
    return jnp.dot(o.astype(jnp.bfloat16), wo_ref[0],
                   preferred_element_type=jnp.float32) + bo_ref[0]  # (Nq, C)


def _layer_norm(x, g_ref, b_ref):
    mean = jnp.mean(x, axis=-1, keepdims=True)
    var = jnp.mean(jnp.square(x - mean), axis=-1, keepdims=True)
    return (x - mean) * jax.lax.rsqrt(var + 1e-5) * g_ref[0] + b_ref[0]


def _mlp(x, w1_ref, b1_ref, w2_ref, b2_ref):
    h = jnp.dot(x.astype(jnp.bfloat16), w1_ref[0],
                preferred_element_type=jnp.float32) + b1_ref[0]
    h = jnp.maximum(h, 0.0)
    return jnp.dot(h.astype(jnp.bfloat16), w2_ref[0],
                   preferred_element_type=jnp.float32) + b2_ref[0]


# -----------------------------------------------------------------------------
# Fused kernels
# -----------------------------------------------------------------------------
def _blocks_kernel(pts_ref, img_ref, imgpe_ref, *rest, ht):
    """All TwoWayAttentionBlocks, grid = (batch, layer).

    Per-layer weights are selected by the layer grid axis (prefetched by the
    BlockSpec pipeline); queries/keys live in f32 VMEM scratch across layers.
    """
    w = rest[:_N_BLOCK_W]
    q_out_ref, k_out_ref = rest[_N_BLOCK_W], rest[_N_BLOCK_W + 1]
    q_carry, k_carry = rest[_N_BLOCK_W + 2], rest[_N_BLOCK_W + 3]

    layer = pl.program_id(1)

    # Layer 0: seed the f32 carries from the (bf16) HBM inputs.
    @pl.when(layer == 0)
    def _():
        q_carry[...] = pts_ref[...].astype(jnp.float32)
        k_carry[...] = img_ref[...].astype(jnp.float32)

    queries = q_carry[0]
    keys = k_carry[0]
    qpe = pts_ref[0].astype(jnp.float32)
    kpe = imgpe_ref[0].astype(jnp.float32)

    sa, ct, ci = w[0:8], w[8:16], w[16:24]
    w1, b1, w2, b2 = w[24:28]
    ln = w[28:36]

    # skip_first_layer_pe: on layer 0 the self-attention uses raw queries and
    # its output replaces (instead of adds to) the queries.
    use_pe = (layer > 0).astype(jnp.float32)

    # (1) self-attention on the sparse queries.
    qq = queries + use_pe * qpe
    attn = _attention(qq, qq, queries, sa, ht)
    queries = use_pe * queries + attn
    queries = _layer_norm(queries, ln[0], ln[1])

    # (2) cross attention: tokens attend to image.
    qq = queries + qpe
    kk = keys + kpe
    queries = queries + _attention(qq, kk, keys, ct, ht)
    queries = _layer_norm(queries, ln[2], ln[3])

    # (3) MLP on the tokens.
    queries = queries + _mlp(queries, w1, b1, w2, b2)
    queries = _layer_norm(queries, ln[4], ln[5])

    # (4) cross attention: image attends to tokens.
    qq = queries + qpe
    kk = keys + kpe
    keys = keys + _attention(kk, qq, queries, ci, ht)
    keys = _layer_norm(keys, ln[6], ln[7])

    q_carry[0] = queries
    k_carry[0] = keys

    @pl.when(layer == pl.num_programs(1) - 1)
    def _():
        q_out_ref[0] = queries.astype(q_out_ref.dtype)
        k_out_ref[0] = keys.astype(k_out_ref.dtype)


def _final_kernel(q_ref, k_ref, qpe_ref, kpe_ref, *rest, ht):
    fa = rest[0:_N_ATTN_W]
    g_ref, b_ref = rest[_N_ATTN_W], rest[_N_ATTN_W + 1]
    q_out_ref = rest[_N_FINAL_W]

    queries = q_ref[0].astype(jnp.float32)
    keys = k_ref[0].astype(jnp.float32)
    qq = queries + qpe_ref[0].astype(jnp.float32)
    kk = keys + kpe_ref[0].astype(jnp.float32)
    queries = queries + _attention(qq, kk, keys, fa, ht)
    q_out_ref[0] = _layer_norm(queries, g_ref, b_ref).astype(q_out_ref.dtype)


# -----------------------------------------------------------------------------
# pallas_call wrappers
# -----------------------------------------------------------------------------
def _layered_weight_spec(w):
    nd = w.ndim
    return pl.BlockSpec((1,) + w.shape[1:], lambda b, l: (l,) + (0,) * (nd - 1))


def _const_weight_spec(w):
    nd = w.ndim
    return pl.BlockSpec(w.shape, lambda b: (0,) * nd)


def fused_blocks(pts, img, img_pe, wlist, ht):
    B, Nq, C = pts.shape
    Nk = img.shape[1]
    L = wlist[0].shape[0]

    act_q = pl.BlockSpec((1, Nq, C), lambda b, l: (b, 0, 0))
    act_k = pl.BlockSpec((1, Nk, C), lambda b, l: (b, 0, 0))
    in_specs = [act_q, act_k, act_k] + [_layered_weight_spec(w) for w in wlist]

    return pl.pallas_call(
        functools.partial(_blocks_kernel, ht=ht),
        out_shape=(jax.ShapeDtypeStruct((B, Nq, C), jnp.bfloat16),
                   jax.ShapeDtypeStruct((B, Nk, C), jnp.bfloat16)),
        grid=(B, L),
        in_specs=in_specs,
        out_specs=(pl.BlockSpec((1, Nq, C), lambda b, l: (b, 0, 0)),
                   pl.BlockSpec((1, Nk, C), lambda b, l: (b, 0, 0))),
        scratch_shapes=[pltpu.VMEM((1, Nq, C), jnp.float32),
                        pltpu.VMEM((1, Nk, C), jnp.float32)],
        compiler_params=pltpu.CompilerParams(
            dimension_semantics=("parallel", "arbitrary"),
            vmem_limit_bytes=64 * 1024 * 1024),
    )(pts, img, img_pe, *wlist)


def final_attention(queries, keys, pts, img_pe, wlist, ht):
    B, Nq, C = queries.shape
    Nk = keys.shape[1]
    act_q = pl.BlockSpec((1, Nq, C), lambda b: (b, 0, 0))
    act_k = pl.BlockSpec((1, Nk, C), lambda b: (b, 0, 0))
    in_specs = [act_q, act_k, act_q, act_k] + [_const_weight_spec(w) for w in wlist]
    return pl.pallas_call(
        functools.partial(_final_kernel, ht=ht),
        out_shape=jax.ShapeDtypeStruct((B, Nq, C), jnp.float32),
        grid=(B,),
        in_specs=in_specs,
        out_specs=pl.BlockSpec((1, Nq, C), lambda b: (b, 0, 0)),
        compiler_params=pltpu.CompilerParams(
            dimension_semantics=("parallel",),
            vmem_limit_bytes=64 * 1024 * 1024),
    )(queries, keys, pts, img_pe, *wlist)


# -----------------------------------------------------------------------------
# Parameter initialization (torch-Linear layout)
# -----------------------------------------------------------------------------
def _init_linear(key, din, dout):
    k1, k2 = jax.random.split(key)
    w = jax.random.normal(k1, (din, dout), jnp.float32) * 0.05
    b = jax.random.normal(k2, (1, dout), jnp.float32) * 0.01
    return w, b


def init_attn_params(key, C, num_heads, downsample_rate=1, extra_heads=1):
    internal = C // downsample_rate
    cph = internal // num_heads
    extra_channel = extra_heads * cph
    ks = jax.random.split(key, 8)
    wq, bq = _init_linear(ks[0], C, internal)
    wk, bk = _init_linear(ks[1], C, internal)
    wv, bv = _init_linear(ks[2], C, internal)
    wo, bo = _init_linear(ks[3], internal, C)
    wqe, bqe = _init_linear(ks[4], C, extra_channel)
    wke, bke = _init_linear(ks[5], C, extra_channel)
    wve, bve = _init_linear(ks[6], C, extra_channel)
    woe, boe = _init_linear(ks[7], extra_channel, C)
    return dict(wq=wq, bq=bq, wk=wk, bk=bk, wv=wv, bv=bv, wo=wo, bo=bo,
                wqe=wqe, bqe=bqe, wke=wke, bke=bke, wve=wve, bve=bve,
                woe=woe, boe=boe)


def init_ln_params(C):
    return dict(g=jnp.ones((1, C), jnp.float32), b=jnp.zeros((1, C), jnp.float32))


def init_block_params(key, C, num_heads, mlp_dim, downsample_rate=2):
    ks = jax.random.split(key, 6)
    w1, b1 = _init_linear(ks[4], C, mlp_dim)
    w2, b2 = _init_linear(ks[5], mlp_dim, C)
    return dict(
        self_attn=init_attn_params(ks[0], C, num_heads, 1),
        cross_t2i=init_attn_params(ks[1], C, num_heads, downsample_rate),
        cross_i2t=init_attn_params(ks[2], C, num_heads, downsample_rate),
        mlp=dict(w1=w1, b1=b1, w2=w2, b2=b2),
        norm1=init_ln_params(C), norm2=init_ln_params(C),
        norm3=init_ln_params(C), norm4=init_ln_params(C),
    )


def init_transformer_params(key, depth, C, num_heads, mlp_dim, downsample_rate=2):
    ks = jax.random.split(key, depth + 1)
    layers = [init_block_params(ks[i], C, num_heads, mlp_dim, downsample_rate)
              for i in range(depth)]
    return dict(
        layers=layers,
        final_attn=init_attn_params(ks[depth], C, num_heads, downsample_rate),
        norm_final=init_ln_params(C),
    )


# -----------------------------------------------------------------------------
# One-time weight packing (channel-concat of main|extra heads, scale fold,
# bf16 cast, per-layer stacking) -- NOT re-run per forward.
# -----------------------------------------------------------------------------
def _pack_attn(p, num_heads):
    """Pack main+extra projections on the channel axis.

    Identical math to torch: concat(q_proj(x), extra_q_proj(x)) etc., and
    out_proj(origin_heads) + extra_out_proj(extra_heads).  1/sqrt(cph) is
    folded into wq/bq so the score matmul needs no extra scaling pass."""
    internal = p["wq"].shape[1]
    cph = internal // num_heads
    scale = 1.0 / math.sqrt(cph)
    wq = (jnp.concatenate([p["wq"], p["wqe"]], axis=1) * scale).astype(jnp.bfloat16)
    bq = jnp.concatenate([p["bq"], p["bqe"]], axis=1) * scale
    wk = jnp.concatenate([p["wk"], p["wke"]], axis=1).astype(jnp.bfloat16)
    bk = jnp.concatenate([p["bk"], p["bke"]], axis=1)
    wv = jnp.concatenate([p["wv"], p["wve"]], axis=1).astype(jnp.bfloat16)
    bv = jnp.concatenate([p["bv"], p["bve"]], axis=1)
    wo = jnp.concatenate([p["wo"], p["woe"]], axis=0).astype(jnp.bfloat16)
    bo = p["bo"] + p["boe"]
    return [wq, bq, wk, bk, wv, bv, wo, bo]


def _pack_block(p, num_heads):
    w = []
    w += _pack_attn(p["self_attn"], num_heads)
    w += _pack_attn(p["cross_t2i"], num_heads)
    w += _pack_attn(p["cross_i2t"], num_heads)
    w += [p["mlp"]["w1"].astype(jnp.bfloat16), p["mlp"]["b1"],
          p["mlp"]["w2"].astype(jnp.bfloat16), p["mlp"]["b2"]]
    for n in ("norm1", "norm2", "norm3", "norm4"):
        w += [p[n]["g"], p[n]["b"]]
    assert len(w) == _N_BLOCK_W
    return w


def prepare_params(params, num_heads):
    """Stack per-layer packed weights on a leading layer axis so the fused
    kernel indexes them with the depth grid axis (layer l+1 weights prefetch
    while layer l computes)."""
    per_layer = [_pack_block(layer, num_heads) for layer in params["layers"]]
    blocks = [jnp.stack([lw[i] for lw in per_layer], axis=0)
              for i in range(_N_BLOCK_W)]
    final = [w[None] for w in _pack_attn(params["final_attn"], num_heads)]
    final += [params["norm_final"]["g"][None], params["norm_final"]["b"][None]]
    assert len(final) == _N_FINAL_W
    return dict(blocks=blocks, final=final)


# -----------------------------------------------------------------------------
# Forward pass
# -----------------------------------------------------------------------------
def two_way_transformer(image_embedding, image_pe, point_embedding, packed,
                        num_heads, extra_heads=1):
    bs, c, h, w = image_embedding.shape
    # NCHW -> (B, H*W, C) token layout; stream activations / PEs as bf16.
    img = image_embedding.reshape(bs, c, h * w).transpose(0, 2, 1).astype(jnp.bfloat16)
    img_pe = image_pe.reshape(bs, c, h * w).transpose(0, 2, 1).astype(jnp.bfloat16)
    pts = point_embedding.astype(jnp.bfloat16)

    ht = num_heads + extra_heads
    queries, keys = fused_blocks(pts, img, img_pe, packed["blocks"], ht)
    queries = final_attention(queries, keys, pts, img_pe, packed["final"], ht)
    return queries, keys.astype(jnp.float32)


# -----------------------------------------------------------------------------
# Main
# -----------------------------------------------------------------------------
if __name__ == "__main__":
    depth = 2
    embedding_dim = 32
    num_heads = 2
    mlp_dim = 64
    attention_downsample_rate = 2
    B, H, W = 2, 8, 8          # image tokens: 64
    N_points = 8

    key = jax.random.PRNGKey(0)
    k_img, k_pe, k_pts, k_params = jax.random.split(key, 4)

    image_embedding = jax.random.normal(
        k_img, (B, embedding_dim, H, W), jnp.float32)
    image_pe = jax.random.normal(
        k_pe, (B, embedding_dim, H, W), jnp.float32)
    point_embedding = jax.random.normal(
        k_pts, (B, N_points, embedding_dim), jnp.float32)

    params = init_transformer_params(
        k_params, depth, embedding_dim, num_heads, mlp_dim,
        attention_downsample_rate)
    packed = jax.block_until_ready(prepare_params(params, num_heads))

    fwd = jax.jit(functools.partial(two_way_transformer, num_heads=num_heads))
    queries, keys = fwd(image_embedding, image_pe, point_embedding, packed)
    jax.block_until_ready((queries, keys))

    assert queries.shape == (B, N_points, embedding_dim)
    assert keys.shape == (B, H * W, embedding_dim)
    assert bool(jnp.all(jnp.isfinite(queries))) and bool(jnp.all(jnp.isfinite(keys)))
    print("KERNEL_OK")
</pallas_src>

<mosaic_0001>
module attributes {stable_mosaic.version = 11 : i64} {
  func.func @_final_kernel(%arg0: i32, %arg1: memref<1x8x32xbf16, #tpu.memory_space<vmem>>, %arg2: memref<1x64x32xbf16, #tpu.memory_space<vmem>>, %arg3: memref<1x8x32xbf16, #tpu.memory_space<vmem>>, %arg4: memref<1x64x32xbf16, #tpu.memory_space<vmem>>, %arg5: memref<1x32x24xbf16, #tpu.memory_space<vmem>>, %arg6: memref<1x1x24xf32, #tpu.memory_space<vmem>>, %arg7: memref<1x32x24xbf16, #tpu.memory_space<vmem>>, %arg8: memref<1x1x24xf32, #tpu.memory_space<vmem>>, %arg9: memref<1x32x24xbf16, #tpu.memory_space<vmem>>, %arg10: memref<1x1x24xf32, #tpu.memory_space<vmem>>, %arg11: memref<1x24x32xbf16, #tpu.memory_space<vmem>>, %arg12: memref<1x1x32xf32, #tpu.memory_space<vmem>>, %arg13: memref<1x1x32xf32, #tpu.memory_space<vmem>>, %arg14: memref<1x1x32xf32, #tpu.memory_space<vmem>>, %arg15: memref<1x8x32xf32, #tpu.memory_space<vmem>>) attributes {dimension_semantics = [#tpu.dimension_semantics<parallel>], iteration_bounds = array<i64: 2>, scalar_prefetch = 0 : i64, scratch_operands = 0 : i64, tpu.core_type = #tpu.core_type<tc>, window_params = [{transform_indices = @transform_0, window_bounds = array<i64: 1, 8, 32>}, {transform_indices = @transform_1, window_bounds = array<i64: 1, 64, 32>}, {transform_indices = @transform_2, window_bounds = array<i64: 1, 8, 32>}, {transform_indices = @transform_3, window_bounds = array<i64: 1, 64, 32>}, {pipeline_mode = #tpu.pipeline_mode<synchronous>, transform_indices = @transform_4, window_bounds = array<i64: 1, 32, 24>}, {pipeline_mode = #tpu.pipeline_mode<synchronous>, transform_indices = @transform_5, window_bounds = array<i64: 1, 1, 24>}, {pipeline_mode = #tpu.pipeline_mode<synchronous>, transform_indices = @transform_6, window_bounds = array<i64: 1, 32, 24>}, {pipeline_mode = #tpu.pipeline_mode<synchronous>, transform_indices = @transform_7, window_bounds = array<i64: 1, 1, 24>}, {pipeline_mode = #tpu.pipeline_mode<synchronous>, transform_indices = @transform_8, window_bounds = array<i64: 1, 32, 24>}, {pipeline_mode = #tpu.pipeline_mode<synchronous>, transform_indices = @transform_9, window_bounds = array<i64: 1, 1, 24>}, {pipeline_mode = #tpu.pipeline_mode<synchronous>, transform_indices = @transform_10, window_bounds = array<i64: 1, 24, 32>}, {pipeline_mode = #tpu.pipeline_mode<synchronous>, transform_indices = @transform_11, window_bounds = array<i64: 1, 1, 32>}, {pipeline_mode = #tpu.pipeline_mode<synchronous>, transform_indices = @transform_12, window_bounds = array<i64: 1, 1, 32>}, {pipeline_mode = #tpu.pipeline_mode<synchronous>, transform_indices = @transform_13, window_bounds = array<i64: 1, 1, 32>}, {transform_indices = @transform_14, window_bounds = array<i64: 1, 8, 32>}]} {
    %c0 = arith.constant 0 : index
    %c0_0 = arith.constant 0 : index
    %c0_1 = arith.constant 0 : index
    %0 = vector.load %arg1[%c0, %c0_0, %c0_1] : memref<1x8x32xbf16, #tpu.memory_space<vmem>>, vector<1x8x32xbf16>
    %1 = vector.shape_cast %0 : vector<1x8x32xbf16> to vector<8x32xbf16>
    %2 = arith.extf %1 : vector<8x32xbf16> to vector<8x32xf32>
    %c0_2 = arith.constant 0 : index
    %c0_3 = arith.constant 0 : index
    %c0_4 = arith.constant 0 : index
    %3 = vector.load %arg2[%c0_2, %c0_3, %c0_4] : memref<1x64x32xbf16, #tpu.memory_space<vmem>>, vector<1x64x32xbf16>
    %4 = vector.shape_cast %3 : vector<1x64x32xbf16> to vector<64x32xbf16>
    %5 = arith.extf %4 : vector<64x32xbf16> to vector<64x32xf32>
    %c0_5 = arith.constant 0 : index
    %c0_6 = arith.constant 0 : index
    %c0_7 = arith.constant 0 : index
    %6 = vector.load %arg3[%c0_5, %c0_6, %c0_7] : memref<1x8x32xbf16, #tpu.memory_space<vmem>>, vector<1x8x32xbf16>
    %7 = vector.shape_cast %6 : vector<1x8x32xbf16> to vector<8x32xbf16>
    %8 = arith.extf %7 : vector<8x32xbf16> to vector<8x32xf32>
    %9 = arith.addf %2, %8 : vector<8x32xf32>
    %c0_8 = arith.constant 0 : index
    %c0_9 = arith.constant 0 : index
    %c0_10 = arith.constant 0 : index
    %10 = vector.load %arg4[%c0_8, %c0_9, %c0_10] : memref<1x64x32xbf16, #tpu.memory_space<vmem>>, vector<1x64x32xbf16>
    %11 = vector.shape_cast %10 : vector<1x64x32xbf16> to vector<64x32xbf16>
    %12 = arith.extf %11 : vector<64x32xbf16> to vector<64x32xf32>
    %13 = arith.addf %5, %12 : vector<64x32xf32>
    %14 = arith.truncf %9 : vector<8x32xf32> to vector<8x32xbf16>
    %c0_11 = arith.constant 0 : index
    %c0_12 = arith.constant 0 : index
    %c0_13 = arith.constant 0 : index
    %15 = vector.load %arg5[%c0_11, %c0_12, %c0_13] : memref<1x32x24xbf16, #tpu.memory_space<vmem>>, vector<1x32x24xbf16>
    %16 = vector.shape_cast %15 : vector<1x32x24xbf16> to vector<32x24xbf16>
    %cst = arith.constant dense<0.000000e+00> : vector<8x24xf32>
    %17 = tpu.matmul %14, %16, %cst {dimension_numbers = #tpu.dot_dimension_numbers<[1], [0], [0], [1], [0, 0, 1, 1], [], []>} : vector<8x32xbf16>, vector<32x24xbf16>, vector<8x24xf32> -> vector<8x24xf32>
    %c0_14 = arith.constant 0 : index
    %c0_15 = arith.constant 0 : index
    %c0_16 = arith.constant 0 : index
    %18 = vector.load %arg6[%c0_14, %c0_15, %c0_16] : memref<1x1x24xf32, #tpu.memory_space<vmem>>, vector<1x1x24xf32>
    %19 = vector.shape_cast %18 : vector<1x1x24xf32> to vector<1x24xf32>
    %20 = vector.broadcast %19 : vector<1x24xf32> to vector<8x24xf32>
    %21 = arith.addf %17, %20 : vector<8x24xf32>
    %22 = arith.truncf %21 : vector<8x24xf32> to vector<8x24xbf16>
    %23 = arith.truncf %13 : vector<64x32xf32> to vector<64x32xbf16>
    %c0_17 = arith.constant 0 : index
    %c0_18 = arith.constant 0 : index
    %c0_19 = arith.constant 0 : index
    %24 = vector.load %arg7[%c0_17, %c0_18, %c0_19] : memref<1x32x24xbf16, #tpu.memory_space<vmem>>, vector<1x32x24xbf16>
    %25 = vector.shape_cast %24 : vector<1x32x24xbf16> to vector<32x24xbf16>
    %cst_20 = arith.constant dense<0.000000e+00> : vector<64x24xf32>
    %26 = tpu.matmul %23, %25, %cst_20 {dimension_numbers = #tpu.dot_dimension_numbers<[1], [0], [0], [1], [0, 0, 1, 1], [], []>} : vector<64x32xbf16>, vector<32x24xbf16>, vector<64x24xf32> -> vector<64x24xf32>
    %c0_21 = arith.constant 0 : index
    %c0_22 = arith.constant 0 : index
    %c0_23 = arith.constant 0 : index
    %27 = vector.load %arg8[%c0_21, %c0_22, %c0_23] : memref<1x1x24xf32, #tpu.memory_space<vmem>>, vector<1x1x24xf32>
    %28 = vector.shape_cast %27 : vector<1x1x24xf32> to vector<1x24xf32>
    %29 = vector.broadcast %28 : vector<1x24xf32> to vector<64x24xf32>
    %30 = arith.addf %26, %29 : vector<64x24xf32>
    %31 = arith.truncf %30 : vector<64x24xf32> to vector<64x24xbf16>
    %32 = arith.truncf %5 : vector<64x32xf32> to vector<64x32xbf16>
    %c0_24 = arith.constant 0 : index
    %c0_25 = arith.constant 0 : index
    %c0_26 = arith.constant 0 : index
    %33 = vector.load %arg9[%c0_24, %c0_25, %c0_26] : memref<1x32x24xbf16, #tpu.memory_space<vmem>>, vector<1x32x24xbf16>
    %34 = vector.shape_cast %33 : vector<1x32x24xbf16> to vector<32x24xbf16>
    %cst_27 = arith.constant dense<0.000000e+00> : vector<64x24xf32>
    %35 = tpu.matmul %32, %34, %cst_27 {dimension_numbers = #tpu.dot_dimension_numbers<[1], [0], [0], [1], [0, 0, 1, 1], [], []>} : vector<64x32xbf16>, vector<32x24xbf16>, vector<64x24xf32> -> vector<64x24xf32>
    %c0_28 = arith.constant 0 : index
    %c0_29 = arith.constant 0 : index
    %c0_30 = arith.constant 0 : index
    %36 = vector.load %arg10[%c0_28, %c0_29, %c0_30] : memref<1x1x24xf32, #tpu.memory_space<vmem>>, vector<1x1x24xf32>
    %37 = vector.shape_cast %36 : vector<1x1x24xf32> to vector<1x24xf32>
    %38 = vector.broadcast %37 : vector<1x24xf32> to vector<64x24xf32>
    %39 = arith.addf %35, %38 : vector<64x24xf32>
    %40 = arith.truncf %39 : vector<64x24xf32> to vector<64x24xbf16>
    %41 = vector.extract_strided_slice %22 {offsets = [0, 0], sizes = [8, 8], strides = [1, 1]} : vector<8x24xbf16> to vector<8x8xbf16>
    %42 = vector.extract_strided_slice %31 {offsets = [0, 0], sizes = [64, 8], strides = [1, 1]} : vector<64x24xbf16> to vector<64x8xbf16>
    "tpu.trace_start"() <{level = 10 : i32, message = "qd,kd->qk"}> : () -> ()
    %cst_31 = arith.constant dense<0.000000e+00> : vector<8x64xf32>
    %43 = tpu.matmul %41, %42, %cst_31 {dimension_numbers = #tpu.dot_dimension_numbers<[1], [1], [0], [0], [0, 0, 1, 0], [], []>} : vector<8x8xbf16>, vector<64x8xbf16>, vector<8x64xf32> -> vector<8x64xf32>
    "tpu.trace_stop"() : () -> ()
    %cst_32 = arith.constant dense<0xFF800000> : vector<8xf32>
    %44 = vector.multi_reduction <maximumf>, %43, %cst_32 [1] : vector<8x64xf32> to vector<8xf32>
    %45 = vector.shape_cast %44 : vector<8xf32> to vector<8x1xf32>
    %46 = vector.broadcast %45 : vector<8x1xf32> to vector<8x64xf32>
    %47 = arith.subf %43, %46 : vector<8x64xf32>
    %48 = math.exp %47 : vector<8x64xf32>
    %cst_33 = arith.constant dense<0.000000e+00> : vector<8xf32>
    %49 = vector.multi_reduction <add>, %48, %cst_33 [1] : vector<8x64xf32> to vector<8xf32>
    %50 = vector.shape_cast %49 : vector<8xf32> to vector<8x1xf32>
    %51 = tpu.reciprocal %50 {approx = true} : vector<8x1xf32> -> vector<8x1xf32>
    %52 = vector.broadcast %51 : vector<8x1xf32> to vector<8x64xf32>
    %53 = arith.mulf %48, %52 : vector<8x64xf32>
    %54 = arith.truncf %53 : vector<8x64xf32> to vector<8x64xbf16>
    %55 = vector.extract_strided_slice %40 {offsets = [0, 0], sizes = [64, 8], strides = [1, 1]} : vector<64x24xbf16> to vector<64x8xbf16>
    %cst_34 = arith.constant dense<0.000000e+00> : vector<8x8xf32>
    %56 = tpu.matmul %54, %55, %cst_34 {dimension_numbers = #tpu.dot_dimension_numbers<[1], [0], [0], [1], [0, 0, 1, 1], [], []>} : vector<8x64xbf16>, vector<64x8xbf16>, vector<8x8xf32> -> vector<8x8xf32>
    %57 = vector.extract_strided_slice %22 {offsets = [0, 8], sizes = [8, 8], strides = [1, 1]} : vector<8x24xbf16> to vector<8x8xbf16>
    %58 = vector.extract_strided_slice %31 {offsets = [0, 8], sizes = [64, 8], strides = [1, 1]} : vector<64x24xbf16> to vector<64x8xbf16>
    "tpu.trace_start"() <{level = 10 : i32, message = "qd,kd->qk"}> : () -> ()
    %cst_35 = arith.constant dense<0.000000e+00> : vector<8x64xf32>
    %59 = tpu.matmul %57, %58, %cst_35 {dimension_numbers = #tpu.dot_dimension_numbers<[1], [1], [0], [0], [0, 0, 1, 0], [], []>} : vector<8x8xbf16>, vector<64x8xbf16>, vector<8x64xf32> -> vector<8x64xf32>
    "tpu.trace_stop"() : () -> ()
    %cst_36 = arith.constant dense<0xFF800000> : vector<8xf32>
    %60 = vector.multi_reduction <maximumf>, %59, %cst_36 [1] : vector<8x64xf32> to vector<8xf32>
    %61 = vector.shape_cast %60 : vector<8xf32> to vector<8x1xf32>
    %62 = vector.broadcast %61 : vector<8x1xf32> to vector<8x64xf32>
    %63 = arith.subf %59, %62 : vector<8x64xf32>
    %64 = math.exp %63 : vector<8x64xf32>
    %cst_37 = arith.constant dense<0.000000e+00> : vector<8xf32>
    %65 = vector.multi_reduction <add>, %64, %cst_37 [1] : vector<8x64xf32> to vector<8xf32>
    %66 = vector.shape_cast %65 : vector<8xf32> to vector<8x1xf32>
    %67 = tpu.reciprocal %66 {approx = true} : vector<8x1xf32> -> vector<8x1xf32>
    %68 = vector.broadcast %67 : vector<8x1xf32> to vector<8x64xf32>
    %69 = arith.mulf %64, %68 : vector<8x64xf32>
    %70 = arith.truncf %69 : vector<8x64xf32> to vector<8x64xbf16>
    %71 = vector.extract_strided_slice %40 {offsets = [0, 8], sizes = [64, 8], strides = [1, 1]} : vector<64x24xbf16> to vector<64x8xbf16>
    %cst_38 = arith.constant dense<0.000000e+00> : vector<8x8xf32>
    %72 = tpu.matmul %70, %71, %cst_38 {dimension_numbers = #tpu.dot_dimension_numbers<[1], [0], [0], [1], [0, 0, 1, 1], [], []>} : vector<8x64xbf16>, vector<64x8xbf16>, vector<8x8xf32> -> vector<8x8xf32>
    %73 = vector.extract_strided_slice %22 {offsets = [0, 16], sizes = [8, 8], strides = [1, 1]} : vector<8x24xbf16> to vector<8x8xbf16>
    %74 = vector.extract_strided_slice %31 {offsets = [0, 16], sizes = [64, 8], strides = [1, 1]} : vector<64x24xbf16> to vector<64x8xbf16>
    "tpu.trace_start"() <{level = 10 : i32, message = "qd,kd->qk"}> : () -> ()
    %cst_39 = arith.constant dense<0.000000e+00> : vector<8x64xf32>
    %75 = tpu.matmul %73, %74, %cst_39 {dimension_numbers = #tpu.dot_dimension_numbers<[1], [1], [0], [0], [0, 0, 1, 0], [], []>} : vector<8x8xbf16>, vector<64x8xbf16>, vector<8x64xf32> -> vector<8x64xf32>
    "tpu.trace_stop"() : () -> ()
    %cst_40 = arith.constant dense<0xFF800000> : vector<8xf32>
    %76 = vector.multi_reduction <maximumf>, %75, %cst_40 [1] : vector<8x64xf32> to vector<8xf32>
    %77 = vector.shape_cast %76 : vector<8xf32> to vector<8x1xf32>
    %78 = vector.broadcast %77 : vector<8x1xf32> to vector<8x64xf32>
    %79 = arith.subf %75, %78 : vector<8x64xf32>
    %80 = math.exp %79 : vector<8x64xf32>
    %cst_41 = arith.constant dense<0.000000e+00> : vector<8xf32>
    %81 = vector.multi_reduction <add>, %80, %cst_41 [1] : vector<8x64xf32> to vector<8xf32>
    %82 = vector.shape_cast %81 : vector<8xf32> to vector<8x1xf32>
    %83 = tpu.reciprocal %82 {approx = true} : vector<8x1xf32> -> vector<8x1xf32>
    %84 = vector.broadcast %83 : vector<8x1xf32> to vector<8x64xf32>
    %85 = arith.mulf %80, %84 : vector<8x64xf32>
    %86 = arith.truncf %85 : vector<8x64xf32> to vector<8x64xbf16>
    %87 = vector.extract_strided_slice %40 {offsets = [0, 16], sizes = [64, 8], strides = [1, 1]} : vector<64x24xbf16> to vector<64x8xbf16>
    %cst_42 = arith.constant dense<0.000000e+00> : vector<8x8xf32>
    %88 = tpu.matmul %86, %87, %cst_42 {dimension_numbers = #tpu.dot_dimension_numbers<[1], [0], [0], [1], [0, 0, 1, 1], [], []>} : vector<8x64xbf16>, vector<64x8xbf16>, vector<8x8xf32> -> vector<8x8xf32>
    %89 = tpu.concatenate %56, %72, %88 in 1 : vector<8x8xf32>, vector<8x8xf32>, vector<8x8xf32> -> vector<8x24xf32>
    %90 = arith.truncf %89 : vector<8x24xf32> to vector<8x24xbf16>
    %c0_43 = arith.constant 0 : index
    %c0_44 = arith.constant 0 : index
    %c0_45 = arith.constant 0 : index
    %91 = vector.load %arg11[%c0_43, %c0_44, %c0_45] : memref<1x24x32xbf16, #tpu.memory_space<vmem>>, vector<1x24x32xbf16>
    %92 = vector.shape_cast %91 : vector<1x24x32xbf16> to vector<24x32xbf16>
    %cst_46 = arith.constant dense<0.000000e+00> : vector<8x32xf32>
    %93 = tpu.matmul %90, %92, %cst_46 {dimension_numbers = #tpu.dot_dimension_numbers<[1], [0], [0], [1], [0, 0, 1, 1], [], []>} : vector<8x24xbf16>, vector<24x32xbf16>, vector<8x32xf32> -> vector<8x32xf32>
    %c0_47 = arith.constant 0 : index
    %c0_48 = arith.constant 0 : index
    %c0_49 = arith.constant 0 : index
    %94 = vector.load %arg12[%c0_47, %c0_48, %c0_49] : memref<1x1x32xf32, #tpu.memory_space<vmem>>, vector<1x1x32xf32>
    %95 = vector.shape_cast %94 : vector<1x1x32xf32> to vector<1x32xf32>
    %96 = vector.broadcast %95 : vector<1x32xf32> to vector<8x32xf32>
    %97 = arith.addf %93, %96 : vector<8x32xf32>
    %98 = arith.addf %2, %97 : vector<8x32xf32>
    %cst_50 = arith.constant dense<0.000000e+00> : vector<8xf32>
    %99 = vector.multi_reduction <add>, %98, %cst_50 [1] : vector<8x32xf32> to vector<8xf32>
    %100 = vector.shape_cast %99 : vector<8xf32> to vector<8x1xf32>
    %cst_51 = arith.constant 3.200000e+01 : f32
    %101 = vector.broadcast %cst_51 : f32 to vector<8x1xf32>
    %102 = arith.divf %100, %101 : vector<8x1xf32>
    %103 = vector.broadcast %102 : vector<8x1xf32> to vector<8x32xf32>
    %104 = arith.subf %98, %103 : vector<8x32xf32>
    %105 = arith.mulf %104, %104 : vector<8x32xf32>
    %cst_52 = arith.constant dense<0.000000e+00> : vector<8xf32>
    %106 = vector.multi_reduction <add>, %105, %cst_52 [1] : vector<8x32xf32> to vector<8xf32>
    %107 = vector.shape_cast %106 : vector<8xf32> to vector<8x1xf32>
    %cst_53 = arith.constant 3.200000e+01 : f32
    %108 = vector.broadcast %cst_53 : f32 to vector<8x1xf32>
    %109 = arith.divf %107, %108 : vector<8x1xf32>
    %110 = vector.broadcast %102 : vector<8x1xf32> to vector<8x32xf32>
    %111 = arith.subf %98, %110 : vector<8x32xf32>
    %cst_54 = arith.constant 9.99999974E-6 : f32
    %112 = vector.broadcast %cst_54 : f32 to vector<8x1xf32>
    %113 = arith.addf %109, %112 : vector<8x1xf32>
    %114 = math.rsqrt %113 : vector<8x1xf32>
    %115 = vector.broadcast %114 : vector<8x1xf32> to vector<8x32xf32>
    %116 = arith.mulf %111, %115 : vector<8x32xf32>
    %c0_55 = arith.constant 0 : index
    %c0_56 = arith.constant 0 : index
    %c0_57 = arith.constant 0 : index
    %117 = vector.load %arg13[%c0_55, %c0_56, %c0_57] : memref<1x1x32xf32, #tpu.memory_space<vmem>>, vector<1x1x32xf32>
    %118 = vector.shape_cast %117 : vector<1x1x32xf32> to vector<1x32xf32>
    %119 = vector.broadcast %118 : vector<1x32xf32> to vector<8x32xf32>
    %120 = arith.mulf %116, %119 : vector<8x32xf32>
    %c0_58 = arith.constant 0 : index
    %c0_59 = arith.constant 0 : index
    %c0_60 = arith.constant 0 : index
    %121 = vector.load %arg14[%c0_58, %c0_59, %c0_60] : memref<1x1x32xf32, #tpu.memory_space<vmem>>, vector<1x1x32xf32>
    %122 = vector.shape_cast %121 : vector<1x1x32xf32> to vector<1x32xf32>
    %123 = vector.broadcast %122 : vector<1x32xf32> to vector<8x32xf32>
    %124 = arith.addf %120, %123 : vector<8x32xf32>
    %c0_61 = arith.constant 0 : index
    %c0_62 = arith.constant 0 : index
    %c0_63 = arith.constant 0 : index
    %125 = vector.load %arg15[%c0_61, %c0_62, %c0_63] : memref<1x8x32xf32, #tpu.memory_space<vmem>>, vector<1x8x32xf32>
    %126 = vector.shape_cast %125 : vector<1x8x32xf32> to vector<8x32xf32>
    %127 = vector.shape_cast %124 : vector<8x32xf32> to vector<1x8x32xf32>
    tpu.vector_store %arg15[%c0_61, %c0_62, %c0_63], %127 {strides = array<i32>} : memref<1x8x32xf32, #tpu.memory_space<vmem>>, vector<1x8x32xf32>,
    return
  }
  func.func @transform_0(%arg0: i32) -> (i32, i32, i32) {
    %c0_i32 = arith.constant 0 : i32
    %c0_i32_0 = arith.constant 0 : i32
    %c0_i32_1 = arith.constant 0 : i32
    return %arg0, %c0_i32, %c0_i32_0 : i32, i32, i32
  }
  func.func @transform_1(%arg0: i32) -> (i32, i32, i32) {
    %c0_i32 = arith.constant 0 : i32
    %c0_i32_0 = arith.constant 0 : i32
    %c0_i32_1 = arith.constant 0 : i32
    return %arg0, %c0_i32, %c0_i32_0 : i32, i32, i32
  }
  func.func @transform_2(%arg0: i32) -> (i32, i32, i32) {
    %c0_i32 = arith.constant 0 : i32
    %c0_i32_0 = arith.constant 0 : i32
    %c0_i32_1 = arith.constant 0 : i32
    return %arg0, %c0_i32, %c0_i32_0 : i32, i32, i32
  }
  func.func @transform_3(%arg0: i32) -> (i32, i32, i32) {
    %c0_i32 = arith.constant 0 : i32
    %c0_i32_0 = arith.constant 0 : i32
    %c0_i32_1 = arith.constant 0 : i32
    return %arg0, %c0_i32, %c0_i32_0 : i32, i32, i32
  }
  func.func @transform_4(%arg0: i32) -> (i32, i32, i32) {
    %c0_i32 = arith.constant 0 : i32
    %c0_i32_0 = arith.constant 0 : i32
    %c0_i32_1 = arith.constant 0 : i32
    %c0_i32_2 = arith.constant 0 : i32
    return %c0_i32, %c0_i32_0, %c0_i32_1 : i32, i32, i32
  }
  func.func @transform_5(%arg0: i32) -> (i32, i32, i32) {
    %c0_i32 = arith.constant 0 : i32
    %c0_i32_0 = arith.constant 0 : i32
    %c0_i32_1 = arith.constant 0 : i32
    %c0_i32_2 = arith.constant 0 : i32
    return %c0_i32, %c0_i32_0, %c0_i32_1 : i32, i32, i32
  }
  func.func @transform_6(%arg0: i32) -> (i32, i32, i32) {
    %c0_i32 = arith.constant 0 : i32
    %c0_i32_0 = arith.constant 0 : i32
    %c0_i32_1 = arith.constant 0 : i32
    %c0_i32_2 = arith.constant 0 : i32
    return %c0_i32, %c0_i32_0, %c0_i32_1 : i32, i32, i32
  }
  func.func @transform_7(%arg0: i32) -> (i32, i32, i32) {
    %c0_i32 = arith.constant 0 : i32
    %c0_i32_0 = arith.constant 0 : i32
    %c0_i32_1 = arith.constant 0 : i32
    %c0_i32_2 = arith.constant 0 : i32
    return %c0_i32, %c0_i32_0, %c0_i32_1 : i32, i32, i32
  }
  func.func @transform_8(%arg0: i32) -> (i32, i32, i32) {
    %c0_i32 = arith.constant 0 : i32
    %c0_i32_0 = arith.constant 0 : i32
    %c0_i32_1 = arith.constant 0 : i32
    %c0_i32_2 = arith.constant 0 : i32
    return %c0_i32, %c0_i32_0, %c0_i32_1 : i32, i32, i32
  }
  func.func @transform_9(%arg0: i32) -> (i32, i32, i32) {
    %c0_i32 = arith.constant 0 : i32
    %c0_i32_0 = arith.constant 0 : i32
    %c0_i32_1 = arith.constant 0 : i32
    %c0_i32_2 = arith.constant 0 : i32
    return %c0_i32, %c0_i32_0, %c0_i32_1 : i32, i32, i32
  }
  func.func @transform_10(%arg0: i32) -> (i32, i32, i32) {
    %c0_i32 = arith.constant 0 : i32
    %c0_i32_0 = arith.constant 0 : i32
    %c0_i32_1 = arith.constant 0 : i32
    %c0_i32_2 = arith.constant 0 : i32
    return %c0_i32, %c0_i32_0, %c0_i32_1 : i32, i32, i32
  }
  func.func @transform_11(%arg0: i32) -> (i32, i32, i32) {
    %c0_i32 = arith.constant 0 : i32
    %c0_i32_0 = arith.constant 0 : i32
    %c0_i32_1 = arith.constant 0 : i32
    %c0_i32_2 = arith.constant 0 : i32
    return %c0_i32, %c0_i32_0, %c0_i32_1 : i32, i32, i32
  }
  func.func @transform_12(%arg0: i32) -> (i32, i32, i32) {
    %c0_i32 = arith.constant 0 : i32
    %c0_i32_0 = arith.constant 0 : i32
    %c0_i32_1 = arith.constant 0 : i32
    %c0_i32_2 = arith.constant 0 : i32
    return %c0_i32, %c0_i32_0, %c0_i32_1 : i32, i32, i32
  }
  func.func @transform_13(%arg0: i32) -> (i32, i32, i32) {
    %c0_i32 = arith.constant 0 : i32
    %c0_i32_0 = arith.constant 0 : i32
    %c0_i32_1 = arith.constant 0 : i32
    %c0_i32_2 = arith.constant 0 : i32
    return %c0_i32, %c0_i32_0, %c0_i32_1 : i32, i32, i32
  }
  func.func @transform_14(%arg0: i32) -> (i32, i32, i32) {
    %c0_i32 = arith.constant 0 : i32
    %c0_i32_0 = arith.constant 0 : i32
    %c0_i32_1 = arith.constant 0 : i32
    return %arg0, %c0_i32, %c0_i32_0 : i32, i32, i32
  }
}

module attributes {stable_mosaic.version = 11 : i64} {
  func.func @_blocks_kernel(%arg0: i32, %arg1: i32, %arg2: memref<1x8x32xbf16, #tpu.memory_space<vmem>>, %arg3: memref<1x64x32xbf16, #tpu.memory_space<vmem>>, %arg4: memref<1x64x32xbf16, #tpu.memory_space<vmem>>, %arg5: memref<1x32x48xbf16, #tpu.memory_space<vmem>>, %arg6: memref<1x1x48xf32, #tpu.memory_space<vmem>>, %arg7: memref<1x32x48xbf16, #tpu.memory_space<vmem>>, %arg8: memref<1x1x48xf32, #tpu.memory_space<vmem>>, %arg9: memref<1x32x48xbf16, #tpu.memory_space<vmem>>, %arg10: memref<1x1x48xf32, #tpu.memory_space<vmem>>, %arg11: memref<1x48x32xbf16, #tpu.memory_space<vmem>>, %arg12: memref<1x1x32xf32, #tpu.memory_space<vmem>>, %arg13: memref<1x32x24xbf16, #tpu.memory_space<vmem>>, %arg14: memref<1x1x24xf32, #tpu.memory_space<vmem>>, %arg15: memref<1x32x24xbf16, #tpu.memory_space<vmem>>, %arg16: memref<1x1x24xf32, #tpu.memory_space<vmem>>, %arg17: memref<1x32x24xbf16, #tpu.memory_space<vmem>>, %arg18: memref<1x1x24xf32, #tpu.memory_space<vmem>>, %arg19: memref<1x24x32xbf16, #tpu.memory_space<vmem>>, %arg20: memref<1x1x32xf32, #tpu.memory_space<vmem>>, %arg21: memref<1x32x24xbf16, #tpu.memory_space<vmem>>, %arg22: memref<1x1x24xf32, #tpu.memory_space<vmem>>, %arg23: memref<1x32x24xbf16, #tpu.memory_space<vmem>>, %arg24: memref<1x1x24xf32, #tpu.memory_space<vmem>>, %arg25: memref<1x32x24xbf16, #tpu.memory_space<vmem>>, %arg26: memref<1x1x24xf32, #tpu.memory_space<vmem>>, %arg27: memref<1x24x32xbf16, #tpu.memory_space<vmem>>, %arg28: memref<1x1x32xf32, #tpu.memory_space<vmem>>, %arg29: memref<1x32x64xbf16, #tpu.memory_space<vmem>>, %arg30: memref<1x1x64xf32, #tpu.memory_space<vmem>>, %arg31: memref<1x64x32xbf16, #tpu.memory_space<vmem>>, %arg32: memref<1x1x32xf32, #tpu.memory_space<vmem>>, %arg33: memref<1x1x32xf32, #tpu.memory_space<vmem>>, %arg34: memref<1x1x32xf32, #tpu.memory_space<vmem>>, %arg35: memref<1x1x32xf32, #tpu.memory_space<vmem>>, %arg36: memref<1x1x32xf32, #tpu.memory_space<vmem>>, %arg37: memref<1x1x32xf32, #tpu.memory_space<vmem>>, %arg38: memref<1x1x32xf32, #tpu.memory_space<vmem>>, %arg39: memref<1x1x32xf32, #tpu.memory_space<vmem>>, %arg40: memref<1x1x32xf32, #tpu.memory_space<vmem>>, %arg41: memref<1x8x32xbf16, #tpu.memory_space<vmem>>, %arg42: memref<1x64x32xbf16, #tpu.memory_space<vmem>>, %arg43: memref<1x8x32xf32, #tpu.memory_space<vmem>>, %arg44: memref<1x64x32xf32, #tpu.memory_space<vmem>>) attributes {dimension_semantics = [#tpu.dimension_semantics<parallel>, #tpu.dimension_semantics<arbitrary>], iteration_bounds = array<i64: 2, 2>, scalar_prefetch = 0 : i64, scratch_operands = 2 : i64, tpu.core_type = #tpu.core_type<tc>, window_params = [{transform_indices = @transform_0, window_bounds = array<i64: 1, 8, 32>}, {transform_indices = @transform_1, window_bounds = array<i64: 1, 64, 32>}, {transform_indices = @transform_2, window_bounds = array<i64: 1, 64, 32>}, {transform_indices = @transform_3, window_bounds = array<i64: 1, 32, 48>}, {transform_indices = @transform_4, window_bounds = array<i64: 1, 1, 48>}, {transform_indices = @transform_5, window_bounds = array<i64: 1, 32, 48>}, {transform_indices = @transform_6, window_bounds = array<i64: 1, 1, 48>}, {transform_indices = @transform_7, window_bounds = array<i64: 1, 32, 48>}, {transform_indices = @transform_8, window_bounds = array<i64: 1, 1, 48>}, {transform_indices = @transform_9, window_bounds = array<i64: 1, 48, 32>}, {transform_indices = @transform_10, window_bounds = array<i64: 1, 1, 32>}, {transform_indices = @transform_11, window_bounds = array<i64: 1, 32, 24>}, {transform_indices = @transform_12, window_bounds = array<i64: 1, 1, 24>}, {transform_indices = @transform_13, window_bounds = array<i64: 1, 32, 24>}, {transform_indices = @transform_14, window_bounds = array<i64: 1, 1, 24>}, {transform_indices = @transform_15, window_bounds = array<i64: 1, 32, 24>}, {transform_indices = @transform_16, window_bounds = array<i64: 1, 1, 24>}, {transform_indices = @transform_17, window_bounds = array<i64: 1, 24, 32>}, {transform_indices = @transform_18, window_bounds = array<i64: 1, 1, 32>}, {transform_indices = @transform_19, window_bounds = array<i64: 1, 32, 24>}, {transform_indices = @transform_20, window_bounds = array<i64: 1, 1, 24>}, {transform_indices = @transform_21, window_bounds = array<i64: 1, 32, 24>}, {transform_indices = @transform_22, window_bounds = array<i64: 1, 1, 24>}, {transform_indices = @transform_23, window_bounds = array<i64: 1, 32, 24>}, {transform_indices = @transform_24, window_bounds = array<i64: 1, 1, 24>}, {transform_indices = @transform_25, window_bounds = array<i64: 1, 24, 32>}, {transform_indices = @transform_26, window_bounds = array<i64: 1, 1, 32>}, {transform_indices = @transform_27, window_bounds = array<i64: 1, 32, 64>}, {transform_indices = @transform_28, window_bounds = array<i64: 1, 1, 64>}, {transform_indices = @transform_29, window_bounds = array<i64: 1, 64, 32>}, {transform_indices = @transform_30, window_bounds = array<i64: 1, 1, 32>}, {transform_indices = @transform_31, window_bounds = array<i64: 1, 1, 32>}, {transform_indices = @transform_32, window_bounds = array<i64: 1, 1, 32>}, {transform_indices = @transform_33, window_bounds = array<i64: 1, 1, 32>}, {transform_indices = @transform_34, window_bounds = array<i64: 1, 1, 32>}, {transform_indices = @transform_35, window_bounds = array<i64: 1, 1, 32>}, {transform_indices = @transform_36, window_bounds = array<i64: 1, 1, 32>}, {transform_indices = @transform_37, window_bounds = array<i64: 1, 1, 32>}, {transform_indices = @transform_38, window_bounds = array<i64: 1, 1, 32>}, {transform_indices = @transform_39, window_bounds = array<i64: 1, 8, 32>}, {transform_indices = @transform_40, window_bounds = array<i64: 1, 64, 32>}]} {
    %c0_i32 = arith.constant 0 : i32
    %0 = arith.cmpi eq, %arg1, %c0_i32 : i32
    %1 = arith.extui %0 : i1 to i32
    %c0_i32_0 = arith.constant 0 : i32
    %2 = arith.cmpi ne, %1, %c0_i32_0 : i32
    scf.if %2 {
      %c0_198 = arith.constant 0 : index
      %c0_199 = arith.constant 0 : index
      %c0_200 = arith.constant 0 : index
      %412 = vector.load %arg2[%c0_198, %c0_199, %c0_200] : memref<1x8x32xbf16, #tpu.memory_space<vmem>>, vector<1x8x32xbf16>
      %413 = arith.extf %412 : vector<1x8x32xbf16> to vector<1x8x32xf32>
      %c0_201 = arith.constant 0 : index
      %c0_202 = arith.constant 0 : index
      %c0_203 = arith.constant 0 : index
      %414 = vector.load %arg43[%c0_201, %c0_202, %c0_203] : memref<1x8x32xf32, #tpu.memory_space<vmem>>, vector<1x8x32xf32>
      tpu.vector_store %arg43[%c0_201, %c0_202, %c0_203], %413 {strides = array<i32>} : memref<1x8x32xf32, #tpu.memory_space<vmem>>, vector<1x8x32xf32>,
      %c0_204 = arith.constant 0 : index
      %c0_205 = arith.constant 0 : index
      %c0_206 = arith.constant 0 : index
      %415 = vector.load %arg3[%c0_204, %c0_205, %c0_206] : memref<1x64x32xbf16, #tpu.memory_space<vmem>>, vector<1x64x32xbf16>
      %416 = arith.extf %415 : vector<1x64x32xbf16> to vector<1x64x32xf32>
      %c0_207 = arith.constant 0 : index
      %c0_208 = arith.constant 0 : index
      %c0_209 = arith.constant 0 : index
      %417 = vector.load %arg44[%c0_207, %c0_208, %c0_209] : memref<1x64x32xf32, #tpu.memory_space<vmem>>, vector<1x64x32xf32>
      tpu.vector_store %arg44[%c0_207, %c0_208, %c0_209], %416 {strides = array<i32>} : memref<1x64x32xf32, #tpu.memory_space<vmem>>, vector<1x64x32xf32>,
    } else {
    }
    %c0 = arith.constant 0 : index
    %c0_1 = arith.constant 0 : index
    %c0_2 = arith.constant 0 : index
    %3 = vector.load %arg43[%c0, %c0_1, %c0_2] : memref<1x8x32xf32, #tpu.memory_space<vmem>>, vector<1x8x32xf32>
    %4 = vector.shape_cast %3 : vector<1x8x32xf32> to vector<8x32xf32>
    %c0_3 = arith.constant 0 : index
    %c0_4 = arith.constant 0 : index
    %c0_5 = arith.constant 0 : index
    %5 = vector.load %arg44[%c0_3, %c0_4, %c0_5] : memref<1x64x32xf32, #tpu.memory_space<vmem>>, vector<1x64x32xf32>
    %6 = vector.shape_cast %5 : vector<1x64x32xf32> to vector<64x32xf32>
    %c0_6 = arith.constant 0 : index
    %c0_7 = arith.constant 0 : index
    %c0_8 = arith.constant 0 : index
    %7 = vector.load %arg2[%c0_6, %c0_7, %c0_8] : memref<1x8x32xbf16, #tpu.memory_space<vmem>>, vector<1x8x32xbf16>
    %8 = vector.shape_cast %7 : vector<1x8x32xbf16> to vector<8x32xbf16>
    %9 = arith.extf %8 : vector<8x32xbf16> to vector<8x32xf32>
    %c0_9 = arith.constant 0 : index
    %c0_10 = arith.constant 0 : index
    %c0_11 = arith.constant 0 : index
    %10 = vector.load %arg4[%c0_9, %c0_10, %c0_11] : memref<1x64x32xbf16, #tpu.memory_space<vmem>>, vector<1x64x32xbf16>
    %11 = vector.shape_cast %10 : vector<1x64x32xbf16> to vector<64x32xbf16>
    %12 = arith.extf %11 : vector<64x32xbf16> to vector<64x32xf32>
    %c0_i32_12 = arith.constant 0 : i32
    %13 = arith.cmpi sgt, %arg1, %c0_i32_12 : i32
    %14 = arith.extui %13 : i1 to i32
    %15 = arith.sitofp %14 : i32 to f32
    %16 = vector.broadcast %15 : f32 to vector<8x32xf32>
    %17 = arith.mulf %16, %9 : vector<8x32xf32>
    %18 = arith.addf %4, %17 : vector<8x32xf32>
    %19 = arith.truncf %18 : vector<8x32xf32> to vector<8x32xbf16>
    %c0_13 = arith.constant 0 : index
    %c0_14 = arith.constant 0 : index
    %c0_15 = arith.constant 0 : index
    %20 = vector.load %arg5[%c0_13, %c0_14, %c0_15] : memref<1x32x48xbf16, #tpu.memory_space<vmem>>, vector<1x32x48xbf16>
    %21 = vector.shape_cast %20 : vector<1x32x48xbf16> to vector<32x48xbf16>
    %cst = arith.constant dense<0.000000e+00> : vector<8x48xf32>
    %22 = tpu.matmul %19, %21, %cst {dimension_numbers = #tpu.dot_dimension_numbers<[1], [0], [0], [1], [0, 0, 1, 1], [], []>} : vector<8x32xbf16>, vector<32x48xbf16>, vector<8x48xf32> -> vector<8x48xf32>
    %c0_16 = arith.constant 0 : index
    %c0_17 = arith.constant 0 : index
    %c0_18 = arith.constant 0 : index
    %23 = vector.load %arg6[%c0_16, %c0_17, %c0_18] : memref<1x1x48xf32, #tpu.memory_space<vmem>>, vector<1x1x48xf32>
    %24 = vector.shape_cast %23 : vector<1x1x48xf32> to vector<1x48xf32>
    %25 = vector.broadcast %24 : vector<1x48xf32> to vector<8x48xf32>
    %26 = arith.addf %22, %25 : vector<8x48xf32>
    %27 = arith.truncf %26 : vector<8x48xf32> to vector<8x48xbf16>
    %28 = arith.truncf %18 : vector<8x32xf32> to vector<8x32xbf16>
    %c0_19 = arith.constant 0 : index
    %c0_20 = arith.constant 0 : index
    %c0_21 = arith.constant 0 : index
    %29 = vector.load %arg7[%c0_19, %c0_20, %c0_21] : memref<1x32x48xbf16, #tpu.memory_space<vmem>>, vector<1x32x48xbf16>
    %30 = vector.shape_cast %29 : vector<1x32x48xbf16> to vector<32x48xbf16>
    %cst_22 = arith.constant dense<0.000000e+00> : vector<8x48xf32>
    %31 = tpu.matmul %28, %30, %cst_22 {dimension_numbers = #tpu.dot_dimension_numbers<[1], [0], [0], [1], [0, 0, 1, 1], [], []>} : vector<8x32xbf16>, vector<32x48xbf16>, vector<8x48xf32> -> vector<8x48xf32>
    %c0_23 = arith.constant 0 : index
    %c0_24 = arith.constant 0 : index
    %c0_25 = arith.constant 0 : index
    %32 = vector.load %arg8[%c0_23, %c0_24, %c0_25] : memref<1x1x48xf32, #tpu.memory_space<vmem>>, vector<1x1x48xf32>
    %33 = vector.shape_cast %32 : vector<1x1x48xf32> to vector<1x48xf32>
    %34 = vector.broadcast %33 : vector<1x48xf32> to vector<8x48xf32>
    %35 = arith.addf %31, %34 : vector<8x48xf32>
    %36 = arith.truncf %35 : vector<8x48xf32> to vector<8x48xbf16>
    %37 = arith.truncf %4 : vector<8x32xf32> to vector<8x32xbf16>
    %c0_26 = arith.constant 0 : index
    %c0_27 = arith.constant 0 : index
    %c0_28 = arith.constant 0 : index
    %38 = vector.load %arg9[%c0_26, %c0_27, %c0_28] : memref<1x32x48xbf16, #tpu.memory_space<vmem>>, vector<1x32x48xbf16>
    %39 = vector.shape_cast %38 : vector<1x32x48xbf16> to vector<32x48xbf16>
    %cst_29 = arith.constant dense<0.000000e+00> : vector<8x48xf32>
    %40 = tpu.matmul %37, %39, %cst_29 {dimension_numbers = #tpu.dot_dimension_numbers<[1], [0], [0], [1], [0, 0, 1, 1], [], []>} : vector<8x32xbf16>, vector<32x48xbf16>, vector<8x48xf32> -> vector<8x48xf32>
    %c0_30 = arith.constant 0 : index
    %c0_31 = arith.constant 0 : index
    %c0_32 = arith.constant 0 : index
    %41 = vector.load %arg10[%c0_30, %c0_31, %c0_32] : memref<1x1x48xf32, #tpu.memory_space<vmem>>, vector<1x1x48xf32>
    %42 = vector.shape_cast %41 : vector<1x1x48xf32> to vector<1x48xf32>
    %43 = vector.broadcast %42 : vector<1x48xf32> to vector<8x48xf32>
    %44 = arith.addf %40, %43 : vector<8x48xf32>
    %45 = arith.truncf %44 : vector<8x48xf32> to vector<8x48xbf16>
    %46 = vector.extract_strided_slice %27 {offsets = [0, 0], sizes = [8, 16], strides = [1, 1]} : vector<8x48xbf16> to vector<8x16xbf16>
    %47 = vector.extract_strided_slice %36 {offsets = [0, 0], sizes = [8, 16], strides = [1, 1]} : vector<8x48xbf16> to vector<8x16xbf16>
    "tpu.trace_start"() <{level = 10 : i32, message = "qd,kd->qk"}> : () -> ()
    %cst_33 = arith.constant dense<0.000000e+00> : vector<8x8xf32>
    %48 = tpu.matmul %46, %47, %cst_33 {dimension_numbers = #tpu.dot_dimension_numbers<[1], [1], [0], [0], [0, 0, 1, 0], [], []>} : vector<8x16xbf16>, vector<8x16xbf16>, vector<8x8xf32> -> vector<8x8xf32>
    "tpu.trace_stop"() : () -> ()
    %cst_34 = arith.constant dense<0xFF800000> : vector<8xf32>
    %49 = vector.multi_reduction <maximumf>, %48, %cst_34 [1] : vector<8x8xf32> to vector<8xf32>
    %50 = vector.shape_cast %49 : vector<8xf32> to vector<8x1xf32>
    %51 = vector.broadcast %50 : vector<8x1xf32> to vector<8x8xf32>
    %52 = arith.subf %48, %51 : vector<8x8xf32>
    %53 = math.exp %52 : vector<8x8xf32>
    %cst_35 = arith.constant dense<0.000000e+00> : vector<8xf32>
    %54 = vector.multi_reduction <add>, %53, %cst_35 [1] : vector<8x8xf32> to vector<8xf32>
    %55 = vector.shape_cast %54 : vector<8xf32> to vector<8x1xf32>
    %56 = tpu.reciprocal %55 {approx = true} : vector<8x1xf32> -> vector<8x1xf32>
    %57 = vector.broadcast %56 : vector<8x1xf32> to vector<8x8xf32>
    %58 = arith.mulf %53, %57 : vector<8x8xf32>
    %59 = arith.truncf %58 : vector<8x8xf32> to vector<8x8xbf16>
    %60 = vector.extract_strided_slice %45 {offsets = [0, 0], sizes = [8, 16], strides = [1, 1]} : vector<8x48xbf16> to vector<8x16xbf16>
    %cst_36 = arith.constant dense<0.000000e+00> : vector<8x16xf32>
    %61 = tpu.matmul %59, %60, %cst_36 {dimension_numbers = #tpu.dot_dimension_numbers<[1], [0], [0], [1], [0, 0, 1, 1], [], []>} : vector<8x8xbf16>, vector<8x16xbf16>, vector<8x16xf32> -> vector<8x16xf32>
    %62 = vector.extract_strided_slice %27 {offsets = [0, 16], sizes = [8, 16], strides = [1, 1]} : vector<8x48xbf16> to vector<8x16xbf16>
    %63 = vector.extract_strided_slice %36 {offsets = [0, 16], sizes = [8, 16], strides = [1, 1]} : vector<8x48xbf16> to vector<8x16xbf16>
    "tpu.trace_start"() <{level = 10 : i32, message = "qd,kd->qk"}> : () -> ()
    %cst_37 = arith.constant dense<0.000000e+00> : vector<8x8xf32>
    %64 = tpu.matmul %62, %63, %cst_37 {dimension_numbers = #tpu.dot_dimension_numbers<[1], [1], [0], [0], [0, 0, 1, 0], [], []>} : vector<8x16xbf16>, vector<8x16xbf16>, vector<8x8xf32> -> vector<8x8xf32>
    "tpu.trace_stop"() : () -> ()
    %cst_38 = arith.constant dense<0xFF800000> : vector<8xf32>
    %65 = vector.multi_reduction <maximumf>, %64, %cst_38 [1] : vector<8x8xf32> to vector<8xf32>
    %66 = vector.shape_cast %65 : vector<8xf32> to vector<8x1xf32>
    %67 = vector.broadcast %66 : vector<8x1xf32> to vector<8x8xf32>
    %68 = arith.subf %64, %67 : vector<8x8xf32>
    %69 = math.exp %68 : vector<8x8xf32>
    %cst_39 = arith.constant dense<0.000000e+00> : vector<8xf32>
    %70 = vector.multi_reduction <add>, %69, %cst_39 [1] : vector<8x8xf32> to vector<8xf32>
    %71 = vector.shape_cast %70 : vector<8xf32> to vector<8x1xf32>
    %72 = tpu.reciprocal %71 {approx = true} : vector<8x1xf32> -> vector<8x1xf32>
    %73 = vector.broadcast %72 : vector<8x1xf32> to vector<8x8xf32>
    %74 = arith.mulf %69, %73 : vector<8x8xf32>
    %75 = arith.truncf %74 : vector<8x8xf32> to vector<8x8xbf16>
    %76 = vector.extract_strided_slice %45 {offsets = [0, 16], sizes = [8, 16], strides = [1, 1]} : vector<8x48xbf16> to vector<8x16xbf16>
    %cst_40 = arith.constant dense<0.000000e+00> : vector<8x16xf32>
    %77 = tpu.matmul %75, %76, %cst_40 {dimension_numbers = #tpu.dot_dimension_numbers<[1], [0], [0], [1], [0, 0, 1, 1], [], []>} : vector<8x8xbf16>, vector<8x16xbf16>, vector<8x16xf32> -> vector<8x16xf32>
    %78 = vector.extract_strided_slice %27 {offsets = [0, 32], sizes = [8, 16], strides = [1, 1]} : vector<8x48xbf16> to vector<8x16xbf16>
    %79 = vector.extract_strided_slice %36 {offsets = [0, 32], sizes = [8, 16], strides = [1, 1]} : vector<8x48xbf16> to vector<8x16xbf16>
    "tpu.trace_start"() <{level = 10 : i32, message = "qd,kd->qk"}> : () -> ()
    %cst_41 = arith.constant dense<0.000000e+00> : vector<8x8xf32>
    %80 = tpu.matmul %78, %79, %cst_41 {dimension_numbers = #tpu.dot_dimension_numbers<[1], [1], [0], [0], [0, 0, 1, 0], [], []>} : vector<8x16xbf16>, vector<8x16xbf16>, vector<8x8xf32> -> vector<8x8xf32>
    "tpu.trace_stop"() : () -> ()
    %cst_42 = arith.constant dense<0xFF800000> : vector<8xf32>
    %81 = vector.multi_reduction <maximumf>, %80, %cst_42 [1] : vector<8x8xf32> to vector<8xf32>
    %82 = vector.shape_cast %81 : vector<8xf32> to vector<8x1xf32>
    %83 = vector.broadcast %82 : vector<8x1xf32> to vector<8x8xf32>
    %84 = arith.subf %80, %83 : vector<8x8xf32>
    %85 = math.exp %84 : vector<8x8xf32>
    %cst_43 = arith.constant dense<0.000000e+00> : vector<8xf32>
    %86 = vector.multi_reduction <add>, %85, %cst_43 [1] : vector<8x8xf32> to vector<8xf32>
    %87 = vector.shape_cast %86 : vector<8xf32> to vector<8x1xf32>
    %88 = tpu.reciprocal %87 {approx = true} : vector<8x1xf32> -> vector<8x1xf32>
    %89 = vector.broadcast %88 : vector<8x1xf32> to vector<8x8xf32>
    %90 = arith.mulf %85, %89 : vector<8x8xf32>
    %91 = arith.truncf %90 : vector<8x8xf32> to vector<8x8xbf16>
    %92 = vector.extract_strided_slice %45 {offsets = [0, 32], sizes = [8, 16], strides = [1, 1]} : vector<8x48xbf16> to vector<8x16xbf16>
    %cst_44 = arith.constant dense<0.000000e+00> : vector<8x16xf32>
    %93 = tpu.matmul %91, %92, %cst_44 {dimension_numbers = #tpu.dot_dimension_numbers<[1], [0], [0], [1], [0, 0, 1, 1], [], []>} : vector<8x8xbf16>, vector<8x16xbf16>, vector<8x16xf32> -> vector<8x16xf32>
    %94 = tpu.concatenate %61, %77, %93 in 1 : vector<8x16xf32>, vector<8x16xf32>, vector<8x16xf32> -> vector<8x48xf32>
    %95 = arith.truncf %94 : vector<8x48xf32> to vector<8x48xbf16>
    %c0_45 = arith.constant 0 : index
    %c0_46 = arith.constant 0 : index
    %c0_47 = arith.constant 0 : index
    %96 = vector.load %arg11[%c0_45, %c0_46, %c0_47] : memref<1x48x32xbf16, #tpu.memory_space<vmem>>, vector<1x48x32xbf16>
    %97 = vector.shape_cast %96 : vector<1x48x32xbf16> to vector<48x32xbf16>
    %cst_48 = arith.constant dense<0.000000e+00> : vector<8x32xf32>
    %98 = tpu.matmul %95, %97, %cst_48 {dimension_numbers = #tpu.dot_dimension_numbers<[1], [0], [0], [1], [0, 0, 1, 1], [], []>} : vector<8x48xbf16>, vector<48x32xbf16>, vector<8x32xf32> -> vector<8x32xf32>
    %c0_49 = arith.constant 0 : index
    %c0_50 = arith.constant 0 : index
    %c0_51 = arith.constant 0 : index
    %99 = vector.load %arg12[%c0_49, %c0_50, %c0_51] : memref<1x1x32xf32, #tpu.memory_space<vmem>>, vector<1x1x32xf32>
    %100 = vector.shape_cast %99 : vector<1x1x32xf32> to vector<1x32xf32>
    %101 = vector.broadcast %100 : vector<1x32xf32> to vector<8x32xf32>
    %102 = arith.addf %98, %101 : vector<8x32xf32>
    %103 = vector.broadcast %15 : f32 to vector<8x32xf32>
    %104 = arith.mulf %103, %4 : vector<8x32xf32>
    %105 = arith.addf %104, %102 : vector<8x32xf32>
    %cst_52 = arith.constant dense<0.000000e+00> : vector<8xf32>
    %106 = vector.multi_reduction <add>, %105, %cst_52 [1] : vector<8x32xf32> to vector<8xf32>
    %107 = vector.shape_cast %106 : vector<8xf32> to vector<8x1xf32>
    %cst_53 = arith.constant 3.200000e+01 : f32
    %108 = vector.broadcast %cst_53 : f32 to vector<8x1xf32>
    %109 = arith.divf %107, %108 : vector<8x1xf32>
    %110 = vector.broadcast %109 : vector<8x1xf32> to vector<8x32xf32>
    %111 = arith.subf %105, %110 : vector<8x32xf32>
    %112 = arith.mulf %111, %111 : vector<8x32xf32>
    %cst_54 = arith.constant dense<0.000000e+00> : vector<8xf32>
    %113 = vector.multi_reduction <add>, %112, %cst_54 [1] : vector<8x32xf32> to vector<8xf32>
    %114 = vector.shape_cast %113 : vector<8xf32> to vector<8x1xf32>
    %cst_55 = arith.constant 3.200000e+01 : f32
    %115 = vector.broadcast %cst_55 : f32 to vector<8x1xf32>
    %116 = arith.divf %114, %115 : vector<8x1xf32>
    %117 = vector.broadcast %109 : vector<8x1xf32> to vector<8x32xf32>
    %118 = arith.subf %105, %117 : vector<8x32xf32>
    %cst_56 = arith.constant 9.99999974E-6 : f32
    %119 = vector.broadcast %cst_56 : f32 to vector<8x1xf32>
    %120 = arith.addf %116, %119 : vector<8x1xf32>
    %121 = math.rsqrt %120 : vector<8x1xf32>
    %122 = vector.broadcast %121 : vector<8x1xf32> to vector<8x32xf32>
    %123 = arith.mulf %118, %122 : vector<8x32xf32>
    %c0_57 = arith.constant 0 : index
    %c0_58 = arith.constant 0 : index
    %c0_59 = arith.constant 0 : index
    %124 = vector.load %arg33[%c0_57, %c0_58, %c0_59] : memref<1x1x32xf32, #tpu.memory_space<vmem>>, vector<1x1x32xf32>
    %125 = vector.shape_cast %124 : vector<1x1x32xf32> to vector<1x32xf32>
    %126 = vector.broadcast %125 : vector<1x32xf32> to vector<8x32xf32>
    %127 = arith.mulf %123, %126 : vector<8x32xf32>
    %c0_60 = arith.constant 0 : index
    %c0_61 = arith.constant 0 : index
    %c0_62 = arith.constant 0 : index
    %128 = vector.load %arg34[%c0_60, %c0_61, %c0_62] : memref<1x1x32xf32, #tpu.memory_space<vmem>>, vector<1x1x32xf32>
    %129 = vector.shape_cast %128 : vector<1x1x32xf32> to vector<1x32xf32>
    %130 = vector.broadcast %129 : vector<1x32xf32> to vector<8x32xf32>
    %131 = arith.addf %127, %130 : vector<8x32xf32>
    %132 = arith.addf %131, %9 : vector<8x32xf32>
    %133 = arith.addf %6, %12 : vector<64x32xf32>
    %134 = arith.truncf %132 : vector<8x32xf32> to vector<8x32xbf16>
    %c0_63 = arith.constant 0 : index
    %c0_64 = arith.constant 0 : index
    %c0_65 = arith.constant 0 : index
    %135 = vector.load %arg13[%c0_63, %c0_64, %c0_65] : memref<1x32x24xbf16, #tpu.memory_space<vmem>>, vector<1x32x24xbf16>
    %136 = vector.shape_cast %135 : vector<1x32x24xbf16> to vector<32x24xbf16>
    %cst_66 = arith.constant dense<0.000000e+00> : vector<8x24xf32>
    %137 = tpu.matmul %134, %136, %cst_66 {dimension_numbers = #tpu.dot_dimension_numbers<[1], [0], [0], [1], [0, 0, 1, 1], [], []>} : vector<8x32xbf16>, vector<32x24xbf16>, vector<8x24xf32> -> vector<8x24xf32>
    %c0_67 = arith.constant 0 : index
    %c0_68 = arith.constant 0 : index
    %c0_69 = arith.constant 0 : index
    %138 = vector.load %arg14[%c0_67, %c0_68, %c0_69] : memref<1x1x24xf32, #tpu.memory_space<vmem>>, vector<1x1x24xf32>
    %139 = vector.shape_cast %138 : vector<1x1x24xf32> to vector<1x24xf32>
    %140 = vector.broadcast %139 : vector<1x24xf32> to vector<8x24xf32>
    %141 = arith.addf %137, %140 : vector<8x24xf32>
    %142 = arith.truncf %141 : vector<8x24xf32> to vector<8x24xbf16>
    %143 = arith.truncf %133 : vector<64x32xf32> to vector<64x32xbf16>
    %c0_70 = arith.constant 0 : index
    %c0_71 = arith.constant 0 : index
    %c0_72 = arith.constant 0 : index
    %144 = vector.load %arg15[%c0_70, %c0_71, %c0_72] : memref<1x32x24xbf16, #tpu.memory_space<vmem>>, vector<1x32x24xbf16>
    %145 = vector.shape_cast %144 : vector<1x32x24xbf16> to vector<32x24xbf16>
    %cst_73 = arith.constant dense<0.000000e+00> : vector<64x24xf32>
    %146 = tpu.matmul %143, %145, %cst_73 {dimension_numbers = #tpu.dot_dimension_numbers<[1], [0], [0], [1], [0, 0, 1, 1], [], []>} : vector<64x32xbf16>, vector<32x24xbf16>, vector<64x24xf32> -> vector<64x24xf32>
    %c0_74 = arith.constant 0 : index
    %c0_75 = arith.constant 0 : index
    %c0_76 = arith.constant 0 : index
    %147 = vector.load %arg16[%c0_74, %c0_75, %c0_76] : memref<1x1x24xf32, #tpu.memory_space<vmem>>, vector<1x1x24xf32>
    %148 = vector.shape_cast %147 : vector<1x1x24xf32> to vector<1x24xf32>
    %149 = vector.broadcast %148 : vector<1x24xf32> to vector<64x24xf32>
    %150 = arith.addf %146, %149 : vector<64x24xf32>
    %151 = arith.truncf %150 : vector<64x24xf32> to vector<64x24xbf16>
    %152 = arith.truncf %6 : vector<64x32xf32> to vector<64x32xbf16>
    %c0_77 = arith.constant 0 : index
    %c0_78 = arith.constant 0 : index
    %c0_79 = arith.constant 0 : index
    %153 = vector.load %arg17[%c0_77, %c0_78, %c0_79] : memref<1x32x24xbf16, #tpu.memory_space<vmem>>, vector<1x32x24xbf16>
    %154 = vector.shape_cast %153 : vector<1x32x24xbf16> to vector<32x24xbf16>
    %cst_80 = arith.constant dense<0.000000e+00> : vector<64x24xf32>
    %155 = tpu.matmul %152, %154, %cst_80 {dimension_numbers = #tpu.dot_dimension_numbers<[1], [0], [0], [1], [0, 0, 1, 1], [], []>} : vector<64x32xbf16>, vector<32x24xbf16>, vector<64x24xf32> -> vector<64x24xf32>
    %c0_81 = arith.constant 0 : index
    %c0_82 = arith.constant 0 : index
    %c0_83 = arith.constant 0 : index
    %156 = vector.load %arg18[%c0_81, %c0_82, %c0_83] : memref<1x1x24xf32, #tpu.memory_space<vmem>>, vector<1x1x24xf32>
    %157 = vector.shape_cast %156 : vector<1x1x24xf32> to vector<1x24xf32>
    %158 = vector.broadcast %157 : vector<1x24xf32> to vector<64x24xf32>
    %159 = arith.addf %155, %158 : vector<64x24xf32>
    %160 = arith.truncf %159 : vector<64x24xf32> to vector<64x24xbf16>
    %161 = vector.extract_strided_slice %142 {offsets = [0, 0], sizes = [8, 8], strides = [1, 1]} : vector<8x24xbf16> to vector<8x8xbf16>
    %162 = vector.extract_strided_slice %151 {offsets = [0, 0], sizes = [64, 8], strides = [1, 1]} : vector<64x24xbf16> to vector<64x8xbf16>
    "tpu.trace_start"() <{level = 10 : i32, message = "qd,kd->qk"}> : () -> ()
    %cst_84 = arith.constant dense<0.000000e+00> : vector<8x64xf32>
    %163 = tpu.matmul %161, %162, %cst_84 {dimension_numbers = #tpu.dot_dimension_numbers<[1], [1], [0], [0], [0, 0, 1, 0], [], []>} : vector<8x8xbf16>, vector<64x8xbf16>, vector<8x64xf32> -> vector<8x64xf32>
    "tpu.trace_stop"() : () -> ()
    %cst_85 = arith.constant dense<0xFF800000> : vector<8xf32>
    %164 = vector.multi_reduction <maximumf>, %163, %cst_85 [1] : vector<8x64xf32> to vector<8xf32>
    %165 = vector.shape_cast %164 : vector<8xf32> to vector<8x1xf32>
    %166 = vector.broadcast %165 : vector<8x1xf32> to vector<8x64xf32>
    %167 = arith.subf %163, %166 : vector<8x64xf32>
    %168 = math.exp %167 : vector<8x64xf32>
    %cst_86 = arith.constant dense<0.000000e+00> : vector<8xf32>
    %169 = vector.multi_reduction <add>, %168, %cst_86 [1] : vector<8x64xf32> to vector<8xf32>
    %170 = vector.shape_cast %169 : vector<8xf32> to vector<8x1xf32>
    %171 = tpu.reciprocal %170 {approx = true} : vector<8x1xf32> -> vector<8x1xf32>
    %172 = vector.broadcast %171 : vector<8x1xf32> to vector<8x64xf32>
    %173 = arith.mulf %168, %172 : vector<8x64xf32>
    %174 = arith.truncf %173 : vector<8x64xf32> to vector<8x64xbf16>
    %175 = vector.extract_strided_slice %160 {offsets = [0, 0], sizes = [64, 8], strides = [1, 1]} : vector<64x24xbf16> to vector<64x8xbf16>
    %cst_87 = arith.constant dense<0.000000e+00> : vector<8x8xf32>
    %176 = tpu.matmul %174, %175, %cst_87 {dimension_numbers = #tpu.dot_dimension_numbers<[1], [0], [0], [1], [0, 0, 1, 1], [], []>} : vector<8x64xbf16>, vector<64x8xbf16>, vector<8x8xf32> -> vector<8x8xf32>
    %177 = vector.extract_strided_slice %142 {offsets = [0, 8], sizes = [8, 8], strides = [1, 1]} : vector<8x24xbf16> to vector<8x8xbf16>
    %178 = vector.extract_strided_slice %151 {offsets = [0, 8], sizes = [64, 8], strides = [1, 1]} : vector<64x24xbf16> to vector<64x8xbf16>
    "tpu.trace_start"() <{level = 10 : i32, message = "qd,kd->qk"}> : () -> ()
    %cst_88 = arith.constant dense<0.000000e+00> : vector<8x64xf32>
    %179 = tpu.matmul %177, %178, %cst_88 {dimension_numbers = #tpu.dot_dimension_numbers<[1], [1], [0], [0], [0, 0, 1, 0], [], []>} : vector<8x8xbf16>, vector<64x8xbf16>, vector<8x64xf32> -> vector<8x64xf32>
    "tpu.trace_stop"() : () -> ()
    %cst_89 = arith.constant dense<0xFF800000> : vector<8xf32>
    %180 = vector.multi_reduction <maximumf>, %179, %cst_89 [1] : vector<8x64xf32> to vector<8xf32>
    %181 = vector.shape_cast %180 : vector<8xf32> to vector<8x1xf32>
    %182 = vector.broadcast %181 : vector<8x1xf32> to vector<8x64xf32>
    %183 = arith.subf %179, %182 : vector<8x64xf32>
    %184 = math.exp %183 : vector<8x64xf32>
    %cst_90 = arith.constant dense<0.000000e+00> : vector<8xf32>
    %185 = vector.multi_reduction <add>, %184, %cst_90 [1] : vector<8x64xf32> to vector<8xf32>
    %186 = vector.shape_cast %185 : vector<8xf32> to vector<8x1xf32>
    %187 = tpu.reciprocal %186 {approx = true} : vector<8x1xf32> -> vector<8x1xf32>
    %188 = vector.broadcast %187 : vector<8x1xf32> to vector<8x64xf32>
    %189 = arith.mulf %184, %188 : vector<8x64xf32>
    %190 = arith.truncf %189 : vector<8x64xf32> to vector<8x64xbf16>
    %191 = vector.extract_strided_slice %160 {offsets = [0, 8], sizes = [64, 8], strides = [1, 1]} : vector<64x24xbf16> to vector<64x8xbf16>
    %cst_91 = arith.constant dense<0.000000e+00> : vector<8x8xf32>
    %192 = tpu.matmul %190, %191, %cst_91 {dimension_numbers = #tpu.dot_dimension_numbers<[1], [0], [0], [1], [0, 0, 1, 1], [], []>} : vector<8x64xbf16>, vector<64x8xbf16>, vector<8x8xf32> -> vector<8x8xf32>
    %193 = vector.extract_strided_slice %142 {offsets = [0, 16], sizes = [8, 8], strides = [1, 1]} : vector<8x24xbf16> to vector<8x8xbf16>
    %194 = vector.extract_strided_slice %151 {offsets = [0, 16], sizes = [64, 8], strides = [1, 1]} : vector<64x24xbf16> to vector<64x8xbf16>
    "tpu.trace_start"() <{level = 10 : i32, message = "qd,kd->qk"}> : () -> ()
    %cst_92 = arith.constant dense<0.000000e+00> : vector<8x64xf32>
    %195 = tpu.matmul %193, %194, %cst_92 {dimension_numbers = #tpu.dot_dimension_numbers<[1], [1], [0], [0], [0, 0, 1, 0], [], []>} : vector<8x8xbf16>, vector<64x8xbf16>, vector<8x64xf32> -> vector<8x64xf32>
    "tpu.trace_stop"() : () -> ()
    %cst_93 = arith.constant dense<0xFF800000> : vector<8xf32>
    %196 = vector.multi_reduction <maximumf>, %195, %cst_93 [1] : vector<8x64xf32> to vector<8xf32>
    %197 = vector.shape_cast %196 : vector<8xf32> to vector<8x1xf32>
    %198 = vector.broadcast %197 : vector<8x1xf32> to vector<8x64xf32>
    %199 = arith.subf %195, %198 : vector<8x64xf32>
    %200 = math.exp %199 : vector<8x64xf32>
    %cst_94 = arith.constant dense<0.000000e+00> : vector<8xf32>
    %201 = vector.multi_reduction <add>, %200, %cst_94 [1] : vector<8x64xf32> to vector<8xf32>
    %202 = vector.shape_cast %201 : vector<8xf32> to vector<8x1xf32>
    %203 = tpu.reciprocal %202 {approx = true} : vector<8x1xf32> -> vector<8x1xf32>
    %204 = vector.broadcast %203 : vector<8x1xf32> to vector<8x64xf32>
    %205 = arith.mulf %200, %204 : vector<8x64xf32>
    %206 = arith.truncf %205 : vector<8x64xf32> to vector<8x64xbf16>
    %207 = vector.extract_strided_slice %160 {offsets = [0, 16], sizes = [64, 8], strides = [1, 1]} : vector<64x24xbf16> to vector<64x8xbf16>
    %cst_95 = arith.constant dense<0.000000e+00> : vector<8x8xf32>
    %208 = tpu.matmul %206, %207, %cst_95 {dimension_numbers = #tpu.dot_dimension_numbers<[1], [0], [0], [1], [0, 0, 1, 1], [], []>} : vector<8x64xbf16>, vector<64x8xbf16>, vector<8x8xf32> -> vector<8x8xf32>
    %209 = tpu.concatenate %176, %192, %208 in 1 : vector<8x8xf32>, vector<8x8xf32>, vector<8x8xf32> -> vector<8x24xf32>
    %210 = arith.truncf %209 : vector<8x24xf32> to vector<8x24xbf16>
    %c0_96 = arith.constant 0 : index
    %c0_97 = arith.constant 0 : index
    %c0_98 = arith.constant 0 : index
    %211 = vector.load %arg19[%c0_96, %c0_97, %c0_98] : memref<1x24x32xbf16, #tpu.memory_space<vmem>>, vector<1x24x32xbf16>
    %212 = vector.shape_cast %211 : vector<1x24x32xbf16> to vector<24x32xbf16>
    %cst_99 = arith.constant dense<0.000000e+00> : vector<8x32xf32>
    %213 = tpu.matmul %210, %212, %cst_99 {dimension_numbers = #tpu.dot_dimension_numbers<[1], [0], [0], [1], [0, 0, 1, 1], [], []>} : vector<8x24xbf16>, vector<24x32xbf16>, vector<8x32xf32> -> vector<8x32xf32>
    %c0_100 = arith.constant 0 : index
    %c0_101 = arith.constant 0 : index
    %c0_102 = arith.constant 0 : index
    %214 = vector.load %arg20[%c0_100, %c0_101, %c0_102] : memref<1x1x32xf32, #tpu.memory_space<vmem>>, vector<1x1x32xf32>
    %215 = vector.shape_cast %214 : vector<1x1x32xf32> to vector<1x32xf32>
    %216 = vector.broadcast %215 : vector<1x32xf32> to vector<8x32xf32>
    %217 = arith.addf %213, %216 : vector<8x32xf32>
    %218 = arith.addf %131, %217 : vector<8x32xf32>
    %cst_103 = arith.constant dense<0.000000e+00> : vector<8xf32>
    %219 = vector.multi_reduction <add>, %218, %cst_103 [1] : vector<8x32xf32> to vector<8xf32>
    %220 = vector.shape_cast %219 : vector<8xf32> to vector<8x1xf32>
    %cst_104 = arith.constant 3.200000e+01 : f32
    %221 = vector.broadcast %cst_104 : f32 to vector<8x1xf32>
    %222 = arith.divf %220, %221 : vector<8x1xf32>
    %223 = vector.broadcast %222 : vector<8x1xf32> to vector<8x32xf32>
    %224 = arith.subf %218, %223 : vector<8x32xf32>
    %225 = arith.mulf %224, %224 : vector<8x32xf32>
    %cst_105 = arith.constant dense<0.000000e+00> : vector<8xf32>
    %226 = vector.multi_reduction <add>, %225, %cst_105 [1] : vector<8x32xf32> to vector<8xf32>
    %227 = vector.shape_cast %226 : vector<8xf32> to vector<8x1xf32>
    %cst_106 = arith.constant 3.200000e+01 : f32
    %228 = vector.broadcast %cst_106 : f32 to vector<8x1xf32>
    %229 = arith.divf %227, %228 : vector<8x1xf32>
    %230 = vector.broadcast %222 : vector<8x1xf32> to vector<8x32xf32>
    %231 = arith.subf %218, %230 : vector<8x32xf32>
    %cst_107 = arith.constant 9.99999974E-6 : f32
    %232 = vector.broadcast %cst_107 : f32 to vector<8x1xf32>
    %233 = arith.addf %229, %232 : vector<8x1xf32>
    %234 = math.rsqrt %233 : vector<8x1xf32>
    %235 = vector.broadcast %234 : vector<8x1xf32> to vector<8x32xf32>
    %236 = arith.mulf %231, %235 : vector<8x32xf32>
    %c0_108 = arith.constant 0 : index
    %c0_109 = arith.constant 0 : index
    %c0_110 = arith.constant 0 : index
    %237 = vector.load %arg35[%c0_108, %c0_109, %c0_110] : memref<1x1x32xf32, #tpu.memory_space<vmem>>, vector<1x1x32xf32>
    %238 = vector.shape_cast %237 : vector<1x1x32xf32> to vector<1x32xf32>
    %239 = vector.broadcast %238 : vector<1x32xf32> to vector<8x32xf32>
    %240 = arith.mulf %236, %239 : vector<8x32xf32>
    %c0_111 = arith.constant 0 : index
    %c0_112 = arith.constant 0 : index
    %c0_113 = arith.constant 0 : index
    %241 = vector.load %arg36[%c0_111, %c0_112, %c0_113] : memref<1x1x32xf32, #tpu.memory_space<vmem>>, vector<1x1x32xf32>
    %242 = vector.shape_cast %241 : vector<1x1x32xf32> to vector<1x32xf32>
    %243 = vector.broadcast %242 : vector<1x32xf32> to vector<8x32xf32>
    %244 = arith.addf %240, %243 : vector<8x32xf32>
    %245 = arith.truncf %244 : vector<8x32xf32> to vector<8x32xbf16>
    %c0_114 = arith.constant 0 : index
    %c0_115 = arith.constant 0 : index
    %c0_116 = arith.constant 0 : index
    %246 = vector.load %arg29[%c0_114, %c0_115, %c0_116] : memref<1x32x64xbf16, #tpu.memory_space<vmem>>, vector<1x32x64xbf16>
    %247 = vector.shape_cast %246 : vector<1x32x64xbf16> to vector<32x64xbf16>
    %cst_117 = arith.constant dense<0.000000e+00> : vector<8x64xf32>
    %248 = tpu.matmul %245, %247, %cst_117 {dimension_numbers = #tpu.dot_dimension_numbers<[1], [0], [0], [1], [0, 0, 1, 1], [], []>} : vector<8x32xbf16>, vector<32x64xbf16>, vector<8x64xf32> -> vector<8x64xf32>
    %c0_118 = arith.constant 0 : index
    %c0_119 = arith.constant 0 : index
    %c0_120 = arith.constant 0 : index
    %249 = vector.load %arg30[%c0_118, %c0_119, %c0_120] : memref<1x1x64xf32, #tpu.memory_space<vmem>>, vector<1x1x64xf32>
    %250 = vector.shape_cast %249 : vector<1x1x64xf32> to vector<1x64xf32>
    %251 = vector.broadcast %250 : vector<1x64xf32> to vector<8x64xf32>
    %252 = arith.addf %248, %251 : vector<8x64xf32>
    %cst_121 = arith.constant 0.000000e+00 : f32
    %253 = vector.broadcast %cst_121 : f32 to vector<8x64xf32>
    %254 = arith.maximumf %252, %253 : vector<8x64xf32>
    %255 = arith.truncf %254 : vector<8x64xf32> to vector<8x64xbf16>
    %c0_122 = arith.constant 0 : index
    %c0_123 = arith.constant 0 : index
    %c0_124 = arith.constant 0 : index
    %256 = vector.load %arg31[%c0_122, %c0_123, %c0_124] : memref<1x64x32xbf16, #tpu.memory_space<vmem>>, vector<1x64x32xbf16>
    %257 = vector.shape_cast %256 : vector<1x64x32xbf16> to vector<64x32xbf16>
    %cst_125 = arith.constant dense<0.000000e+00> : vector<8x32xf32>
    %258 = tpu.matmul %255, %257, %cst_125 {dimension_numbers = #tpu.dot_dimension_numbers<[1], [0], [0], [1], [0, 0, 1, 1], [], []>} : vector<8x64xbf16>, vector<64x32xbf16>, vector<8x32xf32> -> vector<8x32xf32>
    %c0_126 = arith.constant 0 : index
    %c0_127 = arith.constant 0 : index
    %c0_128 = arith.constant 0 : index
    %259 = vector.load %arg32[%c0_126, %c0_127, %c0_128] : memref<1x1x32xf32, #tpu.memory_space<vmem>>, vector<1x1x32xf32>
    %260 = vector.shape_cast %259 : vector<1x1x32xf32> to vector<1x32xf32>
    %261 = vector.broadcast %260 : vector<1x32xf32> to vector<8x32xf32>
    %262 = arith.addf %258, %261 : vector<8x32xf32>
    %263 = arith.addf %244, %262 : vector<8x32xf32>
    %cst_129 = arith.constant dense<0.000000e+00> : vector<8xf32>
    %264 = vector.multi_reduction <add>, %263, %cst_129 [1] : vector<8x32xf32> to vector<8xf32>
    %265 = vector.shape_cast %264 : vector<8xf32> to vector<8x1xf32>
    %cst_130 = arith.constant 3.200000e+01 : f32
    %266 = vector.broadcast %cst_130 : f32 to vector<8x1xf32>
    %267 = arith.divf %265, %266 : vector<8x1xf32>
    %268 = vector.broadcast %267 : vector<8x1xf32> to vector<8x32xf32>
    %269 = arith.subf %263, %268 : vector<8x32xf32>
    %270 = arith.mulf %269, %269 : vector<8x32xf32>
    %cst_131 = arith.constant dense<0.000000e+00> : vector<8xf32>
    %271 = vector.multi_reduction <add>, %270, %cst_131 [1] : vector<8x32xf32> to vector<8xf32>
    %272 = vector.shape_cast %271 : vector<8xf32> to vector<8x1xf32>
    %cst_132 = arith.constant 3.200000e+01 : f32
    %273 = vector.broadcast %cst_132 : f32 to vector<8x1xf32>
    %274 = arith.divf %272, %273 : vector<8x1xf32>
    %275 = vector.broadcast %267 : vector<8x1xf32> to vector<8x32xf32>
    %276 = arith.subf %263, %275 : vector<8x32xf32>
    %cst_133 = arith.constant 9.99999974E-6 : f32
    %277 = vector.broadcast %cst_133 : f32 to vector<8x1xf32>
    %278 = arith.addf %274, %277 : vector<8x1xf32>
    %279 = math.rsqrt %278 : vector<8x1xf32>
    %280 = vector.broadcast %279 : vector<8x1xf32> to vector<8x32xf32>
    %281 = arith.mulf %276, %280 : vector<8x32xf32>
    %c0_134 = arith.constant 0 : index
    %c0_135 = arith.constant 0 : index
    %c0_136 = arith.constant 0 : index
    %282 = vector.load %arg37[%c0_134, %c0_135, %c0_136] : memref<1x1x32xf32, #tpu.memory_space<vmem>>, vector<1x1x32xf32>
    %283 = vector.shape_cast %282 : vector<1x1x32xf32> to vector<1x32xf32>
    %284 = vector.broadcast %283 : vector<1x32xf32> to vector<8x32xf32>
    %285 = arith.mulf %281, %284 : vector<8x32xf32>
    %c0_137 = arith.constant 0 : index
    %c0_138 = arith.constant 0 : index
    %c0_139 = arith.constant 0 : index
    %286 = vector.load %arg38[%c0_137, %c0_138, %c0_139] : memref<1x1x32xf32, #tpu.memory_space<vmem>>, vector<1x1x32xf32>
    %287 = vector.shape_cast %286 : vector<1x1x32xf32> to vector<1x32xf32>
    %288 = vector.broadcast %287 : vector<1x32xf32> to vector<8x32xf32>
    %289 = arith.addf %285, %288 : vector<8x32xf32>
    %290 = arith.addf %289, %9 : vector<8x32xf32>
    %291 = arith.addf %6, %12 : vector<64x32xf32>
    %292 = arith.truncf %291 : vector<64x32xf32> to vector<64x32xbf16>
    %c0_140 = arith.constant 0 : index
    %c0_141 = arith.constant 0 : index
    %c0_142 = arith.constant 0 : index
    %293 = vector.load %arg21[%c0_140, %c0_141, %c0_142] : memref<1x32x24xbf16, #tpu.memory_space<vmem>>, vector<1x32x24xbf16>
    %294 = vector.shape_cast %293 : vector<1x32x24xbf16> to vector<32x24xbf16>
    %cst_143 = arith.constant dense<0.000000e+00> : vector<64x24xf32>
    %295 = tpu.matmul %292, %294, %cst_143 {dimension_numbers = #tpu.dot_dimension_numbers<[1], [0], [0], [1], [0, 0, 1, 1], [], []>} : vector<64x32xbf16>, vector<32x24xbf16>, vector<64x24xf32> -> vector<64x24xf32>
    %c0_144 = arith.constant 0 : index
    %c0_145 = arith.constant 0 : index
    %c0_146 = arith.constant 0 : index
    %296 = vector.load %arg22[%c0_144, %c0_145, %c0_146] : memref<1x1x24xf32, #tpu.memory_space<vmem>>, vector<1x1x24xf32>
    %297 = vector.shape_cast %296 : vector<1x1x24xf32> to vector<1x24xf32>
    %298 = vector.broadcast %297 : vector<1x24xf32> to vector<64x24xf32>
    %299 = arith.addf %295, %298 : vector<64x24xf32>
    %300 = arith.truncf %299 : vector<64x24xf32> to vector<64x24xbf16>
    %301 = arith.truncf %290 : vector<8x32xf32> to vector<8x32xbf16>
    %c0_147 = arith.constant 0 : index
    %c0_148 = arith.constant 0 : index
    %c0_149 = arith.constant 0 : index
    %302 = vector.load %arg23[%c0_147, %c0_148, %c0_149] : memref<1x32x24xbf16, #tpu.memory_space<vmem>>, vector<1x32x24xbf16>
    %303 = vector.shape_cast %302 : vector<1x32x24xbf16> to vector<32x24xbf16>
    %cst_150 = arith.constant dense<0.000000e+00> : vector<8x24xf32>
    %304 = tpu.matmul %301, %303, %cst_150 {dimension_numbers = #tpu.dot_dimension_numbers<[1], [0], [0], [1], [0, 0, 1, 1], [], []>} : vector<8x32xbf16>, vector<32x24xbf16>, vector<8x24xf32> -> vector<8x24xf32>
    %c0_151 = arith.constant 0 : index
    %c0_152 = arith.constant 0 : index
    %c0_153 = arith.constant 0 : index
    %305 = vector.load %arg24[%c0_151, %c0_152, %c0_153] : memref<1x1x24xf32, #tpu.memory_space<vmem>>, vector<1x1x24xf32>
    %306 = vector.shape_cast %305 : vector<1x1x24xf32> to vector<1x24xf32>
    %307 = vector.broadcast %306 : vector<1x24xf32> to vector<8x24xf32>
    %308 = arith.addf %304, %307 : vector<8x24xf32>
    %309 = arith.truncf %308 : vector<8x24xf32> to vector<8x24xbf16>
    %310 = arith.truncf %289 : vector<8x32xf32> to vector<8x32xbf16>
    %c0_154 = arith.constant 0 : index
    %c0_155 = arith.constant 0 : index
    %c0_156 = arith.constant 0 : index
    %311 = vector.load %arg25[%c0_154, %c0_155, %c0_156] : memref<1x32x24xbf16, #tpu.memory_space<vmem>>, vector<1x32x24xbf16>
    %312 = vector.shape_cast %311 : vector<1x32x24xbf16> to vector<32x24xbf16>
    %cst_157 = arith.constant dense<0.000000e+00> : vector<8x24xf32>
    %313 = tpu.matmul %310, %312, %cst_157 {dimension_numbers = #tpu.dot_dimension_numbers<[1], [0], [0], [1], [0, 0, 1, 1], [], []>} : vector<8x32xbf16>, vector<32x24xbf16>, vector<8x24xf32> -> vector<8x24xf32>
    %c0_158 = arith.constant 0 : index
    %c0_159 = arith.constant 0 : index
    %c0_160 = arith.constant 0 : index
    %314 = vector.load %arg26[%c0_158, %c0_159, %c0_160] : memref<1x1x24xf32, #tpu.memory_space<vmem>>, vector<1x1x24xf32>
    %315 = vector.shape_cast %314 : vector<1x1x24xf32> to vector<1x24xf32>
    %316 = vector.broadcast %315 : vector<1x24xf32> to vector<8x24xf32>
    %317 = arith.addf %313, %316 : vector<8x24xf32>
    %318 = arith.truncf %317 : vector<8x24xf32> to vector<8x24xbf16>
    %319 = vector.extract_strided_slice %300 {offsets = [0, 0], sizes = [64, 8], strides = [1, 1]} : vector<64x24xbf16> to vector<64x8xbf16>
    %320 = vector.extract_strided_slice %309 {offsets = [0, 0], sizes = [8, 8], strides = [1, 1]} : vector<8x24xbf16> to vector<8x8xbf16>
    "tpu.trace_start"() <{level = 10 : i32, message = "qd,kd->qk"}> : () -> ()
    %cst_161 = arith.constant dense<0.000000e+00> : vector<64x8xf32>
    %321 = tpu.matmul %319, %320, %cst_161 {dimension_numbers = #tpu.dot_dimension_numbers<[1], [1], [0], [0], [0, 0, 1, 0], [], []>} : vector<64x8xbf16>, vector<8x8xbf16>, vector<64x8xf32> -> vector<64x8xf32>
    "tpu.trace_stop"() : () -> ()
    %cst_162 = arith.constant dense<0xFF800000> : vector<64xf32>
    %322 = vector.multi_reduction <maximumf>, %321, %cst_162 [1] : vector<64x8xf32> to vector<64xf32>
    %323 = vector.shape_cast %322 : vector<64xf32> to vector<64x1xf32>
    %324 = vector.broadcast %323 : vector<64x1xf32> to vector<64x8xf32>
    %325 = arith.subf %321, %324 : vector<64x8xf32>
    %326 = math.exp %325 : vector<64x8xf32>
    %cst_163 = arith.constant dense<0.000000e+00> : vector<64xf32>
    %327 = vector.multi_reduction <add>, %326, %cst_163 [1] : vector<64x8xf32> to vector<64xf32>
    %328 = vector.shape_cast %327 : vector<64xf32> to vector<64x1xf32>
    %329 = tpu.reciprocal %328 {approx = true} : vector<64x1xf32> -> vector<64x1xf32>
    %330 = vector.broadcast %329 : vector<64x1xf32> to vector<64x8xf32>
    %331 = arith.mulf %326, %330 : vector<64x8xf32>
    %332 = arith.truncf %331 : vector<64x8xf32> to vector<64x8xbf16>
    %333 = vector.extract_strided_slice %318 {offsets = [0, 0], sizes = [8, 8], strides = [1, 1]} : vector<8x24xbf16> to vector<8x8xbf16>
    %cst_164 = arith.constant dense<0.000000e+00> : vector<64x8xf32>
    %334 = tpu.matmul %332, %333, %cst_164 {dimension_numbers = #tpu.dot_dimension_numbers<[1], [0], [0], [1], [0, 0, 1, 1], [], []>} : vector<64x8xbf16>, vector<8x8xbf16>, vector<64x8xf32> -> vector<64x8xf32>
    %335 = vector.extract_strided_slice %300 {offsets = [0, 8], sizes = [64, 8], strides = [1, 1]} : vector<64x24xbf16> to vector<64x8xbf16>
    %336 = vector.extract_strided_slice %309 {offsets = [0, 8], sizes = [8, 8], strides = [1, 1]} : vector<8x24xbf16> to vector<8x8xbf16>
    "tpu.trace_start"() <{level = 10 : i32, message = "qd,kd->qk"}> : () -> ()
    %cst_165 = arith.constant dense<0.000000e+00> : vector<64x8xf32>
    %337 = tpu.matmul %335, %336, %cst_165 {dimension_numbers = #tpu.dot_dimension_numbers<[1], [1], [0], [0], [0, 0, 1, 0], [], []>} : vector<64x8xbf16>, vector<8x8xbf16>, vector<64x8xf32> -> vector<64x8xf32>
    "tpu.trace_stop"() : () -> ()
    %cst_166 = arith.constant dense<0xFF800000> : vector<64xf32>
    %338 = vector.multi_reduction <maximumf>, %337, %cst_166 [1] : vector<64x8xf32> to vector<64xf32>
    %339 = vector.shape_cast %338 : vector<64xf32> to vector<64x1xf32>
    %340 = vector.broadcast %339 : vector<64x1xf32> to vector<64x8xf32>
    %341 = arith.subf %337, %340 : vector<64x8xf32>
    %342 = math.exp %341 : vector<64x8xf32>
    %cst_167 = arith.constant dense<0.000000e+00> : vector<64xf32>
    %343 = vector.multi_reduction <add>, %342, %cst_167 [1] : vector<64x8xf32> to vector<64xf32>
    %344 = vector.shape_cast %343 : vector<64xf32> to vector<64x1xf32>
    %345 = tpu.reciprocal %344 {approx = true} : vector<64x1xf32> -> vector<64x1xf32>
    %346 = vector.broadcast %345 : vector<64x1xf32> to vector<64x8xf32>
    %347 = arith.mulf %342, %346 : vector<64x8xf32>
    %348 = arith.truncf %347 : vector<64x8xf32> to vector<64x8xbf16>
    %349 = vector.extract_strided_slice %318 {offsets = [0, 8], sizes = [8, 8], strides = [1, 1]} : vector<8x24xbf16> to vector<8x8xbf16>
    %cst_168 = arith.constant dense<0.000000e+00> : vector<64x8xf32>
    %350 = tpu.matmul %348, %349, %cst_168 {dimension_numbers = #tpu.dot_dimension_numbers<[1], [0], [0], [1], [0, 0, 1, 1], [], []>} : vector<64x8xbf16>, vector<8x8xbf16>, vector<64x8xf32> -> vector<64x8xf32>
    %351 = vector.extract_strided_slice %300 {offsets = [0, 16], sizes = [64, 8], strides = [1, 1]} : vector<64x24xbf16> to vector<64x8xbf16>
    %352 = vector.extract_strided_slice %309 {offsets = [0, 16], sizes = [8, 8], strides = [1, 1]} : vector<8x24xbf16> to vector<8x8xbf16>
    "tpu.trace_start"() <{level = 10 : i32, message = "qd,kd->qk"}> : () -> ()
    %cst_169 = arith.constant dense<0.000000e+00> : vector<64x8xf32>
    %353 = tpu.matmul %351, %352, %cst_169 {dimension_numbers = #tpu.dot_dimension_numbers<[1], [1], [0], [0], [0, 0, 1, 0], [], []>} : vector<64x8xbf16>, vector<8x8xbf16>, vector<64x8xf32> -> vector<64x8xf32>
    "tpu.trace_stop"() : () -> ()
    %cst_170 = arith.constant dense<0xFF800000> : vector<64xf32>
    %354 = vector.multi_reduction <maximumf>, %353, %cst_170 [1] : vector<64x8xf32> to vector<64xf32>
    %355 = vector.shape_cast %354 : vector<64xf32> to vector<64x1xf32>
    %356 = vector.broadcast %355 : vector<64x1xf32> to vector<64x8xf32>
    %357 = arith.subf %353, %356 : vector<64x8xf32>
    %358 = math.exp %357 : vector<64x8xf32>
    %cst_171 = arith.constant dense<0.000000e+00> : vector<64xf32>
    %359 = vector.multi_reduction <add>, %358, %cst_171 [1] : vector<64x8xf32> to vector<64xf32>
    %360 = vector.shape_cast %359 : vector<64xf32> to vector<64x1xf32>
    %361 = tpu.reciprocal %360 {approx = true} : vector<64x1xf32> -> vector<64x1xf32>
    %362 = vector.broadcast %361 : vector<64x1xf32> to vector<64x8xf32>
    %363 = arith.mulf %358, %362 : vector<64x8xf32>
    %364 = arith.truncf %363 : vector<64x8xf32> to vector<64x8xbf16>
    %365 = vector.extract_strided_slice %318 {offsets = [0, 16], sizes = [8, 8], strides = [1, 1]} : vector<8x24xbf16> to vector<8x8xbf16>
    %cst_172 = arith.constant dense<0.000000e+00> : vector<64x8xf32>
    %366 = tpu.matmul %364, %365, %cst_172 {dimension_numbers = #tpu.dot_dimension_numbers<[1], [0], [0], [1], [0, 0, 1, 1], [], []>} : vector<64x8xbf16>, vector<8x8xbf16>, vector<64x8xf32> -> vector<64x8xf32>
    %367 = tpu.concatenate %334, %350, %366 in 1 : vector<64x8xf32>, vector<64x8xf32>, vector<64x8xf32> -> vector<64x24xf32>
    %368 = arith.truncf %367 : vector<64x24xf32> to vector<64x24xbf16>
    %c0_173 = arith.constant 0 : index
    %c0_174 = arith.constant 0 : index
    %c0_175 = arith.constant 0 : index
    %369 = vector.load %arg27[%c0_173, %c0_174, %c0_175] : memref<1x24x32xbf16, #tpu.memory_space<vmem>>, vector<1x24x32xbf16>
    %370 = vector.shape_cast %369 : vector<1x24x32xbf16> to vector<24x32xbf16>
    %cst_176 = arith.constant dense<0.000000e+00> : vector<64x32xf32>
    %371 = tpu.matmul %368, %370, %cst_176 {dimension_numbers = #tpu.dot_dimension_numbers<[1], [0], [0], [1], [0, 0, 1, 1], [], []>} : vector<64x24xbf16>, vector<24x32xbf16>, vector<64x32xf32> -> vector<64x32xf32>
    %c0_177 = arith.constant 0 : index
    %c0_178 = arith.constant 0 : index
    %c0_179 = arith.constant 0 : index
    %372 = vector.load %arg28[%c0_177, %c0_178, %c0_179] : memref<1x1x32xf32, #tpu.memory_space<vmem>>, vector<1x1x32xf32>
    %373 = vector.shape_cast %372 : vector<1x1x32xf32> to vector<1x32xf32>
    %374 = vector.broadcast %373 : vector<1x32xf32> to vector<64x32xf32>
    %375 = arith.addf %371, %374 : vector<64x32xf32>
    %376 = arith.addf %6, %375 : vector<64x32xf32>
    %cst_180 = arith.constant dense<0.000000e+00> : vector<64xf32>
    %377 = vector.multi_reduction <add>, %376, %cst_180 [1] : vector<64x32xf32> to vector<64xf32>
    %378 = vector.shape_cast %377 : vector<64xf32> to vector<64x1xf32>
    %cst_181 = arith.constant 3.200000e+01 : f32
    %379 = vector.broadcast %cst_181 : f32 to vector<64x1xf32>
    %380 = arith.divf %378, %379 : vector<64x1xf32>
    %381 = vector.broadcast %380 : vector<64x1xf32> to vector<64x32xf32>
    %382 = arith.subf %376, %381 : vector<64x32xf32>
    %383 = arith.mulf %382, %382 : vector<64x32xf32>
    %cst_182 = arith.constant dense<0.000000e+00> : vector<64xf32>
    %384 = vector.multi_reduction <add>, %383, %cst_182 [1] : vector<64x32xf32> to vector<64xf32>
    %385 = vector.shape_cast %384 : vector<64xf32> to vector<64x1xf32>
    %cst_183 = arith.constant 3.200000e+01 : f32
    %386 = vector.broadcast %cst_183 : f32 to vector<64x1xf32>
    %387 = arith.divf %385, %386 : vector<64x1xf32>
    %388 = vector.broadcast %380 : vector<64x1xf32> to vector<64x32xf32>
    %389 = arith.subf %376, %388 : vector<64x32xf32>
    %cst_184 = arith.constant 9.99999974E-6 : f32
    %390 = vector.broadcast %cst_184 : f32 to vector<64x1xf32>
    %391 = arith.addf %387, %390 : vector<64x1xf32>
    %392 = math.rsqrt %391 : vector<64x1xf32>
    %393 = vector.broadcast %392 : vector<64x1xf32> to vector<64x32xf32>
    %394 = arith.mulf %389, %393 : vector<64x32xf32>
    %c0_185 = arith.constant 0 : index
    %c0_186 = arith.constant 0 : index
    %c0_187 = arith.constant 0 : index
    %395 = vector.load %arg39[%c0_185, %c0_186, %c0_187] : memref<1x1x32xf32, #tpu.memory_space<vmem>>, vector<1x1x32xf32>
    %396 = vector.shape_cast %395 : vector<1x1x32xf32> to vector<1x32xf32>
    %397 = vector.broadcast %396 : vector<1x32xf32> to vector<64x32xf32>
    %398 = arith.mulf %394, %397 : vector<64x32xf32>
    %c0_188 = arith.constant 0 : index
    %c0_189 = arith.constant 0 : index
    %c0_190 = arith.constant 0 : index
    %399 = vector.load %arg40[%c0_188, %c0_189, %c0_190] : memref<1x1x32xf32, #tpu.memory_space<vmem>>, vector<1x1x32xf32>
    %400 = vector.shape_cast %399 : vector<1x1x32xf32> to vector<1x32xf32>
    %401 = vector.broadcast %400 : vector<1x32xf32> to vector<64x32xf32>
    %402 = arith.addf %398, %401 : vector<64x32xf32>
    %c0_191 = arith.constant 0 : index
    %c0_192 = arith.constant 0 : index
    %c0_193 = arith.constant 0 : index
    %403 = vector.load %arg43[%c0_191, %c0_192, %c0_193] : memref<1x8x32xf32, #tpu.memory_space<vmem>>, vector<1x8x32xf32>
    %404 = vector.shape_cast %403 : vector<1x8x32xf32> to vector<8x32xf32>
    %405 = vector.shape_cast %289 : vector<8x32xf32> to vector<1x8x32xf32>
    tpu.vector_store %arg43[%c0_191, %c0_192, %c0_193], %405 {strides = array<i32>} : memref<1x8x32xf32, #tpu.memory_space<vmem>>, vector<1x8x32xf32>,
    %c0_194 = arith.constant 0 : index
    %c0_195 = arith.constant 0 : index
    %c0_196 = arith.constant 0 : index
    %406 = vector.load %arg44[%c0_194, %c0_195, %c0_196] : memref<1x64x32xf32, #tpu.memory_space<vmem>>, vector<1x64x32xf32>
    %407 = vector.shape_cast %406 : vector<1x64x32xf32> to vector<64x32xf32>
    %408 = vector.shape_cast %402 : vector<64x32xf32> to vector<1x64x32xf32>
    tpu.vector_store %arg44[%c0_194, %c0_195, %c0_196], %408 {strides = array<i32>} : memref<1x64x32xf32, #tpu.memory_space<vmem>>, vector<1x64x32xf32>,
    %c1_i32 = arith.constant 1 : i32
    %409 = arith.cmpi eq, %arg1, %c1_i32 : i32
    %410 = arith.extui %409 : i1 to i32
    %c0_i32_197 = arith.constant 0 : i32
    %411 = arith.cmpi ne, %410, %c0_i32_197 : i32
    scf.if %411 {
      %412 = arith.truncf %289 : vector<8x32xf32> to vector<8x32xbf16>
      %c0_198 = arith.constant 0 : index
      %c0_199 = arith.constant 0 : index
      %c0_200 = arith.constant 0 : index
      %413 = vector.load %arg41[%c0_198, %c0_199, %c0_200] : memref<1x8x32xbf16, #tpu.memory_space<vmem>>, vector<1x8x32xbf16>
      %414 = vector.shape_cast %413 : vector<1x8x32xbf16> to vector<8x32xbf16>
      %415 = vector.shape_cast %412 : vector<8x32xbf16> to vector<1x8x32xbf16>
      tpu.vector_store %arg41[%c0_198, %c0_199, %c0_200], %415 {strides = array<i32>} : memref<1x8x32xbf16, #tpu.memory_space<vmem>>, vector<1x8x32xbf16>,
      %416 = arith.truncf %402 : vector<64x32xf32> to vector<64x32xbf16>
      %c0_201 = arith.constant 0 : index
      %c0_202 = arith.constant 0 : index
      %c0_203 = arith.constant 0 : index
      %417 = vector.load %arg42[%c0_201, %c0_202, %c0_203] : memref<1x64x32xbf16, #tpu.memory_space<vmem>>, vector<1x64x32xbf16>
      %418 = vector.shape_cast %417 : vector<1x64x32xbf16> to vector<64x32xbf16>
      %419 = vector.shape_cast %416 : vector<64x32xbf16> to vector<1x64x32xbf16>
      tpu.vector_store %arg42[%c0_201, %c0_202, %c0_203], %419 {strides = array<i32>} : memref<1x64x32xbf16, #tpu.memory_space<vmem>>, vector<1x64x32xbf16>,
    } else {
    }
    return
  }
  func.func @transform_0(%arg0: i32, %arg1: i32) -> (i32, i32, i32) {
    %c0_i32 = arith.constant 0 : i32
    %c0_i32_0 = arith.constant 0 : i32
    %c0_i32_1 = arith.constant 0 : i32
    return %arg0, %c0_i32, %c0_i32_0 : i32, i32, i32
  }
  func.func @transform_1(%arg0: i32, %arg1: i32) -> (i32, i32, i32) {
    %c0_i32 = arith.constant 0 : i32
    %c0_i32_0 = arith.constant 0 : i32
    %c0_i32_1 = arith.constant 0 : i32
    return %arg0, %c0_i32, %c0_i32_0 : i32, i32, i32
  }
  func.func @transform_2(%arg0: i32, %arg1: i32) -> (i32, i32, i32) {
    %c0_i32 = arith.constant 0 : i32
    %c0_i32_0 = arith.constant 0 : i32
    %c0_i32_1 = arith.constant 0 : i32
    return %arg0, %c0_i32, %c0_i32_0 : i32, i32, i32
  }
  func.func @transform_3(%arg0: i32, %arg1: i32) -> (i32, i32, i32) {
    %c0_i32 = arith.constant 0 : i32
    %c0_i32_0 = arith.constant 0 : i32
    %c0_i32_1 = arith.constant 0 : i32
    return %arg1, %c0_i32, %c0_i32_0 : i32, i32, i32
  }
  func.func @transform_4(%arg0: i32, %arg1: i32) -> (i32, i32, i32) {
    %c0_i32 = arith.constant 0 : i32
    %c0_i32_0 = arith.constant 0 : i32
    %c0_i32_1 = arith.constant 0 : i32
    return %arg1, %c0_i32, %c0_i32_0 : i32, i32, i32
  }
  func.func @transform_5(%arg0: i32, %arg1: i32) -> (i32, i32, i32) {
    %c0_i32 = arith.constant 0 : i32
    %c0_i32_0 = arith.constant 0 : i32
    %c0_i32_1 = arith.constant 0 : i32
    return %arg1, %c0_i32, %c0_i32_0 : i32, i32, i32
  }
  func.func @transform_6(%arg0: i32, %arg1: i32) -> (i32, i32, i32) {
    %c0_i32 = arith.constant 0 : i32
    %c0_i32_0 = arith.constant 0 : i32
    %c0_i32_1 = arith.constant 0 : i32
    return %arg1, %c0_i32, %c0_i32_0 : i32, i32, i32
  }
  func.func @transform_7(%arg0: i32, %arg1: i32) -> (i32, i32, i32) {
    %c0_i32 = arith.constant 0 : i32
    %c0_i32_0 = arith.constant 0 : i32
    %c0_i32_1 = arith.constant 0 : i32
    return %arg1, %c0_i32, %c0_i32_0 : i32, i32, i32
  }
  func.func @transform_8(%arg0: i32, %arg1: i32) -> (i32, i32, i32) {
    %c0_i32 = arith.constant 0 : i32
    %c0_i32_0 = arith.constant 0 : i32
    %c0_i32_1 = arith.constant 0 : i32
    return %arg1, %c0_i32, %c0_i32_0 : i32, i32, i32
  }
  func.func @transform_9(%arg0: i32, %arg1: i32) -> (i32, i32, i32) {
    %c0_i32 = arith.constant 0 : i32
    %c0_i32_0 = arith.constant 0 : i32
    %c0_i32_1 = arith.constant 0 : i32
    return %arg1, %c0_i32, %c0_i32_0 : i32, i32, i32
  }
  func.func @transform_10(%arg0: i32, %arg1: i32) -> (i32, i32, i32) {
    %c0_i32 = arith.constant 0 : i32
    %c0_i32_0 = arith.constant 0 : i32
    %c0_i32_1 = arith.constant 0 : i32
    return %arg1, %c0_i32, %c0_i32_0 : i32, i32, i32
  }
  func.func @transform_11(%arg0: i32, %arg1: i32) -> (i32, i32, i32) {
    %c0_i32 = arith.constant 0 : i32
    %c0_i32_0 = arith.constant 0 : i32
    %c0_i32_1 = arith.constant 0 : i32
    return %arg1, %c0_i32, %c0_i32_0 : i32, i32, i32
  }
  func.func @transform_12(%arg0: i32, %arg1: i32) -> (i32, i32, i32) {
    %c0_i32 = arith.constant 0 : i32
    %c0_i32_0 = arith.constant 0 : i32
    %c0_i32_1 = arith.constant 0 : i32
    return %arg1, %c0_i32, %c0_i32_0 : i32, i32, i32
  }
  func.func @transform_13(%arg0: i32, %arg1: i32) -> (i32, i32, i32) {
    %c0_i32 = arith.constant 0 : i32
    %c0_i32_0 = arith.constant 0 : i32
    %c0_i32_1 = arith.constant 0 : i32
    return %arg1, %c0_i32, %c0_i32_0 : i32, i32, i32
  }
  func.func @transform_14(%arg0: i32, %arg1: i32) -> (i32, i32, i32) {
    %c0_i32 = arith.constant 0 : i32
    %c0_i32_0 = arith.constant 0 : i32
    %c0_i32_1 = arith.constant 0 : i32
    return %arg1, %c0_i32, %c0_i32_0 : i32, i32, i32
  }
  func.func @transform_15(%arg0: i32, %arg1: i32) -> (i32, i32, i32) {
    %c0_i32 = arith.constant 0 : i32
    %c0_i32_0 = arith.constant 0 : i32
    %c0_i32_1 = arith.constant 0 : i32
    return %arg1, %c0_i32, %c0_i32_0 : i32, i32, i32
  }
  func.func @transform_16(%arg0: i32, %arg1: i32) -> (i32, i32, i32) {
    %c0_i32 = arith.constant 0 : i32
    %c0_i32_0 = arith.constant 0 : i32
    %c0_i32_1 = arith.constant 0 : i32
    return %arg1, %c0_i32, %c0_i32_0 : i32, i32, i32
  }
  func.func @transform_17(%arg0: i32, %arg1: i32) -> (i32, i32, i32) {
    %c0_i32 = arith.constant 0 : i32
    %c0_i32_0 = arith.constant 0 : i32
    %c0_i32_1 = arith.constant 0 : i32
    return %arg1, %c0_i32, %c0_i32_0 : i32, i32, i32
  }
  func.func @transform_18(%arg0: i32, %arg1: i32) -> (i32, i32, i32) {
    %c0_i32 = arith.constant 0 : i32
    %c0_i32_0 = arith.constant 0 : i32
    %c0_i32_1 = arith.constant 0 : i32
    return %arg1, %c0_i32, %c0_i32_0 : i32, i32, i32
  }
  func.func @transform_19(%arg0: i32, %arg1: i32) -> (i32, i32, i32) {
    %c0_i32 = arith.constant 0 : i32
    %c0_i32_0 = arith.constant 0 : i32
    %c0_i32_1 = arith.constant 0 : i32
    return %arg1, %c0_i32, %c0_i32_0 : i32, i32, i32
  }
  func.func @transform_20(%arg0: i32, %arg1: i32) -> (i32, i32, i32) {
    %c0_i32 = arith.constant 0 : i32
    %c0_i32_0 = arith.constant 0 : i32
    %c0_i32_1 = arith.constant 0 : i32
    return %arg1, %c0_i32, %c0_i32_0 : i32, i32, i32
  }
  func.func @transform_21(%arg0: i32, %arg1: i32) -> (i32, i32, i32) {
    %c0_i32 = arith.constant 0 : i32
    %c0_i32_0 = arith.constant 0 : i32
    %c0_i32_1 = arith.constant 0 : i32
    return %arg1, %c0_i32, %c0_i32_0 : i32, i32, i32
  }
  func.func @transform_22(%arg0: i32, %arg1: i32) -> (i32, i32, i32) {
    %c0_i32 = arith.constant 0 : i32
    %c0_i32_0 = arith.constant 0 : i32
    %c0_i32_1 = arith.constant 0 : i32
    return %arg1, %c0_i32, %c0_i32_0 : i32, i32, i32
  }
  func.func @transform_23(%arg0: i32, %arg1: i32) -> (i32, i32, i32) {
    %c0_i32 = arith.constant 0 : i32
    %c0_i32_0 = arith.constant 0 : i32
    %c0_i32_1 = arith.constant 0 : i32
    return %arg1, %c0_i32, %c0_i32_0 : i32, i32, i32
  }
  func.func @transform_24(%arg0: i32, %arg1: i32) -> (i32, i32, i32) {
    %c0_i32 = arith.constant 0 : i32
    %c0_i32_0 = arith.constant 0 : i32
    %c0_i32_1 = arith.constant 0 : i32
    return %arg1, %c0_i32, %c0_i32_0 : i32, i32, i32
  }
  func.func @transform_25(%arg0: i32, %arg1: i32) -> (i32, i32, i32) {
    %c0_i32 = arith.constant 0 : i32
    %c0_i32_0 = arith.constant 0 : i32
    %c0_i32_1 = arith.constant 0 : i32
    return %arg1, %c0_i32, %c0_i32_0 : i32, i32, i32
  }
  func.func @transform_26(%arg0: i32, %arg1: i32) -> (i32, i32, i32) {
    %c0_i32 = arith.constant 0 : i32
    %c0_i32_0 = arith.constant 0 : i32
    %c0_i32_1 = arith.constant 0 : i32
    return %arg1, %c0_i32, %c0_i32_0 : i32, i32, i32
  }
  func.func @transform_27(%arg0: i32, %arg1: i32) -> (i32, i32, i32) {
    %c0_i32 = arith.constant 0 : i32
    %c0_i32_0 = arith.constant 0 : i32
    %c0_i32_1 = arith.constant 0 : i32
    return %arg1, %c0_i32, %c0_i32_0 : i32, i32, i32
  }
  func.func @transform_28(%arg0: i32, %arg1: i32) -> (i32, i32, i32) {
    %c0_i32 = arith.constant 0 : i32
    %c0_i32_0 = arith.constant 0 : i32
    %c0_i32_1 = arith.constant 0 : i32
    return %arg1, %c0_i32, %c0_i32_0 : i32, i32, i32
  }
  func.func @transform_29(%arg0: i32, %arg1: i32) -> (i32, i32, i32) {
    %c0_i32 = arith.constant 0 : i32
    %c0_i32_0 = arith.constant 0 : i32
    %c0_i32_1 = arith.constant 0 : i32
    return %arg1, %c0_i32, %c0_i32_0 : i32, i32, i32
  }
  func.func @transform_30(%arg0: i32, %arg1: i32) -> (i32, i32, i32) {
    %c0_i32 = arith.constant 0 : i32
    %c0_i32_0 = arith.constant 0 : i32
    %c0_i32_1 = arith.constant 0 : i32
    return %arg1, %c0_i32, %c0_i32_0 : i32, i32, i32
  }
  func.func @transform_31(%arg0: i32, %arg1: i32) -> (i32, i32, i32) {
    %c0_i32 = arith.constant 0 : i32
    %c0_i32_0 = arith.constant 0 : i32
    %c0_i32_1 = arith.constant 0 : i32
    return %arg1, %c0_i32, %c0_i32_0 : i32, i32, i32
  }
  func.func @transform_32(%arg0: i32, %arg1: i32) -> (i32, i32, i32) {
    %c0_i32 = arith.constant 0 : i32
    %c0_i32_0 = arith.constant 0 : i32
    %c0_i32_1 = arith.constant 0 : i32
    return %arg1, %c0_i32, %c0_i32_0 : i32, i32, i32
  }
  func.func @transform_33(%arg0: i32, %arg1: i32) -> (i32, i32, i32) {
    %c0_i32 = arith.constant 0 : i32
    %c0_i32_0 = arith.constant 0 : i32
    %c0_i32_1 = arith.constant 0 : i32
    return %arg1, %c0_i32, %c0_i32_0 : i32, i32, i32
  }
  func.func @transform_34(%arg0: i32, %arg1: i32) -> (i32, i32, i32) {
    %c0_i32 = arith.constant 0 : i32
    %c0_i32_0 = arith.constant 0 : i32
    %c0_i32_1 = arith.constant 0 : i32
    return %arg1, %c0_i32, %c0_i32_0 : i32, i32, i32
  }
  func.func @transform_35(%arg0: i32, %arg1: i32) -> (i32, i32, i32) {
    %c0_i32 = arith.constant 0 : i32
    %c0_i32_0 = arith.constant 0 : i32
    %c0_i32_1 = arith.constant 0 : i32
    return %arg1, %c0_i32, %c0_i32_0 : i32, i32, i32
  }
  func.func @transform_36(%arg0: i32, %arg1: i32) -> (i32, i32, i32) {
    %c0_i32 = arith.constant 0 : i32
    %c0_i32_0 = arith.constant 0 : i32
    %c0_i32_1 = arith.constant 0 : i32
    return %arg1, %c0_i32, %c0_i32_0 : i32, i32, i32
  }
  func.func @transform_37(%arg0: i32, %arg1: i32) -> (i32, i32, i32) {
    %c0_i32 = arith.constant 0 : i32
    %c0_i32_0 = arith.constant 0 : i32
    %c0_i32_1 = arith.constant 0 : i32
    return %arg1, %c0_i32, %c0_i32_0 : i32, i32, i32
  }
  func.func @transform_38(%arg0: i32, %arg1: i32) -> (i32, i32, i32) {
    %c0_i32 = arith.constant 0 : i32
    %c0_i32_0 = arith.constant 0 : i32
    %c0_i32_1 = arith.constant 0 : i32
    return %arg1, %c0_i32, %c0_i32_0 : i32, i32, i32
  }
  func.func @transform_39(%arg0: i32, %arg1: i32) -> (i32, i32, i32) {
    %c0_i32 = arith.constant 0 : i32
    %c0_i32_0 = arith.constant 0 : i32
    %c0_i32_1 = arith.constant 0 : i32
    return %arg0, %c0_i32, %c0_i32_0 : i32, i32, i32
  }
  func.func @transform_40(%arg0: i32, %arg1: i32) -> (i32, i32, i32) {
    %c0_i32 = arith.constant 0 : i32
    %c0_i32_0 = arith.constant 0 : i32
    %c0_i32_1 = arith.constant 0 : i32
    return %arg0, %c0_i32, %c0_i32_0 : i32, i32, i32
  }
}

</mosaic_0001>

<bundles_post_ra>
// kernel: two_way_transformer.3
= control target key start
LH: loop header
LB: loop body
LE: loop exit
PB: predicated region body
PF: predicated region fallthrough
CT: control target
= control target key end

     0   :  { %s3610_s0 = inlined_call_operand.hbm [shape: bf16[2,8,32], index: 0, kind: input, shape index: {}]   ;;  %s3611_s1 = inlined_call_operand.hbm [shape: bf16[2,64,32], index: 1, kind: input, shape index: {}]   ;;  %s3612_s2 = inlined_call_operand.hbm [shape: bf16[2,8,32], index: 2, kind: input, shape index: {}]   ;;  %s3613_s3 = inlined_call_operand.hbm [shape: bf16[2,64,32], index: 3, kind: input, shape index: {}]   ;;  %s3614_s4 = inlined_call_operand.hbm [shape: bf16[1,32,24], index: 4, kind: input, shape index: {}]   ;;  %s3615_s5 = inlined_call_operand.hbm [shape: f32[1,1,24], index: 5, kind: input, shape index: {}]   ;;  %s3616_s6 = inlined_call_operand.hbm [shape: bf16[1,32,24], index: 6, kind: input, shape index: {}]   ;;  %s3617_s7 = inlined_call_operand.hbm [shape: f32[1,1,24], index: 7, kind: input, shape index: {}]   ;;  %s3618_s8 = inlined_call_operand.hbm [shape: bf16[1,32,24], index: 8, kind: input, shape index: {}]   ;;  %s3619_s9 = inlined_call_operand.hbm [shape: f32[1,1,24], index: 9, kind: input, shape index: {}]   ;;  %s3620_s10 = inlined_call_operand.hbm [shape: bf16[1,24,32], index: 10, kind: input, shape index: {}]   ;;  %s3621_s11 = inlined_call_operand.hbm [shape: f32[1,1,32], index: 11, kind: input, shape index: {}]   ;;  %s3622_s12 = inlined_call_operand.hbm [shape: f32[1,1,32], index: 12, kind: input, shape index: {}]   ;;  %s3623_s13 = inlined_call_operand.hbm [shape: f32[1,1,32], index: 13, kind: input, shape index: {}]   ;;  %s3624_s14 = inlined_call_operand.hbm [shape: f32[2,8,32], index: 14, kind: output, shape index: {}]  }
   0x1   :  { %3658 = sst [smem:[#allocation43_spill]] %s3610_s0 }
   0x2   :  { %3659 = sst [smem:[#allocation44_spill]] %s3611_s1 }
   0x3   :  { %3660 = sst [smem:[#allocation45_spill]] %s3612_s2 }
   0x4   :  { %3661 = sst [smem:[#allocation46_spill]] %s3614_s4 }
   0x5   :  { %3662 = sst [smem:[#allocation47_spill]] %s3615_s5 }
   0x6   :  { %3663 = sst [smem:[#allocation48_spill]] %s3616_s6 }
   0x7   :  { %3664 = sst [smem:[#allocation49_spill]] %s3617_s7 }
   0x8   :  { %3665 = sst [smem:[#allocation50_spill]] %s3618_s8 }
   0x9   :  { %3666 = sst [smem:[#allocation51_spill]] %s3619_s9 }
   0xa   :  { %3667 = sst [smem:[#allocation52_spill]] %s3620_s10 }
   0xb   :  { %3668 = sst [smem:[#allocation53_spill]] %s3621_s11 }
   0xc   :  { %3669 = sst [smem:[#allocation54_spill]] %s3622_s12 }
   0xd   :  { %3670 = sst [smem:[#allocation55_spill]] %s3623_s13 }
   0xe   :  { %3671 = sst [smem:[#allocation56_spill]] %s3624_s14 }
   0xf   :  { %19 = vsyncpa [#allocation3], 0 }
  0x10   :  { %21 = vsyncpa [#allocation3 + $0x1], 0 }
  0x11   :  { %22 = vsyncpa [#allocation6], 0 }
  0x12   :  { %24 = vsyncpa [#allocation6 + $0x1], 0 }
  0x13   :  { %25 = vsyncpa [#allocation9], 0 }
  0x14   :  { %27 = vsyncpa [#allocation9 + $0x1], 0 }
  0x15   :  { %28 = vsyncpa [#allocation12], 0 }
  0x16   :  { %29 = vsyncpa [#allocation15], 0 }
  0x17   :  { %30 = vsyncpa [#allocation18], 0 }
  0x18   :  { %31 = vsyncpa [#allocation21], 0 }
  0x19   :  { %32 = vsyncpa [#allocation24], 0 }
  0x1a   :  { %33 = vsyncpa [#allocation4], 0 }
  0x1b   :  { %35 = vsyncpa [#allocation4 + $0x1], 0  ;;  %s2874_s29 = smov 0   ;;  %s2876_s30 = smov 0  }
  0x1c   :  { %s2878_s15 = smov 0   ;;  %s2880_s16 = smov 0  }
  0x1d LB: > { %3672 = sst [smem:[#allocation36_spill]] %s2762_s29  ;;  %s2776_s17 = smov [#allocation10]   ;;  %s2774_s16 = sphi %s2880_s16, %s3737_s16   ;;  %s2770_s15 = sphi %s2878_s15, %s3739_s15   ;;  %s2766_s30 = sphi %s2876_s30, %s3741_s30   ;;  %s2762_s29 = sphi %s2874_s29, %s3740_s29  }
  0x1e   : > { %3673 = sst [smem:[#allocation37_spill]] %s2770_s15  ;;  %s398_s18 = sshll.u32 %s2776_s17, 4  ;;  %s2900_s18 = int_to_ptr.vmem [resolvable:$true] %s398_s18 }
  0x1f   : > { %s2895_s19 = sadd.s32 4294967295, %s2774_s16   ;;  %p1819_p0 = scmp.ge.s32.totalorder %s2774_s16, 1 }
  0x20   : > { %p3633_p1 = scmp.eq.s32.totalorder %s2895_s19, 0  ;;  %p386_p2 = scmp.lt.s32.totalorder %s2774_s16, 3 }
  0x21   : > { %s2777_s21 = smov [#allocation11]   ;;  %s2778_s24 = smov [#allocation14]  }
  0x22   : > { %p2902_p3 = pnand %p1819_p0, %p386_p2  ;;  %s412_s22 = sshll.u32 %s2777_s21, 4  ;;  %s2915_s22 = int_to_ptr.vmem [resolvable:$true] %s412_s22 }
  0x23   : > { %s436_s25 = sshll.u32 %s2778_s24, 4  ;;  %s3677_s4 = sld [smem:[#allocation46_spill]]  ;;  %s2917_s25 = int_to_ptr.vmem [resolvable:$true] %s436_s25 }
  0x24   : > { %s3674_s20 = scalar_select %p2902_p3, 1, 0 }
  0x25   : > { %p2126_p5 = pneg %p2902_p3 }
  0x26   : > { %3675 = sst [smem:[#allocation38_spill]] %s3674_s20 }
  0x27   : > { %p2911_p6 = pnand %p2126_p5, %p3633_p1 }
  0x29   : > { %s3676_s23 = scalar_select %p2911_p6, 1, 0 }
  0x2a   : > { %s2276_s28 = scalar_lea.hbm %s3677_s4, 256  ;;  %p2927_p8 = pneg %p2911_p6 }
  0x2b   : > { %p2277_p7 = scmp.ne.s32.totalorder %s3677_s4, %s2276_s28  ;;  %p2283_p11 = scmp.lt.u32.totalorder %s2276_s28, %s3677_s4 }
  0x2c   : > { %s3678_s21 = scalar_select %p2927_p8, 1, 0 }
  0x2d   : > { %p2279_p9 = pnand %p2927_p8, %p2277_p7 }
  0x2f   : > { %p2280_p10 = pneg %p2279_p9 }
  0x31   : > { %p2285_p12 = pnand %p2283_p11, %p2280_p10 }
  0x33   : > { %2288 = shalt.err (!%p2285_p12)
}
  0x34   : > { %s2289_s14 = scalar_lea.vmem %s2900_s18, 256  ;;  %p2297_p5 = scmp.lt.s32.totalorder %s2900_s18, %s2900_s18 }
  0x35   : > { %p2290_p13 = scmp.ne.s32.totalorder %s2900_s18, %s2289_s14  ;;  %p2298_p4 = scmp.lt.s32.totalorder %s2289_s14, %s2289_s14 }
  0x37   : > { %p2292_p0 = pnand %p2290_p13, %p2927_p8  ;;  %p2299_p7 = por %p2298_p4, %p2297_p5 }
  0x39   : > { %p2293_p2 = pneg %p2292_p0 }
  0x3b   : > { %p2300_p9 = pnand %p2299_p7, %p2293_p2 }
  0x3d   : > { %2303 = shalt.err (!%p2300_p9)
}
  0x3e   : > { %s3631_s26 = smov 64   ;;  %s3635_s20 = smov 4  }
  0x3f   : > { %2129 = dma.hbm_to_vmem [thread:$0]  (!%p2911_p6), %s3677_s4, 256, %s2900_s18, [#allocation9], %s3631_s26, %s3631_s26, %s3635_s20  }
  0x40   : > { %s3679_s5 = sld [smem:[#allocation47_spill]] }
  0x46   : > { %s2304_s14 = scalar_lea.hbm %s3679_s5, 16 }
  0x47   : > { %p2305_p4 = scmp.ne.s32.totalorder %s3679_s5, %s2304_s14  ;;  %p2311_p12 = scmp.lt.u32.totalorder %s2304_s14, %s3679_s5 }
  0x49   : > { %p2307_p10 = pnand %p2305_p4, %p2927_p8 }
  0x4b   : > { %p2308_p11 = pneg %p2307_p10 }
  0x4d   : > { %p2313_p13 = pnand %p2311_p12, %p2308_p11 }
  0x4f   : > { %2316 = shalt.err (!%p2313_p13)
}
  0x50   : > { %s2317_s18 = scalar_lea.vmem %s2915_s22, 16  ;;  %s2324_s0 = scalar_lea.vmem %s2915_s22, 32 }
  0x51   : > { %p2318_p0 = scmp.ne.s32.totalorder %s2915_s22, %s2317_s18  ;;  %p2325_p7 = scmp.lt.s32.totalorder %s2915_s22, %s2915_s22 }
  0x52   : > { %p2326_p9 = scmp.lt.s32.totalorder %s2324_s0, %s2317_s18 }
  0x53   : > { %p2320_p2 = pnand %p2318_p0, %p2927_p8 }
  0x54   : > { %p2327_p4 = por %p2326_p9, %p2325_p7 }
  0x55   : > { %p2321_p5 = pneg %p2320_p2 }
  0x57   : > { %p2328_p10 = pnand %p2327_p4, %p2321_p5 }
  0x59   : > { %2331 = shalt.err (!%p2328_p10)
}
  0x5a   : > { %2132 = dma.hbm_to_vmem [thread:$0]  (!%p2911_p6), %s3679_s5, 16, %s2915_s22, [#allocation12]  }
  0x5b   : > { %s3680_s7 = sld [smem:[#allocation49_spill]] }
  0x61   : > { %s2332_s28 = scalar_lea.hbm %s3680_s7, 16 }
  0x62   : > { %p2333_p11 = scmp.ne.s32.totalorder %s3680_s7, %s2332_s28  ;;  %p2339_p0 = scmp.lt.u32.totalorder %s2332_s28, %s3680_s7 }
  0x64   : > { %p2335_p12 = pnand %p2333_p11, %p2927_p8 }
  0x66   : > { %p2336_p13 = pneg %p2335_p12 }
  0x68   : > { %p2341_p2 = pnand %p2339_p0, %p2336_p13 }
  0x6a   : > { %2344 = shalt.err (!%p2341_p2)
}
  0x6b   : > { %s2345_s22 = scalar_lea.vmem %s2917_s25, 16  ;;  %s2352_s0 = scalar_lea.vmem %s2917_s25, 32 }
  0x6c   : > { %p2346_p5 = scmp.ne.s32.totalorder %s2917_s25, %s2345_s22  ;;  %p2353_p4 = scmp.lt.s32.totalorder %s2917_s25, %s2917_s25 }
  0x6d   : > { %p2354_p10 = scmp.lt.s32.totalorder %s2352_s0, %s2345_s22 }
  0x6e   : > { %p2348_p7 = pnand %p2346_p5, %p2927_p8 }
  0x6f   : > { %p2355_p11 = por %p2354_p10, %p2353_p4 }
  0x70   : > { %p2349_p9 = pneg %p2348_p7 }
  0x72   : > { %p2356_p12 = pnand %p2355_p11, %p2349_p9 }
  0x74   : > { %2359 = shalt.err (!%p2356_p12)
}
  0x75   : > { %2138 = dma.hbm_to_vmem [thread:$0]  (!%p2911_p6), %s3680_s7, 16, %s2917_s25, [#allocation15]  }
  0x76   : > { %s2781_s13 = smov [#allocation17]   ;;  %s2782_s28 = smov [#allocation20]  }
  0x77   : > { %s460_s27 = sshll.u32 %s2781_s13, 4  ;;  %s484_s17 = sshll.u32 %s2782_s28, 4  ;;  %s461_s27 = int_to_ptr.vmem [resolvable:$true] %s460_s27  ;;  %s485_s17 = int_to_ptr.vmem [resolvable:$true] %s484_s17 }
  0x78   : > { %s3681_s9 = sld [smem:[#allocation51_spill]] }
  0x7e   : > { %s2360_s18 = scalar_lea.hbm %s3681_s9, 16 }
  0x7f   : > { %p2361_p13 = scmp.ne.s32.totalorder %s3681_s9, %s2360_s18  ;;  %p2367_p5 = scmp.lt.u32.totalorder %s2360_s18, %s3681_s9 }
  0x81   : > { %p2363_p0 = pnand %p2361_p13, %p2927_p8 }
  0x83   : > { %p2364_p2 = pneg %p2363_p0 }
  0x85   : > { %p2369_p7 = pnand %p2367_p5, %p2364_p2 }
  0x87   : > { %2372 = shalt.err (!%p2369_p7)
}
  0x88   : > { %s2373_s25 = scalar_lea.vmem %s461_s27, 16  ;;  %s2380_s12 = scalar_lea.vmem %s461_s27, 32 }
  0x89   : > { %p2374_p9 = scmp.ne.s32.totalorder %s461_s27, %s2373_s25  ;;  %p2381_p11 = scmp.lt.s32.totalorder %s461_s27, %s461_s27 }
  0x8a   : > { %p2382_p12 = scmp.lt.s32.totalorder %s2380_s12, %s2373_s25 }
  0x8b   : > { %p2376_p4 = pnand %p2374_p9, %p2927_p8 }
  0x8c   : > { %p2383_p1 = por %p2382_p12, %p2381_p11 }
  0x8d   : > { %p2377_p10 = pneg %p2376_p4 }
  0x8f   : > { %p2384_p3 = pnand %p2383_p1, %p2377_p10 }
  0x91   : > { %2387 = shalt.err (!%p2384_p3)
}
  0x92   : > { %2144 = dma.hbm_to_vmem [thread:$0]  (!%p2911_p6), %s3681_s9, 16, %s461_s27, [#allocation18]  }
  0x93   : > { %s3682_s11 = sld [smem:[#allocation53_spill]] }
  0x99   : > { %s2388_s14 = scalar_lea.hbm %s3682_s11, 16 }
  0x9a   : > { %p2389_p13 = scmp.ne.s32.totalorder %s3682_s11, %s2388_s14  ;;  %p2395_p3 = scmp.lt.u32.totalorder %s2388_s14, %s3682_s11 }
  0x9c   : > { %p2391_p0 = pnand %p2389_p13, %p2927_p8 }
  0x9e   : > { %p2392_p1 = pneg %p2391_p0 }
  0xa0   : > { %p2397_p2 = pnand %p2395_p3, %p2392_p1 }
  0xa2   : > { %2400 = shalt.err (!%p2397_p2)
}
  0xa3   : > { %s2401_s25 = scalar_lea.vmem %s485_s17, 16  ;;  %s2408_s27 = scalar_lea.vmem %s485_s17, 32 }
  0xa4   : > { %p2402_p5 = scmp.ne.s32.totalorder %s485_s17, %s2401_s25  ;;  %p2409_p4 = scmp.lt.s32.totalorder %s485_s17, %s485_s17 }
  0xa5   : > { %p2410_p10 = scmp.lt.s32.totalorder %s2408_s27, %s2401_s25 }
  0xa6   : > { %p2404_p7 = pnand %p2402_p5, %p2927_p8 }
  0xa7   : > { %p2411_p11 = por %p2410_p10, %p2409_p4 }
  0xa8   : > { %p2405_p9 = pneg %p2404_p7 }
  0xaa   : > { %p2412_p12 = pnand %p2411_p11, %p2405_p9 }
  0xac   : > { %2415 = shalt.err (!%p2412_p12)
}
  0xad   : > { %2150 = dma.hbm_to_vmem [thread:$0]  (!%p2911_p6), %s3682_s11, 16, %s485_s17, [#allocation21]  }
  0xae   : > { %s1818_s28 = sadd.s32 4294967294, %s2774_s16   ;;  %s3037_s26 = sadd.s32 1, %s2774_s16  }
  0xaf   : > { %3683 = sst [smem:[#allocation39_spill]] %s3037_s26  ;;  %s48_s24 = sadd.s32 1, %s2770_s15 }
  0xb0   : > { %s45_s14 = ssub.s32 %s2774_s16, %s3037_s26  ;;  %p55_p13 = scmp.ne.s32.totalorder %s2770_s15, %s2766_s30 }
  0xb1   : > { %p46_p0 = scmp.eq.s32.totalorder %s45_s14, 0  ;;  %p56_p1 = scmp.eq.s32.totalorder %s2774_s16, 0 }
  0xb2   : > { %p61_p3 = scmp.ne.s32.totalorder %s2766_s30, %s2762_s29  ;;  %p373_p2 = scmp.eq.s32.totalorder %s2895_s19, 1 }
  0xb3   : > { %s3049_s18 = scalar_select %p46_p0, %s2770_s15, %s48_s24  }
  0xb4   : > { %p57_p5 = por %p56_p1, %p55_p13  ;;  %p3685_p7 = scmp.eq.s32.totalorder %s2895_s19, 0 }
  0xb5   : > { %3684 = sst [smem:[#allocation40_spill]] %s3049_s18  ;;  %p3057_p4 = por %p373_p2, %p55_p13 }
  0xb6   : > { %p3053_p9 = por %p3685_p7, %p61_p3  ;;  %p379_p10 = scmp.eq.s32.totalorder %s1818_s28, 1 }
  0xb7   : > { %s3687_s22 = scalar_select %p3057_p4, 1, 0 }
  0xb8   : > { %s3686_s17 = scalar_select %p3053_p9, 1, 0 }
  0xb9   : > { %3688 = sst [smem:[#allocation41_spill]] %s3687_s22  ;;  %p2184_p11 = scmp.lt.s32.totalorder %s2774_s16, 2 }
  0xba   : > { %s3063_s0 = sand.u32 1, %s2770_s15   ;;  %p3065_p12 = por %p379_p10, %p61_p3 }
  0xbb   : > { %p3070_p0 = pnand %p2184_p11, %p57_p5  ;;  %s3637_s12 = sshll.u32 %s3063_s0, 5 }
  0xbc   : > { %s3689_s2 = scalar_select %p3065_p12, 1, 0 }
  0xbd   : > { %s3691_s27 = scalar_select %p3070_p0, 1, 0 }
  0xbe   : > { %3690 = sst [smem:[#allocation42_spill]] %s3689_s2  ;;  %s3638_s13 = sshll.u32 %s2774_s16, 9 }
  0xbf   : > { %s3692_s1 = sld [smem:[#allocation44_spill]]  ;;  %s539_s20 = scalar_lea.vmem [#allocation5], %s3637_s12 }
  0xc0   : > { %s546_s25 = sshll.u32 %s539_s20, 4  ;;  %s3693_s4 = sand.u32 1, %s2774_s16   ;;  %s3085_s25 = int_to_ptr.vmem [resolvable:$true] %s546_s25 }
  0xc1   : > { %s3089_s5 = scalar_lea.sflag [#allocation6], %s3693_s4  ;;  %p3095_p1 = pneg %p3070_p0 }
  0xc3   : > { %s3694_s9 = scalar_select %p3095_p1, 1, 0 }
  0xc5   : > { %s3081_s14 = scalar_lea.hbm %s3692_s1, %s3638_s13  ;;  %s2421_s20 = scalar_lea.hbm %s3692_s1, 1024 }
  0xc6   : > { %s2416_s7 = scalar_lea.hbm %s3081_s14, 512  ;;  %p2422_p5 = scmp.lt.u32.totalorder %s3081_s14, %s3692_s1 }
  0xc7   : > { %p2417_p13 = scmp.ne.s32.totalorder %s3081_s14, %s2416_s7  ;;  %p2423_p7 = scmp.lt.u32.totalorder %s2421_s20, %s2416_s7 }
  0xc8   : > { %p2425_p11 = scmp.lt.u32.totalorder %s2416_s7, %s3081_s14 }
  0xc9   : > { %p2419_p3 = pnand %p3095_p1, %p2417_p13  ;;  %p2424_p10 = por %p2423_p7, %p2422_p5 }
  0xcb   : > { %p2420_p2 = pneg %p2419_p3  ;;  %p2426_p12 = por %p2425_p11, %p2424_p10 }
  0xcd   : > { %p2427_p4 = pnand %p2426_p12, %p2420_p2 }
  0xcf   : > { %2430 = shalt.err (!%p2427_p4)
}
  0xd0   : > { %s2431_s4 = scalar_lea.vmem %s3085_s25, 512  ;;  %s2783_s24 = smov [#allocation5]  }
  0xd1   : > { %p2432_p13 = scmp.ne.s32.totalorder %s3085_s25, %s2431_s4  ;;  %s2436_s28 = sshll.u32 %s2783_s24, 4  ;;  %s2437_s28 = int_to_ptr.vmem [resolvable:$false] %s2436_s28 }
  0xd2   : > { %s2438_s12 = scalar_lea.vmem %s2437_s28, 1024  ;;  %p2439_p6 = scmp.lt.s32.totalorder %s3085_s25, %s2437_s28 }
  0xd3   : > { %p2434_p3 = pnand %p2432_p13, %p3095_p1  ;;  %p2440_p8 = scmp.lt.s32.totalorder %s2438_s12, %s2431_s4 }
  0xd5   : > { %p2435_p9 = pneg %p2434_p3  ;;  %p2441_p5 = por %p2440_p8, %p2439_p6 }
  0xd7   : > { %p2442_p7 = pnand %p2441_p5, %p2435_p9 }
  0xd9   : > { %2445 = shalt.err (!%p2442_p7)
}
  0xda   : > { %s3695_s7 = smov 4   ;;  %s3696_s13 = smov 64  }
  0xdb   : > { %2163 = dma.hbm_to_vmem [thread:$0]  (!%p3070_p0), %s3081_s14, 512, %s3085_s25, %s3089_s5, %s3696_s13, %s3696_s13, %s3695_s7  }
  0xdc   : > { %s3697_s20 = sshll.u32 %s2774_s16, 9  ;;  %s3698_s28 = sshll.u32 %s3063_s0, 5 }
  0xdd   : > { %s3127_s4 = scalar_lea.hbm %s3613_s3, %s3697_s20  ;;  %s3131_s12 = scalar_lea.vmem [#allocation8], %s3698_s28 }
  0xde   : > { %s2784_s18 = smov [#allocation13]   ;;  %s3699_s6 = sld [smem:[#allocation48_spill]] }
  0xdf   : > { %s422_s15 = sshll.u32 %s2784_s18, 4  ;;  %p3700_p8 = scmp.ne.s32.totalorder %s3678_s21, 0  ;;  %s423_s15 = int_to_ptr.vmem [resolvable:$true] %s422_s15 }
  0xe4   : > { %s2446_s29 = scalar_lea.hbm %s3699_s6, 256 }
  0xe5   : > { %p2447_p6 = scmp.ne.s32.totalorder %s3699_s6, %s2446_s29  ;;  %p2453_p12 = scmp.lt.u32.totalorder %s2446_s29, %s3699_s6 }
  0xe7   : > { %p2449_p9 = pnand %p2447_p6, %p3700_p8 }
  0xe9   : > { %p2450_p4 = pneg %p2449_p9 }
  0xeb   : > { %p2455_p2 = pnand %p2453_p12, %p2450_p4 }
  0xed   : > { %2458 = shalt.err (!%p2455_p2)
}
  0xee   : > { %s2459_s20 = scalar_lea.vmem %s423_s15, 256  ;;  %p2467_p3 = scmp.lt.s32.totalorder %s423_s15, %s423_s15 }
  0xef   : > { %p2460_p10 = scmp.ne.s32.totalorder %s423_s15, %s2459_s20  ;;  %p2468_p5 = scmp.lt.s32.totalorder %s2459_s20, %s2459_s20 }
  0xf1   : > { %p2462_p11 = pnand %p2460_p10, %p3700_p8  ;;  %p2469_p7 = por %p2468_p5, %p2467_p3 }
  0xf3   : > { %p2463_p13 = pneg %p2462_p11 }
  0xf5   : > { %p2470_p0 = pnand %p2469_p7, %p2463_p13 }
  0xf7   : > { %2473 = shalt.err (!%p2470_p0)
}
  0xf8   : > { %p3701_p6 = scmp.ne.s32.totalorder %s3676_s23, 0  ;;  %s2785_s18 = smov [#allocation16]  }
  0xf9   : > { %s446_s22 = sshll.u32 %s2785_s18, 4  ;;  %s2786_s2 = smov [#allocation19]   ;;  %s447_s22 = int_to_ptr.vmem [resolvable:$true] %s446_s22 }
  0xfa   : > { %2135 = dma.hbm_to_vmem [thread:$0]  (!%p3701_p6), %s3699_s6, 256, %s423_s15, [#allocation12], %s3696_s13, %s3696_s13, %s3695_s7  }
  0xfb   : > { %s470_s24 = sshll.u32 %s2786_s2, 4  ;;  %s3702_s8 = sld [smem:[#allocation50_spill]]  ;;  %s471_s24 = int_to_ptr.vmem [resolvable:$true] %s470_s24 }
 0x101   : > { %s2474_s1 = scalar_lea.hbm %s3702_s8, 256 }
 0x102   : > { %p2475_p0 = scmp.ne.s32.totalorder %s3702_s8, %s2474_s1  ;;  %p2481_p12 = scmp.lt.u32.totalorder %s2474_s1, %s3702_s8 }
 0x104   : > { %p2477_p9 = pnand %p2475_p0, %p3700_p8 }
 0x106   : > { %p2478_p4 = pneg %p2477_p9 }
 0x108   : > { %p2483_p2 = pnand %p2481_p12, %p2478_p4 }
 0x10a   : > { %2486 = shalt.err (!%p2483_p2)
}
 0x10b   : > { %s2487_s15 = scalar_lea.vmem %s447_s22, 256  ;;  %p2495_p3 = scmp.lt.s32.totalorder %s447_s22, %s447_s22 }
 0x10c   : > { %p2488_p10 = scmp.ne.s32.totalorder %s447_s22, %s2487_s15  ;;  %p2496_p5 = scmp.lt.s32.totalorder %s2487_s15, %s2487_s15 }
 0x10e   : > { %p2490_p11 = pnand %p2488_p10, %p3700_p8  ;;  %p2497_p7 = por %p2496_p5, %p2495_p3 }
 0x110   : > { %p2491_p13 = pneg %p2490_p11 }
 0x112   : > { %p2498_p1 = pnand %p2497_p7, %p2491_p13 }
 0x114   : > { %2501 = shalt.err (!%p2498_p1)
}
 0x115   : > { %2141 = dma.hbm_to_vmem [thread:$0]  (!%p3701_p6), %s3702_s8, 256, %s447_s22, [#allocation15], %s3696_s13, %s3696_s13, %s3695_s7  }
 0x116   : > { %s3703_s10 = sld [smem:[#allocation52_spill]] }
 0x11c   : > { %s2502_s28 = scalar_lea.hbm %s3703_s10, 192 }
 0x11d   : > { %p2503_p0 = scmp.ne.s32.totalorder %s3703_s10, %s2502_s28  ;;  %p2509_p4 = scmp.lt.u32.totalorder %s2502_s28, %s3703_s10 }
 0x11f   : > { %p2505_p1 = pnand %p2503_p0, %p3700_p8 }
 0x121   : > { %p2506_p9 = pneg %p2505_p1 }
 0x123   : > { %p2511_p12 = pnand %p2509_p4, %p2506_p9 }
 0x125   : > { %2514 = shalt.err (!%p2511_p12)
}
 0x126   : > { %s2515_s26 = scalar_lea.vmem %s471_s24, 192  ;;  %p2523_p13 = scmp.lt.s32.totalorder %s471_s24, %s471_s24 }
 0x127   : > { %p2516_p2 = scmp.ne.s32.totalorder %s471_s24, %s2515_s26  ;;  %p2524_p3 = scmp.lt.s32.totalorder %s2515_s26, %s2515_s26 }
 0x129   : > { %p2518_p10 = pnand %p2516_p2, %p3700_p8  ;;  %p2525_p5 = por %p2524_p3, %p2523_p13 }
 0x12b   : > { %p2519_p11 = pneg %p2518_p10 }
 0x12d   : > { %p2526_p7 = pnand %p2525_p5, %p2519_p11 }
 0x12f   : > { %2529 = shalt.err (!%p2526_p7)
}
 0x130   : > { %2147 = dma.hbm_to_vmem [thread:$0]  (!%p3701_p6), %s3703_s10, 192, %s471_s24, [#allocation18], %s3696_s13, %s3696_s13, %s3695_s7  }
 0x131   : > { %s2787_s11 = smov [#allocation22]   ;;  %s2788_s18 = smov [#allocation23]  }
 0x132   : > { %s495_s29 = sshll.u32 %s2787_s11, 4  ;;  %s506_s2 = sshll.u32 %s2788_s18, 4  ;;  %s496_s29 = int_to_ptr.vmem [resolvable:$true] %s495_s29  ;;  %s507_s2 = int_to_ptr.vmem [resolvable:$true] %s506_s2 }
 0x133   : > { %s3704_s1 = sld [smem:[#allocation54_spill]] }
 0x139   : > { %s2530_s14 = scalar_lea.hbm %s3704_s1, 16 }
 0x13a   : > { %p2531_p0 = scmp.ne.s32.totalorder %s3704_s1, %s2530_s14  ;;  %p2537_p4 = scmp.lt.u32.totalorder %s2530_s14, %s3704_s1 }
 0x13c   : > { %p2533_p1 = pnand %p2531_p0, %p3700_p8 }
 0x13e   : > { %p2534_p9 = pneg %p2533_p1 }
 0x140   : > { %p2539_p12 = pnand %p2537_p4, %p2534_p9 }
 0x142   : > { %2542 = shalt.err (!%p2539_p12)
}
 0x143   : > { %s2543_s24 = scalar_lea.vmem %s496_s29, 16  ;;  %s2550_s15 = scalar_lea.vmem %s496_s29, 32 }
 0x144   : > { %p2544_p2 = scmp.ne.s32.totalorder %s496_s29, %s2543_s24  ;;  %p2551_p13 = scmp.lt.s32.totalorder %s496_s29, %s496_s29 }
 0x145   : > { %p2552_p3 = scmp.lt.s32.totalorder %s2550_s15, %s2543_s24 }
 0x146   : > { %p2546_p10 = pnand %p2544_p2, %p3700_p8 }
 0x147   : > { %p2553_p5 = por %p2552_p3, %p2551_p13 }
 0x148   : > { %p2547_p11 = pneg %p2546_p10 }
 0x14a   : > { %p2554_p7 = pnand %p2553_p5, %p2547_p11 }
 0x14c   : > { %2557 = shalt.err (!%p2554_p7)
}
 0x14d   : > { %2153 = dma.hbm_to_vmem [thread:$0]  (!%p3701_p6), %s3704_s1, 16, %s496_s29, [#allocation21]  }
 0x14e   : > { %s3705_s25 = sld [smem:[#allocation55_spill]] }
 0x154   : > { %s2558_s14 = scalar_lea.hbm %s3705_s25, 16 }
 0x155   : > { %p2559_p0 = scmp.ne.s32.totalorder %s3705_s25, %s2558_s14  ;;  %p2565_p4 = scmp.lt.u32.totalorder %s2558_s14, %s3705_s25 }
 0x157   : > { %p2561_p1 = pnand %p2559_p0, %p3700_p8 }
 0x159   : > { %p2562_p9 = pneg %p2561_p1 }
 0x15b   : > { %p2567_p12 = pnand %p2565_p4, %p2562_p9 }
 0x15d   : > { %2570 = shalt.err (!%p2567_p12)
}
 0x15e   : > { %s2571_s15 = scalar_lea.vmem %s507_s2, 16  ;;  %s2578_s29 = scalar_lea.vmem %s507_s2, 32 }
 0x15f   : > { %p2572_p2 = scmp.ne.s32.totalorder %s507_s2, %s2571_s15  ;;  %p2579_p13 = scmp.lt.s32.totalorder %s507_s2, %s507_s2 }
 0x160   : > { %p2580_p3 = scmp.lt.s32.totalorder %s2578_s29, %s2571_s15 }
 0x161   : > { %p2574_p10 = pnand %p2572_p2, %p3700_p8 }
 0x162   : > { %p2581_p5 = por %p2580_p3, %p2579_p13 }
 0x163   : > { %p2575_p11 = pneg %p2574_p10 }
 0x165   : > { %p2582_p7 = pnand %p2581_p5, %p2575_p11 }
 0x167   : > { %2585 = shalt.err (!%p2582_p7)
}
 0x168   : > { %2156 = dma.hbm_to_vmem [thread:$0]  (!%p3701_p6), %s3705_s25, 16, %s507_s2, [#allocation24]  }
 0x169   : > { %s3657_s21 = sshll.u32 %s3063_s0, 2  ;;  %s1832_s6 = sshll.u32 %s2774_s16, 6 }
 0x16a   : > { %s3706_s20 = sld [smem:[#allocation43_spill]]  ;;  %s521_s23 = scalar_lea.vmem [#allocation2], %s3657_s21 }
 0x16b   : > { %s528_s22 = sshll.u32 %s521_s23, 4  ;;  %s3707_s29 = sld [smem:[#allocation45_spill]]  ;;  %s3242_s22 = int_to_ptr.vmem [resolvable:$true] %s528_s22 }
 0x16c   : > { %s518_s18 = scalar_lea.sflag [#allocation3], %s3063_s0  ;;  %p3709_p6 = scmp.ne.s32.totalorder %s3694_s9, 0 }
 0x170   : > { %s3238_s26 = scalar_lea.hbm %s3706_s20, %s1832_s6  ;;  %s2591_s8 = scalar_lea.hbm %s3706_s20, 128 }
 0x171   : > { %s3708_s11 = smov %s3707_s29  ;;  %s3247_s2 = scalar_lea.hbm %s3707_s29, %s1832_s6 }
 0x172   : > { %s2586_s1 = scalar_lea.hbm %s3238_s26, 64  ;;  %p2592_p9 = scmp.lt.u32.totalorder %s3238_s26, %s3706_s20 }
 0x173   : > { %p2587_p8 = scmp.ne.s32.totalorder %s3238_s26, %s2586_s1  ;;  %p2593_p4 = scmp.lt.u32.totalorder %s2591_s8, %s2586_s1 }
 0x174   : > { %p2595_p2 = scmp.lt.u32.totalorder %s2586_s1, %s3238_s26 }
 0x175   : > { %p2589_p0 = pnand %p2587_p8, %p3709_p6  ;;  %p2594_p12 = por %p2593_p4, %p2592_p9 }
 0x177   : > { %p2590_p1 = pneg %p2589_p0  ;;  %p2596_p10 = por %p2595_p2, %p2594_p12 }
 0x179   : > { %p2597_p11 = pnand %p2596_p10, %p2590_p1 }
 0x17b   : > { %2600 = shalt.err (!%p2597_p11)
}
 0x17c   : > { %s2601_s6 = scalar_lea.vmem %s3242_s22, 64  ;;  %s2789_s23 = smov [#allocation2]  }
 0x17d   : > { %p2602_p13 = scmp.ne.s32.totalorder %s3242_s22, %s2601_s6  ;;  %s2606_s24 = sshll.u32 %s2789_s23, 4  ;;  %s2607_s24 = int_to_ptr.vmem [resolvable:$false] %s2606_s24 }
 0x17e   : > { %s2608_s10 = scalar_lea.vmem %s2607_s24, 128  ;;  %p2609_p7 = scmp.lt.s32.totalorder %s3242_s22, %s2607_s24 }
 0x17f   : > { %p2604_p3 = pnand %p2602_p13, %p3709_p6  ;;  %p2610_p8 = scmp.lt.s32.totalorder %s2608_s10, %s2601_s6 }
 0x181   : > { %p2605_p5 = pneg %p2604_p3  ;;  %p2611_p0 = por %p2610_p8, %p2609_p7 }
 0x183   : > { %p2612_p9 = pnand %p2611_p0, %p2605_p5 }
 0x185   : > { %2615 = shalt.err (!%p2612_p9)
}
 0x186   : > { %p3710_p1 = scmp.ne.s32.totalorder %s3691_s27, 0  ;;  %s3711_s8 = sshll.u32 %s3131_s12, 4  ;;  %s3273_s8 = int_to_ptr.vmem [resolvable:$true] %s3711_s8 }
 0x187   : > { %s3712_s1 = sshll.u32 %s3063_s0, 2  ;;  %s2616_s29 = scalar_lea.hbm %s3247_s2, 64 }
 0x188   : > { %2160 = dma.hbm_to_vmem [thread:$0]  (!%p3710_p1), %s3238_s26, 64, %s3242_s22, %s518_s18  }
 0x189   : > { %s560_s21 = scalar_lea.vmem [#allocation7], %s3712_s1  ;;  %p2617_p4 = scmp.ne.s32.totalorder %s3247_s2, %s2616_s29 }
 0x18a   : > { %s567_s15 = sshll.u32 %s560_s21, 4  ;;  %s2621_s6 = scalar_lea.hbm %s3708_s11, 128  ;;  %s568_s15 = int_to_ptr.vmem [resolvable:$true] %s567_s15 }
 0x18b   : > { %p2619_p12 = pnand %p2617_p4, %p3709_p6  ;;  %p2622_p10 = scmp.lt.u32.totalorder %s3247_s2, %s3708_s11 }
 0x18c   : > { %p2623_p11 = scmp.lt.u32.totalorder %s2621_s6, %s2616_s29  ;;  %p2625_p3 = scmp.lt.u32.totalorder %s2616_s29, %s3247_s2 }
 0x18d   : > { %p2620_p2 = pneg %p2619_p12 }
 0x18e   : > { %p2624_p13 = por %p2623_p11, %p2622_p10 }
 0x190   : > { %p2626_p5 = por %p2625_p3, %p2624_p13 }
 0x192   : > { %p2627_p7 = pnand %p2626_p5, %p2620_p2 }
 0x194   : > { %2630 = shalt.err (!%p2627_p7)
}
 0x195   : > { %s2631_s0 = scalar_lea.vmem %s568_s15, 64  ;;  %s2790_s12 = smov [#allocation7]  }
 0x196   : > { %p2632_p8 = scmp.ne.s32.totalorder %s568_s15, %s2631_s0  ;;  %s2636_s26 = sshll.u32 %s2790_s12, 4  ;;  %s2637_s26 = int_to_ptr.vmem [resolvable:$false] %s2636_s26 }
 0x197   : > { %s2638_s22 = scalar_lea.vmem %s2637_s26, 128  ;;  %p2639_p4 = scmp.lt.s32.totalorder %s568_s15, %s2637_s26 }
 0x198   : > { %p2634_p0 = pnand %p2632_p8, %p3709_p6  ;;  %p2640_p12 = scmp.lt.s32.totalorder %s2638_s22, %s2631_s0 }
 0x19a   : > { %p2635_p9 = pneg %p2634_p0  ;;  %p2641_p1 = por %p2640_p12, %p2639_p4 }
 0x19c   : > { %p2642_p10 = pnand %p2641_p1, %p2635_p9 }
 0x19e   : > { %2645 = shalt.err (!%p2642_p10)
}
 0x19f   : > { %p3713_p11 = scmp.ne.s32.totalorder %s3691_s27, 0  ;;  %s3714_s18 = sand.u32 1, %s2774_s16  }
 0x1a0   : > { %s3297_s10 = scalar_lea.sflag [#allocation9], %s3714_s18  ;;  %s2646_s1 = scalar_lea.hbm %s3127_s4, 512 }
 0x1a1   : > { %2166 = dma.hbm_to_vmem [thread:$0]  (!%p3713_p11), %s3247_s2, 64, %s568_s15, %s3089_s5  }
 0x1a2   : > { %p2647_p2 = scmp.ne.s32.totalorder %s3127_s4, %s2646_s1  ;;  %s2651_s28 = scalar_lea.hbm %s3613_s3, 1024 }
 0x1a3   : > { %p2652_p3 = scmp.lt.u32.totalorder %s3127_s4, %s3613_s3  ;;  %p2653_p5 = scmp.lt.u32.totalorder %s2651_s28, %s2646_s1 }
 0x1a4   : > { %p2649_p13 = pnand %p2647_p2, %p3709_p6  ;;  %p2655_p8 = scmp.lt.u32.totalorder %s2646_s1, %s3127_s4 }
 0x1a5   : > { %p2654_p7 = por %p2653_p5, %p2652_p3 }
 0x1a6   : > { %p2650_p1 = pneg %p2649_p13 }
 0x1a7   : > { %p2656_p0 = por %p2655_p8, %p2654_p7 }
 0x1a9   : > { %p2657_p9 = pnand %p2656_p0, %p2650_p1 }
 0x1ab   : > { %2660 = shalt.err (!%p2657_p9)
}
 0x1ac   : > { %s2661_s5 = scalar_lea.vmem %s3273_s8, 512  ;;  %s2791_s2 = smov [#allocation8]  }
 0x1ad   : > { %p2662_p4 = scmp.ne.s32.totalorder %s3273_s8, %s2661_s5  ;;  %s2666_s15 = sshll.u32 %s2791_s2, 4  ;;  %s2667_s15 = int_to_ptr.vmem [resolvable:$false] %s2666_s15 }
 0x1ae   : > { %s2668_s23 = scalar_lea.vmem %s2667_s15, 1024  ;;  %p2669_p2 = scmp.lt.s32.totalorder %s3273_s8, %s2667_s15 }
 0x1af   : > { %p2664_p12 = pnand %p2662_p4, %p3709_p6  ;;  %p2670_p13 = scmp.lt.s32.totalorder %s2668_s23, %s2661_s5 }
 0x1b1   : > { %p2665_p10 = pneg %p2664_p12  ;;  %p2671_p3 = por %p2670_p13, %p2669_p2 }
 0x1b3   : > { %p2672_p5 = pnand %p2671_p3, %p2665_p10 }
 0x1b5   : > { %2675 = shalt.err (!%p2672_p5)
}
 0x1b6   : > { %2169 = dma.hbm_to_vmem [thread:$0]  (!%p3713_p11), %s3127_s4, 512, %s3273_s8, %s3297_s10, %s3696_s13, %s3696_s13, %s3695_s7  }
 0x1b7   : > { %s3715_s9 = sld [smem:[#allocation38_spill]] }
 0x1bd   : > { %p3716_p6 = scmp.ne.s32.totalorder %s3715_s9, 0 }
 0x1be   : > { %s3327_s24 = sand.u32 (!%p3716_p6), 1, %s2766_s30   ;;  %p3717_p1 = scmp.ne.s32.totalorder (!%p3716_p6), %s3686_s17, 0 }
 0x1bf   : > { %597 = sbr.rel (%p3716_p6) target bundleno = 3267 (0xcc3), region = 76  ;;  %s1842_s0 = sshll.u32 (!%p3716_p6), %s3327_s24, 2 }
 0x1c0   : > { %s600_s12 = scalar_lea.sflag (!%p3716_p6), [#allocation3], %s3327_s24  ;;  %s3331_s26 = scalar_lea.vmem (!%p3716_p6), [#allocation2], %s1842_s0 }
 0x1c6   : > { %2721 = dma.done.wait (%p3717_p1), %s600_s12, 64  }
 0x1c7   : > { %2723 = vsyncadd (%p3717_p1), %s600_s12, 4294967232  ;;  %s608_s27 = sand.u32 1, %s2895_s19   ;;  %s1843_s7 = sshll.u32 %s3327_s24, 5 }
 0x1c8   : > { %s609_s13 = scalar_lea.sflag [#allocation6], %s608_s27  ;;  %s3339_s4 = scalar_lea.vmem [#allocation5], %s1843_s7 }
 0x1c9   : > { %2725 = dma.done.wait (%p3717_p1), %s609_s13, 576  }
 0x1ca   : > { %2727 = vsyncadd (%p3717_p1), %s609_s13, 4294966720  ;;  %s3345_s8 = scalar_lea.vmem [#allocation7], %s1842_s0  ;;  %s627_s22 = scalar_lea.sflag [#allocation9], %s608_s27 }
 0x1cb   : > { %s3347_s18 = scalar_lea.vmem [#allocation8], %s1843_s7 }
 0x1cc   : > { %2729 = dma.done.wait (%p3717_p1), %s627_s22, 512  }
 0x1cd   : > { %2731 = vsyncadd (%p3717_p1), %s627_s22, 4294966784  ;;  %p3718_p11 = scmp.eq.s32.totalorder %s2895_s19, 0 }
 0x1cf   : > { %2733 = dma.done.wait (%p3718_p11), [#allocation9], 256   ;;  %p3719_p7 = pmov %p3718_p11 }
 0x1d1   : > { %2735 = vsyncadd (%p3719_p7), [#allocation9], 4294967040  ;;  %p3720_p8 = pmov %p3719_p7 }
 0x1d2   : > { %p3721_p0 = pmov %p3719_p7 }
 0x1d3   : > { %2737 = dma.done.wait (%p3720_p8), [#allocation12], 272  }
 0x1d4   : > { %2739 = vsyncadd (%p3721_p0), [#allocation12], 4294967024  ;;  %p3722_p9 = pmov %p3721_p0 }
 0x1d5   : > { %p3723_p4 = pmov %p3721_p0 }
 0x1d6   : > { %2741 = dma.done.wait (%p3722_p9), [#allocation15], 272  }
 0x1d7   : > { %2743 = vsyncadd (%p3723_p4), [#allocation15], 4294967024  ;;  %p3724_p12 = pmov %p3721_p0 }
 0x1d8   : > { %p3725_p10 = pmov %p3721_p0 }
 0x1d9   : > { %2745 = dma.done.wait (%p3724_p12), [#allocation18], 208  }
 0x1da   : > { %2747 = vsyncadd (%p3725_p10), [#allocation18], 4294967088  ;;  %p3726_p2 = pmov %p3721_p0 }
 0x1db   : > { %p3727_p13 = pmov %p3721_p0 }
 0x1dc   : > { %2749 = dma.done.wait (%p3726_p2), [#allocation21], 32  }
 0x1dd   : > { %2751 = vsyncadd (%p3727_p13), [#allocation21], 4294967264  ;;  %p3728_p3 = pmov %p3721_p0 }
 0x1de   : > { %p3729_p5 = pmov %p3721_p0 }
 0x1df   : > { %2753 = dma.done.wait (%p3728_p3), [#allocation24], 16  }
 0x1e0   : > { %2755 = vsyncadd (%p3729_p5), [#allocation24], 4294967280  ;;  %v2792_v0 = vmov 0.0   ;;  %vm2793_vm0 = vmmov 0   ;;  %v2246_v1 = vld [vmem:[#allocation13] sm:$0xff]   ;;  %v2247_v2 = vld [vmem:[#allocation13 + $0x8] sm:$0xff]  }
 0x1e1   : > { %1964 = vmatprep.subr.bf16.mxu0 %v2792_v0  ;;  %1968 = vmatprep.mubr.msk.bf16.mxu0 %vm2793_vm0, %v2792_v0  ;;  %v3381_v3 = vld [vmem:[%s3339_s4] sm:$0xff]   ;;  %v1898_v4 = vld [vmem:[%s3347_s18] sm:$0xff]   ;;  %vm800_vm1 = vcmask 261120   ;;  %v1913_v10 = vld [vmem:[%s3347_s18 + $0x8] sm:$0xff]   ;;  %vm1077_vm2 = vcmask 64512   ;;  %s2794_s17 = smov 120  }
 0x1e2   : > { %1972 = vmatprep.subr.bf16.mxu1 %v2246_v1  ;;  %v3385_v5 = vld [vmem:[%s3339_s4 + $0x8] sm:$0xff]   ;;  %v741_v6 = vunpack.c.l.bf16 %v3381_v3  ;;  %v742_v7 = vunpack.c.h.bf16 %v3381_v3  ;;  %v1899_v8 = vunpack.c.l.bf16 %v1898_v4  ;;  %v1900_v9 = vunpack.c.h.bf16 %v1898_v4  ;;  %v3391_v11 = vld [vmem:[%s3339_s4 + $0x10] sm:$0xff]   ;;  %v1914_v12 = vld [vmem:[%s3347_s18 + $0x10] sm:$0xff]   ;;  %s2795_s10 = smov 112   ;;  %s2796_s1 = smov 8  }
 0x1e3   : > { %1973 = vmatpush3.bf16.msra.mxu1 %v2246_v1  ;;  %v743_v13 = vunpack.c.l.bf16 %v3385_v5  ;;  %v744_v14 = vunpack.c.h.bf16 %v3385_v5  ;;  %v1903_v15 = vunpack.c.l.bf16 %v1913_v10  ;;  %v1904_v16 = vunpack.c.h.bf16 %v1913_v10  ;;  %v3397_v17 = vld [vmem:[%s3339_s4 + $0x18] sm:$0xff]   ;;  %v1915_v18 = vld [vmem:[%s3347_s18 + $0x18] sm:$0xff]   ;;  %v2248_v23 = vld [vmem:[#allocation10] sm:$0xff]   ;;  %s2797_s21 = smov 16   ;;  %s1856_s29 = sshll.u32 %s3327_s24, 3 }
 0x1e4   : > { %1974 = vmatprep.subr.bf16.mxu1 %v2247_v2  ;;  %v768_v19 = vadd.f32 %v1899_v8, %v741_v6  ;;  %v769_v20 = vadd.f32 %v1900_v9, %v742_v7  ;;  %v745_v21 = vunpack.c.l.bf16 %v3391_v11  ;;  %v746_v22 = vunpack.c.h.bf16 %v3391_v11  ;;  %v2249_v28 = vld [vmem:[#allocation10 + $0x8] sm:$0xff]   ;;  %v3403_v29 = vld [vmem:[%s3331_s26] sm:$0xf]  ;;  %1965 = vmatpush3.bf16.msra.mxu0 %v2248_v23  ;;  %v749_v34 = vld [vmem:[%s3345_s8] sm:$0xf]  ;;  %s3730_s28 = sld [smem:[#allocation41_spill]] }
 0x1e5   : > { %v770_v24 = vadd.f32 %v1903_v15, %v743_v13  ;;  %v771_v25 = vadd.f32 %v1904_v16, %v744_v14  ;;  %v1907_v26 = vunpack.c.l.bf16 %v1914_v12  ;;  %v1908_v27 = vunpack.c.h.bf16 %v1914_v12  ;;  %1966 = vmatprep.subr.bf16.mxu0 %v2792_v0  ;;  %v1861_v48 = vld [vmem:[#allocation14] ss:$0 sm:$0xff]  ;;  %v1857_v4 = vld [vmem:[#allocation11] ss:$0 sm:$0xff]  ;;  %s1892_s14 = sshll.u32 %s2895_s19, 7  ;;  %s729_s6 = scalar_lea.vmem [#allocation25], %s1856_s29 }
 0x1e6   : > { %v845_v30 = vpack.c.bf16 %v769_v20, %v768_v19  ;;  %v747_v31 = vunpack.c.l.bf16 %v3397_v17  ;;  %v748_v32 = vunpack.c.h.bf16 %v3397_v17  ;;  %v1911_v33 = vunpack.c.l.bf16 %v1915_v18  ;;  %v2250_v20 = vld [vmem:[#allocation16] sm:$0xff]   ;;  %s1587_s5 = sshll.u32 %s729_s6, 4  ;;  %s3731_s23 = sld [smem:[#allocation56_spill]]  ;;  %s3567_s5 = int_to_ptr.vmem [resolvable:$true] %s1587_s5 }
 0x1e7   : > { %1975 = vmatpush3.bf16.msra.mxu1 %v2247_v2  ;;  %v846_v35 = vpack.c.bf16 %v771_v25, %v770_v24  ;;  %v772_v36 = vadd.f32 %v1907_v26, %v745_v21  ;;  %v773_v37 = vadd.f32 %v1908_v27, %v746_v22  ;;  %v1912_v38 = vunpack.c.h.bf16 %v1915_v18  ;;  %v2251_v21 = vld [vmem:[#allocation16 + $0x8] sm:$0xff]   ;;  %v1868_v26 = vld [vmem:[#allocation17] ss:$0 sm:$0xff]  ;;  %s1574_s0 = scalar_lea.sflag [#allocation4], %s3327_s24  ;;  %s2676_s12 = scalar_lea.vmem %s3567_s5, 128 }
 0x1e8   : > { %1996 = vmatprep.subr.bf16.mxu1 %v2792_v0  ;;  %1976 = vmatprep.mubr.msk.bf16.mxu1 %vm800_vm1, %v845_v30  ;;  %v732_v39 = vunpack.c.l.bf16 %v3403_v29  ;;  %v750_v40 = vunpack.c.l.bf16 %v749_v34  ;;  %v774_v42 = vadd.f32 %v1911_v33, %v747_v31  ;;  %vm1133_vm3 = vcmask 523264   ;;  %p2677_p6 = scmp.ne.s32.totalorder %s3567_s5, %s2676_s12  ;;  %s2798_s19 = smov [#allocation25]  }
 0x1e9   : > { %v847_v41 = vpack.c.bf16 %v773_v37, %v772_v36  ;;  %v775_v43 = vadd.f32 %v1912_v38, %v748_v32  ;;  %1967 = vmatpush3.bf16.msra.mxu0 %v2249_v28  ;;  %vm1497_vm4 = vcmask 1043456   ;;  %vm1471_vm5 = vcmask 130048   ;;  %s2680_s26 = sshll.u32 %s2798_s19, 4  ;;  %s2681_s26 = int_to_ptr.vmem [resolvable:$false] %s2680_s26 }
 0x1ea   : > { %1977 = vmatmul.mubr.msk.bf16.vlgmr.msra.gmra.mrb[0].mxu1 %vm800_vm1, %v846_v35  ;;  %v751_v44 = vadd.f32 %v750_v40, %v732_v39  ;;  %1984 = vmatprep.subr.bf16.mxu0 %v2250_v20  ;;  %vm1493_vm6 = vcmask 195584   ;;  %p3732_p1 = scmp.ne.s32.totalorder %s3730_s28, 0  ;;  %s2682_s27 = scalar_lea.vmem %s2681_s26, 256 }
 0x1eb   : > { %1980 = vmatprep.mubr.msk.bf16.mxu1 %vm800_vm1, %v847_v41  ;;  %v848_v46 = vpack.c.bf16 %v775_v43, %v774_v42  ;;  %p2683_p8 = scmp.lt.s32.totalorder %s3567_s5, %s2681_s26  ;;  %p2684_p0 = scmp.lt.s32.totalorder %s2682_s27, %s2676_s12 }
 0x1ec   : > { %v776_v45 = vpack.c.bf16 %v751_v44, %v751_v44  ;;  %s3565_s9 = scalar_lea.hbm %s3731_s23, %s1892_s14  ;;  %p2678_p11 = pnand %p2677_p6, %p3732_p1 }
 0x1ed   : > { %p2685_p9 = por %p2684_p0, %p2683_p8 }
 0x1ee   : > { %1969 = vmatmul.mubr.msk.bf16.vlgmr.msra.gmra.mrb[0].mxu0 %vm800_vm1, %v776_v45  ;;  %p2679_p7 = pneg %p2678_p11 }
 0x1ef   : > { %1988 = vmatprep.mubr.msk.bf16.mxu0 %vm800_vm1, %v3381_v3  ;;  %1985 = vmatpush3.bf16.msra.mxu0 %v2250_v20 }
 0x1f0   : > { %1986 = vmatprep.subr.bf16.mxu0 %v2251_v21  ;;  %p2686_p4 = pnand %p2685_p9, %p2679_p7 }
 0x1f2   : > { %1981 = vmatmul.mubr.msk.bf16.gmra.mrb[4].mxu1 %vm800_vm1, %v848_v46 }
 0x1f3   : > { %2004 = vmatprep.mubr.msk.bf16.mxu1 %vm2793_vm0, %v2792_v0  ;;  %1987 = vmatpush3.bf16.msra.mxu0 %v2251_v21 }
 0x1f4   : > { %2008 = vmatprep.subr.bf16.mxu0 %v2792_v0 }
 0x1f6   : > { %1989 = vmatmul.mubr.msk.bf16.vlgmr.msra.gmra.mrb[4].mxu0 %vm800_vm1, %v3385_v5 }
 0x1f7   : > { %1992 = vmatprep.mubr.msk.bf16.mxu0 %vm800_vm1, %v3391_v11 }
 0x1fe   : > { %1993 = vmatmul.mubr.msk.bf16.gmra.mrb[8].mxu0 %vm800_vm1, %v3397_v17 }
 0x1ff   : > { %2016 = vmatprep.mubr.msk.bf16.mxu0 %vm2793_vm0, %v2792_v0 }
 0x2bd   : > { %v1978_v47 = vpop.f32.mrb[0].mxu1 }
 0x2be   : > { %v918_v49 = vpop.f32.mrb[1].mxu1  ;;  %v927_v51 = vadd.f32 %v1978_v47, %v1861_v48 }
 0x2bf   : > { %v1979_v50 = vpop.f32.mrb[2].mxu1  ;;  %v919_v54 = vadd.f32 %v1861_v48, %v918_v49 }
 0x2c0   : > { %v930_v52 = vadd.f32 %v1979_v50, %v1861_v48  ;;  %v921_v53 = vpop.f32.mrb[3].mxu1 }
 0x2c1   : > { %v922_v55 = vadd.f32 %v1861_v48, %v921_v53  ;;  %v838_v57 = vpop.f32.mrb[0].mxu0 }
 0x2c2   : > { %v3420_v56 = vpack.c.bf16 %v930_v52, %v927_v51  ;;  %v1970_v59 = vpop.f32.mrb[1].mxu0  ;;  %v839_v12 = vadd.f32 %v1857_v4, %v838_v57 }
 0x2c3   : > { %v3422_v58 = vpack.c.bf16 %v922_v55, %v919_v54  ;;  %v841_v60 = vpop.f32.mrb[2].mxu0 }
 0x2c4   : > { %v1971_v63 = vpop.f32.mrb[3].mxu0  ;;  %v1085_v15 = vsel %vm1077_vm2, %v3420_v56, 0  ;;  %v3439_v16 = vpack.c.bf16 %v839_v12, %v839_v12 }
 0x2c5   : > { %1196 = vrot.lane.b32.xlu1 %v3422_v58, %s2794_s17  ;;  %v1082_v61 = vsel %vm1077_vm2, %v3422_v58, 0  ;;  %v1982_v62 = vpop.f32.mrb[4].mxu1 }
 0x2c6   : > { %1997 = vmatpush3.bf16.xpose.msra.mxu1 %v1082_v61  ;;  %v943_v1 = vadd.f32 %v1982_v62, %v1861_v48  ;;  %v934_v2 = vpop.f32.mrb[5].mxu1 }
 0x2c7   : > { %v935_v6 = vadd.f32 %v1861_v48, %v934_v2  ;;  %v1983_v7 = vpop.f32.mrb[6].mxu1  ;;  %1998 = vmatprep.subr.bf16.mxu1 %v2792_v0 }
 0x2c8   : > { %v946_v8 = vadd.f32 %v1983_v7, %v1861_v48  ;;  %v937_v9 = vpop.f32.mrb[7].mxu1 }
 0x2c9   : > { %1198 = vrot.lane.b32.xlu1 %v3420_v56, %s2794_s17  ;;  %v938_v10 = vadd.f32 %v1861_v48, %v937_v9  ;;  %v1990_v27 = vpop.f32.mrb[4].mxu0 }
 0x2ca   : > { %v3431_v13 = vpack.c.bf16 %v946_v8, %v943_v1  ;;  %v1051_v5 = vadd.f32 %v1990_v27, %v1868_v26  ;;  %v1042_v28 = vpop.f32.mrb[5].mxu0 }
 0x2cb   : > { %v3433_v14 = vpack.c.bf16 %v938_v10, %v935_v6  ;;  %v1043_v30 = vadd.f32 %v1868_v26, %v1042_v28  ;;  %v1991_v11 = vpop.f32.mrb[6].mxu0 }
 0x2cc   : > { %v1091_v19 = vsel %vm1077_vm2, %v3431_v13, 0  ;;  %v1054_v31 = vadd.f32 %v1991_v11, %v1868_v26  ;;  %v1045_v32 = vpop.f32.mrb[7].mxu0 }
 0x2cd   : > { %1202 = vrot.lane.b32.xlu1 %v3431_v13, %s2794_s17  ;;  %v1088_v18 = vsel %vm1077_vm2, %v3433_v14, 0  ;;  %v1046_v17 = vadd.f32 %v1868_v26, %v1045_v32 }
 0x2ce   : > { %1999 = vmatpush3.bf16.xpose.msra.mxu1 %v1085_v15  ;;  %v3466_v33 = vpack.c.bf16 %v1054_v31, %v1051_v5 }
 0x2cf   : > { %2000 = vmatprep.subr.bf16.mxu1 %v2792_v0  ;;  %v3468_v34 = vpack.c.bf16 %v1046_v17, %v1043_v30 }
 0x2d1   : > { %1190 = vrot.lane.b32.xlu1 %v3439_v16, %s2794_s17  ;;  %v1994_v35 = vpop.f32.mrb[8].mxu0  ;;  %2009 = vmatpush3.bf16.msra.mxu0 %v3468_v34 }
 0x2d2   : > { %v1067_v36 = vadd.f32 %v1994_v35, %v1868_v26  ;;  %v1058_v37 = vpop.f32.mrb[9].mxu0  ;;  %2010 = vmatprep.subr.bf16.mxu0 %v2792_v0 }
 0x2d3   : > { %v1059_v38 = vadd.f32 %v1868_v26, %v1058_v37  ;;  %v1995_v40 = vpop.f32.mrb[10].mxu0 }
 0x2d4   : > { %v1070_v41 = vadd.f32 %v1995_v40, %v1868_v26  ;;  %v1061_v42 = vpop.f32.mrb[11].mxu0 }
 0x2d5   : > { %v1062_v43 = vadd.f32 %v1868_v26, %v1061_v42  ;;  %2011 = vmatpush3.bf16.msra.mxu0 %v3466_v33 }
 0x2d6   : > { %2001 = vmatpush3.bf16.xpose.msra.mxu1 %v1088_v18  ;;  %v3473_v44 = vpack.c.bf16 %v1070_v41, %v1067_v36  ;;  %2012 = vmatprep.subr.bf16.mxu0 %v2792_v0 }
 0x2d7   : > { %2002 = vmatprep.subr.bf16.mxu1 %v2792_v0  ;;  %v3476_v45 = vpack.c.bf16 %v1062_v43, %v1059_v38 }
 0x2d9   : > { %2013 = vmatpush3.bf16.msra.mxu0 %v3476_v45 }
 0x2da   : > { %2014 = vmatprep.subr.bf16.mxu0 %v2792_v0 }
 0x2dd   : > { %2015 = vmatpush3.bf16.msra.mxu0 %v3473_v44 }
 0x2de   : > { %2003 = vmatpush3.bf16.xpose.msra.mxu1 %v1091_v19  ;;  %2020 = vmatprep.subr.bf16.mxu0 %v2792_v0 }
 0x2df   : > { %2032 = vmatprep.subr.bf16.mxu1 %v2792_v0 }
 0x2e5   : > { %2005 = vmatmul.mubr.msk.bf16.vlgmr.msra.gmra.mrb[8].mxu1 %vm1077_vm2, %v3439_v16 }
 0x2e6   : > { %2040 = vmatprep.mubr.msk.bf16.mxu1 %vm2793_vm0, %v2792_v0 }
 0x337   : > { %v1197_v54 = vpop.permute.xlu1 %1196 }
 0x338   : > { %v1208_v57 = vsel %vm1077_vm2, %v1197_v54, 0 }
 0x33b   : > { %v1199_v59 = vpop.permute.xlu1 %1198 }
 0x33c   : > { %v1211_v60 = vsel %vm1077_vm2, %v1199_v59, 0  ;;  %v2256_v59 = vld [vmem:[#allocation19] sm:$0xff]  }
 0x33f   : > { %v1203_v63 = vpop.permute.xlu1 %1202 }
 0x340   : > { %v1217_v1 = vsel %vm1077_vm2, %v1203_v63, 0 }
 0x343   : > { %v1191_v2 = vpop.permute.xlu1 %1190 }
 0x3b8   : > { %v1127_v22 = vpop.f32.mrb[8].mxu1 }
 0x3b9   : > { %v2006_v3 = vpop.f32.mrb[9].mxu1  ;;  %v1134_v23 = vsel %vm1133_vm3, %v1127_v22, -inf }
 0x3ba   : > { %1135 = vmax.xlane.f32.xlu0 %v1134_v23  ;;  %v1130_v24 = vpop.f32.mrb[10].mxu1 }
 0x3bb   : > { %v2007_v25 = vpop.f32.mrb[11].mxu1 }
 0x447   : > { %v1136_v46 = vpop.xlane.xlu0 %1135 }
 0x448   : > { %v1137_v47 = vsub.f32 %v1127_v22, %v1136_v46 }
 0x44a   : > { %v1138_v48 = vmul.f32 1.442695, %v1137_v47 }
 0x44c   : > { %2262 = vpow2.f32 %v1138_v48 }
 0x456   : > { %v2263_v49 = vpop.eup %2262 }
 0x457   : > { %v1140_v50 = vsel %vm1133_vm3, %v2263_v49, 0.0 }
 0x458   : > { %1141 = vadd.xlane.f32.xlu0 %v1140_v50 }
 0x46e   : > { %1200 = vrot.lane.b32.xlu0 %v3433_v14, %s2794_s17 }
 0x4e5   : > { %v1142_v51 = vpop.xlane.xlu0 %1141 }
 0x4e6   : > { %2264 = vrcp.f32 %v1142_v51 }
 0x4e9   : > { %v1201_v61 = vpop.permute.xlu0 %1200 }
 0x4ea   : > { %v1214_v62 = vsel %vm1077_vm2, %v1201_v61, 0 }
 0x4f0   : > { %v2265_v52 = vpop.eup %2264 }
 0x4f1   : > { %v1144_v53 = vmul.f32 %v2265_v52, %v2263_v49 }
 0x4f3   : > { %v1145_v55 = vpack.c.bf16 %v1144_v53, %v1144_v53 }
 0x4f5   : > { %2017 = vmatmul.mubr.msk.bf16.vlgmr.msra.gmra.mrb[12].mxu0 %vm1133_vm3, %v1145_v55 }
 0x4f6   : > { %2021 = vmatpush3.bf16.xpose.msra.mxu0 %v1208_v57  ;;  %2028 = vmatprep.mubr.msk.bf16.mxu0 %vm2793_vm0, %v2792_v0 }
 0x4f7   : > { %2022 = vmatprep.subr.bf16.mxu0 %v2792_v0 }
 0x4fe   : > { %2023 = vmatpush3.bf16.xpose.msra.mxu0 %v1211_v60  ;;  %v2257_v60 = vld [vmem:[#allocation19 + $0x8] ss:$0 sps:$4 sm:$0xff]  }
 0x4ff   : > { %2024 = vmatprep.subr.bf16.mxu0 %v2792_v0 }
 0x506   : > { %2025 = vmatpush3.bf16.xpose.msra.mxu0 %v1214_v62 }
 0x507   : > { %2026 = vmatprep.subr.bf16.mxu0 %v2792_v0 }
 0x50e   : > { %2027 = vmatpush3.bf16.xpose.msra.mxu0 %v1217_v1 }
 0x50f   : > { %2056 = vmatprep.subr.bf16.mxu0 %v2792_v0 }
 0x515   : > { %2029 = vmatmul.mubr.msk.bf16.vlgmr.msra.gmra.mrb[16].mxu0 %vm1077_vm2, %v1191_v2 }
 0x516   : > { %2064 = vmatprep.mubr.msk.bf16.mxu0 %vm2793_vm0, %v2792_v0 }
 0x5c8   : > { %v3499_v4 = vpop.f32.mrb[12].mxu0 }
 0x5c9   : > { %v2018_v6 = vpop.f32.mrb[13].mxu0 }
 0x5ca   : > { %v1186_v7 = vpop.f32.mrb[14].mxu0 }
 0x5cb   : > { %v2019_v8 = vpop.f32.mrb[15].mxu0 }
 0x5e8   : > { %v1253_v9 = vpop.f32.mrb[16].mxu0 }
 0x5e9   : > { %v2030_v10 = vpop.f32.mrb[17].mxu0  ;;  %v1259_v12 = vsel %vm1133_vm3, %v1253_v9, -inf }
 0x5ea   : > { %1260 = vmax.xlane.f32.xlu1 %v1259_v12  ;;  %v1256_v15 = vpop.f32.mrb[18].mxu0  ;;  %v1885_v10 = vld [vmem:[#allocation20] ss:$0 sm:$0xff] }
 0x5eb   : > { %v2031_v18 = vpop.f32.mrb[19].mxu0 }
 0x5fb   : > { %1275 = vrot.lane.b32.xlu1 %v3468_v34, %s2794_s17 }
 0x5ff   : > { %1279 = vrot.lane.b32.xlu1 %v3476_v45, %s2794_s17 }
 0x603   : > { %1281 = vrot.lane.b32.xlu1 %v3473_v44, %s2794_s17 }
 0x607   : > { %1332 = vrot.lane.b32.xlu1 %v3422_v58, %s2795_s10 }
 0x60b   : > { %1334 = vrot.lane.b32.xlu1 %v3420_v56, %s2795_s10 }
 0x60f   : > { %1338 = vrot.lane.b32.xlu1 %v3431_v13, %s2795_s10 }
 0x677   : > { %v1261_v19 = vpop.xlane.xlu1 %1260 }
 0x678   : > { %v1262_v20 = vsub.f32 %v1253_v9, %v1261_v19 }
 0x67a   : > { %v1263_v21 = vmul.f32 1.442695, %v1262_v20 }
 0x67b   : > { %v1276_v22 = vpop.permute.xlu1 %1275 }
 0x67c   : > { %2266 = vpow2.f32 %v1263_v21  ;;  %2033 = vmatpush3.bf16.msra.mxu1 %v1276_v22 }
 0x67d   : > { %2034 = vmatprep.subr.bf16.mxu1 %v2792_v0 }
 0x67f   : > { %v1280_v13 = vpop.permute.xlu1 %1279 }
 0x683   : > { %v1282_v26 = vpop.permute.xlu1 %1281 }
 0x686   : > { %v2267_v3 = vpop.eup %2266 }
 0x687   : > { %v1265_v23 = vsel %vm1133_vm3, %v2267_v3, 0.0  ;;  %v1333_v28 = vpop.permute.xlu1 %1332 }
 0x688   : > { %1266 = vadd.xlane.f32.xlu0 %v1265_v23  ;;  %v1344_v30 = vsel %vm1077_vm2, %v1333_v28, 0 }
 0x68b   : > { %v1335_v11 = vpop.permute.xlu1 %1334 }
 0x68c   : > { %v1347_v31 = vsel %vm1077_vm2, %v1335_v11, 0 }
 0x68f   : > { %v1339_v17 = vpop.permute.xlu1 %1338 }
 0x69e   : > { %1277 = vrot.lane.b32.xlu0 %v3466_v33, %s2794_s17 }
 0x6a2   : > { %1336 = vrot.lane.b32.xlu0 %v3433_v14, %s2795_s10 }
 0x6a6   : > { %1330 = vrot.lane.b32.xlu0 %v3439_v16, %s2795_s10 }
 0x6aa   : > { %1407 = vrot.lane.b32.xlu0 %v3468_v34, %s2795_s10  ;;  %v1353_v34 = vsel %vm1077_vm2, %v1339_v17, 0 }
 0x715   : > { %v1267_v56 = vpop.xlane.xlu0 %1266 }
 0x716   : > { %2268 = vrcp.f32 %v1267_v56 }
 0x719   : > { %v1278_v58 = vpop.permute.xlu0 %1277 }
 0x71a   : > { %2035 = vmatpush3.bf16.msra.mxu1 %v1278_v58 }
 0x71b   : > { %2036 = vmatprep.subr.bf16.mxu1 %v2792_v0 }
 0x71d   : > { %v1337_v24 = vpop.permute.xlu0 %1336 }
 0x71e   : > { %2037 = vmatpush3.bf16.msra.mxu1 %v1280_v13  ;;  %v1350_v32 = vsel %vm1077_vm2, %v1337_v24, 0 }
 0x71f   : > { %2038 = vmatprep.subr.bf16.mxu1 %v2792_v0 }
 0x720   : > { %v2269_v25 = vpop.eup %2268 }
 0x721   : > { %v1269_v14 = vmul.f32 %v2269_v25, %v2267_v3  ;;  %v1331_v27 = vpop.permute.xlu0 %1330 }
 0x722   : > { %2039 = vmatpush3.bf16.msra.mxu1 %v1282_v26  ;;  %v1890_v26 = vld [vmem:[#allocation23] ss:$0 sm:$0xff] }
 0x723   : > { %v1270_v16 = vpack.c.bf16 %v1269_v14, %v1269_v14  ;;  %2044 = vmatprep.subr.bf16.mxu1 %v2792_v0 }
 0x725   : > { %v1408_v5 = vpop.permute.xlu0 %1407  ;;  %2041 = vmatmul.mubr.msk.bf16.vlgmr.msra.gmra.mrb[12].mxu1 %vm1133_vm3, %v1270_v16 }
 0x726   : > { %2057 = vmatpush3.bf16.msra.mxu0 %v1408_v5  ;;  %2052 = vmatprep.mubr.msk.bf16.mxu1 %vm2793_vm0, %v2792_v0 }
 0x727   : > { %2058 = vmatprep.subr.bf16.mxu0 %v2792_v0 }
 0x72b   : > { %2045 = vmatpush3.bf16.xpose.msra.mxu1 %v1344_v30 }
 0x72c   : > { %2046 = vmatprep.subr.bf16.mxu1 %v2792_v0 }
 0x733   : > { %2047 = vmatpush3.bf16.xpose.msra.mxu1 %v1347_v31 }
 0x734   : > { %2048 = vmatprep.subr.bf16.mxu1 %v2792_v0 }
 0x73b   : > { %2049 = vmatpush3.bf16.xpose.msra.mxu1 %v1350_v32 }
 0x73c   : > { %2050 = vmatprep.subr.bf16.mxu1 %v2792_v0 }
 0x743   : > { %2051 = vmatpush3.bf16.xpose.msra.mxu1 %v1353_v34 }
 0x74a   : > { %2053 = vmatmul.mubr.msk.bf16.vlgmr.msra.gmra.mrb[16].mxu1 %vm1077_vm2, %v1331_v27 }
 0x7f8   : > { %v1324_v35 = vpop.f32.mrb[12].mxu1 }
 0x7f9   : > { %v2042_v36 = vpop.f32.mrb[13].mxu1 }
 0x7fa   : > { %v1327_v37 = vpop.f32.mrb[14].mxu1 }
 0x7fb   : > { %v2043_v38 = vpop.f32.mrb[15].mxu1 }
 0x81d   : > { %v1389_v40 = vpop.f32.mrb[16].mxu1 }
 0x81e   : > { %v2054_v41 = vpop.f32.mrb[17].mxu1  ;;  %v1395_v42 = vsel %vm1133_vm3, %v1389_v40, -inf }
 0x81f   : > { %1396 = vmax.xlane.f32.xlu1 %v1395_v42  ;;  %v1392_v43 = vpop.f32.mrb[18].mxu1 }
 0x820   : > { %v2055_v46 = vpop.f32.mrb[19].mxu1 }
 0x830   : > { %1409 = vrot.lane.b32.xlu1 %v3466_v33, %s2795_s10 }
 0x834   : > { %1411 = vrot.lane.b32.xlu1 %v3476_v45, %s2795_s10 }
 0x838   : > { %1463 = vrot.lane.b32.xlu1 %v1324_v35, %s2796_s1 }
 0x8ac   : > { %v1397_v47 = vpop.xlane.xlu1 %1396 }
 0x8ad   : > { %v1398_v48 = vsub.f32 %v1389_v40, %v1397_v47 }
 0x8af   : > { %v1399_v49 = vmul.f32 1.442695, %v1398_v48 }
 0x8b0   : > { %v1410_v50 = vpop.permute.xlu1 %1409 }
 0x8b1   : > { %2270 = vpow2.f32 %v1399_v49  ;;  %2059 = vmatpush3.bf16.msra.mxu0 %v1410_v50 }
 0x8b2   : > { %2060 = vmatprep.subr.bf16.mxu0 %v2792_v0 }
 0x8b4   : > { %v1412_v51 = vpop.permute.xlu1 %1411 }
 0x8b5   : > { %2061 = vmatpush3.bf16.msra.mxu0 %v1412_v51 }
 0x8b6   : > { %2062 = vmatprep.subr.bf16.mxu0 %v2792_v0 }
 0x8b8   : > { %v1464_v2 = vpop.permute.xlu1 %1463 }
 0x8b9   : > { %v1470_v6 = vsel %vm1077_vm2, %v3499_v4, %v1464_v2 }
 0x8bb   : > { %v2271_v52 = vpop.eup %2270 }
 0x8bc   : > { %v1401_v33 = vsel %vm1133_vm3, %v2271_v52, 0.0 }
 0x8bd   : > { %1402 = vadd.xlane.f32.xlu0 %v1401_v33 }
 0x8d3   : > { %1413 = vrot.lane.b32.xlu0 %v3473_v44, %s2795_s10  ;;  %v1499_v44 = vsel %vm1497_vm4, %v2257_v60, 0 }
 0x94a   : > { %v1403_v45 = vpop.xlane.xlu0 %1402 }
 0x94b   : > { %2272 = vrcp.f32 %v1403_v45 }
 0x94e   : > { %v1414_v53 = vpop.permute.xlu0 %1413 }
 0x94f   : > { %2063 = vmatpush3.bf16.msra.mxu0 %v1414_v53 }
 0x950   : > { %2068 = vmatprep.subr.bf16.mxu0 %v2792_v0 }
 0x955   : > { %v2273_v54 = vpop.eup %2272 }
 0x956   : > { %v1405_v55 = vmul.f32 %v2273_v54, %v2271_v52 }
 0x958   : > { %v1406_v57 = vpack.c.bf16 %v1405_v55, %v1405_v55 }
 0x95a   : > { %2065 = vmatmul.mubr.msk.bf16.vlgmr.msra.gmra.mrb[20].mxu0 %vm1133_vm3, %v1406_v57 }
 0x95b   : > { %2072 = vmatprep.mubr.msk.bf16.mxu0 %vm2793_vm0, %v2792_v0  ;;  %2069 = vmatpush3.bf16.msra.mxu0 %v2256_v59 }
 0x95c   : > { %2070 = vmatprep.subr.bf16.mxu0 %v2792_v0 }
 0x95f   : > { %2071 = vmatpush3.bf16.msra.mxu0 %v1499_v44 }
 0xa2d   : > { %v1456_v61 = vpop.f32.mrb[20].mxu0 }
 0xa2e   : > { %1467 = vrot.lane.b32.xlu0 %v1456_v61, %s2797_s21  ;;  %v2066_v62 = vpop.f32.mrb[21].mxu0 }
 0xa2f   : > { %v1459_v63 = vpop.f32.mrb[22].mxu0 }
 0xa30   : > { %v2067_v1 = vpop.f32.mrb[23].mxu0 }
 0xaa0   : > { %v1468_v7 = vpop.permute.xlu0 %1467 }
 0xaa1   : > { %v1472_v8 = vsel %vm1471_vm5, %v1470_v6, %v1468_v7 }
 0xaa2   : > { %v1473_v9 = vpack.c.bf16 %v1472_v8, %v1472_v8 }
 0xaa4   : > { %2073 = vmatmul.mubr.msk.bf16.vlgmr.msra.gmra.mrb[24].mxu0 %vm1493_vm6, %v1473_v9 }
 0xb77   : > { %v1535_v0 = vpop.f32.mrb[24].mxu0 }
 0xb78   : > { %v1536_v12 = vadd.f32 %v1885_v10, %v1535_v0  ;;  %v2074_v15 = vpop.f32.mrb[25].mxu0 }
 0xb79   : > { %v1538_v18 = vpop.f32.mrb[26].mxu0 }
 0xb7a   : > { %v2075_v19 = vpop.f32.mrb[27].mxu0  ;;  %v1541_v20 = vadd.f32 %v1536_v12, %v732_v39  ;;  %v1889_v39 = vld [vmem:[#allocation22] ss:$0 sm:$0xff] }
 0xb7c   : > { %v1542_v21 = vsel %vm800_vm1, %v1541_v20, 0.0 }
 0xb7d   : > { %1543 = vadd.xlane.f32.xlu1 %v1542_v21 }
 0xc0a   : > { %v1544_v4 = vpop.xlane.xlu1 %1543 }
 0xc0b   : > { %v1546_v22 = vmul.f32 0.03125, %v1544_v4 }
 0xc0d   : > { %v1547_v3 = vsub.f32 %v1541_v20, %v1546_v22 }
 0xc0f   : > { %v1548_v23 = vmul.f32 %v1547_v3, %v1547_v3 }
 0xc11   : > { %v1549_v56 = vsel %vm800_vm1, %v1548_v23, 0.0 }
 0xc12   : > { %1550 = vadd.xlane.f32.xlu0 %v1549_v56 }
 0xc9f   : > { %v1551_v58 = vpop.xlane.xlu0 %1550 }
 0xca0   : > { %v1552_v13 = vmul.f32 0.03125, %v1551_v58 }
 0xca2   : > { %v1553_v24 = vadd.f32 1e-05, %v1552_v13 }
 0xca4   : > { %2274 = vrsqrt.f32 %v1553_v24 }
 0xcae   : > { %v2275_v29 = vpop.eup %2274 }
 0xcaf   : > { %v1555_v25 = vmul.f32 %v2275_v29, %v1547_v3 }
 0xcb1   : > { %v1563_v14 = vmul.f32 %v1889_v39, %v1555_v25 }
 0xcb3   : > { %v1571_v27 = vadd.f32 %v1890_v26, %v1563_v14 }
 0xcb5   : > { %1572 = vst.msk [vmem:[%s729_s6] sm:$0xff] %vm800_vm1, %v1571_v27 }
 0xcb6   : > { %2689 = shalt.err (!%p2686_p4)
}
 0xcb7   : > { %s2690_s24 = scalar_lea.hbm %s3565_s9, 128  ;;  %s2694_s4 = scalar_lea.hbm %s3731_s23, 256 }
 0xcb8   : > { %p2691_p12 = scmp.ne.s32.totalorder %s3565_s9, %s2690_s24  ;;  %p2695_p13 = scmp.lt.u32.totalorder %s3565_s9, %s3731_s23 }
 0xcb9   : > { %p2696_p3 = scmp.lt.u32.totalorder %s2694_s4, %s2690_s24  ;;  %p2698_p6 = scmp.lt.u32.totalorder %s2690_s24, %s3565_s9 }
 0xcba   : > { %p2692_p10 = pnand %p2691_p12, %p3732_p1 }
 0xcbb   : > { %p2697_p5 = por %p2696_p3, %p2695_p13 }
 0xcbc   : > { %p2693_p2 = pneg %p2692_p10 }
 0xcbd   : > { %p2699_p11 = por %p2698_p6, %p2697_p5 }
 0xcbf   : > { %p2700_p7 = pnand %p2699_p11, %p2693_p2 }
 0xcc1   : > { %2703 = shalt.err (!%p2700_p7)
}
 0xcc2   : > { %2124 = dma.vmem_to_hbm [thread:$0]  (%p3732_p1), %s3567_s5, 128, %s3565_s9, %s1574_s0  }
 0xcc3 PF: > { %s3733_s18 = sld [smem:[#allocation36_spill]]  ;;  %s3734_s17 = sld [smem:[#allocation42_spill]] }
 0xcc4   : > { %p3736_p0 = scmp.ge.s32.totalorder %s2774_s16, 2 }
 0xcc9   : > { %s1599_s10 = sand.u32 1, %s3733_s18   ;;  %p3735_p8 = scmp.ne.s32.totalorder %s3734_s17, 0 }
 0xcca   : > { %s1600_s1 = scalar_lea.sflag [#allocation4], %s1599_s10 }
 0xccb   : > { %p2171_p9 = pnand %p3736_p0, %p3735_p8 }
 0xccd   : > { %2757 = dma.done.wait (!%p2171_p9), %s1600_s1, 128  }
 0xcce   : > { %2759 = vsyncadd (!%p2171_p9), %s1600_s1, 4294967168  ;;  %s3737_s16 = sld [smem:[#allocation39_spill]]  ;;  %s3738_s21 = sld [smem:[#allocation37_spill]] }
 0xccf   : > { %s3739_s15 = sld [smem:[#allocation40_spill]]  ;;  %s3740_s29 = smov %s2766_s30 }
 0xcd4   : > { %p38_p4 = scmp.ge.s32.totalorder %s3737_s16, 4   ;;  %s3741_s30 = smov %s3738_s21 }
 0xcd6   :  { %40 = sbr.rel (!%p38_p4) target bundleno = 29 (0x1d), region = 198 }
 0xcdd   :  { %1605 = vsyncpa [#allocation3], 1 }
 0xcde   :  { %1607 = vsyncpa [#allocation3 + $0x1], 1 }
 0xcdf   :  { %1608 = vsyncpa [#allocation6], 1 }
 0xce0   :  { %1610 = vsyncpa [#allocation6 + $0x1], 1 }
 0xce1   :  { %1611 = vsyncpa [#allocation9], 1 }
 0xce2   :  { %1613 = vsyncpa [#allocation9 + $0x1], 1 }
 0xce3   :  { %1614 = vsyncpa [#allocation12], 1 }
 0xce4   :  { %1615 = vsyncpa [#allocation15], 1 }
 0xce5   :  { %1616 = vsyncpa [#allocation18], 1 }
 0xce6   :  { %1617 = vsyncpa [#allocation21], 1 }
 0xce7   :  { %1618 = vsyncpa [#allocation24], 1 }
 0xce8   :  { %1619 = vsyncpa [#allocation4], 1 }
 0xce9   :  { %1621 = vsyncpa [#allocation4 + $0x1], 1 }

// kernel: two_way_transformer.2
= control target key start
LH: loop header
LB: loop body
LE: loop exit
PB: predicated region body
PF: predicated region fallthrough
CT: control target
= control target key end

     0   :  { %s9094_s6 = smov 1   ;;  %s9095_s10 = smov 2   ;;  %s11640_s0 = inlined_call_operand.smem [shape: u32[41], index: -1, kind: input, shape index: {}] }
   0x1   :  { %s9195_s5 = sld [smem:[%s11640_s0]]   ;;  %s9096_s14 = smov 3  }
   0x2   :  { %s9200_s9 = sld [smem:[%s11640_s0 + %s9094_s6]]   ;;  %s9097_s18 = smov 4  }
   0x3   :  { %s9205_s13 = sld [smem:[%s11640_s0 + %s9095_s10]]   ;;  %s9098_s22 = smov 5  }
   0x4   :  { %s9210_s17 = sld [smem:[%s11640_s0 + %s9096_s14]]   ;;  %s9099_s26 = smov 6  }
   0x5   :  { %s9215_s21 = sld [smem:[%s11640_s0 + %s9097_s18]]   ;;  %s9100_s30 = smov 7  }
   0x6   :  { %s9220_s25 = sld [smem:[%s11640_s0 + %s9098_s22]]   ;;  %s9101_s4 = smov 8  }
   0x7   :  { %11754 = sst [smem:[#allocation89_spill]] %s9195_s5  ;;  %s9102_s10 = smov 9  }
   0x8   :  { %11755 = sst [smem:[#allocation90_spill]] %s9200_s9  ;;  %s9103_s15 = smov 10  }
   0x9   :  { %11756 = sst [smem:[#allocation91_spill]] %s9205_s13  ;;  %s9104_s20 = smov 11  }
   0xa   :  { %11757 = sst [smem:[#allocation92_spill]] %s9210_s17  ;;  %s9106_s1 = smov 13  }
   0xb   :  { %11758 = sst [smem:[#allocation93_spill]] %s9215_s21  ;;  %s9107_s7 = smov 14  }
   0xc   :  { %11759 = sst [smem:[#allocation94_spill]] %s9220_s25  ;;  %s9109_s22 = smov 16  }
   0xd   :  { %s9225_s29 = sld [smem:[%s11640_s0 + %s9099_s26]]   ;;  %s9105_s26 = smov 12  }
   0xe   :  { %s9230_s3 = sld [smem:[%s11640_s0 + %s9100_s30]]   ;;  %s9110_s28 = smov 17  }
   0xf   :  { %s9235_s8 = sld [smem:[%s11640_s0 + %s9101_s4]]  }
  0x10   :  { %s9240_s14 = sld [smem:[%s11640_s0 + %s9102_s10]]  }
  0x11   :  { %s9245_s19 = sld [smem:[%s11640_s0 + %s9103_s15]]   ;;  %s9108_s15 = smov 15  }
  0x12   :  { %s9250_s24 = sld [smem:[%s11640_s0 + %s9104_s20]]  }
  0x13   :  { %11760 = sst [smem:[#allocation95_spill]] %s9225_s29 }
  0x14   :  { %11761 = sst [smem:[#allocation96_spill]] %s9230_s3 }
  0x15   :  { %11762 = sst [smem:[#allocation97_spill]] %s9235_s8 }
  0x16   :  { %11763 = sst [smem:[#allocation98_spill]] %s9240_s14 }
  0x17   :  { %11764 = sst [smem:[#allocation99_spill]] %s9245_s19 }
  0x18   :  { %s9255_s30 = sld [smem:[%s11640_s0 + %s9105_s26]]  }
  0x19   :  { %s9260_s6 = sld [smem:[%s11640_s0 + %s9106_s1]]  }
  0x1a   :  { %s9265_s12 = sld [smem:[%s11640_s0 + %s9107_s7]]   ;;  %s9111_s7 = smov 18  }
  0x1b   :  { %s9270_s20 = sld [smem:[%s11640_s0 + %s9108_s15]]   ;;  %s9112_s15 = smov 19  }
  0x1c   :  { %s9275_s27 = sld [smem:[%s11640_s0 + %s9109_s22]]   ;;  %s9113_s22 = smov 20  }
  0x1d   :  { %s9280_s4 = sld [smem:[%s11640_s0 + %s9110_s28]]   ;;  %s9114_s28 = smov 21  }
  0x1e   :  { %11765 = sst [smem:[#allocation100_spill]] %s9255_s30 }
  0x1f   :  { %11766 = sst [smem:[#allocation101_spill]] %s9260_s6 }
  0x20   :  { %11767 = sst [smem:[#allocation102_spill]] %s9265_s12 }
  0x21   :  { %11768 = sst [smem:[#allocation103_spill]] %s9270_s20 }
  0x22   :  { %11769 = sst [smem:[#allocation104_spill]] %s9275_s27 }
  0x23   :  { %11770 = sst [smem:[#allocation105_spill]] %s9280_s4 }
  0x24   :  { %s9285_s12 = sld [smem:[%s11640_s0 + %s9111_s7]]   ;;  %s9115_s7 = smov 22  }
  0x25   :  { %s9290_s30 = sld [smem:[%s11640_s0 + %s9112_s15]]   ;;  %s9116_s15 = smov 23  }
  0x26   :  { %s9295_s27 = sld [smem:[%s11640_s0 + %s9113_s22]]   ;;  %s9117_s22 = smov 24  }
  0x27   :  { %s9300_s19 = sld [smem:[%s11640_s0 + %s9114_s28]]   ;;  %s9118_s28 = smov 25  }
  0x28   :  { %s9310_s8 = sld [smem:[%s11640_s0 + %s9116_s15]]   ;;  %s9120_s15 = smov 27  }
  0x29   :  { %s9320_s29 = sld [smem:[%s11640_s0 + %s9118_s28]]   ;;  %s9122_s28 = smov 29  }
  0x2a   :  { %11771 = sst [smem:[#allocation106_spill]] %s9285_s12 }
  0x2b   :  { %11772 = sst [smem:[#allocation107_spill]] %s9290_s30 }
  0x2c   :  { %11773 = sst [smem:[#allocation108_spill]] %s9295_s27 }
  0x2d   :  { %11774 = sst [smem:[#allocation109_spill]] %s9300_s19 }
  0x2e   :  { %s9305_s12 = sld [smem:[%s11640_s0 + %s9115_s7]]   ;;  %s9119_s7 = smov 26  }
  0x2f   :  { %11776 = sst [smem:[#allocation111_spill]] %s9310_s8 }
  0x30   :  { %s9315_s27 = sld [smem:[%s11640_s0 + %s9117_s22]]   ;;  %s9121_s22 = smov 28  }
  0x31   :  { %11778 = sst [smem:[#allocation113_spill]] %s9320_s29 }
  0x32   :  { %s9330_s21 = sld [smem:[%s11640_s0 + %s9120_s15]]   ;;  %s9124_s15 = smov 31  }
  0x33   :  { %s9340_s5 = sld [smem:[%s11640_s0 + %s9122_s28]]   ;;  %s9126_s28 = smov 33  }
  0x34   :  { %11775 = sst [smem:[#allocation110_spill]] %s9305_s12 }
  0x35   :  { %s9325_s12 = sld [smem:[%s11640_s0 + %s9119_s7]]   ;;  %s9123_s7 = smov 30  }
  0x36   :  { %11777 = sst [smem:[#allocation112_spill]] %s9315_s27 }
  0x37   :  { %s9335_s27 = sld [smem:[%s11640_s0 + %s9121_s22]]   ;;  %s9125_s22 = smov 32  }
  0x38   :  { %11780 = sst [smem:[#allocation115_spill]] %s9330_s21 }
  0x39   :  { %11782 = sst [smem:[#allocation117_spill]] %s9340_s5 }
  0x3a   :  { %s9350_s21 = sld [smem:[%s11640_s0 + %s9124_s15]]   ;;  %s9128_s15 = smov 35  }
  0x3b   :  { %11779 = sst [smem:[#allocation114_spill]] %s9325_s12 }
  0x3c   :  { %s9345_s12 = sld [smem:[%s11640_s0 + %s9123_s7]]   ;;  %s9127_s7 = smov 34  }
  0x3d   :  { %11781 = sst [smem:[#allocation116_spill]] %s9335_s27 }
  0x3e   :  { %s9355_s27 = sld [smem:[%s11640_s0 + %s9125_s22]]   ;;  %s9129_s22 = smov 36  }
  0x3f   :  { %s9360_s5 = sld [smem:[%s11640_s0 + %s9126_s28]]   ;;  %s9130_s28 = smov 37  }
  0x40   :  { %11784 = sst [smem:[#allocation119_spill]] %s9350_s21 }
  0x41   :  { %s9370_s21 = sld [smem:[%s11640_s0 + %s9128_s15]]   ;;  %s9132_s15 = smov 39  }
  0x42   :  { %11783 = sst [smem:[#allocation118_spill]] %s9345_s12 }
  0x43   :  { %s9365_s12 = sld [smem:[%s11640_s0 + %s9127_s7]]   ;;  %s9131_s7 = smov 38  }
  0x44   :  { %11785 = sst [smem:[#allocation120_spill]] %s9355_s27 }
  0x45   :  { %11786 = sst [smem:[#allocation121_spill]] %s9360_s5 }
  0x46   :  { %s9375_s27 = sld [smem:[%s11640_s0 + %s9129_s22]]   ;;  %s9133_s22 = smov 40  }
  0x47   :  { %11788 = sst [smem:[#allocation123_spill]] %s9370_s21 }
  0x48   :  { %s9380_s5 = sld [smem:[%s11640_s0 + %s9130_s28]]  }
  0x49   :  { %11787 = sst [smem:[#allocation122_spill]] %s9365_s12 }
  0x4a   :  { %s9385_s12 = sld [smem:[%s11640_s0 + %s9131_s7]]  }
  0x4b   :  { %s9390_s21 = sld [smem:[%s11640_s0 + %s9132_s15]]  }
  0x4c   :  { %11789 = sst [smem:[#allocation124_spill]] %s9375_s27 }
  0x4d   :  { %s9395_s27 = sld [smem:[%s11640_s0 + %s9133_s22]]  }
  0x4e   :  { %11790 = sst [smem:[#allocation125_spill]] %s9380_s5 }
  0x50   :  { %11791 = sst [smem:[#allocation126_spill]] %s9385_s12 }
  0x51   :  { %11792 = sst [smem:[#allocation127_spill]] %s9390_s21 }
  0x53   :  { %11793 = sst [smem:[#allocation128_spill]] %s9395_s27 }
  0x54   :  { %87 = vsyncpa [#allocation5], 0 }
  0x55   :  { %89 = vsyncpa [#allocation5 + $0x1], 0 }
  0x56   :  { %90 = vsyncpa [#allocation8], 0 }
  0x57   :  { %92 = vsyncpa [#allocation8 + $0x1], 0 }
  0x58   :  { %93 = vsyncpa [#allocation11], 0 }
  0x59   :  { %95 = vsyncpa [#allocation11 + $0x1], 0 }
  0x5a   :  { %96 = vsyncpa [#allocation14], 0 }
  0x5b   :  { %98 = vsyncpa [#allocation14 + $0x1], 0 }
  0x5c   :  { %99 = vsyncpa [#allocation17], 0 }
  0x5d   :  { %101 = vsyncpa [#allocation17 + $0x1], 0 }
  0x5e   :  { %102 = vsyncpa [#allocation20], 0 }
  0x5f   :  { %104 = vsyncpa [#allocation20 + $0x1], 0 }
  0x60   :  { %105 = vsyncpa [#allocation23], 0 }
  0x61   :  { %107 = vsyncpa [#allocation23 + $0x1], 0 }
  0x62   :  { %108 = vsyncpa [#allocation26], 0 }
  0x63   :  { %110 = vsyncpa [#allocation26 + $0x1], 0 }
  0x64   :  { %111 = vsyncpa [#allocation29], 0 }
  0x65   :  { %113 = vsyncpa [#allocation29 + $0x1], 0 }
  0x66   :  { %114 = vsyncpa [#allocation32], 0 }
  0x67   :  { %116 = vsyncpa [#allocation32 + $0x1], 0 }
  0x68   :  { %117 = vsyncpa [#allocation35], 0 }
  0x69   :  { %119 = vsyncpa [#allocation35 + $0x1], 0 }
  0x6a   :  { %120 = vsyncpa [#allocation38], 0 }
  0x6b   :  { %122 = vsyncpa [#allocation38 + $0x1], 0 }
  0x6c   :  { %123 = vsyncpa [#allocation41], 0 }
  0x6d   :  { %125 = vsyncpa [#allocation41 + $0x1], 0 }
  0x6e   :  { %126 = vsyncpa [#allocation44], 0 }
  0x6f   :  { %128 = vsyncpa [#allocation44 + $0x1], 0 }
  0x70   :  { %129 = vsyncpa [#allocation47], 0 }
  0x71   :  { %131 = vsyncpa [#allocation47 + $0x1], 0 }
  0x72   :  { %132 = vsyncpa [#allocation50], 0 }
  0x73   :  { %134 = vsyncpa [#allocation50 + $0x1], 0 }
  0x74   :  { %135 = vsyncpa [#allocation53], 0 }
  0x75   :  { %137 = vsyncpa [#allocation53 + $0x1], 0 }
  0x76   :  { %138 = vsyncpa [#allocation56], 0 }
  0x77   :  { %140 = vsyncpa [#allocation56 + $0x1], 0 }
  0x78   :  { %141 = vsyncpa [#allocation59], 0 }
  0x79   :  { %143 = vsyncpa [#allocation59 + $0x1], 0 }
  0x7a   :  { %144 = vsyncpa [#allocation62], 0 }
  0x7b   :  { %146 = vsyncpa [#allocation62 + $0x1], 0 }
  0x7c   :  { %147 = vsyncpa [#allocation6], 0 }
  0x7d   :  { %149 = vsyncpa [#allocation6 + $0x1], 0 }
  0x7e   :  { %150 = vsyncpa [#allocation66], 0 }
  0x7f   :  { %152 = vsyncpa [#allocation66 + $0x1], 0  ;;  %s9397_s0 = smov 0   ;;  %s9399_s28 = smov 0  }
  0x80   :  { %s9401_s1 = smov 0   ;;  %s9403_s2 = smov 0  }
  0x81   :  { %s9405_s7 = smov 0   ;;  %s9407_s10 = smov 0  }
  0x82   :  { %s9409_s11 = smov 0   ;;  %s9411_s15 = smov 0  }
  0x83   :  { %s9413_s16 = smov 0   ;;  %s9415_s18 = smov 0  }
  0x84   :  { %s9417_s22 = smov 0  }
  0x85 LB: > { %s11794_s13 = sld [smem:[#allocation91_spill]]  ;;  %s11795_s20 = sld [smem:[#allocation103_spill]]  ;;  %s9080_s15 = sphi %s9411_s15, %s11959_s15   ;;  %s9076_s11 = sphi %s9409_s11, %s11958_s11   ;;  %s9072_s10 = sphi %s9407_s10, %s11953_s10   ;;  %s9068_s7 = sphi %s9405_s7, %s11957_s7   ;;  %s9064_s2 = sphi %s9403_s2, %s11956_s2   ;;  %s9060_s1 = sphi %s9401_s1, %s11951_s1   ;;  %s9056_s28 = sphi %s9399_s28, %s11950_s28   ;;  %s9052_s0 = sphi %s9397_s0, %s11949_s0   ;;  %s9092_s22 = sphi %s9417_s22, %s158_s22   ;;  %s9088_s18 = sphi %s9415_s18, %s11961_s18   ;;  %s9084_s16 = sphi %s9413_s16, %s11960_s16  }
  0x86   : > { %s11796_s14 = sld [smem:[#allocation98_spill]]  ;;  %s11797_s6 = sld [smem:[#allocation101_spill]] }
  0x87   : > { %s11798_s3 = sld [smem:[#allocation96_spill]]  ;;  %s11799_s25 = sld [smem:[#allocation94_spill]] }
  0x88   : > { %s11800_s17 = sld [smem:[#allocation92_spill]]  ;;  %s11801_s9 = sld [smem:[#allocation90_spill]] }
  0x89   : > { %11802 = sst [smem:[#allocation129_spill]] %s9056_s28  ;;  %s9453_s23 = sadd.s32 4294967295, %s9092_s22  }
  0x8a   : > { %11803 = sst [smem:[#allocation130_spill]] %s9060_s1  ;;  %s6595_s26 = sadd.s32 4294967294, %s9092_s22  }
  0x8b   : > { %11804 = sst [smem:[#allocation131_spill]] %s9064_s2  ;;  %s167_s27 = sadd.s32 1, %s9084_s16 }
  0x8c   : > { %11805 = sst [smem:[#allocation132_spill]] %s9072_s10  ;;  %s170_s21 = sadd.s32 1, %s9088_s18 }
  0x8d   : > { %11806 = sst [smem:[#allocation133_spill]] %s9076_s11  ;;  %p168_p0 = scmp.ge.s32.totalorder %s167_s27, 2 }
  0x8e   : > { %11807 = sst [smem:[#allocation134_spill]] %s9080_s15  ;;  %s177_s15 = sadd.s32 1, %s9072_s10 }
  0x8f   : > { %11808 = sst [smem:[#allocation135_spill]] %s9453_s23  ;;  %p184_p1 = scmp.ne.s32.totalorder %s9072_s10, %s9068_s7 }
  0x90   : > { %p185_p2 = scmp.eq.s32.totalorder %s9092_s22, 0  ;;  %s11963_s27 = smov (%p168_p0, %s167_s27), 0 }
  0x91   : > { %11809 = sst [smem:[#allocation136_spill]] %s11963_s27  ;;  %s11965_s21 = smov (!%p168_p0, %s170_s21), %s9088_s18 }
  0x92   : > { %p9470_p3 = por %p185_p2, %p184_p1  ;;  %p11676_p4 = scmp.ne.s32.totalorder %s9068_s7, %s9064_s2 }
  0x93   : > { %p172_p5 = scmp.ge.s32.totalorder %s11965_s21, 2  ;;  %p191_p6 = scmp.eq.s32.totalorder %s9453_s23, 0 }
  0x94   : > { %s11810_s11 = scalar_select %p9470_p3, 1, 0 }
  0x95   : > { %s252_s12 = ssub.s32 %s9084_s16, %s11963_s27  ;;  %s255_s5 = sadd.s32 1, %s9060_s1 }
  0x96   : > { %s11967_s21 = smov (%p172_p5, %s11965_s21), 0  ;;  %p9487_p7 = por %p191_p6, %p11676_p4 }
  0x97   : > { %11811 = sst [smem:[#allocation137_spill]] %s11967_s21  ;;  %p253_p8 = scmp.eq.s32.totalorder %s252_s12, 0 }
  0x98   : > { %s11812_s29 = scalar_select %p9487_p7, 1, 0 }
  0x99   : > { %s174_s8 = ssub.s32 %s9088_s18, %s11967_s21  ;;  %p262_p9 = scmp.ne.s32.totalorder %s9060_s1, %s9056_s28 }
  0x9a   : > { %11813 = sst [smem:[#allocation138_spill]] %s11812_s29  ;;  %p175_p10 = scmp.eq.s32.totalorder %s174_s8, 0 }
  0x9b   : > { %p268_p11 = scmp.ne.s32.totalorder %s9056_s28, %s9052_s0  ;;  %p9505_p12 = por %p262_p9, %p185_p2 }
  0x9c   : > { %s9498_s19 = scalar_select %p253_p8, %s9060_s1, %s255_s5  }
  0x9d   : > { %s9501_s27 = scalar_select %p175_p10, %s9072_s10, %s177_s15  }
  0x9e   : > { %11814 = sst [smem:[#allocation139_spill]] %s9498_s19  ;;  %p9511_p13 = por %p268_p11, %p191_p6 }
  0x9f   : > { %11815 = sst [smem:[#allocation140_spill]] %s9501_s27  ;;  %p1202_p0 = scmp.eq.s32.totalorder %s9453_s23, 3 }
  0xa0   : > { %s11817_s4 = scalar_select %p9511_p13, 1, 0 }
  0xa1   : > { %p1208_p5 = scmp.eq.s32.totalorder %s6595_s26, 3  ;;  %p9519_p4 = por %p1202_p0, %p184_p1 }
  0xa2   : > { %11818 = sst [smem:[#allocation141_spill]] %s11817_s4  ;;  %p11821_p8 = scmp.ne.s32.totalorder %s9068_s7, %s9064_s2 }
  0xa3   : > { %s11819_s8 = scalar_select %p9519_p4, 1, 0 }
  0xa4   : > { %p9526_p10 = por %p1208_p5, %p11821_p8  ;;  %p6597_p2 = scmp.ge.s32.totalorder %s9092_s22, 4 }
  0xa5   : > { %11820 = sst [smem:[#allocation142_spill]] %s11819_s8  ;;  %s9532_s12 = sand.u32 (!%p6597_p2), 1, %s9072_s10  }
  0xa6   : > { %s11822_s5 = scalar_select %p9526_p10, 1, 0 }
  0xa7   : > { %1250 = sbr.rel (%p6597_p2) target bundleno = 1157 (0x485), region = 16  ;;  %s9535_s0 = sand.u32 (!%p6597_p2), 1, %s9092_s22  }
  0xa8   : > { %11823 = sst [smem:[#allocation143_spill]] %s11822_s5  ;;  %s11684_s15 = sshll.u32 (!%p6597_p2), %s9532_s12, 5 }
  0xa9   : > { %s11685_s26 = sshll.u32 (!%p6597_p2), %s9088_s18, 9  ;;  %s1276_s27 = scalar_lea.vmem (!%p6597_p2), [#allocation7], %s11684_s15 }
  0xaa   : > { %s9542_s21 = scalar_lea.hbm (!%p6597_p2), %s11801_s9, %s11685_s26  ;;  %s1283_s19 = sshll.u32 (!%p6597_p2), %s1276_s27, 4  ;;  %s9546_s19 = int_to_ptr.vmem [resolvable:$true] %s1283_s19 }
  0xab   : > { %s7770_s5 = scalar_lea.hbm (!%p6597_p2), %s9542_s21, 512  ;;  %s7774_s2 = scalar_lea.hbm (!%p6597_p2), %s11801_s9, 1024 }
  0xac   : > { %p7771_p1 = scmp.ne.s32.totalorder (!%p6597_p2), %s9542_s21, %s7770_s5  ;;  %p7775_p11 = scmp.lt.u32.totalorder (!%p6597_p2), %s9542_s21, %s11801_s9 }
  0xad   : > { %p7776_p0 = scmp.lt.u32.totalorder (!%p6597_p2), %s7774_s2, %s7770_s5  ;;  %p7778_p8 = scmp.lt.u32.totalorder (!%p6597_p2), %s7770_s5, %s9542_s21 }
  0xae   : > { %p7772_p6 = pnand %p7771_p1, %p9470_p3 }
  0xaf   : > { %p7777_p5 = por %p7776_p0, %p7775_p11 }
  0xb0   : > { %p7773_p9 = pneg %p7772_p6 }
  0xb1   : > { %p7779_p2 = por %p7778_p8, %p7777_p5 }
  0xb3   : > { %p7780_p10 = pnand %p7779_p2, %p7773_p9 }
  0xb5   : > { %7783 = shalt.err (!%p7780_p10)
}
  0xb6   : > { %s7784_s27 = scalar_lea.vmem %s9546_s19, 512  ;;  %s9134_s15 = smov [#allocation7]  }
  0xb7   : > { %p7785_p4 = scmp.ne.s32.totalorder %s9546_s19, %s7784_s27  ;;  %s7788_s26 = sshll.u32 %s9134_s15, 4  ;;  %s7789_s26 = int_to_ptr.vmem [resolvable:$false] %s7788_s26 }
  0xb8   : > { %s7790_s10 = scalar_lea.vmem %s7789_s26, 1024  ;;  %p7791_p1 = scmp.lt.s32.totalorder %s9546_s19, %s7789_s26 }
  0xb9   : > { %p7786_p13 = pnand %p7785_p4, %p9470_p3  ;;  %p7792_p6 = scmp.lt.s32.totalorder %s7790_s10, %s7784_s27 }
  0xbb   : > { %p7787_p7 = pneg %p7786_p13  ;;  %p7793_p11 = por %p7792_p6, %p7791_p1 }
  0xbd   : > { %p7794_p0 = pnand %p7793_p11, %p7787_p7 }
  0xbf   : > { %7797 = shalt.err (!%p7794_p0)
}
  0xc0   : > { %s11693_s2 = smov 64   ;;  %s11695_s5 = smov 4  }
  0xc1   : > { %s11824_s10 = scalar_lea.sflag [#allocation8], %s9535_s0  ;;  %s11825_s15 = sshll.u32 %s9088_s18, 9 }
  0xc2   : > { %7320 = dma.hbm_to_vmem [thread:$0]  (%p9470_p3), %s9542_s21, 512, %s9546_s19, %s11824_s10, %s11693_s2, %s11693_s2, %s11695_s5  }
  0xc3   : > { %s9574_s26 = scalar_lea.hbm %s11794_s13, %s11825_s15  ;;  %s11826_s27 = sshll.u32 %s9532_s12, 5 }
  0xc4   : > { %s9578_s9 = scalar_lea.vmem [#allocation9], %s11826_s27  ;;  %s9582_s4 = sand.u32 1, %s9060_s1  }
  0xc5   : > { %s9585_s28 = sshll.u32 %s9582_s4, 4  ;;  %s9588_s23 = sshll.u32 %s9084_s16, 8 }
  0xc6   : > { %s9592_s21 = scalar_lea.hbm %s11800_s17, %s9588_s23  ;;  %s1318_s19 = scalar_lea.vmem [#allocation10], %s9585_s28 }
  0xc7   : > { %s1325_s10 = sshll.u32 %s1318_s19, 4  ;;  %s7798_s27 = scalar_lea.hbm %s9592_s21, 256  ;;  %s9595_s10 = int_to_ptr.vmem [resolvable:$true] %s1325_s10 }
  0xc8   : > { %p7799_p4 = scmp.ne.s32.totalorder %s9592_s21, %s7798_s27  ;;  %s7802_s8 = scalar_lea.hbm %s11800_s17, 512 }
  0xc9   : > { %p7803_p10 = scmp.lt.u32.totalorder %s9592_s21, %s11800_s17  ;;  %p7804_p9 = scmp.lt.u32.totalorder %s7802_s8, %s7798_s27 }
  0xca   : > { %p7800_p7 = pnand %p7799_p4, %p9505_p12  ;;  %p7806_p8 = scmp.lt.u32.totalorder %s7798_s27, %s9592_s21 }
  0xcb   : > { %p7805_p5 = por %p7804_p9, %p7803_p10 }
  0xcc   : > { %p7801_p13 = pneg %p7800_p7 }
  0xcd   : > { %p7807_p2 = por %p7806_p8, %p7805_p5 }
  0xcf   : > { %p7808_p1 = pnand %p7807_p2, %p7801_p13 }
  0xd1   : > { %7811 = shalt.err (!%p7808_p1)
}
  0xd2   : > { %s7812_s19 = scalar_lea.vmem %s9595_s10, 256  ;;  %s9137_s15 = smov [#allocation10]  }
  0xd3   : > { %p7813_p6 = scmp.ne.s32.totalorder %s9595_s10, %s7812_s19  ;;  %s7816_s2 = sshll.u32 %s9137_s15, 4  ;;  %s7817_s2 = int_to_ptr.vmem [resolvable:$false] %s7816_s2 }
  0xd4   : > { %s7818_s5 = scalar_lea.vmem %s7817_s2, 512  ;;  %p7819_p4 = scmp.lt.s32.totalorder %s9595_s10, %s7817_s2 }
  0xd5   : > { %p7814_p11 = pnand %p7813_p6, %p9505_p12  ;;  %p7820_p7 = scmp.lt.s32.totalorder %s7818_s5, %s7812_s19 }
  0xd7   : > { %p7815_p0 = pneg %p7814_p11  ;;  %p7821_p10 = por %p7820_p7, %p7819_p4 }
  0xd9   : > { %p7822_p9 = pnand %p7821_p10, %p7815_p0 }
  0xdb   : > { %7825 = shalt.err (!%p7822_p9)
}
  0xdc   : > { %s11827_s8 = smov 4   ;;  %s11828_s27 = smov 64  }
  0xdd   : > { %s11829_s17 = scalar_lea.sflag [#allocation11], %s9535_s0  ;;  %s9622_s2 = scalar_lea.hbm %s11799_s25, %s9588_s23 }
  0xde   : > { %7322 = dma.hbm_to_vmem [thread:$0]  (%p9505_p12), %s9592_s21, 256, %s9595_s10, %s11829_s17, %s11828_s27, %s11828_s27, %s11827_s8  }
  0xdf   : > { %s1356_s5 = scalar_lea.vmem [#allocation13], %s9585_s28  ;;  %s11702_s19 = scalar_lea.sflag [#allocation14], %s9535_s0 }
  0xe0   : > { %s1363_s15 = sshll.u32 %s1356_s5, 4  ;;  %s7826_s1 = scalar_lea.hbm %s9622_s2, 256  ;;  %s9625_s15 = int_to_ptr.vmem [resolvable:$true] %s1363_s15 }
  0xe1   : > { %p7827_p13 = scmp.ne.s32.totalorder %s9622_s2, %s7826_s1  ;;  %s7830_s29 = scalar_lea.hbm %s11799_s25, 512 }
  0xe2   : > { %p7831_p2 = scmp.lt.u32.totalorder %s9622_s2, %s11799_s25  ;;  %p7832_p1 = scmp.lt.u32.totalorder %s7830_s29, %s7826_s1 }
  0xe3   : > { %p7828_p5 = pnand %p7827_p13, %p9505_p12  ;;  %p7834_p11 = scmp.lt.u32.totalorder %s7826_s1, %s9622_s2 }
  0xe4   : > { %p7833_p6 = por %p7832_p1, %p7831_p2 }
  0xe5   : > { %p7829_p8 = pneg %p7828_p5 }
  0xe6   : > { %p7835_p0 = por %p7834_p11, %p7833_p6 }
  0xe8   : > { %p7836_p4 = pnand %p7835_p0, %p7829_p8 }
  0xea   : > { %7839 = shalt.err (!%p7836_p4)
}
  0xeb   : > { %s7840_s17 = scalar_lea.vmem %s9625_s15, 256  ;;  %s9138_s21 = smov [#allocation13]  }
  0xec   : > { %p7841_p7 = scmp.ne.s32.totalorder %s9625_s15, %s7840_s17  ;;  %s7844_s10 = sshll.u32 %s9138_s21, 4  ;;  %s7845_s10 = int_to_ptr.vmem [resolvable:$false] %s7844_s10 }
  0xed   : > { %s7846_s5 = scalar_lea.vmem %s7845_s10, 512  ;;  %p7847_p13 = scmp.lt.s32.totalorder %s9625_s15, %s7845_s10 }
  0xee   : > { %p7842_p10 = pnand %p7841_p7, %p9505_p12  ;;  %p7848_p5 = scmp.lt.s32.totalorder %s7846_s5, %s7840_s17 }
  0xf0   : > { %p7843_p9 = pneg %p7842_p10  ;;  %p7849_p2 = por %p7848_p5, %p7847_p13 }
  0xf2   : > { %p7850_p1 = pnand %p7849_p2, %p7843_p9 }
  0xf4   : > { %7853 = shalt.err (!%p7850_p1)
}
  0xf5   : > { %7324 = dma.hbm_to_vmem [thread:$0]  (%p9505_p12), %s9622_s2, 256, %s9625_s15, %s11702_s19, %s11828_s27, %s11828_s27, %s11827_s8  }
  0xf6   : > { %s9652_s29 = scalar_lea.hbm %s11798_s3, %s9588_s23  ;;  %s1394_s1 = scalar_lea.vmem [#allocation16], %s9585_s28 }
  0xf7   : > { %s1401_s17 = sshll.u32 %s1394_s1, 4  ;;  %s7311_s21 = smul.u32 24, %s9582_s4  ;;  %s9655_s17 = int_to_ptr.vmem [resolvable:$true] %s1401_s17 }
  0xf8   : > { %s11707_s10 = scalar_lea.sflag [#allocation17], %s9535_s0  ;;  %s7854_s5 = scalar_lea.hbm %s9652_s29, 256 }
  0xf9   : > { %p7855_p8 = scmp.ne.s32.totalorder %s9652_s29, %s7854_s5  ;;  %s7858_s25 = scalar_lea.hbm %s11798_s3, 512 }
  0xfa   : > { %p7859_p0 = scmp.lt.u32.totalorder %s9652_s29, %s11798_s3  ;;  %p7860_p4 = scmp.lt.u32.totalorder %s7858_s25, %s7854_s5 }
  0xfb   : > { %p7856_p6 = pnand %p7855_p8, %p9505_p12  ;;  %p7862_p10 = scmp.lt.u32.totalorder %s7854_s5, %s9652_s29 }
  0xfc   : > { %p7861_p7 = por %p7860_p4, %p7859_p0 }
  0xfd   : > { %p7857_p11 = pneg %p7856_p6 }
  0xfe   : > { %p7863_p9 = por %p7862_p10, %p7861_p7 }
 0x100   : > { %p7864_p13 = pnand %p7863_p9, %p7857_p11 }
 0x102   : > { %7867 = shalt.err (!%p7864_p13)
}
 0x103   : > { %s7868_s2 = scalar_lea.vmem %s9655_s17, 256  ;;  %s9139_s15 = smov [#allocation16]  }
 0x104   : > { %p7869_p5 = scmp.ne.s32.totalorder %s9655_s17, %s7868_s2  ;;  %s7872_s1 = sshll.u32 %s9139_s15, 4  ;;  %s7873_s1 = int_to_ptr.vmem [resolvable:$false] %s7872_s1 }
 0x105   : > { %s7874_s19 = scalar_lea.vmem %s7873_s1, 512  ;;  %p7875_p8 = scmp.lt.s32.totalorder %s9655_s17, %s7873_s1 }
 0x106   : > { %p7870_p2 = pnand %p7869_p5, %p9505_p12  ;;  %p7876_p6 = scmp.lt.s32.totalorder %s7874_s19, %s7868_s2 }
 0x108   : > { %p7871_p1 = pneg %p7870_p2  ;;  %p7877_p0 = por %p7876_p6, %p7875_p8 }
 0x10a   : > { %p7878_p4 = pnand %p7877_p0, %p7871_p1 }
 0x10c   : > { %7881 = shalt.err (!%p7878_p4)
}
 0x10d   : > { %7326 = dma.hbm_to_vmem [thread:$0]  (%p9505_p12), %s9652_s29, 256, %s9655_s17, %s11707_s10, %s11828_s27, %s11828_s27, %s11827_s8  }
 0x10e   : > { %s7312_s25 = smul.u32 384, %s9084_s16  ;;  %s1432_s19 = scalar_lea.vmem [#allocation19], %s7311_s21 }
 0x10f   : > { %s1439_s5 = sshll.u32 %s1432_s19, 4  ;;  %s11705_s15 = scalar_lea.sflag [#allocation20], %s9535_s0  ;;  %s9687_s5 = int_to_ptr.vmem [resolvable:$true] %s1439_s5 }
 0x110   : > { %s9685_s2 = scalar_lea.hbm %s11796_s14, %s7312_s25  ;;  %s7886_s3 = scalar_lea.hbm %s11796_s14, 768 }
 0x111   : > { %s7882_s1 = scalar_lea.hbm %s9685_s2, 384  ;;  %p7887_p9 = scmp.lt.u32.totalorder %s9685_s2, %s11796_s14 }
 0x112   : > { %p7883_p11 = scmp.ne.s32.totalorder %s9685_s2, %s7882_s1  ;;  %p7888_p13 = scmp.lt.u32.totalorder %s7886_s3, %s7882_s1 }
 0x113   : > { %p7890_p2 = scmp.lt.u32.totalorder %s7882_s1, %s9685_s2 }
 0x114   : > { %p7884_p7 = pnand %p7883_p11, %p9505_p12  ;;  %p7889_p5 = por %p7888_p13, %p7887_p9 }
 0x116   : > { %p7885_p10 = pneg %p7884_p7  ;;  %p7891_p1 = por %p7890_p2, %p7889_p5 }
 0x118   : > { %p7892_p8 = pnand %p7891_p1, %p7885_p10 }
 0x11a   : > { %7895 = shalt.err (!%p7892_p8)
}
 0x11b   : > { %s7896_s29 = scalar_lea.vmem %s9687_s5, 384  ;;  %s9140_s17 = smov [#allocation19]  }
 0x11c   : > { %p7897_p6 = scmp.ne.s32.totalorder %s9687_s5, %s7896_s29  ;;  %s7900_s21 = sshll.u32 %s9140_s17, 4  ;;  %s7901_s21 = int_to_ptr.vmem [resolvable:$false] %s7900_s21 }
 0x11d   : > { %s7902_s25 = scalar_lea.vmem %s7901_s21, 768  ;;  %p7903_p11 = scmp.lt.s32.totalorder %s9687_s5, %s7901_s21 }
 0x11e   : > { %p7898_p0 = pnand %p7897_p6, %p9505_p12  ;;  %p7904_p7 = scmp.lt.s32.totalorder %s7902_s25, %s7896_s29 }
 0x120   : > { %p7899_p4 = pneg %p7898_p0  ;;  %p7905_p9 = por %p7904_p7, %p7903_p11 }
 0x122   : > { %p7906_p13 = pnand %p7905_p9, %p7899_p4 }
 0x124   : > { %7909 = shalt.err (!%p7906_p13)
}
 0x125   : > { %7328 = dma.hbm_to_vmem [thread:$0]  (%p9505_p12), %s9685_s2, 384, %s9687_s5, %s11705_s15, %s11828_s27, %s11828_s27, %s11827_s8  }
 0x126   : > { %s9714_s3 = scalar_lea.hbm %s9250_s24, %s9588_s23  ;;  %s1470_s19 = scalar_lea.vmem [#allocation22], %s9585_s28 }
 0x127   : > { %s1477_s1 = sshll.u32 %s1470_s19, 4  ;;  %s11704_s29 = scalar_lea.sflag [#allocation23], %s9535_s0  ;;  %s9717_s1 = int_to_ptr.vmem [resolvable:$true] %s1477_s1 }
 0x128   : > { %s7910_s17 = scalar_lea.hbm %s9714_s3, 256  ;;  %s7914_s21 = scalar_lea.hbm %s9250_s24, 512 }
 0x129   : > { %p7911_p10 = scmp.ne.s32.totalorder %s9714_s3, %s7910_s17  ;;  %p7915_p1 = scmp.lt.u32.totalorder %s9714_s3, %s9250_s24 }
 0x12a   : > { %p7916_p8 = scmp.lt.u32.totalorder %s7914_s21, %s7910_s17  ;;  %p7918_p0 = scmp.lt.u32.totalorder %s7910_s17, %s9714_s3 }
 0x12b   : > { %p7912_p5 = pnand %p7911_p10, %p9505_p12 }
 0x12c   : > { %p7917_p6 = por %p7916_p8, %p7915_p1 }
 0x12d   : > { %p7913_p2 = pneg %p7912_p5 }
 0x12e   : > { %p7919_p4 = por %p7918_p0, %p7917_p6 }
 0x130   : > { %p7920_p11 = pnand %p7919_p4, %p7913_p2 }
 0x132   : > { %7923 = shalt.err (!%p7920_p11)
}
 0x133   : > { %s7924_s5 = scalar_lea.vmem %s9717_s1, 256  ;;  %s9141_s2 = smov [#allocation22]  }
 0x134   : > { %p7925_p7 = scmp.ne.s32.totalorder %s9717_s1, %s7924_s5  ;;  %s7928_s25 = sshll.u32 %s9141_s2, 4  ;;  %s7929_s25 = int_to_ptr.vmem [resolvable:$false] %s7928_s25 }
 0x135   : > { %s7930_s19 = scalar_lea.vmem %s7929_s25, 512  ;;  %p7931_p10 = scmp.lt.s32.totalorder %s9717_s1, %s7929_s25 }
 0x136   : > { %p7926_p9 = pnand %p7925_p7, %p9505_p12  ;;  %p7932_p5 = scmp.lt.s32.totalorder %s7930_s19, %s7924_s5 }
 0x138   : > { %p7927_p13 = pneg %p7926_p9  ;;  %p7933_p1 = por %p7932_p5, %p7931_p10 }
 0x13a   : > { %p7934_p8 = pnand %p7933_p1, %p7927_p13 }
 0x13c   : > { %7937 = shalt.err (!%p7934_p8)
}
 0x13d   : > { %7330 = dma.hbm_to_vmem [thread:$0]  (%p9505_p12), %s9714_s3, 256, %s9717_s1, %s11704_s29, %s11828_s27, %s11828_s27, %s11827_s8  }
 0x13e   : > { %s9744_s17 = scalar_lea.hbm %s11797_s6, %s9588_s23  ;;  %s1508_s21 = scalar_lea.vmem [#allocation25], %s9585_s28 }
 0x13f   : > { %s1515_s5 = sshll.u32 %s1508_s21, 4  ;;  %s11706_s2 = scalar_lea.sflag [#allocation26], %s9535_s0  ;;  %s9747_s5 = int_to_ptr.vmem [resolvable:$true] %s1515_s5 }
 0x140   : > { %s7938_s25 = scalar_lea.hbm %s9744_s17, 256  ;;  %s7942_s19 = scalar_lea.hbm %s11797_s6, 512 }
 0x141   : > { %p7939_p2 = scmp.ne.s32.totalorder %s9744_s17, %s7938_s25  ;;  %p7943_p4 = scmp.lt.u32.totalorder %s9744_s17, %s11797_s6 }
 0x142   : > { %p7944_p11 = scmp.lt.u32.totalorder %s7942_s19, %s7938_s25  ;;  %p7946_p9 = scmp.lt.u32.totalorder %s7938_s25, %s9744_s17 }
 0x143   : > { %p7940_p6 = pnand %p7939_p2, %p9505_p12 }
 0x144   : > { %p7945_p7 = por %p7944_p11, %p7943_p4 }
 0x145   : > { %p7941_p0 = pneg %p7940_p6 }
 0x146   : > { %p7947_p13 = por %p7946_p9, %p7945_p7 }
 0x148   : > { %p7948_p10 = pnand %p7947_p13, %p7941_p0 }
 0x14a   : > { %7951 = shalt.err (!%p7948_p10)
}
 0x14b   : > { %s7952_s3 = scalar_lea.vmem %s9747_s5, 256  ;;  %s9142_s1 = smov [#allocation25]  }
 0x14c   : > { %p7953_p5 = scmp.ne.s32.totalorder %s9747_s5, %s7952_s3  ;;  %s7956_s21 = sshll.u32 %s9142_s1, 4  ;;  %s7957_s21 = int_to_ptr.vmem [resolvable:$false] %s7956_s21 }
 0x14d   : > { %s7958_s29 = scalar_lea.vmem %s7957_s21, 512  ;;  %p7959_p2 = scmp.lt.s32.totalorder %s9747_s5, %s7957_s21 }
 0x14e   : > { %p7954_p1 = pnand %p7953_p5, %p9505_p12  ;;  %p7960_p6 = scmp.lt.s32.totalorder %s7958_s29, %s7952_s3 }
 0x150   : > { %p7955_p8 = pneg %p7954_p1  ;;  %p7961_p4 = por %p7960_p6, %p7959_p2 }
 0x152   : > { %p7962_p11 = pnand %p7961_p4, %p7955_p8 }
 0x154   : > { %7965 = shalt.err (!%p7962_p11)
}
 0x155   : > { %7332 = dma.hbm_to_vmem [thread:$0]  (%p9505_p12), %s9744_s17, 256, %s9747_s5, %s11706_s2, %s11828_s27, %s11828_s27, %s11827_s8  }
 0x156   : > { %s9774_s29 = scalar_lea.hbm %s11795_s20, %s9588_s23  ;;  %s1546_s25 = scalar_lea.vmem [#allocation28], %s9585_s28 }
 0x157   : > { %s1553_s19 = sshll.u32 %s1546_s25, 4  ;;  %s11710_s3 = smul.u32 12, %s9582_s4  ;;  %s9777_s19 = int_to_ptr.vmem [resolvable:$true] %s1553_s19 }
 0x158   : > { %s11709_s1 = scalar_lea.sflag [#allocation29], %s9535_s0  ;;  %s7966_s21 = scalar_lea.hbm %s9774_s29, 256 }
 0x159   : > { %p7967_p0 = scmp.ne.s32.totalorder %s9774_s29, %s7966_s21  ;;  %s7970_s15 = scalar_lea.hbm %s11795_s20, 512 }
 0x15a   : > { %p7971_p13 = scmp.lt.u32.totalorder %s9774_s29, %s11795_s20  ;;  %p7972_p10 = scmp.lt.u32.totalorder %s7970_s15, %s7966_s21 }
 0x15b   : > { %p7968_p7 = pnand %p7967_p0, %p9505_p12  ;;  %p7974_p1 = scmp.lt.u32.totalorder %s7966_s21, %s9774_s29 }
 0x15c   : > { %p7973_p5 = por %p7972_p10, %p7971_p13 }
 0x15d   : > { %p7969_p9 = pneg %p7968_p7 }
 0x15e   : > { %p7975_p8 = por %p7974_p1, %p7973_p5 }
 0x160   : > { %p7976_p2 = pnand %p7975_p8, %p7969_p9 }
 0x162   : > { %7979 = shalt.err (!%p7976_p2)
}
 0x163   : > { %s7980_s17 = scalar_lea.vmem %s9777_s19, 256  ;;  %s9143_s5 = smov [#allocation28]  }
 0x164   : > { %p7981_p6 = scmp.ne.s32.totalorder %s9777_s19, %s7980_s17  ;;  %s7984_s25 = sshll.u32 %s9143_s5, 4  ;;  %s7985_s25 = int_to_ptr.vmem [resolvable:$false] %s7984_s25 }
 0x165   : > { %s7986_s2 = scalar_lea.vmem %s7985_s25, 512  ;;  %p7987_p0 = scmp.lt.s32.totalorder %s9777_s19, %s7985_s25 }
 0x166   : > { %p7982_p4 = pnand %p7981_p6, %p9505_p12  ;;  %p7988_p7 = scmp.lt.s32.totalorder %s7986_s2, %s7980_s17 }
 0x168   : > { %p7983_p11 = pneg %p7982_p4  ;;  %p7989_p13 = por %p7988_p7, %p7987_p0 }
 0x16a   : > { %p7990_p10 = pnand %p7989_p13, %p7983_p11 }
 0x16c   : > { %7993 = shalt.err (!%p7990_p10)
}
 0x16d   : > { %s11830_s15 = sld [smem:[#allocation105_spill]]  ;;  %s11712_s2 = smul.u32 192, %s9084_s16 }
 0x16e   : > { %7334 = dma.hbm_to_vmem [thread:$0]  (%p9505_p12), %s9774_s29, 256, %s9777_s19, %s11709_s1, %s11828_s27, %s11828_s27, %s11827_s8  }
 0x16f   : > { %s1584_s17 = scalar_lea.vmem [#allocation31], %s11710_s3  ;;  %s11711_s10 = scalar_lea.sflag [#allocation32], %s9535_s0 }
 0x170   : > { %s1591_s5 = sshll.u32 %s1584_s17, 4  ;;  %s9811_s5 = int_to_ptr.vmem [resolvable:$true] %s1591_s5 }
 0x173   : > { %s11831_s21 = smov %s11830_s15  ;;  %s9809_s25 = scalar_lea.hbm %s11830_s15, %s11712_s2 }
 0x174   : > { %s7994_s6 = scalar_lea.hbm %s9809_s25, 192  ;;  %s7998_s29 = scalar_lea.hbm %s11831_s21, 384 }
 0x175   : > { %p7995_p9 = scmp.ne.s32.totalorder %s9809_s25, %s7994_s6  ;;  %p7999_p8 = scmp.lt.u32.totalorder %s9809_s25, %s11831_s21 }
 0x176   : > { %p8000_p2 = scmp.lt.u32.totalorder %s7998_s29, %s7994_s6  ;;  %p8002_p4 = scmp.lt.u32.totalorder %s7994_s6, %s9809_s25 }
 0x177   : > { %p7996_p5 = pnand %p7995_p9, %p9505_p12 }
 0x178   : > { %p8001_p6 = por %p8000_p2, %p7999_p8 }
 0x179   : > { %p7997_p1 = pneg %p7996_p5 }
 0x17a   : > { %p8003_p11 = por %p8002_p4, %p8001_p6 }
 0x17c   : > { %p8004_p0 = pnand %p8003_p11, %p7997_p1 }
 0x17e   : > { %8007 = shalt.err (!%p8004_p0)
}
 0x17f   : > { %s8008_s19 = scalar_lea.vmem %s9811_s5, 192  ;;  %s9144_s15 = smov [#allocation31]  }
 0x180   : > { %p8009_p7 = scmp.ne.s32.totalorder %s9811_s5, %s8008_s19  ;;  %s8012_s17 = sshll.u32 %s9144_s15, 4  ;;  %s8013_s17 = int_to_ptr.vmem [resolvable:$false] %s8012_s17 }
 0x181   : > { %s8014_s1 = scalar_lea.vmem %s8013_s17, 384  ;;  %p8015_p9 = scmp.lt.s32.totalorder %s9811_s5, %s8013_s17 }
 0x182   : > { %p8010_p13 = pnand %p8009_p7, %p9505_p12  ;;  %p8016_p5 = scmp.lt.s32.totalorder %s8014_s1, %s8008_s19 }
 0x184   : > { %p8011_p10 = pneg %p8010_p13  ;;  %p8017_p8 = por %p8016_p5, %p8015_p9 }
 0x186   : > { %p8018_p2 = pnand %p8017_p8, %p8011_p10 }
 0x188   : > { %8021 = shalt.err (!%p8018_p2)
}
 0x189   : > { %s11832_s6 = sld [smem:[#allocation107_spill]]  ;;  %s1622_s29 = scalar_lea.vmem [#allocation34], %s9585_s28 }
 0x18a   : > { %7336 = dma.hbm_to_vmem [thread:$0]  (%p9505_p12), %s9809_s25, 192, %s9811_s5, %s11711_s10, %s11828_s27, %s11828_s27, %s11827_s8  }
 0x18b   : > { %s1629_s19 = sshll.u32 %s1622_s29, 4  ;;  %s11713_s15 = scalar_lea.sflag [#allocation35], %s9535_s0  ;;  %s9841_s19 = int_to_ptr.vmem [resolvable:$true] %s1629_s19 }
 0x18f   : > { %s9838_s1 = scalar_lea.hbm %s11832_s6, %s9588_s23  ;;  %s8026_s3 = scalar_lea.hbm %s11832_s6, 512 }
 0x190   : > { %s8022_s17 = scalar_lea.hbm %s9838_s1, 256  ;;  %p8027_p11 = scmp.lt.u32.totalorder %s9838_s1, %s11832_s6 }
 0x191   : > { %p8023_p1 = scmp.ne.s32.totalorder %s9838_s1, %s8022_s17  ;;  %p8028_p0 = scmp.lt.u32.totalorder %s8026_s3, %s8022_s17 }
 0x192   : > { %p8030_p13 = scmp.lt.u32.totalorder %s8022_s17, %s9838_s1 }
 0x193   : > { %p8024_p6 = pnand %p8023_p1, %p9505_p12  ;;  %p8029_p7 = por %p8028_p0, %p8027_p11 }
 0x195   : > { %p8025_p4 = pneg %p8024_p6  ;;  %p8031_p10 = por %p8030_p13, %p8029_p7 }
 0x197   : > { %p8032_p9 = pnand %p8031_p10, %p8025_p4 }
 0x199   : > { %8035 = shalt.err (!%p8032_p9)
}
 0x19a   : > { %s8036_s5 = scalar_lea.vmem %s9841_s19, 256  ;;  %s9145_s25 = smov [#allocation34]  }
 0x19b   : > { %p8037_p5 = scmp.ne.s32.totalorder %s9841_s19, %s8036_s5  ;;  %s8040_s29 = sshll.u32 %s9145_s25, 4  ;;  %s8041_s29 = int_to_ptr.vmem [resolvable:$false] %s8040_s29 }
 0x19c   : > { %s8042_s10 = scalar_lea.vmem %s8041_s29, 512  ;;  %p8043_p1 = scmp.lt.s32.totalorder %s9841_s19, %s8041_s29 }
 0x19d   : > { %p8038_p8 = pnand %p8037_p5, %p9505_p12  ;;  %p8044_p6 = scmp.lt.s32.totalorder %s8042_s10, %s8036_s5 }
 0x19f   : > { %p8039_p2 = pneg %p8038_p8  ;;  %p8045_p11 = por %p8044_p6, %p8043_p1 }
 0x1a1   : > { %p8046_p0 = pnand %p8045_p11, %p8039_p2 }
 0x1a3   : > { %8049 = shalt.err (!%p8046_p0)
}
 0x1a4   : > { %s11833_s3 = sld [smem:[#allocation109_spill]]  ;;  %s1660_s17 = scalar_lea.vmem [#allocation37], %s9585_s28 }
 0x1a5   : > { %7338 = dma.hbm_to_vmem [thread:$0]  (%p9505_p12), %s9838_s1, 256, %s9841_s19, %s11713_s15, %s11828_s27, %s11828_s27, %s11827_s8  }
 0x1a6   : > { %s1667_s5 = sshll.u32 %s1660_s17, 4  ;;  %s11716_s25 = scalar_lea.sflag [#allocation38], %s9535_s0  ;;  %s9871_s5 = int_to_ptr.vmem [resolvable:$true] %s1667_s5 }
 0x1aa   : > { %s9868_s10 = scalar_lea.hbm %s11833_s3, %s9588_s23  ;;  %s8054_s2 = scalar_lea.hbm %s11833_s3, 512 }
 0x1ab   : > { %s8050_s29 = scalar_lea.hbm %s9868_s10, 256  ;;  %p8055_p10 = scmp.lt.u32.totalorder %s9868_s10, %s11833_s3 }
 0x1ac   : > { %p8051_p4 = scmp.ne.s32.totalorder %s9868_s10, %s8050_s29  ;;  %p8056_p9 = scmp.lt.u32.totalorder %s8054_s2, %s8050_s29 }
 0x1ad   : > { %p8058_p8 = scmp.lt.u32.totalorder %s8050_s29, %s9868_s10 }
 0x1ae   : > { %p8052_p7 = pnand %p8051_p4, %p9505_p12  ;;  %p8057_p5 = por %p8056_p9, %p8055_p10 }
 0x1b0   : > { %p8053_p13 = pneg %p8052_p7  ;;  %p8059_p2 = por %p8058_p8, %p8057_p5 }
 0x1b2   : > { %p8060_p1 = pnand %p8059_p2, %p8053_p13 }
 0x1b4   : > { %8063 = shalt.err (!%p8060_p1)
}
 0x1b5   : > { %s8064_s1 = scalar_lea.vmem %s9871_s5, 256  ;;  %s9146_s19 = smov [#allocation37]  }
 0x1b6   : > { %p8065_p6 = scmp.ne.s32.totalorder %s9871_s5, %s8064_s1  ;;  %s8068_s17 = sshll.u32 %s9146_s19, 4  ;;  %s8069_s17 = int_to_ptr.vmem [resolvable:$false] %s8068_s17 }
 0x1b7   : > { %s8070_s15 = scalar_lea.vmem %s8069_s17, 512  ;;  %p8071_p4 = scmp.lt.s32.totalorder %s9871_s5, %s8069_s17 }
 0x1b8   : > { %p8066_p11 = pnand %p8065_p6, %p9505_p12  ;;  %p8072_p7 = scmp.lt.s32.totalorder %s8070_s15, %s8064_s1 }
 0x1ba   : > { %p8067_p0 = pneg %p8066_p11  ;;  %p8073_p10 = por %p8072_p7, %p8071_p4 }
 0x1bc   : > { %p8074_p9 = pnand %p8073_p10, %p8067_p0 }
 0x1be   : > { %8077 = shalt.err (!%p8074_p9)
}
 0x1bf   : > { %s11834_s2 = sld [smem:[#allocation111_spill]]  ;;  %s1698_s1 = scalar_lea.vmem [#allocation40], %s9585_s28 }
 0x1c0   : > { %7340 = dma.hbm_to_vmem [thread:$0]  (%p9505_p12), %s9868_s10, 256, %s9871_s5, %s11716_s25, %s11828_s27, %s11828_s27, %s11827_s8  }
 0x1c1   : > { %s1705_s19 = sshll.u32 %s1698_s1, 4  ;;  %s11719_s17 = scalar_lea.sflag [#allocation41], %s9535_s0  ;;  %s9901_s19 = int_to_ptr.vmem [resolvable:$true] %s1705_s19 }
 0x1c5   : > { %s11835_s29 = smov %s11834_s2  ;;  %s9898_s15 = scalar_lea.hbm %s11834_s2, %s9588_s23 }
 0x1c6   : > { %s8078_s3 = scalar_lea.hbm %s9898_s15, 256  ;;  %s8082_s6 = scalar_lea.hbm %s11835_s29, 512 }
 0x1c7   : > { %p8079_p13 = scmp.ne.s32.totalorder %s9898_s15, %s8078_s3  ;;  %p8083_p2 = scmp.lt.u32.totalorder %s9898_s15, %s11835_s29 }
 0x1c8   : > { %p8084_p1 = scmp.lt.u32.totalorder %s8082_s6, %s8078_s3  ;;  %p8086_p11 = scmp.lt.u32.totalorder %s8078_s3, %s9898_s15 }
 0x1c9   : > { %p8080_p5 = pnand %p8079_p13, %p9505_p12 }
 0x1ca   : > { %p8085_p6 = por %p8084_p1, %p8083_p2 }
 0x1cb   : > { %p8081_p8 = pneg %p8080_p5 }
 0x1cc   : > { %p8087_p0 = por %p8086_p11, %p8085_p6 }
 0x1ce   : > { %p8088_p4 = pnand %p8087_p0, %p8081_p8 }
 0x1d0   : > { %8091 = shalt.err (!%p8088_p4)
}
 0x1d1   : > { %s8092_s10 = scalar_lea.vmem %s9901_s19, 256  ;;  %s9147_s5 = smov [#allocation40]  }
 0x1d2   : > { %p8093_p7 = scmp.ne.s32.totalorder %s9901_s19, %s8092_s10  ;;  %s8096_s2 = sshll.u32 %s9147_s5, 4  ;;  %s8097_s2 = int_to_ptr.vmem [resolvable:$false] %s8096_s2 }
 0x1d3   : > { %s8098_s1 = scalar_lea.vmem %s8097_s2, 512  ;;  %p8099_p13 = scmp.lt.s32.totalorder %s9901_s19, %s8097_s2 }
 0x1d4   : > { %p8094_p10 = pnand %p8093_p7, %p9505_p12  ;;  %p8100_p5 = scmp.lt.s32.totalorder %s8098_s1, %s8092_s10 }
 0x1d6   : > { %p8095_p9 = pneg %p8094_p10  ;;  %p8101_p2 = por %p8100_p5, %p8099_p13 }
 0x1d8   : > { %p8102_p1 = pnand %p8101_p2, %p8095_p9 }
 0x1da   : > { %8105 = shalt.err (!%p8102_p1)
}
 0x1db   : > { %s11836_s6 = sld [smem:[#allocation113_spill]]  ;;  %s11837_s3 = smul.u32 192, %s9084_s16 }
 0x1dc   : > { %7342 = dma.hbm_to_vmem [thread:$0]  (%p9505_p12), %s9898_s15, 256, %s9901_s19, %s11719_s17, %s11828_s27, %s11828_s27, %s11827_s8  }
 0x1dd   : > { %s11838_s5 = smul.u32 12, %s9582_s4  ;;  %s11720_s25 = scalar_lea.sflag [#allocation44], %s9535_s0 }
 0x1df   : > { %s1736_s2 = scalar_lea.vmem [#allocation43], %s11838_s5 }
 0x1e0   : > { %s1743_s1 = sshll.u32 %s1736_s2, 4  ;;  %s9933_s1 = int_to_ptr.vmem [resolvable:$true] %s1743_s1 }
 0x1e1   : > { %s9929_s10 = scalar_lea.hbm %s11836_s6, %s11837_s3  ;;  %s8110_s20 = scalar_lea.hbm %s11836_s6, 384 }
 0x1e2   : > { %s8106_s14 = scalar_lea.hbm %s9929_s10, 192  ;;  %p8111_p0 = scmp.lt.u32.totalorder %s9929_s10, %s11836_s6 }
 0x1e3   : > { %p8107_p8 = scmp.ne.s32.totalorder %s9929_s10, %s8106_s14  ;;  %p8112_p4 = scmp.lt.u32.totalorder %s8110_s20, %s8106_s14 }
 0x1e4   : > { %p8114_p10 = scmp.lt.u32.totalorder %s8106_s14, %s9929_s10 }
 0x1e5   : > { %p8108_p6 = pnand %p8107_p8, %p9505_p12  ;;  %p8113_p7 = por %p8112_p4, %p8111_p0 }
 0x1e7   : > { %p8109_p11 = pneg %p8108_p6  ;;  %p8115_p9 = por %p8114_p10, %p8113_p7 }
 0x1e9   : > { %p8116_p13 = pnand %p8115_p9, %p8109_p11 }
 0x1eb   : > { %8119 = shalt.err (!%p8116_p13)
}
 0x1ec   : > { %s8120_s15 = scalar_lea.vmem %s9933_s1, 192  ;;  %s9148_s19 = smov [#allocation43]  }
 0x1ed   : > { %p8121_p5 = scmp.ne.s32.totalorder %s9933_s1, %s8120_s15  ;;  %s8124_s3 = sshll.u32 %s9148_s19, 4  ;;  %s8125_s3 = int_to_ptr.vmem [resolvable:$false] %s8124_s3 }
 0x1ee   : > { %s8126_s5 = scalar_lea.vmem %s8125_s3, 384  ;;  %p8127_p8 = scmp.lt.s32.totalorder %s9933_s1, %s8125_s3 }
 0x1ef   : > { %p8122_p2 = pnand %p8121_p5, %p9505_p12  ;;  %p8128_p6 = scmp.lt.s32.totalorder %s8126_s5, %s8120_s15 }
 0x1f1   : > { %p8123_p1 = pneg %p8122_p2  ;;  %p8129_p0 = por %p8128_p6, %p8127_p8 }
 0x1f3   : > { %p8130_p4 = pnand %p8129_p0, %p8123_p1 }
 0x1f5   : > { %8133 = shalt.err (!%p8130_p4)
}
 0x1f6   : > { %s11839_s14 = sld [smem:[#allocation115_spill]]  ;;  %s1774_s2 = scalar_lea.vmem [#allocation46], %s9585_s28 }
 0x1f7   : > { %7344 = dma.hbm_to_vmem [thread:$0]  (%p9505_p12), %s9929_s10, 192, %s9933_s1, %s11720_s25, %s11828_s27, %s11828_s27, %s11827_s8  }
 0x1f8   : > { %s1781_s15 = sshll.u32 %s1774_s2, 4  ;;  %s6652_s19 = sshll.u32 %s9582_s4, 5  ;;  %s9963_s15 = int_to_ptr.vmem [resolvable:$true] %s1781_s15 }
 0x1f9   : > { %s11721_s3 = scalar_lea.sflag [#allocation47], %s9535_s0 }
 0x1fc   : > { %s9960_s20 = scalar_lea.hbm %s11839_s14, %s9588_s23  ;;  %s8138_s17 = scalar_lea.hbm %s11839_s14, 512 }
 0x1fd   : > { %s8134_s5 = scalar_lea.hbm %s9960_s20, 256  ;;  %p8139_p9 = scmp.lt.u32.totalorder %s9960_s20, %s11839_s14 }
 0x1fe   : > { %p8135_p11 = scmp.ne.s32.totalorder %s9960_s20, %s8134_s5  ;;  %p8140_p13 = scmp.lt.u32.totalorder %s8138_s17, %s8134_s5 }
 0x1ff   : > { %p8142_p2 = scmp.lt.u32.totalorder %s8134_s5, %s9960_s20 }
 0x200   : > { %p8136_p7 = pnand %p8135_p11, %p9505_p12  ;;  %p8141_p5 = por %p8140_p13, %p8139_p9 }
 0x202   : > { %p8137_p10 = pneg %p8136_p7  ;;  %p8143_p1 = por %p8142_p2, %p8141_p5 }
 0x204   : > { %p8144_p8 = pnand %p8143_p1, %p8137_p10 }
 0x206   : > { %8147 = shalt.err (!%p8144_p8)
}
 0x207   : > { %s8148_s28 = scalar_lea.vmem %s9963_s15, 256  ;;  %s9149_s23 = smov [#allocation46]  }
 0x208   : > { %p8149_p6 = scmp.ne.s32.totalorder %s9963_s15, %s8148_s28  ;;  %s8152_s10 = sshll.u32 %s9149_s23, 4  ;;  %s8153_s10 = int_to_ptr.vmem [resolvable:$false] %s8152_s10 }
 0x209   : > { %s8154_s1 = scalar_lea.vmem %s8153_s10, 512  ;;  %p8155_p11 = scmp.lt.s32.totalorder %s9963_s15, %s8153_s10 }
 0x20a   : > { %p8150_p0 = pnand %p8149_p6, %p9505_p12  ;;  %p8156_p7 = scmp.lt.s32.totalorder %s8154_s1, %s8148_s28 }
 0x20c   : > { %p8151_p4 = pneg %p8150_p0  ;;  %p8157_p9 = por %p8156_p7, %p8155_p11 }
 0x20e   : > { %p8158_p13 = pnand %p8157_p9, %p8151_p4 }
 0x210   : > { %8161 = shalt.err (!%p8158_p13)
}
 0x211   : > { %s11840_s17 = sld [smem:[#allocation117_spill]]  ;;  %s6825_s2 = sshll.u32 %s9084_s16, 9 }
 0x212   : > { %7346 = dma.hbm_to_vmem [thread:$0]  (%p9505_p12), %s9960_s20, 256, %s9963_s15, %s11721_s3, %s11828_s27, %s11828_s27, %s11827_s8  }
 0x213   : > { %s1812_s28 = scalar_lea.vmem [#allocation49], %s6652_s19  ;;  %s9998_s10 = sshll.u32 %s9084_s16, 4 }
 0x214   : > { %s1819_s23 = sshll.u32 %s1812_s28, 4  ;;  %s11722_s1 = scalar_lea.sflag [#allocation50], %s9535_s0  ;;  %s9995_s23 = int_to_ptr.vmem [resolvable:$true] %s1819_s23 }
 0x217   : > { %s9991_s5 = scalar_lea.hbm %s11840_s17, %s6825_s2  ;;  %s8166_s20 = scalar_lea.hbm %s11840_s17, 1024 }
 0x218   : > { %s8162_s25 = scalar_lea.hbm %s9991_s5, 512  ;;  %p8167_p1 = scmp.lt.u32.totalorder %s9991_s5, %s11840_s17 }
 0x219   : > { %p8163_p10 = scmp.ne.s32.totalorder %s9991_s5, %s8162_s25  ;;  %p8168_p8 = scmp.lt.u32.totalorder %s8166_s20, %s8162_s25 }
 0x21a   : > { %p8170_p0 = scmp.lt.u32.totalorder %s8162_s25, %s9991_s5 }
 0x21b   : > { %p8164_p5 = pnand %p8163_p10, %p9505_p12  ;;  %p8169_p6 = por %p8168_p8, %p8167_p1 }
 0x21d   : > { %p8165_p2 = pneg %p8164_p5  ;;  %p8171_p4 = por %p8170_p0, %p8169_p6 }
 0x21f   : > { %p8172_p11 = pnand %p8171_p4, %p8165_p2 }
 0x221   : > { %8175 = shalt.err (!%p8172_p11)
}
 0x222   : > { %s8176_s15 = scalar_lea.vmem %s9995_s23, 512  ;;  %s9150_s19 = smov [#allocation49]  }
 0x223   : > { %p8177_p7 = scmp.ne.s32.totalorder %s9995_s23, %s8176_s15  ;;  %s8180_s2 = sshll.u32 %s9150_s19, 4  ;;  %s8181_s2 = int_to_ptr.vmem [resolvable:$false] %s8180_s2 }
 0x224   : > { %s8182_s28 = scalar_lea.vmem %s8181_s2, 1024  ;;  %p8183_p10 = scmp.lt.s32.totalorder %s9995_s23, %s8181_s2 }
 0x225   : > { %p8178_p9 = pnand %p8177_p7, %p9505_p12  ;;  %p8184_p5 = scmp.lt.s32.totalorder %s8182_s28, %s8176_s15 }
 0x227   : > { %p8179_p13 = pneg %p8178_p9  ;;  %p8185_p1 = por %p8184_p5, %p8183_p10 }
 0x229   : > { %p8186_p8 = pnand %p8185_p1, %p8179_p13 }
 0x22b   : > { %8189 = shalt.err (!%p8186_p8)
}
 0x22c   : > { %s11841_s25 = sld [smem:[#allocation119_spill]]  ;;  %s1849_s15 = scalar_lea.vmem [#allocation52], %s9582_s4 }
 0x22d   : > { %7348 = dma.hbm_to_vmem [thread:$0]  (%p9505_p12), %s9991_s5, 512, %s9995_s23, %s11722_s1, %s11828_s27, %s11828_s27, %s11827_s8  }
 0x22e   : > { %s1856_s19 = sshll.u32 %s1849_s15, 4  ;;  %s11726_s2 = scalar_lea.sflag [#allocation53], %s9535_s0  ;;  %s1857_s19 = int_to_ptr.vmem [resolvable:$true] %s1856_s19 }
 0x232   : > { %s10025_s20 = scalar_lea.hbm %s11841_s25, %s9998_s10  ;;  %s8194_s3 = scalar_lea.hbm %s11841_s25, 32 }
 0x233   : > { %s8190_s28 = scalar_lea.hbm %s10025_s20, 16  ;;  %p8195_p4 = scmp.lt.u32.totalorder %s10025_s20, %s11841_s25 }
 0x234   : > { %p8191_p2 = scmp.ne.s32.totalorder %s10025_s20, %s8190_s28  ;;  %p8196_p11 = scmp.lt.u32.totalorder %s8194_s3, %s8190_s28 }
 0x235   : > { %p8198_p9 = scmp.lt.u32.totalorder %s8190_s28, %s10025_s20 }
 0x236   : > { %p8192_p6 = pnand %p8191_p2, %p9505_p12  ;;  %p8197_p7 = por %p8196_p11, %p8195_p4 }
 0x238   : > { %p8193_p0 = pneg %p8192_p6  ;;  %p8199_p13 = por %p8198_p9, %p8197_p7 }
 0x23a   : > { %p8200_p10 = pnand %p8199_p13, %p8193_p0 }
 0x23c   : > { %8203 = shalt.err (!%p8200_p10)
}
 0x23d   : > { %s8204_s5 = scalar_lea.vmem %s1857_s19, 16  ;;  %s9151_s23 = smov [#allocation52]  }
 0x23e   : > { %p8205_p5 = scmp.ne.s32.totalorder %s1857_s19, %s8204_s5  ;;  %s8208_s15 = sshll.u32 %s9151_s23, 4  ;;  %s8209_s15 = int_to_ptr.vmem [resolvable:$false] %s8208_s15 }
 0x23f   : > { %s8210_s1 = scalar_lea.vmem %s8209_s15, 32  ;;  %p8211_p2 = scmp.lt.s32.totalorder %s1857_s19, %s8209_s15 }
 0x240   : > { %p8206_p1 = pnand %p8205_p5, %p9505_p12  ;;  %p8212_p6 = scmp.lt.s32.totalorder %s8210_s1, %s8204_s5 }
 0x242   : > { %p8207_p8 = pneg %p8206_p1  ;;  %p8213_p3 = por %p8212_p6, %p8211_p2 }
 0x244   : > { %p8214_p4 = pnand %p8213_p3, %p8207_p8 }
 0x246   : > { %8217 = shalt.err (!%p8214_p4)
}
 0x247   : > { %s11842_s3 = sld [smem:[#allocation121_spill]]  ;;  %s1883_s1 = scalar_lea.vmem [#allocation55], %s9582_s4 }
 0x248   : > { %7350 = dma.hbm_to_vmem [thread:$0]  (%p9505_p12), %s10025_s20, 16, %s1857_s19, %s11726_s2  }
 0x249   : > { %s1890_s5 = sshll.u32 %s1883_s1, 4  ;;  %s11728_s23 = scalar_lea.sflag [#allocation56], %s9535_s0  ;;  %s1891_s5 = int_to_ptr.vmem [resolvable:$true] %s1890_s5 }
 0x24d   : > { %s10046_s28 = scalar_lea.hbm %s11842_s3, %s9998_s10  ;;  %s8222_s6 = scalar_lea.hbm %s11842_s3, 32 }
 0x24e   : > { %s8218_s15 = scalar_lea.hbm %s10046_s28, 16  ;;  %p8223_p7 = scmp.lt.u32.totalorder %s10046_s28, %s11842_s3 }
 0x24f   : > { %p8219_p3 = scmp.ne.s32.totalorder %s10046_s28, %s8218_s15  ;;  %p8224_p9 = scmp.lt.u32.totalorder %s8222_s6, %s8218_s15 }
 0x250   : > { %p8226_p10 = scmp.lt.u32.totalorder %s8218_s15, %s10046_s28 }
 0x251   : > { %p8220_p0 = pnand %p8219_p3, %p9505_p12  ;;  %p8225_p13 = por %p8224_p9, %p8223_p7 }
 0x253   : > { %p8221_p11 = pneg %p8220_p0  ;;  %p8227_p5 = por %p8226_p10, %p8225_p13 }
 0x255   : > { %p8228_p1 = pnand %p8227_p5, %p8221_p11 }
 0x257   : > { %8231 = shalt.err (!%p8228_p1)
}
 0x258   : > { %s8232_s20 = scalar_lea.vmem %s1891_s5, 16  ;;  %s9152_s19 = smov [#allocation55]  }
 0x259   : > { %p8233_p8 = scmp.ne.s32.totalorder %s1891_s5, %s8232_s20  ;;  %s8236_s1 = sshll.u32 %s9152_s19, 4  ;;  %s8237_s1 = int_to_ptr.vmem [resolvable:$false] %s8236_s1 }
 0x25a   : > { %s8238_s2 = scalar_lea.vmem %s8237_s1, 32  ;;  %p8239_p4 = scmp.lt.s32.totalorder %s1891_s5, %s8237_s1 }
 0x25b   : > { %p8234_p2 = pnand %p8233_p8, %p9505_p12  ;;  %p8240_p3 = scmp.lt.s32.totalorder %s8238_s2, %s8232_s20 }
 0x25d   : > { %p8235_p6 = pneg %p8234_p2  ;;  %p8241_p0 = por %p8240_p3, %p8239_p4 }
 0x25f   : > { %p8242_p7 = pnand %p8241_p0, %p8235_p6 }
 0x261   : > { %8245 = shalt.err (!%p8242_p7)
}
 0x262   : > { %s11843_s6 = sld [smem:[#allocation123_spill]]  ;;  %s1917_s2 = scalar_lea.vmem [#allocation58], %s9582_s4 }
 0x263   : > { %7352 = dma.hbm_to_vmem [thread:$0]  (%p9505_p12), %s10046_s28, 16, %s1891_s5, %s11728_s23  }
 0x264   : > { %s1924_s20 = sshll.u32 %s1917_s2, 4  ;;  %s11731_s19 = scalar_lea.sflag [#allocation59], %s9535_s0  ;;  %s1925_s20 = int_to_ptr.vmem [resolvable:$true] %s1924_s20 }
 0x268   : > { %s10067_s15 = scalar_lea.hbm %s11843_s6, %s9998_s10  ;;  %s8250_s3 = scalar_lea.hbm %s11843_s6, 32 }
 0x269   : > { %s8246_s1 = scalar_lea.hbm %s10067_s15, 16  ;;  %p8251_p10 = scmp.lt.u32.totalorder %s10067_s15, %s11843_s6 }
 0x26a   : > { %p8247_p11 = scmp.ne.s32.totalorder %s10067_s15, %s8246_s1  ;;  %p8252_p5 = scmp.lt.u32.totalorder %s8250_s3, %s8246_s1 }
 0x26b   : > { %p8254_p8 = scmp.lt.u32.totalorder %s8246_s1, %s10067_s15 }
 0x26c   : > { %p8248_p9 = pnand %p8247_p11, %p9505_p12  ;;  %p8253_p1 = por %p8252_p5, %p8251_p10 }
 0x26e   : > { %p8249_p13 = pneg %p8248_p9  ;;  %p8255_p2 = por %p8254_p8, %p8253_p1 }
 0x270   : > { %p8256_p6 = pnand %p8255_p2, %p8249_p13 }
 0x272   : > { %8259 = shalt.err (!%p8256_p6)
}
 0x273   : > { %s8260_s28 = scalar_lea.vmem %s1925_s20, 16  ;;  %s9153_s5 = smov [#allocation58]  }
 0x274   : > { %p8261_p4 = scmp.ne.s32.totalorder %s1925_s20, %s8260_s28  ;;  %s8264_s2 = sshll.u32 %s9153_s5, 4  ;;  %s8265_s2 = int_to_ptr.vmem [resolvable:$false] %s8264_s2 }
 0x275   : > { %s8266_s23 = scalar_lea.vmem %s8265_s2, 32  ;;  %p8267_p7 = scmp.lt.s32.totalorder %s1925_s20, %s8265_s2 }
 0x276   : > { %p8262_p3 = pnand %p8261_p4, %p9505_p12  ;;  %p8268_p11 = scmp.lt.s32.totalorder %s8266_s23, %s8260_s28 }
 0x278   : > { %p8263_p0 = pneg %p8262_p3  ;;  %p8269_p9 = por %p8268_p11, %p8267_p7 }
 0x27a   : > { %p8270_p5 = pnand %p8269_p9, %p8263_p0 }
 0x27c   : > { %8273 = shalt.err (!%p8270_p5)
}
 0x27d   : > { %s11844_s3 = sld [smem:[#allocation125_spill]]  ;;  %s1951_s23 = scalar_lea.vmem [#allocation61], %s9582_s4 }
 0x27e   : > { %7354 = dma.hbm_to_vmem [thread:$0]  (%p9505_p12), %s10067_s15, 16, %s1925_s20, %s11731_s19  }
 0x27f   : > { %s1958_s28 = sshll.u32 %s1951_s23, 4  ;;  %s6598_s5 = sshll.u32 %s9532_s12, 2  ;;  %s10091_s28 = int_to_ptr.vmem [resolvable:$true] %s1958_s28 }
 0x280   : > { %s11734_s2 = scalar_lea.sflag [#allocation62], %s9535_s0 }
 0x283   : > { %s10088_s1 = scalar_lea.hbm %s11844_s3, %s9998_s10  ;;  %s8278_s14 = scalar_lea.hbm %s11844_s3, 32 }
 0x284   : > { %s8274_s6 = scalar_lea.hbm %s10088_s1, 16  ;;  %p8279_p8 = scmp.lt.u32.totalorder %s10088_s1, %s11844_s3 }
 0x285   : > { %p8275_p13 = scmp.ne.s32.totalorder %s10088_s1, %s8274_s6  ;;  %p8280_p2 = scmp.lt.u32.totalorder %s8278_s14, %s8274_s6 }
 0x286   : > { %p8282_p4 = scmp.lt.u32.totalorder %s8274_s6, %s10088_s1 }
 0x287   : > { %p8276_p10 = pnand %p8275_p13, %p9505_p12  ;;  %p8281_p6 = por %p8280_p2, %p8279_p8 }
 0x289   : > { %p8277_p1 = pneg %p8276_p10  ;;  %p8283_p3 = por %p8282_p4, %p8281_p6 }
 0x28b   : > { %p8284_p0 = pnand %p8283_p3, %p8277_p1 }
 0x28d   : > { %8287 = shalt.err (!%p8284_p0)
}
 0x28e   : > { %s8288_s15 = scalar_lea.vmem %s10091_s28, 16  ;;  %s9154_s20 = smov [#allocation61]  }
 0x28f   : > { %p8289_p7 = scmp.ne.s32.totalorder %s10091_s28, %s8288_s15  ;;  %s8292_s23 = sshll.u32 %s9154_s20, 4  ;;  %s8293_s23 = int_to_ptr.vmem [resolvable:$false] %s8292_s23 }
 0x290   : > { %s8294_s19 = scalar_lea.vmem %s8293_s23, 32  ;;  %p8295_p5 = scmp.lt.s32.totalorder %s10091_s28, %s8293_s23 }
 0x291   : > { %p8290_p11 = pnand %p8289_p7, %p9505_p12  ;;  %p8296_p13 = scmp.lt.s32.totalorder %s8294_s19, %s8288_s15 }
 0x293   : > { %p8291_p9 = pneg %p8290_p11  ;;  %p8297_p10 = por %p8296_p13, %p8295_p5 }
 0x295   : > { %p8298_p8 = pnand %p8297_p10, %p8291_p9 }
 0x297   : > { %8301 = shalt.err (!%p8298_p8)
}
 0x298   : > { %s11845_s14 = sld [smem:[#allocation89_spill]]  ;;  %s6599_s6 = sshll.u32 %s9088_s18, 6 }
 0x299   : > { %7356 = dma.hbm_to_vmem [thread:$0]  (%p9505_p12), %s10088_s1, 16, %s10091_s28, %s11734_s2  }
 0x29a   : > { %s1258_s15 = scalar_lea.vmem [#allocation4], %s6598_s5  ;;  %s11846_s23 = sshll.u32 %s9578_s9, 4  ;;  %s10124_s23 = int_to_ptr.vmem [resolvable:$true] %s11846_s23 }
 0x29b   : > { %s1265_s20 = sshll.u32 %s1258_s15, 4  ;;  %s1255_s3 = scalar_lea.sflag [#allocation5], %s9532_s12  ;;  %s10120_s20 = int_to_ptr.vmem [resolvable:$true] %s1265_s20 }
 0x29c   : > { %p11847_p2 = scmp.ne.s32.totalorder %s11810_s11, 0 }
 0x29e   : > { %s10116_s19 = scalar_lea.hbm %s11845_s14, %s6599_s6  ;;  %s8306_s1 = scalar_lea.hbm %s11845_s14, 128 }
 0x29f   : > { %s8302_s17 = scalar_lea.hbm %s10116_s19, 64  ;;  %p8307_p3 = scmp.lt.u32.totalorder %s10116_s19, %s11845_s14 }
 0x2a0   : > { %p8303_p1 = scmp.ne.s32.totalorder %s10116_s19, %s8302_s17  ;;  %p8308_p0 = scmp.lt.u32.totalorder %s8306_s1, %s8302_s17 }
 0x2a1   : > { %p8310_p11 = scmp.lt.u32.totalorder %s8302_s17, %s10116_s19 }
 0x2a2   : > { %p8304_p6 = pnand %p8303_p1, %p11847_p2  ;;  %p8309_p7 = por %p8308_p0, %p8307_p3 }
 0x2a4   : > { %p8305_p4 = pneg %p8304_p6  ;;  %p8311_p9 = por %p8310_p11, %p8309_p7 }
 0x2a6   : > { %p8312_p5 = pnand %p8311_p9, %p8305_p4 }
 0x2a8   : > { %8315 = shalt.err (!%p8312_p5)
}
 0x2a9   : > { %s8316_s9 = scalar_lea.vmem %s10120_s20, 64  ;;  %s9155_s12 = smov [#allocation4]  }
 0x2aa   : > { %p8317_p13 = scmp.ne.s32.totalorder %s10120_s20, %s8316_s9  ;;  %s8320_s28 = sshll.u32 %s9155_s12, 4  ;;  %s8321_s28 = int_to_ptr.vmem [resolvable:$false] %s8320_s28 }
 0x2ab   : > { %s8322_s5 = scalar_lea.vmem %s8321_s28, 128  ;;  %p8323_p1 = scmp.lt.s32.totalorder %s10120_s20, %s8321_s28 }
 0x2ac   : > { %p8318_p10 = pnand %p8317_p13, %p11847_p2  ;;  %p8324_p6 = scmp.lt.s32.totalorder %s8322_s5, %s8316_s9 }
 0x2ae   : > { %p8319_p8 = pneg %p8318_p10  ;;  %p8325_p3 = por %p8324_p6, %p8323_p1 }
 0x2b0   : > { %p8326_p0 = pnand %p8325_p3, %p8319_p8 }
 0x2b2   : > { %8329 = shalt.err (!%p8326_p0)
}
 0x2b3   : > { %7319 = dma.hbm_to_vmem [thread:$0]  (%p11847_p2), %s10116_s19, 64, %s10120_s20, %s1255_s3  }
 0x2b4   : > { %s8330_s17 = scalar_lea.hbm %s9574_s26, 512  ;;  %s8334_s6 = scalar_lea.hbm %s11794_s13, 1024 }
 0x2b5   : > { %p8331_p4 = scmp.ne.s32.totalorder %s9574_s26, %s8330_s17  ;;  %p8335_p9 = scmp.lt.u32.totalorder %s9574_s26, %s11794_s13 }
 0x2b6   : > { %p8336_p5 = scmp.lt.u32.totalorder %s8334_s6, %s8330_s17  ;;  %p8338_p10 = scmp.lt.u32.totalorder %s8330_s17, %s9574_s26 }
 0x2b7   : > { %p8332_p7 = pnand %p8331_p4, %p11847_p2 }
 0x2b8   : > { %p8337_p13 = por %p8336_p5, %p8335_p9 }
 0x2b9   : > { %p8333_p11 = pneg %p8332_p7 }
 0x2ba   : > { %p8339_p8 = por %p8338_p10, %p8337_p13 }
 0x2bc   : > { %p8340_p1 = pnand %p8339_p8, %p8333_p11 }
 0x2be   : > { %8343 = shalt.err (!%p8340_p1)
}
 0x2bf   : > { %s8344_s15 = scalar_lea.vmem %s10124_s23, 512  ;;  %s9156_s3 = smov [#allocation9]  }
 0x2c0   : > { %p8345_p6 = scmp.ne.s32.totalorder %s10124_s23, %s8344_s15  ;;  %s8348_s19 = sshll.u32 %s9156_s3, 4  ;;  %s8349_s19 = int_to_ptr.vmem [resolvable:$false] %s8348_s19 }
 0x2c1   : > { %s8350_s20 = scalar_lea.vmem %s8349_s19, 1024  ;;  %p8351_p4 = scmp.lt.s32.totalorder %s10124_s23, %s8349_s19 }
 0x2c2   : > { %p8346_p3 = pnand %p8345_p6, %p11847_p2  ;;  %p8352_p7 = scmp.lt.s32.totalorder %s8350_s20, %s8344_s15 }
 0x2c4   : > { %p8347_p0 = pneg %p8346_p3  ;;  %p8353_p9 = por %p8352_p7, %p8351_p4 }
 0x2c6   : > { %p8354_p5 = pnand %p8353_p9, %p8347_p0 }
 0x2c8   : > { %8357 = shalt.err (!%p8354_p5)
}
 0x2c9   : > { %s11848_s1 = scalar_lea.sflag [#allocation8], %s9535_s0  ;;  %s11849_s9 = sld [smem:[#allocation93_spill]] }
 0x2ca   : > { %s11850_s12 = sld [smem:[#allocation95_spill]]  ;;  %s1338_s11 = scalar_lea.vmem [#allocation12], %s9582_s4 }
 0x2cb   : > { %7321 = dma.hbm_to_vmem [thread:$0]  (%p11847_p2), %s9574_s26, 512, %s10124_s23, %s11848_s1, %s11828_s27, %s11828_s27, %s11827_s8  }
 0x2cc   : > { %s1345_s5 = sshll.u32 %s1338_s11, 4  ;;  %s1346_s5 = int_to_ptr.vmem [resolvable:$true] %s1345_s5 }
 0x2cf   : > { %s10168_s28 = scalar_lea.hbm %s11849_s9, %s9998_s10  ;;  %s8362_s15 = scalar_lea.hbm %s11849_s9, 32 }
 0x2d0   : > { %s10173_s17 = scalar_lea.hbm %s11850_s12, %s9998_s10  ;;  %s8358_s6 = scalar_lea.hbm %s10168_s28, 16 }
 0x2d1   : > { %p8359_p11 = scmp.ne.s32.totalorder %s10168_s28, %s8358_s6  ;;  %p8363_p8 = scmp.lt.u32.totalorder %s10168_s28, %s11849_s9 }
 0x2d2   : > { %p8364_p1 = scmp.lt.u32.totalorder %s8362_s15, %s8358_s6  ;;  %p8366_p6 = scmp.lt.u32.totalorder %s8358_s6, %s10168_s28 }
 0x2d3   : > { %p8360_p13 = pnand %p8359_p11, %p9505_p12 }
 0x2d4   : > { %p8365_p2 = por %p8364_p1, %p8363_p8 }
 0x2d5   : > { %p8361_p10 = pneg %p8360_p13 }
 0x2d6   : > { %p8367_p3 = por %p8366_p6, %p8365_p2 }
 0x2d8   : > { %p8368_p0 = pnand %p8367_p3, %p8361_p10 }
 0x2da   : > { %8371 = shalt.err (!%p8368_p0)
}
 0x2db   : > { %s8372_s26 = scalar_lea.vmem %s1346_s5, 16  ;;  %s9157_s8 = smov [#allocation12]  }
 0x2dc   : > { %p8373_p4 = scmp.ne.s32.totalorder %s1346_s5, %s8372_s26  ;;  %s8376_s27 = sshll.u32 %s9157_s8, 4  ;;  %s8377_s27 = int_to_ptr.vmem [resolvable:$false] %s8376_s27 }
 0x2dd   : > { %s8378_s23 = scalar_lea.vmem %s8377_s27, 32  ;;  %p8379_p5 = scmp.lt.s32.totalorder %s1346_s5, %s8377_s27 }
 0x2de   : > { %p8374_p7 = pnand %p8373_p4, %p9505_p12  ;;  %p8380_p11 = scmp.lt.s32.totalorder %s8378_s23, %s8372_s26 }
 0x2e0   : > { %p8375_p9 = pneg %p8374_p7  ;;  %p8381_p13 = por %p8380_p11, %p8379_p5 }
 0x2e2   : > { %p8382_p1 = pnand %p8381_p13, %p8375_p9 }
 0x2e4   : > { %8385 = shalt.err (!%p8382_p1)
}
 0x2e5   : > { %s11851_s3 = scalar_lea.sflag [#allocation11], %s9535_s0  ;;  %s11852_s19 = sld [smem:[#allocation97_spill]] }
 0x2e6   : > { %7323 = dma.hbm_to_vmem [thread:$0]  (%p9505_p12), %s10168_s28, 16, %s1346_s5, %s11851_s3  }
 0x2e7   : > { %s1376_s20 = scalar_lea.vmem [#allocation15], %s9582_s4  ;;  %s8386_s6 = scalar_lea.hbm %s10173_s17, 16 }
 0x2e8   : > { %s1383_s1 = sshll.u32 %s1376_s20, 4  ;;  %p8387_p10 = scmp.ne.s32.totalorder %s10173_s17, %s8386_s6  ;;  %s1384_s1 = int_to_ptr.vmem [resolvable:$true] %s1383_s1 }
 0x2e9   : > { %s8390_s15 = scalar_lea.hbm %s11850_s12, 32  ;;  %p8391_p6 = scmp.lt.u32.totalorder %s10173_s17, %s11850_s12 }
 0x2ea   : > { %p8388_p8 = pnand %p8387_p10, %p9505_p12  ;;  %p8392_p3 = scmp.lt.u32.totalorder %s8390_s15, %s8386_s6 }
 0x2eb   : > { %s10193_s11 = scalar_lea.hbm %s11852_s19, %s9998_s10  ;;  %p8394_p4 = scmp.lt.u32.totalorder %s8386_s6, %s10173_s17 }
 0x2ec   : > { %p8389_p2 = pneg %p8388_p8  ;;  %p8393_p0 = por %p8392_p3, %p8391_p6 }
 0x2ee   : > { %p8395_p7 = por %p8394_p4, %p8393_p0 }
 0x2f0   : > { %p8396_p9 = pnand %p8395_p7, %p8389_p2 }
 0x2f2   : > { %8399 = shalt.err (!%p8396_p9)
}
 0x2f3   : > { %s8400_s26 = scalar_lea.vmem %s1384_s1, 16  ;;  %s9158_s28 = smov [#allocation15]  }
 0x2f4   : > { %p8401_p5 = scmp.ne.s32.totalorder %s1384_s1, %s8400_s26  ;;  %s8404_s5 = sshll.u32 %s9158_s28, 4  ;;  %s8405_s5 = int_to_ptr.vmem [resolvable:$false] %s8404_s5 }
 0x2f5   : > { %s8406_s8 = scalar_lea.vmem %s8405_s5, 32  ;;  %p8407_p1 = scmp.lt.s32.totalorder %s1384_s1, %s8405_s5 }
 0x2f6   : > { %p8402_p11 = pnand %p8401_p5, %p9505_p12  ;;  %p8408_p10 = scmp.lt.s32.totalorder %s8406_s8, %s8400_s26 }
 0x2f8   : > { %p8403_p13 = pneg %p8402_p11  ;;  %p8409_p8 = por %p8408_p10, %p8407_p1 }
 0x2fa   : > { %p8410_p3 = pnand %p8409_p8, %p8403_p13 }
 0x2fc   : > { %8413 = shalt.err (!%p8410_p3)
}
 0x2fd   : > { %s11853_s27 = scalar_lea.sflag [#allocation14], %s9535_s0  ;;  %s11854_s23 = sld [smem:[#allocation99_spill]] }
 0x2fe   : > { %7325 = dma.hbm_to_vmem [thread:$0]  (%p9505_p12), %s10173_s17, 16, %s1384_s1, %s11853_s27  }
 0x2ff   : > { %s1414_s3 = scalar_lea.vmem [#allocation18], %s9582_s4  ;;  %s8414_s15 = scalar_lea.hbm %s10193_s11, 16 }
 0x300   : > { %s1421_s20 = sshll.u32 %s1414_s3, 4  ;;  %p8415_p2 = scmp.ne.s32.totalorder %s10193_s11, %s8414_s15  ;;  %s1422_s20 = int_to_ptr.vmem [resolvable:$true] %s1421_s20 }
 0x301   : > { %s8418_s26 = scalar_lea.hbm %s11852_s19, 32  ;;  %p8419_p4 = scmp.lt.u32.totalorder %s10193_s11, %s11852_s19 }
 0x302   : > { %p8416_p6 = pnand %p8415_p2, %p9505_p12  ;;  %p8420_p7 = scmp.lt.u32.totalorder %s8418_s26, %s8414_s15 }
 0x303   : > { %s10213_s6 = scalar_lea.hbm %s11854_s23, %s9998_s10  ;;  %p8422_p5 = scmp.lt.u32.totalorder %s8414_s15, %s10193_s11 }
 0x304   : > { %p8417_p0 = pneg %p8416_p6  ;;  %p8421_p9 = por %p8420_p7, %p8419_p4 }
 0x306   : > { %p8423_p11 = por %p8422_p5, %p8421_p9 }
 0x308   : > { %p8424_p13 = pnand %p8423_p11, %p8417_p0 }
 0x30a   : > { %8427 = shalt.err (!%p8424_p13)
}
 0x30b   : > { %s8428_s28 = scalar_lea.vmem %s1422_s20, 16  ;;  %s9159_s17 = smov [#allocation18]  }
 0x30c   : > { %p8429_p1 = scmp.ne.s32.totalorder %s1422_s20, %s8428_s28  ;;  %s8432_s1 = sshll.u32 %s9159_s17, 4  ;;  %s8433_s1 = int_to_ptr.vmem [resolvable:$false] %s8432_s1 }
 0x30d   : > { %s8434_s5 = scalar_lea.vmem %s8433_s1, 32  ;;  %p8435_p3 = scmp.lt.s32.totalorder %s1422_s20, %s8433_s1 }
 0x30e   : > { %p8430_p10 = pnand %p8429_p1, %p9505_p12  ;;  %p8436_p2 = scmp.lt.s32.totalorder %s8434_s5, %s8428_s28 }
 0x310   : > { %p8431_p8 = pneg %p8430_p10  ;;  %p8437_p6 = por %p8436_p2, %p8435_p3 }
 0x312   : > { %p8438_p4 = pnand %p8437_p6, %p8431_p8 }
 0x314   : > { %8441 = shalt.err (!%p8438_p4)
}
 0x315   : > { %s11855_s8 = scalar_lea.sflag [#allocation17], %s9535_s0  ;;  %s11856_s27 = sld [smem:[#allocation100_spill]] }
 0x316   : > { %7327 = dma.hbm_to_vmem [thread:$0]  (%p9505_p12), %s10193_s11, 16, %s1422_s20, %s11855_s8  }
 0x317   : > { %s1452_s3 = scalar_lea.vmem [#allocation21], %s9582_s4  ;;  %s8442_s28 = scalar_lea.hbm %s10213_s6, 16 }
 0x318   : > { %s1459_s15 = sshll.u32 %s1452_s3, 4  ;;  %p8443_p0 = scmp.ne.s32.totalorder %s10213_s6, %s8442_s28  ;;  %s1460_s15 = int_to_ptr.vmem [resolvable:$true] %s1459_s15 }
 0x319   : > { %s8446_s17 = scalar_lea.hbm %s11854_s23, 32  ;;  %p8447_p5 = scmp.lt.u32.totalorder %s10213_s6, %s11854_s23 }
 0x31a   : > { %p8444_p7 = pnand %p8443_p0, %p9505_p12  ;;  %p8448_p11 = scmp.lt.u32.totalorder %s8446_s17, %s8442_s28 }
 0x31b   : > { %s10233_s26 = scalar_lea.hbm %s11856_s27, %s9998_s10  ;;  %p8450_p1 = scmp.lt.u32.totalorder %s8442_s28, %s10213_s6 }
 0x31c   : > { %p8445_p9 = pneg %p8444_p7  ;;  %p8449_p13 = por %p8448_p11, %p8447_p5 }
 0x31e   : > { %p8451_p10 = por %p8450_p1, %p8449_p13 }
 0x320   : > { %p8452_p8 = pnand %p8451_p10, %p8445_p9 }
 0x322   : > { %8455 = shalt.err (!%p8452_p8)
}
 0x323   : > { %s8456_s1 = scalar_lea.vmem %s1460_s15, 16  ;;  %s9160_s11 = smov [#allocation21]  }
 0x324   : > { %p8457_p3 = scmp.ne.s32.totalorder %s1460_s15, %s8456_s1  ;;  %s8460_s20 = sshll.u32 %s9160_s11, 4  ;;  %s8461_s20 = int_to_ptr.vmem [resolvable:$false] %s8460_s20 }
 0x325   : > { %s8462_s5 = scalar_lea.vmem %s8461_s20, 32  ;;  %p8463_p4 = scmp.lt.s32.totalorder %s1460_s15, %s8461_s20 }
 0x326   : > { %p8458_p2 = pnand %p8457_p3, %p9505_p12  ;;  %p8464_p0 = scmp.lt.s32.totalorder %s8462_s5, %s8456_s1 }
 0x328   : > { %p8459_p6 = pneg %p8458_p2  ;;  %p8465_p7 = por %p8464_p0, %p8463_p4 }
 0x32a   : > { %p8466_p5 = pnand %p8465_p7, %p8459_p6 }
 0x32c   : > { %8469 = shalt.err (!%p8466_p5)
}
 0x32d   : > { %s11857_s8 = scalar_lea.sflag [#allocation20], %s9535_s0  ;;  %s11858_s3 = sld [smem:[#allocation102_spill]] }
 0x32e   : > { %7329 = dma.hbm_to_vmem [thread:$0]  (%p9505_p12), %s10213_s6, 16, %s1460_s15, %s11857_s8  }
 0x32f   : > { %s1490_s28 = scalar_lea.vmem [#allocation24], %s9582_s4  ;;  %s8470_s11 = scalar_lea.hbm %s10233_s26, 16 }
 0x330   : > { %s1497_s17 = sshll.u32 %s1490_s28, 4  ;;  %p8471_p9 = scmp.ne.s32.totalorder %s10233_s26, %s8470_s11  ;;  %s1498_s17 = int_to_ptr.vmem [resolvable:$true] %s1497_s17 }
 0x331   : > { %s8474_s20 = scalar_lea.hbm %s11856_s27, 32  ;;  %p8475_p1 = scmp.lt.u32.totalorder %s10233_s26, %s11856_s27 }
 0x332   : > { %p8472_p11 = pnand %p8471_p9, %p9505_p12  ;;  %p8476_p10 = scmp.lt.u32.totalorder %s8474_s20, %s8470_s11 }
 0x333   : > { %s10253_s1 = scalar_lea.hbm %s11858_s3, %s9998_s10  ;;  %p8478_p3 = scmp.lt.u32.totalorder %s8470_s11, %s10233_s26 }
 0x334   : > { %p8473_p13 = pneg %p8472_p11  ;;  %p8477_p8 = por %p8476_p10, %p8475_p1 }
 0x336   : > { %p8479_p2 = por %p8478_p3, %p8477_p8 }
 0x338   : > { %p8480_p6 = pnand %p8479_p2, %p8473_p13 }
 0x33a   : > { %8483 = shalt.err (!%p8480_p6)
}
 0x33b   : > { %s8484_s5 = scalar_lea.vmem %s1498_s17, 16  ;;  %s9161_s6 = smov [#allocation24]  }
 0x33c   : > { %p8485_p4 = scmp.ne.s32.totalorder %s1498_s17, %s8484_s5  ;;  %s8488_s15 = sshll.u32 %s9161_s6, 4  ;;  %s8489_s15 = int_to_ptr.vmem [resolvable:$false] %s8488_s15 }
 0x33d   : > { %s8490_s8 = scalar_lea.vmem %s8489_s15, 32  ;;  %p8491_p5 = scmp.lt.s32.totalorder %s1498_s17, %s8489_s15 }
 0x33e   : > { %p8486_p0 = pnand %p8485_p4, %p9505_p12  ;;  %p8492_p9 = scmp.lt.s32.totalorder %s8490_s8, %s8484_s5 }
 0x340   : > { %p8487_p7 = pneg %p8486_p0  ;;  %p8493_p11 = por %p8492_p9, %p8491_p5 }
 0x342   : > { %p8494_p1 = pnand %p8493_p11, %p8487_p7 }
 0x344   : > { %8497 = shalt.err (!%p8494_p1)
}
 0x345   : > { %s11859_s28 = scalar_lea.sflag [#allocation23], %s9535_s0  ;;  %s11860_s11 = sld [smem:[#allocation104_spill]] }
 0x346   : > { %7331 = dma.hbm_to_vmem [thread:$0]  (%p9505_p12), %s10233_s26, 16, %s1498_s17, %s11859_s28  }
 0x347   : > { %s1528_s5 = scalar_lea.vmem [#allocation27], %s9582_s4  ;;  %s8498_s8 = scalar_lea.hbm %s10253_s1, 16 }
 0x348   : > { %s1535_s6 = sshll.u32 %s1528_s5, 4  ;;  %p8499_p13 = scmp.ne.s32.totalorder %s10253_s1, %s8498_s8  ;;  %s1536_s6 = int_to_ptr.vmem [resolvable:$true] %s1535_s6 }
 0x349   : > { %s8502_s2 = scalar_lea.hbm %s11858_s3, 32  ;;  %p8503_p3 = scmp.lt.u32.totalorder %s10253_s1, %s11858_s3 }
 0x34a   : > { %p8500_p10 = pnand %p8499_p13, %p9505_p12  ;;  %p8504_p2 = scmp.lt.u32.totalorder %s8502_s2, %s8498_s8 }
 0x34b   : > { %s11861_s20 = smov %s11860_s11  ;;  %s10273_s15 = scalar_lea.hbm %s11860_s11, %s9998_s10 }
 0x34c   : > { %p8501_p8 = pneg %p8500_p10  ;;  %p8505_p6 = por %p8504_p2, %p8503_p3 }
 0x34d   : > { %p8506_p4 = scmp.lt.u32.totalorder %s8498_s8, %s10253_s1 }
 0x34f   : > { %p8507_p0 = por %p8506_p4, %p8505_p6 }
 0x351   : > { %p8508_p7 = pnand %p8507_p0, %p8501_p8 }
 0x353   : > { %8511 = shalt.err (!%p8508_p7)
}
 0x354   : > { %s8512_s9 = scalar_lea.vmem %s1536_s6, 16  ;;  %s9162_s26 = smov [#allocation27]  }
 0x355   : > { %p8513_p5 = scmp.ne.s32.totalorder %s1536_s6, %s8512_s9  ;;  %s8516_s17 = sshll.u32 %s9162_s26, 4  ;;  %s8517_s17 = int_to_ptr.vmem [resolvable:$false] %s8516_s17 }
 0x356   : > { %s8518_s28 = scalar_lea.vmem %s8517_s17, 32  ;;  %p8519_p1 = scmp.lt.s32.totalorder %s1536_s6, %s8517_s17 }
 0x357   : > { %p8514_p9 = pnand %p8513_p5, %p9505_p12  ;;  %p8520_p13 = scmp.lt.s32.totalorder %s8518_s28, %s8512_s9 }
 0x359   : > { %p8515_p11 = pneg %p8514_p9  ;;  %p8521_p10 = por %p8520_p13, %p8519_p1 }
 0x35b   : > { %p8522_p2 = pnand %p8521_p10, %p8515_p11 }
 0x35d   : > { %8525 = shalt.err (!%p8522_p2)
}
 0x35e   : > { %s11862_s2 = scalar_lea.sflag [#allocation26], %s9535_s0  ;;  %s11863_s11 = sld [smem:[#allocation106_spill]] }
 0x35f   : > { %7333 = dma.hbm_to_vmem [thread:$0]  (%p9505_p12), %s10253_s1, 16, %s1536_s6, %s11862_s2  }
 0x360   : > { %s1566_s9 = scalar_lea.vmem [#allocation30], %s9582_s4  ;;  %s8526_s17 = scalar_lea.hbm %s10273_s15, 16 }
 0x361   : > { %s1573_s8 = sshll.u32 %s1566_s9, 4  ;;  %p8527_p8 = scmp.ne.s32.totalorder %s10273_s15, %s8526_s17  ;;  %s1574_s8 = int_to_ptr.vmem [resolvable:$true] %s1573_s8 }
 0x362   : > { %s8530_s28 = scalar_lea.hbm %s11861_s20, 32  ;;  %p8531_p4 = scmp.lt.u32.totalorder %s10273_s15, %s11861_s20 }
 0x363   : > { %p8528_p3 = pnand %p8527_p8, %p9505_p12  ;;  %p8532_p0 = scmp.lt.u32.totalorder %s8530_s28, %s8526_s17 }
 0x364   : > { %s11864_s5 = smov %s11863_s11  ;;  %s10293_s26 = scalar_lea.hbm %s11863_s11, %s9998_s10 }
 0x365   : > { %p8529_p6 = pneg %p8528_p3  ;;  %p8533_p7 = por %p8532_p0, %p8531_p4 }
 0x366   : > { %p8534_p5 = scmp.lt.u32.totalorder %s8526_s17, %s10273_s15 }
 0x368   : > { %p8535_p9 = por %p8534_p5, %p8533_p7 }
 0x36a   : > { %p8536_p11 = pnand %p8535_p9, %p8529_p6 }
 0x36c   : > { %8539 = shalt.err (!%p8536_p11)
}
 0x36d   : > { %s8540_s3 = scalar_lea.vmem %s1574_s8, 16  ;;  %s9163_s1 = smov [#allocation30]  }
 0x36e   : > { %p8541_p1 = scmp.ne.s32.totalorder %s1574_s8, %s8540_s3  ;;  %s8544_s6 = sshll.u32 %s9163_s1, 4  ;;  %s8545_s6 = int_to_ptr.vmem [resolvable:$false] %s8544_s6 }
 0x36f   : > { %s8546_s2 = scalar_lea.vmem %s8545_s6, 32  ;;  %p8547_p2 = scmp.lt.s32.totalorder %s1574_s8, %s8545_s6 }
 0x370   : > { %p8542_p13 = pnand %p8541_p1, %p9505_p12  ;;  %p8548_p8 = scmp.lt.s32.totalorder %s8546_s2, %s8540_s3 }
 0x372   : > { %p8543_p10 = pneg %p8542_p13  ;;  %p8549_p3 = por %p8548_p8, %p8547_p2 }
 0x374   : > { %p8550_p0 = pnand %p8549_p3, %p8543_p10 }
 0x376   : > { %8553 = shalt.err (!%p8550_p0)
}
 0x377   : > { %s11865_s11 = scalar_lea.sflag [#allocation29], %s9535_s0  ;;  %s11866_s9 = sld [smem:[#allocation108_spill]] }
 0x378   : > { %7335 = dma.hbm_to_vmem [thread:$0]  (%p9505_p12), %s10273_s15, 16, %s1574_s8, %s11865_s11  }
 0x379   : > { %s1604_s3 = scalar_lea.vmem [#allocation33], %s9582_s4  ;;  %s8554_s1 = scalar_lea.hbm %s10293_s26, 16 }
 0x37a   : > { %s1611_s17 = sshll.u32 %s1604_s3, 4  ;;  %p8555_p6 = scmp.ne.s32.totalorder %s10293_s26, %s8554_s1  ;;  %s1612_s17 = int_to_ptr.vmem [resolvable:$true] %s1611_s17 }
 0x37b   : > { %s8558_s6 = scalar_lea.hbm %s11864_s5, 32  ;;  %p8559_p5 = scmp.lt.u32.totalorder %s10293_s26, %s11864_s5 }
 0x37c   : > { %p8556_p4 = pnand %p8555_p6, %p9505_p12  ;;  %p8560_p9 = scmp.lt.u32.totalorder %s8558_s6, %s8554_s1 }
 0x37d   : > { %s10313_s28 = scalar_lea.hbm %s11866_s9, %s9998_s10  ;;  %p8562_p1 = scmp.lt.u32.totalorder %s8554_s1, %s10293_s26 }
 0x37e   : > { %p8557_p7 = pneg %p8556_p4  ;;  %p8561_p11 = por %p8560_p9, %p8559_p5 }
 0x380   : > { %p8563_p13 = por %p8562_p1, %p8561_p11 }
 0x382   : > { %p8564_p10 = pnand %p8563_p13, %p8557_p7 }
 0x384   : > { %8567 = shalt.err (!%p8564_p10)
}
 0x385   : > { %s8568_s2 = scalar_lea.vmem %s1612_s17, 16  ;;  %s9164_s15 = smov [#allocation33]  }
 0x386   : > { %p8569_p2 = scmp.ne.s32.totalorder %s1612_s17, %s8568_s2  ;;  %s8572_s8 = sshll.u32 %s9164_s15, 4  ;;  %s8573_s8 = int_to_ptr.vmem [resolvable:$false] %s8572_s8 }
 0x387   : > { %s8574_s11 = scalar_lea.vmem %s8573_s8, 32  ;;  %p8575_p0 = scmp.lt.s32.totalorder %s1612_s17, %s8573_s8 }
 0x388   : > { %p8570_p8 = pnand %p8569_p2, %p9505_p12  ;;  %p8576_p6 = scmp.lt.s32.totalorder %s8574_s11, %s8568_s2 }
 0x38a   : > { %p8571_p3 = pneg %p8570_p8  ;;  %p8577_p4 = por %p8576_p6, %p8575_p0 }
 0x38c   : > { %p8578_p5 = pnand %p8577_p4, %p8571_p3 }
 0x38e   : > { %8581 = shalt.err (!%p8578_p5)
}
 0x38f   : > { %s11867_s3 = scalar_lea.sflag [#allocation32], %s9535_s0  ;;  %s11868_s1 = sld [smem:[#allocation110_spill]] }
 0x390   : > { %7337 = dma.hbm_to_vmem [thread:$0]  (%p9505_p12), %s10293_s26, 16, %s1612_s17, %s11867_s3  }
 0x391   : > { %s1642_s2 = scalar_lea.vmem [#allocation36], %s9582_s4  ;;  %s8582_s11 = scalar_lea.hbm %s10313_s28, 16 }
 0x392   : > { %s1649_s15 = sshll.u32 %s1642_s2, 4  ;;  %p8583_p7 = scmp.ne.s32.totalorder %s10313_s28, %s8582_s11  ;;  %s1650_s15 = int_to_ptr.vmem [resolvable:$true] %s1649_s15 }
 0x393   : > { %s8586_s5 = scalar_lea.hbm %s11866_s9, 32  ;;  %p8587_p1 = scmp.lt.u32.totalorder %s10313_s28, %s11866_s9 }
 0x394   : > { %p8584_p9 = pnand %p8583_p7, %p9505_p12  ;;  %p8588_p13 = scmp.lt.u32.totalorder %s8586_s5, %s8582_s11 }
 0x395   : > { %s11869_s6 = smov %s11868_s1  ;;  %s10333_s8 = scalar_lea.hbm %s11868_s1, %s9998_s10 }
 0x396   : > { %p8585_p11 = pneg %p8584_p9  ;;  %p8589_p10 = por %p8588_p13, %p8587_p1 }
 0x397   : > { %p8590_p2 = scmp.lt.u32.totalorder %s8582_s11, %s10313_s28 }
 0x399   : > { %p8591_p8 = por %p8590_p2, %p8589_p10 }
 0x39b   : > { %p8592_p3 = pnand %p8591_p8, %p8585_p11 }
 0x39d   : > { %8595 = shalt.err (!%p8592_p3)
}
 0x39e   : > { %s8596_s12 = scalar_lea.vmem %s1650_s15, 16  ;;  %s9165_s26 = smov [#allocation36]  }
 0x39f   : > { %p8597_p0 = scmp.ne.s32.totalorder %s1650_s15, %s8596_s12  ;;  %s8600_s17 = sshll.u32 %s9165_s26, 4  ;;  %s8601_s17 = int_to_ptr.vmem [resolvable:$false] %s8600_s17 }
 0x3a0   : > { %s8602_s3 = scalar_lea.vmem %s8601_s17, 32  ;;  %p8603_p5 = scmp.lt.s32.totalorder %s1650_s15, %s8601_s17 }
 0x3a1   : > { %p8598_p6 = pnand %p8597_p0, %p9505_p12  ;;  %p8604_p7 = scmp.lt.s32.totalorder %s8602_s3, %s8596_s12 }
 0x3a3   : > { %p8599_p4 = pneg %p8598_p6  ;;  %p8605_p9 = por %p8604_p7, %p8603_p5 }
 0x3a5   : > { %p8606_p1 = pnand %p8605_p9, %p8599_p4 }
 0x3a7   : > { %8609 = shalt.err (!%p8606_p1)
}
 0x3a8   : > { %s11870_s5 = scalar_lea.sflag [#allocation35], %s9535_s0  ;;  %s11871_s1 = sld [smem:[#allocation112_spill]] }
 0x3a9   : > { %7339 = dma.hbm_to_vmem [thread:$0]  (%p9505_p12), %s10313_s28, 16, %s1650_s15, %s11870_s5  }
 0x3aa   : > { %s1680_s12 = scalar_lea.vmem [#allocation39], %s9582_s4  ;;  %s8610_s26 = scalar_lea.hbm %s10333_s8, 16 }
 0x3ab   : > { %s1687_s2 = sshll.u32 %s1680_s12, 4  ;;  %p8611_p11 = scmp.ne.s32.totalorder %s10333_s8, %s8610_s26  ;;  %s1688_s2 = int_to_ptr.vmem [resolvable:$true] %s1687_s2 }
 0x3ac   : > { %s8614_s17 = scalar_lea.hbm %s11869_s6, 32  ;;  %p8615_p2 = scmp.lt.u32.totalorder %s10333_s8, %s11869_s6 }
 0x3ad   : > { %p8612_p13 = pnand %p8611_p11, %p9505_p12  ;;  %p8616_p8 = scmp.lt.u32.totalorder %s8614_s17, %s8610_s26 }
 0x3ae   : > { %s11872_s9 = smov %s11871_s1  ;;  %s10353_s11 = scalar_lea.hbm %s11871_s1, %s9998_s10 }
 0x3af   : > { %p8613_p10 = pneg %p8612_p13  ;;  %p8617_p3 = por %p8616_p8, %p8615_p2 }
 0x3b0   : > { %p8618_p0 = scmp.lt.u32.totalorder %s8610_s26, %s10333_s8 }
 0x3b2   : > { %p8619_p6 = por %p8618_p0, %p8617_p3 }
 0x3b4   : > { %p8620_p4 = pnand %p8619_p6, %p8613_p10 }
 0x3b6   : > { %8623 = shalt.err (!%p8620_p4)
}
 0x3b7   : > { %s8624_s3 = scalar_lea.vmem %s1688_s2, 16  ;;  %s9166_s28 = smov [#allocation39]  }
 0x3b8   : > { %p8625_p5 = scmp.ne.s32.totalorder %s1688_s2, %s8624_s3  ;;  %s8628_s15 = sshll.u32 %s9166_s28, 4  ;;  %s8629_s15 = int_to_ptr.vmem [resolvable:$false] %s8628_s15 }
 0x3b9   : > { %s8630_s5 = scalar_lea.vmem %s8629_s15, 32  ;;  %p8631_p1 = scmp.lt.s32.totalorder %s1688_s2, %s8629_s15 }
 0x3ba   : > { %p8626_p7 = pnand %p8625_p5, %p9505_p12  ;;  %p8632_p11 = scmp.lt.s32.totalorder %s8630_s5, %s8624_s3 }
 0x3bc   : > { %p8627_p9 = pneg %p8626_p7  ;;  %p8633_p13 = por %p8632_p11, %p8631_p1 }
 0x3be   : > { %p8634_p2 = pnand %p8633_p13, %p8627_p9 }
 0x3c0   : > { %8637 = shalt.err (!%p8634_p2)
}
 0x3c1   : > { %s11873_s1 = scalar_lea.sflag [#allocation38], %s9535_s0  ;;  %s11874_s12 = sld [smem:[#allocation114_spill]] }
 0x3c2   : > { %7341 = dma.hbm_to_vmem [thread:$0]  (%p9505_p12), %s10333_s8, 16, %s1688_s2, %s11873_s1  }
 0x3c3   : > { %s1718_s26 = scalar_lea.vmem [#allocation42], %s9582_s4  ;;  %s8638_s28 = scalar_lea.hbm %s10353_s11, 16 }
 0x3c4   : > { %s1725_s17 = sshll.u32 %s1718_s26, 4  ;;  %p8639_p10 = scmp.ne.s32.totalorder %s10353_s11, %s8638_s28  ;;  %s1726_s17 = int_to_ptr.vmem [resolvable:$true] %s1725_s17 }
 0x3c5   : > { %s8642_s15 = scalar_lea.hbm %s11872_s9, 32  ;;  %p8643_p0 = scmp.lt.u32.totalorder %s10353_s11, %s11872_s9 }
 0x3c6   : > { %p8640_p8 = pnand %p8639_p10, %p9505_p12  ;;  %p8644_p6 = scmp.lt.u32.totalorder %s8642_s15, %s8638_s28 }
 0x3c7   : > { %s10373_s3 = scalar_lea.hbm %s11874_s12, %s9998_s10  ;;  %p8646_p5 = scmp.lt.u32.totalorder %s8638_s28, %s10353_s11 }
 0x3c8   : > { %p8641_p3 = pneg %p8640_p8  ;;  %p8645_p4 = por %p8644_p6, %p8643_p0 }
 0x3ca   : > { %p8647_p7 = por %p8646_p5, %p8645_p4 }
 0x3cc   : > { %p8648_p9 = pnand %p8647_p7, %p8641_p3 }
 0x3ce   : > { %8651 = shalt.err (!%p8648_p9)
}
 0x3cf   : > { %s8652_s5 = scalar_lea.vmem %s1726_s17, 16  ;;  %s9167_s8 = smov [#allocation42]  }
 0x3d0   : > { %p8653_p1 = scmp.ne.s32.totalorder %s1726_s17, %s8652_s5  ;;  %s8656_s2 = sshll.u32 %s9167_s8, 4  ;;  %s8657_s2 = int_to_ptr.vmem [resolvable:$false] %s8656_s2 }
 0x3d1   : > { %s8658_s1 = scalar_lea.vmem %s8657_s2, 32  ;;  %p8659_p2 = scmp.lt.s32.totalorder %s1726_s17, %s8657_s2 }
 0x3d2   : > { %p8654_p11 = pnand %p8653_p1, %p9505_p12  ;;  %p8660_p10 = scmp.lt.s32.totalorder %s8658_s1, %s8652_s5 }
 0x3d4   : > { %p8655_p13 = pneg %p8654_p11  ;;  %p8661_p8 = por %p8660_p10, %p8659_p2 }
 0x3d6   : > { %p8662_p0 = pnand %p8661_p8, %p8655_p13 }
 0x3d8   : > { %8665 = shalt.err (!%p8662_p0)
}
 0x3d9   : > { %s11875_s26 = scalar_lea.sflag [#allocation41], %s9535_s0  ;;  %s11876_s28 = sld [smem:[#allocation116_spill]] }
 0x3da   : > { %7343 = dma.hbm_to_vmem [thread:$0]  (%p9505_p12), %s10353_s11, 16, %s1726_s17, %s11875_s26  }
 0x3db   : > { %s1756_s15 = scalar_lea.vmem [#allocation45], %s9582_s4  ;;  %s8666_s2 = scalar_lea.hbm %s10373_s3, 16 }
 0x3dc   : > { %s1763_s5 = sshll.u32 %s1756_s15, 4  ;;  %p8667_p3 = scmp.ne.s32.totalorder %s10373_s3, %s8666_s2  ;;  %s1764_s5 = int_to_ptr.vmem [resolvable:$true] %s1763_s5 }
 0x3dd   : > { %s8670_s1 = scalar_lea.hbm %s11874_s12, 32  ;;  %p8671_p5 = scmp.lt.u32.totalorder %s10373_s3, %s11874_s12 }
 0x3de   : > { %p8668_p6 = pnand %p8667_p3, %p9505_p12  ;;  %p8672_p7 = scmp.lt.u32.totalorder %s8670_s1, %s8666_s2 }
 0x3df   : > { %s11877_s6 = smov %s11876_s28  ;;  %s10393_s8 = scalar_lea.hbm %s11876_s28, %s9998_s10 }
 0x3e0   : > { %p8669_p4 = pneg %p8668_p6  ;;  %p8673_p9 = por %p8672_p7, %p8671_p5 }
 0x3e1   : > { %p8674_p1 = scmp.lt.u32.totalorder %s8666_s2, %s10373_s3 }
 0x3e3   : > { %p8675_p11 = por %p8674_p1, %p8673_p9 }
 0x3e5   : > { %p8676_p13 = pnand %p8675_p11, %p8669_p4 }
 0x3e7   : > { %8679 = shalt.err (!%p8676_p13)
}
 0x3e8   : > { %s8680_s9 = scalar_lea.vmem %s1764_s5, 16  ;;  %s9168_s11 = smov [#allocation45]  }
 0x3e9   : > { %p8681_p2 = scmp.ne.s32.totalorder %s1764_s5, %s8680_s9  ;;  %s8684_s17 = sshll.u32 %s9168_s11, 4  ;;  %s8685_s17 = int_to_ptr.vmem [resolvable:$false] %s8684_s17 }
 0x3ea   : > { %s8686_s26 = scalar_lea.vmem %s8685_s17, 32  ;;  %p8687_p0 = scmp.lt.s32.totalorder %s1764_s5, %s8685_s17 }
 0x3eb   : > { %p8682_p10 = pnand %p8681_p2, %p9505_p12  ;;  %p8688_p3 = scmp.lt.s32.totalorder %s8686_s26, %s8680_s9 }
 0x3ed   : > { %p8683_p8 = pneg %p8682_p10  ;;  %p8689_p6 = por %p8688_p3, %p8687_p0 }
 0x3ef   : > { %p8690_p5 = pnand %p8689_p6, %p8683_p8 }
 0x3f1   : > { %8693 = shalt.err (!%p8690_p5)
}
 0x3f2   : > { %s11878_s28 = scalar_lea.sflag [#allocation44], %s9535_s0  ;;  %s11879_s15 = sld [smem:[#allocation118_spill]] }
 0x3f3   : > { %7345 = dma.hbm_to_vmem [thread:$0]  (%p9505_p12), %s10373_s3, 16, %s1764_s5, %s11878_s28  }
 0x3f4   : > { %s1794_s9 = scalar_lea.vmem [#allocation48], %s9582_s4  ;;  %s8694_s11 = scalar_lea.hbm %s10393_s8, 16 }
 0x3f5   : > { %s1801_s2 = sshll.u32 %s1794_s9, 4  ;;  %p8695_p4 = scmp.ne.s32.totalorder %s10393_s8, %s8694_s11  ;;  %s1802_s2 = int_to_ptr.vmem [resolvable:$true] %s1801_s2 }
 0x3f6   : > { %s8698_s17 = scalar_lea.hbm %s11877_s6, 32  ;;  %p8699_p1 = scmp.lt.u32.totalorder %s10393_s8, %s11877_s6 }
 0x3f7   : > { %p8696_p7 = pnand %p8695_p4, %p9505_p12  ;;  %p8700_p11 = scmp.lt.u32.totalorder %s8698_s17, %s8694_s11 }
 0x3f8   : > { %s11880_s12 = smov %s11879_s15  ;;  %s10413_s1 = scalar_lea.hbm %s11879_s15, %s9998_s10 }
 0x3f9   : > { %p8697_p9 = pneg %p8696_p7  ;;  %p8701_p13 = por %p8700_p11, %p8699_p1 }
 0x3fa   : > { %p8702_p2 = scmp.lt.u32.totalorder %s8694_s11, %s10393_s8 }
 0x3fc   : > { %p8703_p10 = por %p8702_p2, %p8701_p13 }
 0x3fe   : > { %p8704_p8 = pnand %p8703_p10, %p8697_p9 }
 0x400   : > { %8707 = shalt.err (!%p8704_p8)
}
 0x401   : > { %s8708_s26 = scalar_lea.vmem %s1802_s2, 16  ;;  %s9169_s3 = smov [#allocation48]  }
 0x402   : > { %p8709_p0 = scmp.ne.s32.totalorder %s1802_s2, %s8708_s26  ;;  %s8712_s5 = sshll.u32 %s9169_s3, 4  ;;  %s8713_s5 = int_to_ptr.vmem [resolvable:$false] %s8712_s5 }
 0x403   : > { %s8714_s28 = scalar_lea.vmem %s8713_s5, 32  ;;  %p8715_p5 = scmp.lt.s32.totalorder %s1802_s2, %s8713_s5 }
 0x404   : > { %p8710_p3 = pnand %p8709_p0, %p9505_p12  ;;  %p8716_p4 = scmp.lt.s32.totalorder %s8714_s28, %s8708_s26 }
 0x406   : > { %p8711_p6 = pneg %p8710_p3  ;;  %p8717_p7 = por %p8716_p4, %p8715_p5 }
 0x408   : > { %p8718_p1 = pnand %p8717_p7, %p8711_p6 }
 0x40a   : > { %8721 = shalt.err (!%p8718_p1)
}
 0x40b   : > { %s11881_s15 = scalar_lea.sflag [#allocation47], %s9535_s0  ;;  %s11882_s9 = sld [smem:[#allocation120_spill]] }
 0x40c   : > { %7347 = dma.hbm_to_vmem [thread:$0]  (%p9505_p12), %s10393_s8, 16, %s1802_s2, %s11881_s15  }
 0x40d   : > { %s1832_s11 = scalar_lea.vmem [#allocation51], %s9582_s4  ;;  %s8722_s3 = scalar_lea.hbm %s10413_s1, 16 }
 0x40e   : > { %s1839_s17 = sshll.u32 %s1832_s11, 4  ;;  %p8723_p9 = scmp.ne.s32.totalorder %s10413_s1, %s8722_s3  ;;  %s1840_s17 = int_to_ptr.vmem [resolvable:$true] %s1839_s17 }
 0x40f   : > { %s8726_s5 = scalar_lea.hbm %s11880_s12, 32  ;;  %p8727_p2 = scmp.lt.u32.totalorder %s10413_s1, %s11880_s12 }
 0x410   : > { %p8724_p11 = pnand %p8723_p9, %p9505_p12  ;;  %p8728_p10 = scmp.lt.u32.totalorder %s8726_s5, %s8722_s3 }
 0x411   : > { %s10433_s26 = scalar_lea.hbm %s11882_s9, %s9998_s10  ;;  %p8730_p0 = scmp.lt.u32.totalorder %s8722_s3, %s10413_s1 }
 0x412   : > { %p8725_p13 = pneg %p8724_p11  ;;  %p8729_p8 = por %p8728_p10, %p8727_p2 }
 0x414   : > { %p8731_p3 = por %p8730_p0, %p8729_p8 }
 0x416   : > { %p8732_p6 = pnand %p8731_p3, %p8725_p13 }
 0x418   : > { %8735 = shalt.err (!%p8732_p6)
}
 0x419   : > { %s8736_s28 = scalar_lea.vmem %s1840_s17, 16  ;;  %s9170_s8 = smov [#allocation51]  }
 0x41a   : > { %p8737_p5 = scmp.ne.s32.totalorder %s1840_s17, %s8736_s28  ;;  %s8740_s2 = sshll.u32 %s9170_s8, 4  ;;  %s8741_s2 = int_to_ptr.vmem [resolvable:$false] %s8740_s2 }
 0x41b   : > { %s8742_s15 = scalar_lea.vmem %s8741_s2, 32  ;;  %p8743_p1 = scmp.lt.s32.totalorder %s1840_s17, %s8741_s2 }
 0x41c   : > { %p8738_p4 = pnand %p8737_p5, %p9505_p12  ;;  %p8744_p9 = scmp.lt.s32.totalorder %s8742_s15, %s8736_s28 }
 0x41e   : > { %p8739_p7 = pneg %p8738_p4  ;;  %p8745_p11 = por %p8744_p9, %p8743_p1 }
 0x420   : > { %p8746_p2 = pnand %p8745_p11, %p8739_p7 }
 0x422   : > { %8749 = shalt.err (!%p8746_p2)
}
 0x423   : > { %s11883_s11 = scalar_lea.sflag [#allocation50], %s9535_s0  ;;  %s11884_s3 = sld [smem:[#allocation122_spill]] }
 0x424   : > { %7349 = dma.hbm_to_vmem [thread:$0]  (%p9505_p12), %s10413_s1, 16, %s1840_s17, %s11883_s11  }
 0x425   : > { %s1866_s5 = scalar_lea.vmem [#allocation54], %s9582_s4  ;;  %s8750_s2 = scalar_lea.hbm %s10433_s26, 16 }
 0x426   : > { %s1873_s28 = sshll.u32 %s1866_s5, 4  ;;  %p8751_p13 = scmp.ne.s32.totalorder %s10433_s26, %s8750_s2  ;;  %s1874_s28 = int_to_ptr.vmem [resolvable:$true] %s1873_s28 }
 0x427   : > { %s8754_s15 = scalar_lea.hbm %s11882_s9, 32  ;;  %p8755_p0 = scmp.lt.u32.totalorder %s10433_s26, %s11882_s9 }
 0x428   : > { %p8752_p10 = pnand %p8751_p13, %p9505_p12  ;;  %p8756_p3 = scmp.lt.u32.totalorder %s8754_s15, %s8750_s2 }
 0x429   : > { %s10453_s8 = scalar_lea.hbm %s11884_s3, %s9998_s10  ;;  %p8758_p5 = scmp.lt.u32.totalorder %s8750_s2, %s10433_s26 }
 0x42a   : > { %p8753_p8 = pneg %p8752_p10  ;;  %p8757_p6 = por %p8756_p3, %p8755_p0 }
 0x42c   : > { %p8759_p4 = por %p8758_p5, %p8757_p6 }
 0x42e   : > { %p8760_p7 = pnand %p8759_p4, %p8753_p8 }
 0x430   : > { %8763 = shalt.err (!%p8760_p7)
}
 0x431   : > { %s8764_s6 = scalar_lea.vmem %s1874_s28, 16  ;;  %s9171_s1 = smov [#allocation54]  }
 0x432   : > { %p8765_p1 = scmp.ne.s32.totalorder %s1874_s28, %s8764_s6  ;;  %s8768_s17 = sshll.u32 %s9171_s1, 4  ;;  %s8769_s17 = int_to_ptr.vmem [resolvable:$false] %s8768_s17 }
 0x433   : > { %s8770_s11 = scalar_lea.vmem %s8769_s17, 32  ;;  %p8771_p2 = scmp.lt.s32.totalorder %s1874_s28, %s8769_s17 }
 0x434   : > { %p8766_p9 = pnand %p8765_p1, %p9505_p12  ;;  %p8772_p13 = scmp.lt.s32.totalorder %s8770_s11, %s8764_s6 }
 0x436   : > { %p8767_p11 = pneg %p8766_p9  ;;  %p8773_p10 = por %p8772_p13, %p8771_p2 }
 0x438   : > { %p8774_p0 = pnand %p8773_p10, %p8767_p11 }
 0x43a   : > { %8777 = shalt.err (!%p8774_p0)
}
 0x43b   : > { %s11885_s5 = scalar_lea.sflag [#allocation53], %s9535_s0  ;;  %s11886_s2 = sld [smem:[#allocation124_spill]] }
 0x43c   : > { %7351 = dma.hbm_to_vmem [thread:$0]  (%p9505_p12), %s10433_s26, 16, %s1874_s28, %s11885_s5  }
 0x43d   : > { %s1900_s6 = scalar_lea.vmem [#allocation57], %s9582_s4  ;;  %s8778_s17 = scalar_lea.hbm %s10453_s8, 16 }
 0x43e   : > { %s1907_s15 = sshll.u32 %s1900_s6, 4  ;;  %p8779_p8 = scmp.ne.s32.totalorder %s10453_s8, %s8778_s17  ;;  %s1908_s15 = int_to_ptr.vmem [resolvable:$true] %s1907_s15 }
 0x43f   : > { %s8782_s11 = scalar_lea.hbm %s11884_s3, 32  ;;  %p8783_p5 = scmp.lt.u32.totalorder %s10453_s8, %s11884_s3 }
 0x440   : > { %p8780_p3 = pnand %p8779_p8, %p9505_p12  ;;  %p8784_p4 = scmp.lt.u32.totalorder %s8782_s11, %s8778_s17 }
 0x441   : > { %s11887_s9 = smov %s11886_s2  ;;  %s10473_s1 = scalar_lea.hbm %s11886_s2, %s9998_s10 }
 0x442   : > { %p8781_p6 = pneg %p8780_p3  ;;  %p8785_p7 = por %p8784_p4, %p8783_p5 }
 0x443   : > { %p8786_p1 = scmp.lt.u32.totalorder %s8778_s17, %s10453_s8 }
 0x445   : > { %p8787_p9 = por %p8786_p1, %p8785_p7 }
 0x447   : > { %p8788_p11 = pnand %p8787_p9, %p8781_p6 }
 0x449   : > { %8791 = shalt.err (!%p8788_p11)
}
 0x44a   : > { %s8792_s12 = scalar_lea.vmem %s1908_s15, 16  ;;  %s9172_s26 = smov [#allocation57]  }
 0x44b   : > { %p8793_p2 = scmp.ne.s32.totalorder %s1908_s15, %s8792_s12  ;;  %s8796_s28 = sshll.u32 %s9172_s26, 4  ;;  %s8797_s28 = int_to_ptr.vmem [resolvable:$false] %s8796_s28 }
 0x44c   : > { %s8798_s5 = scalar_lea.vmem %s8797_s28, 32  ;;  %p8799_p0 = scmp.lt.s32.totalorder %s1908_s15, %s8797_s28 }
 0x44d   : > { %p8794_p13 = pnand %p8793_p2, %p9505_p12  ;;  %p8800_p8 = scmp.lt.s32.totalorder %s8798_s5, %s8792_s12 }
 0x44f   : > { %p8795_p10 = pneg %p8794_p13  ;;  %p8801_p3 = por %p8800_p8, %p8799_p0 }
 0x451   : > { %p8802_p4 = pnand %p8801_p3, %p8795_p10 }
 0x453   : > { %8805 = shalt.err (!%p8802_p4)
}
 0x454   : > { %s11888_s2 = scalar_lea.sflag [#allocation56], %s9535_s0  ;;  %s11889_s6 = sld [smem:[#allocation126_spill]] }
 0x455   : > { %7353 = dma.hbm_to_vmem [thread:$0]  (%p9505_p12), %s10453_s8, 16, %s1908_s15, %s11888_s2  }
 0x456   : > { %s1934_s12 = scalar_lea.vmem [#allocation60], %s9582_s4  ;;  %s8806_s26 = scalar_lea.hbm %s10473_s1, 16 }
 0x457   : > { %s1941_s17 = sshll.u32 %s1934_s12, 4  ;;  %p8807_p6 = scmp.ne.s32.totalorder %s10473_s1, %s8806_s26  ;;  %s1942_s17 = int_to_ptr.vmem [resolvable:$true] %s1941_s17 }
 0x458   : > { %s8810_s28 = scalar_lea.hbm %s11887_s9, 32  ;;  %p8811_p1 = scmp.lt.u32.totalorder %s10473_s1, %s11887_s9 }
 0x459   : > { %p8808_p5 = pnand %p8807_p6, %p9505_p12  ;;  %p8812_p9 = scmp.lt.u32.totalorder %s8810_s28, %s8806_s26 }
 0x45a   : > { %s10493_s11 = scalar_lea.hbm %s11889_s6, %s9998_s10  ;;  %p8814_p2 = scmp.lt.u32.totalorder %s8806_s26, %s10473_s1 }
 0x45b   : > { %p8809_p7 = pneg %p8808_p5  ;;  %p8813_p11 = por %p8812_p9, %p8811_p1 }
 0x45d   : > { %p8815_p13 = por %p8814_p2, %p8813_p11 }
 0x45f   : > { %p8816_p10 = pnand %p8815_p13, %p8809_p7 }
 0x461   : > { %8819 = shalt.err (!%p8816_p10)
}
 0x462   : > { %s8820_s5 = scalar_lea.vmem %s1942_s17, 16  ;;  %s9173_s10 = smov [#allocation60]  }
 0x463   : > { %p8821_p0 = scmp.ne.s32.totalorder %s1942_s17, %s8820_s5  ;;  %s8824_s8 = sshll.u32 %s9173_s10, 4  ;;  %s8825_s8 = int_to_ptr.vmem [resolvable:$false] %s8824_s8 }
 0x464   : > { %s8826_s15 = scalar_lea.vmem %s8825_s8, 32  ;;  %p8827_p4 = scmp.lt.s32.totalorder %s1942_s17, %s8825_s8 }
 0x465   : > { %p8822_p8 = pnand %p8821_p0, %p9505_p12  ;;  %p8828_p6 = scmp.lt.s32.totalorder %s8826_s15, %s8820_s5 }
 0x467   : > { %p8823_p3 = pneg %p8822_p8  ;;  %p8829_p5 = por %p8828_p6, %p8827_p4 }
 0x469   : > { %p8830_p1 = pnand %p8829_p5, %p8823_p3 }
 0x46b   : > { %8833 = shalt.err (!%p8830_p1)
}
 0x46c   : > { %s11890_s2 = scalar_lea.sflag [#allocation59], %s9535_s0  ;;  %s1968_s12 = scalar_lea.vmem [#allocation63], %s9582_s4 }
 0x46d   : > { %7355 = dma.hbm_to_vmem [thread:$0]  (%p9505_p12), %s10473_s1, 16, %s1942_s17, %s11890_s2  }
 0x46e   : > { %s1975_s26 = sshll.u32 %s1968_s12, 4  ;;  %s8834_s28 = scalar_lea.hbm %s10493_s11, 16  ;;  %s1976_s26 = int_to_ptr.vmem [resolvable:$true] %s1975_s26 }
 0x46f   : > { %p8835_p7 = scmp.ne.s32.totalorder %s10493_s11, %s8834_s28  ;;  %s8838_s5 = scalar_lea.hbm %s11889_s6, 32 }
 0x470   : > { %p8839_p2 = scmp.lt.u32.totalorder %s10493_s11, %s11889_s6  ;;  %p8840_p13 = scmp.lt.u32.totalorder %s8838_s5, %s8834_s28 }
 0x471   : > { %p8836_p9 = pnand %p8835_p7, %p9505_p12  ;;  %p8842_p0 = scmp.lt.u32.totalorder %s8834_s28, %s10493_s11 }
 0x472   : > { %p8841_p10 = por %p8840_p13, %p8839_p2 }
 0x473   : > { %p8837_p11 = pneg %p8836_p9 }
 0x474   : > { %p8843_p8 = por %p8842_p0, %p8841_p10 }
 0x476   : > { %p8844_p3 = pnand %p8843_p8, %p8837_p11 }
 0x478   : > { %8847 = shalt.err (!%p8844_p3)
}
 0x479   : > { %s8848_s10 = scalar_lea.vmem %s1976_s26, 16  ;;  %s9174_s4 = smov [#allocation63]  }
 0x47a   : > { %p8849_p4 = scmp.ne.s32.totalorder %s1976_s26, %s8848_s10  ;;  %s8852_s1 = sshll.u32 %s9174_s4, 4  ;;  %s8853_s1 = int_to_ptr.vmem [resolvable:$false] %s8852_s1 }
 0x47b   : > { %s8854_s17 = scalar_lea.vmem %s8853_s1, 32  ;;  %p8855_p1 = scmp.lt.s32.totalorder %s1976_s26, %s8853_s1 }
 0x47c   : > { %p8850_p6 = pnand %p8849_p4, %p9505_p12  ;;  %p8856_p7 = scmp.lt.s32.totalorder %s8854_s17, %s8848_s10 }
 0x47e   : > { %p8851_p5 = pneg %p8850_p6  ;;  %p8857_p9 = por %p8856_p7, %p8855_p1 }
 0x480   : > { %p8858_p2 = pnand %p8857_p9, %p8851_p5 }
 0x482   : > { %8861 = shalt.err (!%p8858_p2)
}
 0x483   : > { %s11891_s8 = scalar_lea.sflag [#allocation62], %s9535_s0 }
 0x484   : > { %7357 = dma.hbm_to_vmem [thread:$0]  (%p9505_p12), %s10493_s11, 16, %s1976_s26, %s11891_s8  }
 0x485 PF: > { %p6664_p11 = scmp.ge.s32.totalorder %s9092_s22, 1  ;;  %p1980_p13 = scmp.lt.s32.totalorder %s9092_s22, 5 }
 0x487   : > { %p1981_p10 = pnand %p6664_p11, %p1980_p13 }
 0x488   : > { %s11892_s15 = sld [smem:[#allocation138_spill]] (!%p1981_p10)  ;;  %s10529_s2 = sand.u32 (!%p1981_p10), 1, %s9068_s7  }
 0x489   : > { %1984 = sbr.rel (%p1981_p10) target bundleno = 8338 (0x2092), region = 176  ;;  %s11746_s12 = sshll.u32 (!%p1981_p10), %s10529_s2, 2 }
 0x48a   : > { %s1987_s30 = scalar_lea.sflag (!%p1981_p10), [#allocation5], %s10529_s2  ;;  %s10535_s0 = scalar_lea.vmem (!%p1981_p10), [#allocation4], %s11746_s12 }
 0x48e   : > { %p11893_p12 = scmp.ne.s32.totalorder (!%p1981_p10), %s11892_s15, 0 }
 0x490   : > { %8963 = dma.done.wait (%p11893_p12), %s1987_s30, 64  }
 0x491   : > { %8965 = vsyncadd (%p11893_p12), %s1987_s30, 4294967232  ;;  %s11894_s11 = sld [smem:[#allocation135_spill]]  ;;  %s10545_s28 = sshll.u32 %s10529_s2, 5 }
 0x492   : > { %s10549_s10 = scalar_lea.vmem [#allocation7], %s10545_s28 }
 0x497   : > { %s10542_s26 = sand.u32 1, %s11894_s11  }
 0x498   : > { %s1996_s5 = scalar_lea.sflag [#allocation8], %s10542_s26 }
 0x499   : > { %8967 = dma.done.wait (%p11893_p12), %s1996_s5, 1024  }
 0x49a   : > { %8969 = vsyncadd (%p11893_p12), %s1996_s5, 4294966272  ;;  %s11895_s4 = sld [smem:[#allocation129_spill]]  ;;  %s11896_s1 = sld [smem:[#allocation141_spill]] }
 0x49b   : > { %s10562_s30 = scalar_lea.vmem [#allocation9], %s10545_s28  ;;  %s2014_s11 = scalar_lea.sflag [#allocation11], %s10542_s26 }
 0x4a0   : > { %s10556_s17 = sand.u32 1, %s11895_s4   ;;  %p11897_p0 = scmp.ne.s32.totalorder %s11896_s1, 0 }
 0x4a1   : > { %s10559_s8 = sshll.u32 %s10556_s17, 4 }
 0x4a2   : > { %8971 = dma.done.wait (%p11897_p0), %s2014_s11, 272  }
 0x4a3   : > { %8973 = vsyncadd (%p11897_p0), %s2014_s11, 4294967024  ;;  %s2031_s5 = scalar_lea.sflag [#allocation14], %s10542_s26 }
 0x4a4   : > { %8975 = dma.done.wait (%p11897_p0), %s2031_s5, 272  }
 0x4a5   : > { %8977 = vsyncadd (%p11897_p0), %s2031_s5, 4294967024  ;;  %s2048_s3 = scalar_lea.sflag [#allocation17], %s10542_s26 }
 0x4a6   : > { %8979 = dma.done.wait (%p11897_p0), %s2048_s3, 272  }
 0x4a7   : > { %8981 = vsyncadd (%p11897_p0), %s2048_s3, 4294967024  ;;  %s7317_s11 = smul.u32 24, %s10556_s17  ;;  %s2065_s4 = scalar_lea.sflag [#allocation20], %s10542_s26 }
 0x4a9   : > { %s10587_s5 = scalar_lea.vmem [#allocation19], %s7317_s11 }
 0x4aa   : > { %8983 = dma.done.wait (%p11897_p0), %s2065_s4, 400  }
 0x4ab   : > { %8985 = vsyncadd (%p11897_p0), %s2065_s4, 4294966896  ;;  %s2082_s3 = scalar_lea.sflag [#allocation23], %s10542_s26 }
 0x4ac   : > { %8987 = dma.done.wait (%p11897_p0), %s2082_s3, 272  }
 0x4ad   : > { %8989 = vsyncadd (%p11897_p0), %s2082_s3, 4294967024  ;;  %s2099_s15 = scalar_lea.sflag [#allocation26], %s10542_s26 }
 0x4ae   : > { %8991 = dma.done.wait (%p11897_p0), %s2099_s15, 272  }
 0x4af   : > { %8993 = vsyncadd (%p11897_p0), %s2099_s15, 4294967024  ;;  %s2116_s12 = scalar_lea.sflag [#allocation29], %s10542_s26 }
 0x4b0   : > { %8995 = dma.done.wait (%p11897_p0), %s2116_s12, 272  }
 0x4b1   : > { %8997 = vsyncadd (%p11897_p0), %s2116_s12, 4294967024  ;;  %s7318_s3 = smul.u32 12, %s10556_s17  ;;  %s2133_s9 = scalar_lea.sflag [#allocation32], %s10542_s26 }
 0x4b3   : > { %s10617_s15 = scalar_lea.vmem [#allocation31], %s7318_s3 }
 0x4b4   : > { %8999 = dma.done.wait (%p11897_p0), %s2133_s9, 208  }
 0x4b5   : > { %9001 = vsyncadd (%p11897_p0), %s2133_s9, 4294967088  ;;  %s2150_s12 = scalar_lea.sflag [#allocation35], %s10542_s26 }
 0x4b6   : > { %9003 = dma.done.wait (%p11897_p0), %s2150_s12, 272  }
 0x4b7   : > { %9005 = vsyncadd (%p11897_p0), %s2150_s12, 4294967024  ;;  %s2167_s13 = scalar_lea.sflag [#allocation38], %s10542_s26 }
 0x4b8   : > { %9007 = dma.done.wait (%p11897_p0), %s2167_s13, 272  }
 0x4b9   : > { %9009 = vsyncadd (%p11897_p0), %s2167_s13, 4294967024  ;;  %s2184_s4 = scalar_lea.sflag [#allocation41], %s10542_s26 }
 0x4ba   : > { %9011 = dma.done.wait (%p11897_p0), %s2184_s4, 272  }
 0x4bb   : > { %9013 = vsyncadd (%p11897_p0), %s2184_s4, 4294967024  ;;  %s2201_s11 = scalar_lea.sflag [#allocation44], %s10542_s26  ;;  %s10646_s14 = scalar_lea.vmem [#allocation43], %s7318_s3 }
 0x4bc   : > { %9015 = dma.done.wait (%p11897_p0), %s2201_s11, 208  }
 0x4bd   : > { %9017 = vsyncadd (%p11897_p0), %s2201_s11, 4294967088  ;;  %s2218_s9 = scalar_lea.sflag [#allocation47], %s10542_s26 }
 0x4be   : > { %9019 = dma.done.wait (%p11897_p0), %s2218_s9, 272  }
 0x4bf   : > { %9021 = vsyncadd (%p11897_p0), %s2218_s9, 4294967024  ;;  %s6678_s4 = sshll.u32 %s10556_s17, 5  ;;  %s2235_s12 = scalar_lea.sflag [#allocation50], %s10542_s26 }
 0x4c0   : > { %s10662_s11 = scalar_lea.vmem [#allocation49], %s6678_s4 }
 0x4c1   : > { %9023 = dma.done.wait (%p11897_p0), %s2235_s12, 528  }
 0x4c2   : > { %9025 = vsyncadd (%p11897_p0), %s2235_s12, 4294966768  ;;  %s2252_s9 = scalar_lea.sflag [#allocation53], %s10542_s26 }
 0x4c3   : > { %9027 = dma.done.wait (%p11897_p0), %s2252_s9, 32  }
 0x4c4   : > { %9029 = vsyncadd (%p11897_p0), %s2252_s9, 4294967264  ;;  %s2268_s3 = scalar_lea.sflag [#allocation56], %s10542_s26 }
 0x4c5   : > { %9031 = dma.done.wait (%p11897_p0), %s2268_s3, 32  }
 0x4c6   : > { %9033 = vsyncadd (%p11897_p0), %s2268_s3, 4294967264  ;;  %s2284_s13 = scalar_lea.sflag [#allocation59], %s10542_s26 }
 0x4c7   : > { %9035 = dma.done.wait (%p11897_p0), %s2284_s13, 32  }
 0x4c8   : > { %9037 = vsyncadd (%p11897_p0), %s2284_s13, 4294967264  ;;  %s2294_s9 = scalar_lea.vmem [#allocation60], %s10556_s17  ;;  %s2300_s19 = scalar_lea.sflag [#allocation62], %s10542_s26 }
 0x4c9   : > { %s2302_s4 = scalar_lea.vmem [#allocation61], %s10556_s17 }
 0x4ca   : > { %9039 = dma.done.wait (%p11897_p0), %s2300_s19, 32  }
 0x4cb   : > { %9041 = vsyncadd (%p11897_p0), %s2300_s19, 4294967264  ;;  %s2310_s3 = scalar_lea.vmem [#allocation63], %s10556_s17  ;;  %s11898_s6 = sshll.u32 %s10529_s2, 2 }
 0x4cc   : > { %s10699_s12 = scalar_lea.vmem [#allocation64], %s11898_s6  ;;  %s10702_s13 = scalar_lea.vmem [#allocation65], %s10545_s28 }
 0x4cd   : > { %s11899_s20 = sld [smem:[#allocation133_spill]] }
 0x4d3   : > { %p6681_p8 = scmp.ne.s32.totalorder %s11899_s20, 0 }
 0x4d4   : > { %v2585_v0 = vld [vmem:[%s10535_s0] sm:$0xf] (!%p6681_p8)  ;;  %vm2587_vm0 = vcmask (!%p6681_p8), 261120   ;;  %v6836_v1 = vld [vmem:[%s10549_s10] sm:$0xff] (!%p6681_p8)   ;;  %v6867_v2 = vld [vmem:[%s10549_s10 + $0x8] sm:$0xff] (!%p6681_p8)  }
 0x4d5   : > { %2584 = sbr.rel (%p6681_p8) target bundleno = 1244 (0x4dc), region = 336  ;;  %v2586_v3 = vunpack.c.l.bf16 (!%p6681_p8), %v2585_v0  ;;  %v6837_v4 = vunpack.c.l.bf16 (!%p6681_p8), %v6836_v1  ;;  %v6838_v5 = vunpack.c.h.bf16 (!%p6681_p8), %v6836_v1  ;;  %v6841_v6 = vunpack.c.l.bf16 (!%p6681_p8), %v6867_v2  ;;  %v6868_v7 = vld [vmem:[%s10549_s10 + $0x10] sm:$0xff] (!%p6681_p8)   ;;  %v6869_v8 = vld [vmem:[%s10549_s10 + $0x18] sm:$0xff] (!%p6681_p8)  }
 0x4d6   : > { %v6842_v9 = vunpack.c.h.bf16 (!%p6681_p8), %v6867_v2  ;;  %v6845_v10 = vunpack.c.l.bf16 (!%p6681_p8), %v6868_v7  ;;  %v6846_v11 = vunpack.c.h.bf16 (!%p6681_p8), %v6868_v7  ;;  %v6849_v12 = vunpack.c.l.bf16 (!%p6681_p8), %v6869_v8 }
 0x4d7   : > { %2588 = vst.msk [vmem:[#allocation2] sm:$0xff] (!%p6681_p8), %vm2587_vm0, %v2586_v3  ;;  %2605 = vst.msk [vmem:[#allocation3] sm:$0xff] (!%p6681_p8), %vm2587_vm0, %v6837_v4  ;;  %v6850_v13 = vunpack.c.h.bf16 (!%p6681_p8), %v6869_v8 }
 0x4d8   : > { %2606 = vst.msk [vmem:[#allocation3 + $0x8] sm:$0xff] (!%p6681_p8), %vm2587_vm0, %v6838_v5  ;;  %2607 = vst.msk [vmem:[#allocation3 + $0x10] sm:$0xff] (!%p6681_p8), %vm2587_vm0, %v6841_v6 }
 0x4d9   : > { %2608 = vst.msk [vmem:[#allocation3 + $0x18] sm:$0xff] (!%p6681_p8), %vm2587_vm0, %v6842_v9  ;;  %2609 = vst.msk [vmem:[#allocation3 + $0x20] sm:$0xff] (!%p6681_p8), %vm2587_vm0, %v6845_v10 }
 0x4da   : > { %2610 = vst.msk [vmem:[#allocation3 + $0x28] sm:$0xff] (!%p6681_p8), %vm2587_vm0, %v6846_v11  ;;  %2611 = vst.msk [vmem:[#allocation3 + $0x30] sm:$0xff] (!%p6681_p8), %vm2587_vm0, %v6849_v12 }
 0x4db   : > { %2612 = vst.msk [vmem:[#allocation3 + $0x38] sm:$0xff] (!%p6681_p8), %vm2587_vm0, %v6850_v13 }
 0x4dc PF: > { %s11900_s19 = scalar_lea.vmem [#allocation10], %s10559_s8  ;;  %s11901_s20 = sld [smem:[#allocation133_spill]]  ;;  %v9175_v15 = vmov 0.0   ;;  %vm9176_vm1 = vmmov 0   ;;  %v2622_v17 = vld [vmem:[%s10535_s0] sm:$0xf] }
 0x4dd   : > { %v7589_v14 = vld [vmem:[%s11900_s19] sm:$0xff]   ;;  %7002 = vmatprep.subr.bf16.mxu0 %v9175_v15  ;;  %7026 = vmatprep.subr.bf16.mxu1 %v9175_v15  ;;  %s11902_s6 = smov %s11900_s19  ;;  %v10732_v18 = vunpack.c.l.bf16 %v2622_v17  ;;  %vm2670_vm2 = vcmask 261120   ;;  %s11903_s0 = scalar_lea.vmem [#allocation13], %s10559_s8  ;;  %vm2847_vm3 = vcmask 130048   ;;  %vm2894_vm4 = vcmask 64512  }
 0x4de   : > { %7003 = vmatpush3.bf16.msra.mxu0 %v7589_v14  ;;  %v7590_v16 = vld [vmem:[%s11902_s6 + $0x8] sm:$0xff]   ;;  %7006 = vmatprep.mubr.msk.bf16.mxu0 %vm9176_vm1, %v9175_v15  ;;  %v10734_v19 = vld [vmem:[#allocation2] sm:$0xff]  ;;  %s11904_s10 = smov %s11903_s0  ;;  %s11905_s1 = scalar_lea.vmem [#allocation15], %s10556_s17  ;;  %vm2910_vm5 = vcmask 1043456   ;;  %vm3219_vm6 = vcmask 392192   ;;  %vm3643_vm7 = vcmask 523264  }
 0x4df   : > { %7004 = vmatprep.subr.bf16.mxu0 %v9175_v15  ;;  %7028 = vmatprep.mubr.msk.bf16.mxu1 %vm9176_vm1, %v9175_v15  ;;  %v7591_v22 = vld [vmem:[%s11903_s0] sm:$0xff]   ;;  %v6686_v30 = vld [vmem:[%s11905_s1] ss:$0 sm:$0xff]  ;;  %s11906_s19 = scalar_lea.vmem [#allocation12], %s10556_s17  ;;  %s9177_s6 = smov 96   ;;  %v2779_v43 = vpack.c.bf16 %v10734_v19, %v10734_v19  ;;  %vm4002_vm8 = vcmask 195584  }
 0x4e0   : > { %v7592_v25 = vld [vmem:[%s11904_s10 + $0x8] sm:$0xff]   ;;  %v6682_v31 = vld [vmem:[%s11906_s19] ss:$0 sm:$0xff]  ;;  %s11909_s10 = scalar_lea.vmem [#allocation18], %s10556_s17  ;;  %s9179_s1 = smov 16  }
 0x4e1   : > { %v6690_v6 = vld [vmem:[%s11909_s10] ss:$0 sm:$0xff]  ;;  %s9180_s19 = smov 32   ;;  %s11915_s10 = scalar_lea.vmem [#allocation27], %s10556_s17 }
 0x4e2   : > { %p2640_p3 = scmp.gt.s32.totalorder %s11901_s20, 0  ;;  %7005 = vmatpush3.bf16.msra.mxu0 %v7590_v16  ;;  %p6797_p4 = scmp.ne.s32.totalorder %s11901_s20, 1 }
 0x4e3   : > { %7010 = vmatprep.subr.bf16.mxu0 %v9175_v15  ;;  %vm5613_vm9 = vcmask (!%p6797_p4), 257024  }
 0x4e4   : > { %s2641_s26 = scalar_select %p2640_p3, 1, 0 }
 0x4e6   : > { %s2642_s28 = scvt.s32.f32 %s2641_s26  ;;  %s9178_s26 = smov 112  }
 0x4e8   : > { %v10737_v20 = vstv %s2642_s28  ;;  %s11907_s28 = scalar_lea.vmem [#allocation16], %s10559_s8 }
 0x4e9   : > { %v2644_v21 = vmul.f32 %v10737_v20, %v10732_v18  ;;  %v7593_v41 = vld [vmem:[%s11907_s28] sm:$0xff]   ;;  %s11908_s0 = smov %s11907_s28 }
 0x4ea   : > { %v7594_v42 = vld [vmem:[%s11908_s0 + $0x8] sm:$0xff]  }
 0x4eb   : > { %v2645_v23 = vadd.f32 %v2644_v21, %v10734_v19 }
 0x4ed   : > { %v2646_v24 = vpack.c.bf16 %v2645_v23, %v2645_v23 }
 0x4ef   : > { %7007 = vmatmul.mubr.msk.bf16.vlgmr.msra.gmra.mrb[0].mxu0 %vm2670_vm2, %v2646_v24 }
 0x4f0   : > { %7011 = vmatpush3.bf16.msra.mxu0 %v7591_v22  ;;  %7014 = vmatprep.mubr.msk.bf16.mxu0 %vm9176_vm1, %v9175_v15 }
 0x4f1   : > { %7012 = vmatprep.subr.bf16.mxu0 %v9175_v15 }
 0x4f4   : > { %7013 = vmatpush3.bf16.msra.mxu0 %v7592_v25 }
 0x4f5   : > { %7018 = vmatprep.subr.bf16.mxu0 %v9175_v15 }
 0x4f7   : > { %7015 = vmatmul.mubr.msk.bf16.vlgmr.msra.gmra.mrb[4].mxu0 %vm2670_vm2, %v2646_v24 }
 0x4f8   : > { %7022 = vmatprep.mubr.msk.bf16.mxu0 %vm9176_vm1, %v9175_v15  ;;  %7019 = vmatpush3.bf16.msra.mxu0 %v7593_v41 }
 0x4f9   : > { %7020 = vmatprep.subr.bf16.mxu0 %v9175_v15 }
 0x4fc   : > { %7021 = vmatpush3.bf16.msra.mxu0 %v7594_v42 }
 0x4fd   : > { %7032 = vmatprep.subr.bf16.mxu0 %v9175_v15 }
 0x4ff   : > { %7023 = vmatmul.mubr.msk.bf16.vlgmr.msra.gmra.mrb[8].mxu0 %vm2670_vm2, %v2779_v43 }
 0x500   : > { %7034 = vmatprep.mubr.msk.bf16.mxu0 %vm9176_vm1, %v9175_v15 }
 0x5c2   : > { %v2708_v26 = vpop.f32.mrb[0].mxu0 }
 0x5c3   : > { %v7008_v27 = vpop.f32.mrb[1].mxu0  ;;  %v2709_v36 = vadd.f32 %v6682_v31, %v2708_v26 }
 0x5c4   : > { %v2711_v28 = vpop.f32.mrb[2].mxu0 }
 0x5c5   : > { %v7009_v29 = vpop.f32.mrb[3].mxu0  ;;  %v2714_v40 = vpack.c.bf16 %v2709_v36, %v2709_v36 }
 0x5ca   : > { %v2772_v32 = vpop.f32.mrb[4].mxu0 }
 0x5cb   : > { %v2773_v33 = vadd.f32 %v6686_v30, %v2772_v32  ;;  %v7016_v34 = vpop.f32.mrb[5].mxu0 }
 0x5cc   : > { %v2775_v35 = vpop.f32.mrb[6].mxu0 }
 0x5cd   : > { %v2778_v37 = vpack.c.bf16 %v2773_v33, %v2773_v33  ;;  %v7017_v38 = vpop.f32.mrb[7].mxu0 }
 0x5cf   : > { %3069 = vrot.lane.b32.xlu1 %v2778_v37, %s9177_s6  ;;  %2958 = vrot.lane.b32.xlu0 %v2778_v37, %s9178_s26  ;;  %v2852_v39 = vsel %vm2847_vm3, %v2778_v37, 0 }
 0x5d0   : > { %7027 = vmatpush3.bf16.xpose.msra.mxu1 %v2852_v39 }
 0x5d1   : > { %7038 = vmatprep.subr.bf16.mxu1 %v9175_v15 }
 0x5d2   : > { %v2840_v7 = vpop.f32.mrb[8].mxu0 }
 0x5d3   : > { %3067 = vrot.lane.b32.xlu1 %v2714_v40, %s9177_s6  ;;  %2955 = vrot.lane.b32.xlu0 %v2714_v40, %s9178_s26  ;;  %v2841_v8 = vadd.f32 %v6690_v6, %v2840_v7  ;;  %v7024_v9 = vpop.f32.mrb[9].mxu0 }
 0x5d4   : > { %v2843_v10 = vpop.f32.mrb[10].mxu0 }
 0x5d5   : > { %v2846_v11 = vpack.c.bf16 %v2841_v8, %v2841_v8  ;;  %v7025_v12 = vpop.f32.mrb[11].mxu0 }
 0x5d6   : > { %v10832_v12 = vld [vmem:[#allocation3 + $0x8] sm:$0xff] }
 0x5d7   : > { %7029 = vmatmul.mubr.msk.bf16.vlgmr.msra.gmra.mrb[0].mxu1 %vm2847_vm3, %v2714_v40  ;;  %v2912_v13 = vsel %vm2910_vm5, %v2846_v11, 0 }
 0x5d8   : > { %7040 = vmatprep.mubr.msk.bf16.mxu1 %vm9176_vm1, %v9175_v15  ;;  %7033 = vmatpush3.bf16.msra.mxu0 %v2912_v13 }
 0x5d9   : > { %7044 = vmatprep.subr.bf16.mxu0 %v9175_v15 }
 0x641   : > { %v2959_v44 = vpop.permute.xlu0 %2958  ;;  %v3070_v46 = vpop.permute.xlu1 %3069 }
 0x642   : > { %v2964_v45 = vsel %vm2847_vm3, %v2959_v44, 0  ;;  %v3075_v48 = vsel %vm2847_vm3, %v3070_v46, 0 }
 0x643   : > { %7039 = vmatpush3.bf16.xpose.msra.mxu1 %v2964_v45 }
 0x644   : > { %7050 = vmatprep.subr.bf16.mxu1 %v9175_v15 }
 0x645   : > { %v2956_v47 = vpop.permute.xlu0 %2955  ;;  %v3068_v49 = vpop.permute.xlu1 %3067 }
 0x64a   : > { %7041 = vmatmul.mubr.msk.bf16.vlgmr.msra.gmra.mrb[4].mxu1 %vm2847_vm3, %v2956_v47 }
 0x64b   : > { %7051 = vmatpush3.bf16.xpose.msra.mxu1 %v3075_v48  ;;  %7052 = vmatprep.mubr.msk.bf16.mxu1 %vm9176_vm1, %v9175_v15  ;;  %v7595_v48 = vld [vmem:[%s10587_s5] sm:$0xff]  }
 0x64c   : > { %7062 = vmatprep.subr.bf16.mxu1 %v9175_v15 }
 0x652   : > { %7053 = vmatmul.mubr.msk.bf16.vlgmr.msra.gmra.mrb[8].mxu1 %vm2847_vm3, %v3068_v49  ;;  %v7596_v49 = vld [vmem:[%s10587_s5 + $0x8] sm:$0xff]  }
 0x653   : > { %7068 = vmatprep.mubr.msk.bf16.mxu1 %vm9176_vm1, %v9175_v15  ;;  %7063 = vmatpush3.bf16.msra.mxu1 %v7595_v48 }
 0x654   : > { %7064 = vmatprep.subr.bf16.mxu1 %v9175_v15 }
 0x657   : > { %7065 = vmatpush3.bf16.msra.mxu1 %v7596_v49 }
 0x658   : > { %7066 = vmatprep.subr.bf16.mxu1 %v9175_v15 }
 0x6aa   : > { %v2888_v50 = vpop.f32.mrb[0].mxu1 }
 0x6ab   : > { %v7030_v51 = vpop.f32.mrb[1].mxu1  ;;  %v2895_v52 = vsel %vm2894_vm4, %v2888_v50, -inf }
 0x6ac   : > { %2896 = vmax.xlane.f32.xlu0 %v2895_v52  ;;  %v2891_v53 = vpop.f32.mrb[2].mxu1 }
 0x6ad   : > { %v7031_v54 = vpop.f32.mrb[3].mxu1 }
 0x71d   : > { %v3000_v55 = vpop.f32.mrb[4].mxu1 }
 0x71e   : > { %v7042_v56 = vpop.f32.mrb[5].mxu1  ;;  %v3006_v57 = vsel %vm2894_vm4, %v3000_v55, -inf }
 0x71f   : > { %3007 = vmax.xlane.f32.xlu1 %v3006_v57  ;;  %v3003_v58 = vpop.f32.mrb[6].mxu1 }
 0x720   : > { %v7043_v59 = vpop.f32.mrb[7].mxu1 }
 0x725   : > { %v3111_v60 = vpop.f32.mrb[8].mxu1 }
 0x726   : > { %v7054_v61 = vpop.f32.mrb[9].mxu1  ;;  %v3117_v62 = vsel %vm2894_vm4, %v3111_v60, -inf }
 0x727   : > { %3118 = vmax.xlane.f32.xlu0 %v3117_v62  ;;  %v3114_v63 = vpop.f32.mrb[10].mxu1 }
 0x728   : > { %v7055_v0 = vpop.f32.mrb[11].mxu1 }
 0x739   : > { %v2897_v1 = vpop.xlane.xlu0 %2896 }
 0x73a   : > { %v2898_v2 = vsub.f32 %v2888_v50, %v2897_v1  ;;  %v7597_v50 = vld [vmem:[%s10587_s5 + $0x10] sm:$0xff]   ;;  %s11910_s5 = scalar_lea.vmem [#allocation21], %s10556_s17  ;;  %v3263_v1 = vmul.f32 %v10737_v20, %v10734_v19  ;;  %v6852_v19 = vld [vmem:[%s10562_s30] sm:$0xff]  }
 0x73b   : > { %7067 = vmatpush3.bf16.msra.mxu1 %v7597_v50  ;;  %v6700_v0 = vld [vmem:[%s11910_s5] ss:$0 sm:$0xff]  ;;  %v6853_v20 = vunpack.c.l.bf16 %v6852_v19  ;;  %v6854_v13 = vunpack.c.h.bf16 %v6852_v19  ;;  %s11916_s5 = scalar_lea.vmem [#allocation52], %s10556_s17 }
 0x73c   : > { %v2899_v3 = vmul.f32 1.442695, %v2898_v2 }
 0x73e   : > { %7620 = vpow2.f32 %v2899_v3 }
 0x748   : > { %v7621_v4 = vpop.eup %7620 }
 0x749   : > { %v2901_v5 = vsel %vm2894_vm4, %v7621_v4, 0.0 }
 0x74a   : > { %2902 = vadd.xlane.f32.xlu0 %v2901_v5 }
 0x7ac   : > { %v3008_v14 = vpop.xlane.xlu1 %3007 }
 0x7ad   : > { %v3009_v16 = vsub.f32 %v3000_v55, %v3008_v14  ;;  %v10835_v14 = vld [vmem:[#allocation3 + $0x10] sm:$0xff] }
 0x7af   : > { %v3010_v17 = vmul.f32 1.442695, %v3009_v16  ;;  %v10837_v16 = vld [vmem:[#allocation3 + $0x18] sm:$0xff] }
 0x7b1   : > { %7622 = vpow2.f32 %v3010_v17  ;;  %v6870_v17 = vld [vmem:[%s10562_s30 + $0x8] sm:$0xff]  }
 0x7b4   : > { %v3119_v21 = vpop.xlane.xlu0 %3118 }
 0x7b5   : > { %v3120_v22 = vsub.f32 %v3111_v60, %v3119_v21  ;;  %v6857_v21 = vunpack.c.l.bf16 %v6870_v17 }
 0x7b7   : > { %v3121_v23 = vmul.f32 1.442695, %v3120_v22  ;;  %v6858_v22 = vunpack.c.h.bf16 %v6870_v17 }
 0x7b9   : > { %7624 = vpow2.f32 %v3121_v23  ;;  %v10840_v23 = vld [vmem:[#allocation3 + $0x20] sm:$0xff] }
 0x7bb   : > { %v7623_v24 = vpop.eup %7622 }
 0x7bc   : > { %v3012_v25 = vsel %vm2894_vm4, %v7623_v24, 0.0 }
 0x7bd   : > { %3013 = vadd.xlane.f32.xlu1 %v3012_v25  ;;  %v6871_v25 = vld [vmem:[%s10562_s30 + $0x10] sm:$0xff]  }
 0x7c3   : > { %v7625_v26 = vpop.eup %7624 }
 0x7c4   : > { %v3123_v27 = vsel %vm2894_vm4, %v7625_v26, 0.0 }
 0x7c5   : > { %3124 = vadd.xlane.f32.xlu0 %v3123_v27  ;;  %v3297_v27 = vadd.f32 %v6854_v13, %v10832_v12 }
 0x7ce   : > { %3019 = vrot.lane.b32.xlu1 %v2846_v11, %s9178_s26 }
 0x7d7   : > { %v2903_v28 = vpop.xlane.xlu0 %2902 }
 0x7d8   : > { %7626 = vrcp.f32 %v2903_v28  ;;  %v6861_v28 = vunpack.c.l.bf16 %v6871_v25 }
 0x7db   : > { %3129 = vrot.lane.b32.xlu0 %v2846_v11, %s9177_s6  ;;  %s11911_s6 = scalar_lea.vmem [#allocation25], %s10559_s8  ;;  %v10830_v11 = vld [vmem:[#allocation3] sm:$0xff] }
 0x7dc   : > { %v7598_v9 = vld [vmem:[%s11911_s6] sm:$0xff]   ;;  %s11912_s28 = smov %s11911_s6  ;;  %s11917_s6 = scalar_lea.vmem [#allocation54], %s10556_s17 }
 0x7dd   : > { %v7599_v10 = vld [vmem:[%s11912_s28 + $0x8] sm:$0xff]   ;;  %7080 = vmatprep.subr.bf16.mxu1 %v7598_v9  ;;  %s11918_s28 = scalar_lea.vmem [#allocation24], %s10556_s17 }
 0x7e2   : > { %v7627_v29 = vpop.eup %7626 }
 0x7e3   : > { %v2905_v30 = vmul.f32 %v7627_v29, %v7621_v4  ;;  %v6862_v29 = vunpack.c.h.bf16 %v6871_v25  ;;  %v6705_v25 = vld [vmem:[%s11916_s5] ss:$0 sm:$0xff]  ;;  %s9182_s5 = smov 8  }
 0x7e5   : > { %v2906_v31 = vpack.c.bf16 %v2905_v30, %v2905_v30  ;;  %v6872_v30 = vld [vmem:[%s10562_s30 + $0x18] sm:$0xff]   ;;  %s11913_s30 = scalar_lea.vmem [#allocation22], %s10559_s8 }
 0x7e6   : > { %v7600_v50 = vld [vmem:[%s11913_s30] sm:$0xff]   ;;  %s11914_s0 = smov %s11913_s30  ;;  %s11919_s30 = scalar_lea.vmem [#allocation28], %s10559_s8 }
 0x7e7   : > { %7035 = vmatmul.mubr.msk.bf16.vlgmr.msra.gmra.mrb[12].mxu0 %vm2894_vm4, %v2906_v31  ;;  %v3298_v31 = vadd.f32 %v6857_v21, %v10835_v14 }
 0x7e8   : > { %7046 = vmatprep.mubr.msk.bf16.mxu0 %vm9176_vm1, %v9175_v15 }
 0x84a   : > { %v3014_v32 = vpop.xlane.xlu1 %3013 }
 0x84b   : > { %7628 = vrcp.f32 %v3014_v32  ;;  %v3299_v32 = vadd.f32 %v6858_v22, %v10837_v16 }
 0x84e   : > { %v3020_v33 = vpop.permute.xlu1 %3019 }
 0x84f   : > { %v3025_v34 = vsel %vm2910_vm5, %v3020_v33, 0  ;;  %v6865_v33 = vunpack.c.l.bf16 %v6872_v30 }
 0x850   : > { %7045 = vmatpush3.bf16.msra.mxu0 %v3025_v34 }
 0x851   : > { %7056 = vmatprep.subr.bf16.mxu0 %v9175_v15 }
 0x852   : > { %v3125_v35 = vpop.xlane.xlu0 %3124 }
 0x853   : > { %7630 = vrcp.f32 %v3125_v35  ;;  %v3300_v35 = vadd.f32 %v6861_v28, %v10840_v23 }
 0x855   : > { %v7629_v36 = vpop.eup %7628 }
 0x856   : > { %v3016_v37 = vmul.f32 %v7629_v36, %v7623_v24  ;;  %v3130_v38 = vpop.permute.xlu0 %3129  ;;  %v10842_v24 = vld [vmem:[#allocation3 + $0x28] sm:$0xff] }
 0x857   : > { %v3135_v40 = vsel %vm2910_vm5, %v3130_v38, 0  ;;  %v3301_v36 = vadd.f32 %v6862_v29, %v10842_v24  ;;  %v10854_v38 = vpack.c.bf16 %v3299_v32, %v3298_v31  ;;  %v6707_v32 = vld [vmem:[%s11918_s28] ss:$0 sm:$0xff] }
 0x858   : > { %v3017_v39 = vpack.c.bf16 %v3016_v37, %v3016_v37  ;;  %v6866_v37 = vunpack.c.h.bf16 %v6872_v30 }
 0x85a   : > { %7047 = vmatmul.mubr.msk.bf16.vlgmr.msra.gmra.mrb[16].mxu0 %vm2894_vm4, %v3017_v39  ;;  %v10856_v39 = vld [vmem:[#allocation3 + $0x30] sm:$0xff] }
 0x85b   : > { %7057 = vmatpush3.bf16.msra.mxu0 %v3135_v40  ;;  %7058 = vmatprep.mubr.msk.bf16.mxu0 %vm9176_vm1, %v9175_v15  ;;  %v10858_v40 = vld [vmem:[#allocation3 + $0x38] sm:$0xff] }
 0x85c   : > { %7072 = vmatprep.subr.bf16.mxu0 %v9175_v15 }
 0x85d   : > { %v7631_v41 = vpop.eup %7630 }
 0x85e   : > { %v3127_v42 = vmul.f32 %v7631_v41, %v7625_v26  ;;  %v3296_v26 = vadd.f32 %v6853_v20, %v10830_v11  ;;  %v10862_v41 = vpack.c.bf16 %v3301_v36, %v3300_v35 }
 0x860   : > { %v3128_v43 = vpack.c.bf16 %v3127_v42, %v3127_v42  ;;  %v10850_v34 = vpack.c.bf16 %v3297_v27, %v3296_v26  ;;  %v3302_v42 = vadd.f32 %v6865_v33, %v10856_v39  ;;  %v6706_v27 = vld [vmem:[%s11917_s6] ss:$0 sm:$0xff]  ;;  %s11923_s6 = scalar_lea.vmem [#allocation46], %s10559_s8 }
 0x861   : > { %s11924_s28 = smov %s11923_s6 }
 0x862   : > { %7059 = vmatmul.mubr.msk.bf16.vlgmr.msra.gmra.mrb[20].mxu0 %vm2894_vm4, %v3128_v43  ;;  %v3303_v43 = vadd.f32 %v6866_v37, %v10858_v40 }
 0x863   : > { %7076 = vmatprep.mubr.msk.bf16.mxu0 %vm9176_vm1, %v9175_v15  ;;  %7073 = vmatpush3.bf16.msra.mxu0 %v7600_v50 }
 0x864   : > { %7074 = vmatprep.subr.bf16.mxu0 %v9175_v15 }
 0x8ba   : > { %v2948_v44 = vpop.f32.mrb[12].mxu0 }
 0x8bb   : > { %v7036_v45 = vpop.f32.mrb[13].mxu0 }
 0x8bc   : > { %v2951_v46 = vpop.f32.mrb[14].mxu0 }
 0x8bd   : > { %v7037_v47 = vpop.f32.mrb[15].mxu0 }
 0x92d   : > { %v3061_v51 = vpop.f32.mrb[16].mxu0 }
 0x92e   : > { %3178 = vrot.lane.b32.xlu1 %v3061_v51, %s9179_s1  ;;  %v7048_v52 = vpop.f32.mrb[17].mxu0  ;;  %v7601_v51 = vld [vmem:[%s11914_s0 + $0x8] sm:$0xff]   ;;  %s11920_s0 = smov %s11919_s30 }
 0x92f   : > { %v3064_v53 = vpop.f32.mrb[18].mxu0  ;;  %7075 = vmatpush3.bf16.msra.mxu0 %v7601_v51  ;;  %v6711_v52 = vld [vmem:[%s11915_s10] ss:$0 sm:$0xff]  ;;  %s11921_s10 = scalar_lea.vmem [#allocation30], %s10556_s17 }
 0x930   : > { %v7049_v54 = vpop.f32.mrb[19].mxu0  ;;  %v6718_v50 = vld [vmem:[%s11921_s10] ss:$0 sm:$0xff]  ;;  %s11927_s10 = scalar_lea.vmem [#allocation48], %s10556_s17 }
 0x935   : > { %v3171_v55 = vpop.f32.mrb[20].mxu0 }
 0x936   : > { %3182 = vrot.lane.b32.xlu1 %v3171_v55, %s9180_s19  ;;  %v7060_v56 = vpop.f32.mrb[21].mxu0  ;;  %s9181_s19 = smov 120  }
 0x937   : > { %v3174_v57 = vpop.f32.mrb[22].mxu0 }
 0x938   : > { %v7061_v58 = vpop.f32.mrb[23].mxu0 }
 0x9a0   : > { %v3179_v59 = vpop.permute.xlu1 %3178 }
 0x9a1   : > { %v3185_v60 = vsel %vm2847_vm3, %v2948_v44, %v3179_v59  ;;  %v10871_v44 = vpack.c.bf16 %v3303_v43, %v3302_v42 }
 0x9a8   : > { %v3183_v61 = vpop.permute.xlu1 %3182 }
 0x9a9   : > { %v3186_v62 = vsel %vm2670_vm2, %v3185_v60, %v3183_v61 }
 0x9aa   : > { %v3187_v63 = vpack.c.bf16 %v3186_v62, %v3186_v62 }
 0x9ac   : > { %7069 = vmatmul.mubr.msk.bf16.vlgmr.msra.gmra.mrb[12].mxu1 %vm3219_vm6, %v3187_v63 }
 0x9ad   : > { %7081 = vmatpush3.bf16.msra.mxu1 %v7598_v9  ;;  %7084 = vmatprep.mubr.msk.bf16.mxu1 %vm2670_vm2, %v10850_v34 }
 0x9ae   : > { %7082 = vmatprep.subr.bf16.mxu1 %v7599_v10 }
 0x9b1   : > { %7083 = vmatpush3.bf16.msra.mxu1 %v7599_v10 }
 0x9b2   : > { %7104 = vmatprep.subr.bf16.mxu1 %v9175_v15 }
 0x9b4   : > { %7085 = vmatmul.mubr.msk.bf16.vlgmr.msra.gmra.mrb[16].mxu1 %vm2670_vm2, %v10854_v38 }
 0x9b5   : > { %7088 = vmatprep.mubr.msk.bf16.mxu1 %vm2670_vm2, %v10862_v41 }
 0x9bc   : > { %7089 = vmatmul.mubr.msk.bf16.gmra.mrb[20].mxu1 %vm2670_vm2, %v10871_v44 }
 0x9bd   : > { %7112 = vmatprep.mubr.msk.bf16.mxu1 %vm9176_vm1, %v9175_v15 }
 0xa7f   : > { %v3257_v2 = vpop.f32.mrb[12].mxu1 }
 0xa80   : > { %v3258_v3 = vadd.f32 %v6700_v0, %v3257_v2  ;;  %v7070_v4 = vpop.f32.mrb[13].mxu1 }
 0xa81   : > { %v3260_v5 = vpop.f32.mrb[14].mxu1 }
 0xa82   : > { %v7071_v6 = vpop.f32.mrb[15].mxu1  ;;  %v3264_v7 = vadd.f32 %v3263_v1, %v3258_v3 }
 0xa84   : > { %v3265_v8 = vsel %vm2670_vm2, %v3264_v7, 0.0 }
 0xa85   : > { %3266 = vadd.xlane.f32.xlu0 %v3265_v8 }
 0xa87   : > { %v7086_v53 = vpop.f32.mrb[16].mxu1 }
 0xa88   : > { %v3454_v54 = vadd.f32 %v7086_v53, %v6711_v52  ;;  %v3445_v55 = vpop.f32.mrb[17].mxu1 }
 0xa89   : > { %v3446_v56 = vadd.f32 %v6711_v52, %v3445_v55  ;;  %v7087_v57 = vpop.f32.mrb[18].mxu1 }
 0xa8a   : > { %v3457_v58 = vadd.f32 %v7087_v57, %v6711_v52  ;;  %v3448_v59 = vpop.f32.mrb[19].mxu1 }
 0xa8b   : > { %v3449_v60 = vadd.f32 %v6711_v52, %v3448_v59 }
 0xa8c   : > { %v10885_v61 = vpack.c.bf16 %v3457_v58, %v3454_v54 }
 0xa8d   : > { %v10887_v62 = vpack.c.bf16 %v3449_v60, %v3446_v56 }
 0xa8e   : > { %v3595_v9 = vsel %vm2894_vm4, %v10885_v61, 0 }
 0xa8f   : > { %v3592_v63 = vsel %vm2894_vm4, %v10887_v62, 0  ;;  %v7090_v0 = vpop.f32.mrb[20].mxu1 }
 0xa90   : > { %7105 = vmatpush3.bf16.xpose.msra.mxu1 %v3592_v63  ;;  %v3470_v1 = vadd.f32 %v7090_v0, %v6711_v52  ;;  %v3461_v2 = vpop.f32.mrb[21].mxu1 }
 0xa91   : > { %7106 = vmatprep.subr.bf16.mxu1 %v9175_v15  ;;  %v3462_v3 = vadd.f32 %v6711_v52, %v3461_v2  ;;  %v7091_v4 = vpop.f32.mrb[22].mxu1 }
 0xa92   : > { %v3473_v5 = vadd.f32 %v7091_v4, %v6711_v52  ;;  %v3464_v6 = vpop.f32.mrb[23].mxu1 }
 0xa94   : > { %v10894_v8 = vpack.c.bf16 %v3473_v5, %v3470_v1 }
 0xa96   : > { %v3601_v20 = vsel %vm2894_vm4, %v10894_v8, 0 }
 0xa98   : > { %7107 = vmatpush3.bf16.xpose.msra.mxu1 %v3595_v9 }
 0xa99   : > { %7108 = vmatprep.subr.bf16.mxu1 %v9175_v15 }
 0xb12   : > { %v3267_v45 = vpop.xlane.xlu0 %3266 }
 0xb13   : > { %v3269_v46 = vmul.f32 0.03125, %v3267_v45  ;;  %v7602_v45 = vld [vmem:[%s11919_s30] sm:$0xff]   ;;  %s11925_s30 = scalar_lea.vmem [#allocation55], %s10556_s17 }
 0xb14   : > { %7092 = vmatprep.subr.bf16.mxu0 %v7602_v45 }
 0xb15   : > { %v3270_v47 = vsub.f32 %v3264_v7, %v3269_v46  ;;  %v3465_v7 = vadd.f32 %v6711_v52, %v3464_v6  ;;  %v7603_v46 = vld [vmem:[%s11920_s0 + $0x8] sm:$0xff]   ;;  %s11926_s0 = scalar_lea.vmem [#allocation57], %s10556_s17 }
 0xb17   : > { %v3271_v48 = vmul.f32 %v3270_v47, %v3270_v47  ;;  %v10898_v10 = vpack.c.bf16 %v3465_v7, %v3462_v3 }
 0xb19   : > { %v3272_v49 = vsel %vm2670_vm2, %v3271_v48, 0.0  ;;  %v3598_v19 = vsel %vm2894_vm4, %v10898_v10, 0  ;;  %v3481_v48 = vpack.c.bf16 %v10837_v16, %v10835_v14 }
 0xb1a   : > { %3273 = vadd.xlane.f32.xlu1 %v3272_v49  ;;  %7109 = vmatpush3.bf16.xpose.msra.mxu1 %v3598_v19  ;;  %v3482_v49 = vpack.c.bf16 %v10842_v24, %v10840_v23 }
 0xb1b   : > { %7110 = vmatprep.subr.bf16.mxu1 %v9175_v15 }
 0xb22   : > { %7111 = vmatpush3.bf16.xpose.msra.mxu1 %v3601_v20 }
 0xb23   : > { %7140 = vmatprep.subr.bf16.mxu1 %v9175_v15 }
 0xb2b   : > { %3706 = vrot.lane.b32.xlu1 %v10887_v62, %s9181_s19 }
 0xb2f   : > { %3710 = vrot.lane.b32.xlu1 %v10898_v10, %s9181_s19 }
 0xb33   : > { %3712 = vrot.lane.b32.xlu1 %v10894_v8, %s9181_s19 }
 0xba7   : > { %v3274_v13 = vpop.xlane.xlu1 %3273 }
 0xba8   : > { %v3275_v17 = vmul.f32 0.03125, %v3274_v13 }
 0xbaa   : > { %v3276_v21 = vadd.f32 1e-05, %v3275_v17 }
 0xbac   : > { %7632 = vrsqrt.f32 %v3276_v21 }
 0xbb6   : > { %v7633_v22 = vpop.eup %7632 }
 0xbb7   : > { %v3278_v26 = vmul.f32 %v7633_v22, %v3270_v47  ;;  %v3480_v47 = vpack.c.bf16 %v10832_v12, %v10830_v11  ;;  %v3483_v11 = vpack.c.bf16 %v10858_v40, %v10856_v39 }
 0xbb9   : > { %v3286_v28 = vmul.f32 %v6705_v25, %v3278_v26 }
 0xbbb   : > { %v10915_v29 = vadd.f32 %v6706_v27, %v3286_v28  ;;  %v3707_v28 = vpop.permute.xlu1 %3706 }
 0xbbd   : > { %v3295_v30 = vadd.f32 %v10915_v29, %v10732_v18 }
 0xbbf   : > { %v3304_v31 = vpack.c.bf16 %v3295_v30, %v3295_v30 }
 0xbc1   : > { %7077 = vmatmul.mubr.msk.bf16.vlgmr.msra.gmra.mrb[24].mxu0 %vm2670_vm2, %v3304_v31  ;;  %v3718_v31 = vsel %vm2894_vm4, %v3707_v28, 0 }
 0xbc2   : > { %7096 = vmatprep.mubr.msk.bf16.mxu0 %vm2670_vm2, %v3480_v47  ;;  %7093 = vmatpush3.bf16.msra.mxu0 %v7602_v45 }
 0xbc3   : > { %7094 = vmatprep.subr.bf16.mxu0 %v7603_v46 }
 0xbc6   : > { %7095 = vmatpush3.bf16.msra.mxu0 %v7603_v46 }
 0xbc7   : > { %7116 = vmatprep.subr.bf16.mxu0 %v9175_v15 }
 0xbc9   : > { %7097 = vmatmul.mubr.msk.bf16.vlgmr.msra.gmra.mrb[28].mxu0 %vm2670_vm2, %v3481_v48 }
 0xbca   : > { %7100 = vmatprep.mubr.msk.bf16.mxu0 %vm2670_vm2, %v3482_v49 }
 0xbd1   : > { %7101 = vmatmul.mubr.msk.bf16.gmra.mrb[32].mxu0 %vm2670_vm2, %v3483_v11 }
 0xbd2   : > { %7124 = vmatprep.mubr.msk.bf16.mxu0 %vm9176_vm1, %v9175_v15 }
 0xc94   : > { %v3365_v33 = vpop.f32.mrb[24].mxu0 }
 0xc95   : > { %v3366_v35 = vadd.f32 %v6707_v32, %v3365_v33  ;;  %v7078_v36 = vpop.f32.mrb[25].mxu0  ;;  %v3711_v33 = vpop.permute.xlu1 %3710 }
 0xc96   : > { %v3368_v37 = vpop.f32.mrb[26].mxu0 }
 0xc97   : > { %v10922_v42 = vpack.c.bf16 %v3366_v35, %v3366_v35  ;;  %v7079_v43 = vpop.f32.mrb[27].mxu0  ;;  %v3724_v35 = vsel %vm2894_vm4, %v3711_v33, 0  ;;  %v7604_v33 = vld [vmem:[%s10617_s15] sm:$0xff]  }
 0xc99   : > { %7113 = vmatmul.mubr.msk.bf16.vlgmr.msra.gmra.mrb[24].mxu1 %vm2894_vm4, %v10922_v42  ;;  %v3713_v36 = vpop.permute.xlu1 %3712 }
 0xc9a   : > { %7148 = vmatprep.mubr.msk.bf16.mxu1 %vm9176_vm1, %v9175_v15  ;;  %v3727_v37 = vsel %vm2894_vm4, %v3713_v36, 0 }
 0xc9c   : > { %v7098_v51 = vpop.f32.mrb[28].mxu0 }
 0xc9d   : > { %v3562_v52 = vadd.f32 %v7098_v51, %v6718_v50  ;;  %v3553_v53 = vpop.f32.mrb[29].mxu0 }
 0xc9e   : > { %v3554_v54 = vadd.f32 %v6718_v50, %v3553_v53  ;;  %v7099_v39 = vpop.f32.mrb[30].mxu0 }
 0xc9f   : > { %v3565_v40 = vadd.f32 %v7099_v39, %v6718_v50  ;;  %v3556_v55 = vpop.f32.mrb[31].mxu0 }
 0xca0   : > { %v3557_v56 = vadd.f32 %v6718_v50, %v3556_v55 }
 0xca1   : > { %v10950_v57 = vpack.c.bf16 %v3565_v40, %v3562_v52 }
 0xca2   : > { %v10952_v58 = vpack.c.bf16 %v3557_v56, %v3554_v54 }
 0xca4   : > { %v7102_v59 = vpop.f32.mrb[32].mxu0  ;;  %7117 = vmatpush3.bf16.msra.mxu0 %v10952_v58 }
 0xca5   : > { %v3578_v60 = vadd.f32 %v7102_v59, %v6718_v50  ;;  %v3569_v63 = vpop.f32.mrb[33].mxu0  ;;  %7118 = vmatprep.subr.bf16.mxu0 %v9175_v15 }
 0xca6   : > { %v3570_v0 = vadd.f32 %v6718_v50, %v3569_v63  ;;  %v7103_v1 = vpop.f32.mrb[34].mxu0 }
 0xca7   : > { %v3581_v2 = vadd.f32 %v7103_v1, %v6718_v50  ;;  %v3572_v3 = vpop.f32.mrb[35].mxu0 }
 0xca8   : > { %v3573_v4 = vadd.f32 %v6718_v50, %v3572_v3  ;;  %7119 = vmatpush3.bf16.msra.mxu0 %v10950_v57 }
 0xca9   : > { %v10957_v5 = vpack.c.bf16 %v3581_v2, %v3578_v60  ;;  %7120 = vmatprep.subr.bf16.mxu0 %v9175_v15 }
 0xcaa   : > { %v10960_v6 = vpack.c.bf16 %v3573_v4, %v3570_v0 }
 0xcac   : > { %7121 = vmatpush3.bf16.msra.mxu0 %v10960_v6 }
 0xcad   : > { %7122 = vmatprep.subr.bf16.mxu0 %v9175_v15 }
 0xcb0   : > { %7123 = vmatpush3.bf16.msra.mxu0 %v10957_v5 }
 0xcb1   : > { %7128 = vmatprep.subr.bf16.mxu0 %v9175_v15 }
 0xd6c   : > { %v3637_v12 = vpop.f32.mrb[24].mxu1 }
 0xd6d   : > { %v7114_v14 = vpop.f32.mrb[25].mxu1  ;;  %v3644_v16 = vsel %vm3643_vm7, %v3637_v12, -inf }
 0xd6e   : > { %3645 = vmax.xlane.f32.xlu0 %v3644_v16  ;;  %v3640_v23 = vpop.f32.mrb[26].mxu1 }
 0xd6f   : > { %v7115_v24 = vpop.f32.mrb[27].mxu1 }
 0xdfb   : > { %v3646_v7 = vpop.xlane.xlu0 %3645 }
 0xdfc   : > { %v3647_v9 = vsub.f32 %v3637_v12, %v3646_v7 }
 0xdfe   : > { %v3648_v19 = vmul.f32 1.442695, %v3647_v9 }
 0xe00   : > { %7634 = vpow2.f32 %v3648_v19 }
 0xe0a   : > { %v7635_v20 = vpop.eup %7634 }
 0xe0b   : > { %v3650_v13 = vsel %vm3643_vm7, %v7635_v20, 0.0 }
 0xe0c   : > { %3651 = vadd.xlane.f32.xlu0 %v3650_v13 }
 0xe22   : > { %3708 = vrot.lane.b32.xlu0 %v10885_v61, %s9181_s19 }
 0xe26   : > { %3700 = vrot.lane.b32.xlu0 %v10922_v42, %s9181_s19 }
 0xe2a   : > { %3785 = vrot.lane.b32.xlu0 %v10952_v58, %s9181_s19 }
 0xe99   : > { %v3652_v17 = vpop.xlane.xlu0 %3651 }
 0xe9a   : > { %7636 = vrcp.f32 %v3652_v17 }
 0xe9d   : > { %v3709_v21 = vpop.permute.xlu0 %3708 }
 0xe9e   : > { %v3721_v32 = vsel %vm2894_vm4, %v3709_v21, 0 }
 0xea1   : > { %v3701_v22 = vpop.permute.xlu0 %3700 }
 0xea4   : > { %v7637_v25 = vpop.eup %7636 }
 0xea5   : > { %v3654_v26 = vmul.f32 %v7637_v25, %v7635_v20  ;;  %v3786_v27 = vpop.permute.xlu0 %3785 }
 0xea6   : > { %7141 = vmatpush3.bf16.msra.mxu1 %v3786_v27 }
 0xea7   : > { %v3655_v30 = vpack.c.bf16 %v3654_v26, %v3654_v26  ;;  %7142 = vmatprep.subr.bf16.mxu1 %v9175_v15 }
 0xea9   : > { %7125 = vmatmul.mubr.msk.bf16.vlgmr.msra.gmra.mrb[36].mxu0 %vm3643_vm7, %v3655_v30 }
 0xeaa   : > { %7129 = vmatpush3.bf16.xpose.msra.mxu0 %v3718_v31  ;;  %7136 = vmatprep.mubr.msk.bf16.mxu0 %vm9176_vm1, %v9175_v15 }
 0xeab   : > { %7130 = vmatprep.subr.bf16.mxu0 %v9175_v15 }
 0xeb2   : > { %7131 = vmatpush3.bf16.xpose.msra.mxu0 %v3721_v32 }
 0xeb3   : > { %7132 = vmatprep.subr.bf16.mxu0 %v9175_v15 }
 0xeba   : > { %7133 = vmatpush3.bf16.xpose.msra.mxu0 %v3724_v35  ;;  %v7605_v35 = vld [vmem:[%s10617_s15 + $0x8] ss:$0 sps:$4 sm:$0xff]   ;;  %s11922_s15 = scalar_lea.vmem [#allocation33], %s10556_s17 }
 0xebb   : > { %7134 = vmatprep.subr.bf16.mxu0 %v9175_v15 }
 0xec2   : > { %7135 = vmatpush3.bf16.xpose.msra.mxu0 %v3727_v37 }
 0xec3   : > { %7164 = vmatprep.subr.bf16.mxu0 %v9175_v15 }
 0xec9   : > { %7137 = vmatmul.mubr.msk.bf16.vlgmr.msra.gmra.mrb[40].mxu0 %vm2894_vm4, %v3701_v22 }
 0xeca   : > { %7172 = vmatprep.mubr.msk.bf16.mxu0 %vm9176_vm1, %v9175_v15 }
 0xf7c   : > { %v10988_v43 = vpop.f32.mrb[36].mxu0 }
 0xf7d   : > { %v7126_v45 = vpop.f32.mrb[37].mxu0 }
 0xf7e   : > { %v3696_v46 = vpop.f32.mrb[38].mxu0 }
 0xf7f   : > { %v7127_v47 = vpop.f32.mrb[39].mxu0 }
 0xf9c   : > { %v3763_v48 = vpop.f32.mrb[40].mxu0 }
 0xf9d   : > { %v7138_v49 = vpop.f32.mrb[41].mxu0  ;;  %v3769_v11 = vsel %vm3643_vm7, %v3763_v48, -inf }
 0xf9e   : > { %3770 = vmax.xlane.f32.xlu1 %v3769_v11  ;;  %v3766_v12 = vpop.f32.mrb[42].mxu0 }
 0xf9f   : > { %v7139_v14 = vpop.f32.mrb[43].mxu0 }
 0xfa0   : > { %v6731_v14 = vld [vmem:[%s11922_s15] ss:$0 sm:$0xff]  ;;  %s11928_s15 = scalar_lea.vmem [#allocation51], %s10556_s17 }
 0xfaf   : > { %3787 = vrot.lane.b32.xlu1 %v10950_v57, %s9181_s19 }
 0xfb3   : > { %3789 = vrot.lane.b32.xlu1 %v10960_v6, %s9181_s19 }
 0xfb7   : > { %3842 = vrot.lane.b32.xlu1 %v10887_v62, %s9178_s26 }
 0xfbb   : > { %3846 = vrot.lane.b32.xlu1 %v10898_v10, %s9178_s26 }
 0xfbf   : > { %3840 = vrot.lane.b32.xlu1 %v10922_v42, %s9178_s26 }
 0xfc3   : > { %3919 = vrot.lane.b32.xlu1 %v10950_v57, %s9178_s26 }
0x102b   : > { %v3771_v16 = vpop.xlane.xlu1 %3770 }
0x102c   : > { %v3772_v23 = vsub.f32 %v3763_v48, %v3771_v16 }
0x102e   : > { %v3773_v24 = vmul.f32 1.442695, %v3772_v23 }
0x102f   : > { %v3788_v50 = vpop.permute.xlu1 %3787 }
0x1030   : > { %7638 = vpow2.f32 %v3773_v24  ;;  %7143 = vmatpush3.bf16.msra.mxu1 %v3788_v50 }
0x1031   : > { %7144 = vmatprep.subr.bf16.mxu1 %v9175_v15 }
0x1033   : > { %v3790_v51 = vpop.permute.xlu1 %3789 }
0x1034   : > { %7145 = vmatpush3.bf16.msra.mxu1 %v3790_v51 }
0x1035   : > { %7146 = vmatprep.subr.bf16.mxu1 %v9175_v15 }
0x1037   : > { %v3843_v39 = vpop.permute.xlu1 %3842 }
0x1038   : > { %v3854_v55 = vsel %vm2894_vm4, %v3843_v39, 0  ;;  %v7606_v39 = vld [vmem:[%s11923_s6] sm:$0xff]  }
0x103a   : > { %v7639_v62 = vpop.eup %7638 }
0x103b   : > { %v3775_v10 = vsel %vm3643_vm7, %v7639_v62, 0.0  ;;  %v3847_v56 = vpop.permute.xlu1 %3846 }
0x103c   : > { %3776 = vadd.xlane.f32.xlu0 %v3775_v10  ;;  %v3860_v57 = vsel %vm2894_vm4, %v3847_v56, 0 }
0x103f   : > { %v3841_v63 = vpop.permute.xlu1 %3840 }
0x1043   : > { %v3920_v25 = vpop.permute.xlu1 %3919 }
0x1052   : > { %3791 = vrot.lane.b32.xlu0 %v10957_v5, %s9181_s19 }
0x1056   : > { %3844 = vrot.lane.b32.xlu0 %v10885_v61, %s9178_s26 }
0x105a   : > { %3848 = vrot.lane.b32.xlu0 %v10894_v8, %s9178_s26 }
0x10c9   : > { %v3777_v42 = vpop.xlane.xlu0 %3776 }
0x10ca   : > { %7640 = vrcp.f32 %v3777_v42 }
0x10cd   : > { %v3792_v52 = vpop.permute.xlu0 %3791 }
0x10ce   : > { %7147 = vmatpush3.bf16.msra.mxu1 %v3792_v52 }
0x10cf   : > { %7152 = vmatprep.subr.bf16.mxu1 %v9175_v15 }
0x10d1   : > { %v3845_v61 = vpop.permute.xlu0 %3844 }
0x10d2   : > { %v3857_v8 = vsel %vm2894_vm4, %v3845_v61, 0 }
0x10d4   : > { %v7641_v53 = vpop.eup %7640 }
0x10d5   : > { %v3779_v54 = vmul.f32 %v7641_v53, %v7639_v62  ;;  %v3849_v59 = vpop.permute.xlu0 %3848 }
0x10d6   : > { %v3863_v60 = vsel %vm2894_vm4, %v3849_v59, 0  ;;  %v6735_v59 = vld [vmem:[%s11925_s30] ss:$0 sm:$0xff]  ;;  %s11932_s30 = scalar_lea.vmem [#allocation37], %s10559_s8 }
0x10d7   : > { %v3780_v40 = vpack.c.bf16 %v3779_v54, %v3779_v54 }
0x10d9   : > { %7149 = vmatmul.mubr.msk.bf16.vlgmr.msra.gmra.mrb[28].mxu1 %vm3643_vm7, %v3780_v40  ;;  %v7608_v40 = vld [vmem:[%s10662_s11] sm:$0xff]  }
0x10da   : > { %7153 = vmatpush3.bf16.xpose.msra.mxu1 %v3854_v55  ;;  %7160 = vmatprep.mubr.msk.bf16.mxu1 %vm9176_vm1, %v9175_v15  ;;  %v7609_v55 = vld [vmem:[%s10662_s11 + $0x8] sm:$0xff]  }
0x10db   : > { %7154 = vmatprep.subr.bf16.mxu1 %v9175_v15 }
0x10e2   : > { %7155 = vmatpush3.bf16.xpose.msra.mxu1 %v3857_v8 }
0x10e3   : > { %7156 = vmatprep.subr.bf16.mxu1 %v9175_v15 }
0x10ea   : > { %7157 = vmatpush3.bf16.xpose.msra.mxu1 %v3860_v57 }
0x10eb   : > { %7158 = vmatprep.subr.bf16.mxu1 %v9175_v15 }
0x10f2   : > { %7159 = vmatpush3.bf16.xpose.msra.mxu1 %v3863_v60 }
0x10f3   : > { %7192 = vmatprep.subr.bf16.mxu1 %v9175_v15 }
0x10f9   : > { %7161 = vmatmul.mubr.msk.bf16.vlgmr.msra.gmra.mrb[32].mxu1 %vm2894_vm4, %v3841_v63  ;;  %v6736_v63 = vld [vmem:[%s11926_s0] ss:$0 sm:$0xff] }
0x10fa   : > { %7200 = vmatprep.mubr.msk.bf16.mxu1 %vm9176_vm1, %v9175_v15  ;;  %7193 = vmatpush3.bf16.msra.mxu1 %v7608_v40 }
0x10fb   : > { %7194 = vmatprep.subr.bf16.mxu1 %v9175_v15 }
0x10fe   : > { %7195 = vmatpush3.bf16.msra.mxu1 %v7609_v55 }
0x10ff   : > { %7196 = vmatprep.subr.bf16.mxu1 %v9175_v15 }
0x11ac   : > { %v3834_v0 = vpop.f32.mrb[28].mxu1 }
0x11ad   : > { %v7150_v1 = vpop.f32.mrb[29].mxu1 }
0x11ae   : > { %v3837_v2 = vpop.f32.mrb[30].mxu1 }
0x11af   : > { %v7151_v3 = vpop.f32.mrb[31].mxu1 }
0x11b0   : > { %v7610_v3 = vld [vmem:[%s10662_s11 + $0x10] sm:$0xff]  }
0x11b1   : > { %7197 = vmatpush3.bf16.msra.mxu1 %v7610_v3 }
0x11b2   : > { %7198 = vmatprep.subr.bf16.mxu1 %v9175_v15 }
0x11cc   : > { %v3899_v4 = vpop.f32.mrb[32].mxu1 }
0x11cd   : > { %v7162_v7 = vpop.f32.mrb[33].mxu1  ;;  %v3905_v9 = vsel %vm3643_vm7, %v3899_v4, -inf }
0x11ce   : > { %3906 = vmax.xlane.f32.xlu0 %v3905_v9  ;;  %v3902_v19 = vpop.f32.mrb[34].mxu1  ;;  %v6737_v7 = vld [vmem:[%s11927_s10] ss:$0 sm:$0xff]  ;;  %s11934_s10 = smov %s11932_s30 }
0x11cf   : > { %v7163_v20 = vpop.f32.mrb[35].mxu1 }
0x11e4   : > { %3917 = vrot.lane.b32.xlu0 %v10952_v58, %s9178_s26 }
0x11e8   : > { %3921 = vrot.lane.b32.xlu0 %v10960_v6, %s9178_s26 }
0x11ec   : > { %3973 = vrot.lane.b32.xlu0 %v3834_v0, %s9182_s5 }
0x125b   : > { %v3907_v13 = vpop.xlane.xlu0 %3906 }
0x125c   : > { %v3908_v17 = vsub.f32 %v3899_v4, %v3907_v13  ;;  %v7611_v4 = vld [vmem:[%s10662_s11 + $0x18] sm:$0xff]   ;;  %s11929_s11 = scalar_lea.vmem [#allocation34], %s10559_s8 }
0x125d   : > { %7199 = vmatpush3.bf16.msra.mxu1 %v7611_v4  ;;  %s11930_s6 = smov %s11929_s11 }
0x125e   : > { %v3909_v21 = vmul.f32 1.442695, %v3908_v17  ;;  %7216 = vmatprep.subr.bf16.mxu1 %v9175_v15 }
0x125f   : > { %v3918_v22 = vpop.permute.xlu0 %3917 }
0x1260   : > { %7642 = vpow2.f32 %v3909_v21  ;;  %7165 = vmatpush3.bf16.msra.mxu0 %v3918_v22 }
0x1261   : > { %7166 = vmatprep.subr.bf16.mxu0 %v9175_v15 }
0x1263   : > { %v3922_v26 = vpop.permute.xlu0 %3921 }
0x1264   : > { %7167 = vmatpush3.bf16.msra.mxu0 %v3920_v25 }
0x1265   : > { %7168 = vmatprep.subr.bf16.mxu0 %v9175_v15 }
0x1267   : > { %v3974_v47 = vpop.permute.xlu0 %3973 }
0x1268   : > { %7169 = vmatpush3.bf16.msra.mxu0 %v3922_v26  ;;  %v3980_v48 = vsel %vm2894_vm4, %v10988_v43, %v3974_v47 }
0x1269   : > { %7170 = vmatprep.subr.bf16.mxu0 %v9175_v15 }
0x126a   : > { %v7643_v58 = vpop.eup %7642 }
0x126b   : > { %v3911_v6 = vsel %vm3643_vm7, %v7643_v58, 0.0 }
0x126c   : > { %3912 = vadd.xlane.f32.xlu1 %v3911_v6 }
0x127d   : > { %3923 = vrot.lane.b32.xlu1 %v10957_v5, %s9178_s26  ;;  %v4007_v5 = vsel %vm2910_vm5, %v7605_v35, 0 }
0x12f9   : > { %v3913_v27 = vpop.xlane.xlu1 %3912 }
0x12fa   : > { %7644 = vrcp.f32 %v3913_v27 }
0x12fd   : > { %v3924_v28 = vpop.permute.xlu1 %3923 }
0x12fe   : > { %7171 = vmatpush3.bf16.msra.mxu0 %v3924_v28 }
0x12ff   : > { %7176 = vmatprep.subr.bf16.mxu0 %v9175_v15 }
0x1304   : > { %v7645_v30 = vpop.eup %7644 }
0x1305   : > { %v3915_v31 = vmul.f32 %v7645_v30, %v7643_v58 }
0x1307   : > { %v3916_v32 = vpack.c.bf16 %v3915_v31, %v3915_v31  ;;  %v7612_v31 = vld [vmem:[%s11929_s11] sm:$0xff]   ;;  %s11938_s11 = scalar_lea.vmem [#allocation39], %s10556_s17 }
0x1308   : > { %v6756_v3 = vld [vmem:[%s11938_s11] ss:$0 sm:$0xff] }
0x1309   : > { %7173 = vmatmul.mubr.msk.bf16.vlgmr.msra.gmra.mrb[44].mxu0 %vm3643_vm7, %v3916_v32 }
0x130a   : > { %7180 = vmatprep.mubr.msk.bf16.mxu0 %vm9176_vm1, %v9175_v15  ;;  %7177 = vmatpush3.bf16.msra.mxu0 %v7604_v33 }
0x130b   : > { %7178 = vmatprep.subr.bf16.mxu0 %v9175_v15 }
0x130e   : > { %7179 = vmatpush3.bf16.msra.mxu0 %v4007_v5 }
0x130f   : > { %7184 = vmatprep.subr.bf16.mxu0 %v9175_v15 }
0x13dc   : > { %v3966_v36 = vpop.f32.mrb[44].mxu0 }
0x13dd   : > { %3977 = vrot.lane.b32.xlu1 %v3966_v36, %s9179_s1  ;;  %v7174_v37 = vpop.f32.mrb[45].mxu0 }
0x13de   : > { %v3969_v45 = vpop.f32.mrb[46].mxu0  ;;  %v7613_v37 = vld [vmem:[%s11930_s6 + $0x8] sm:$0xff]  }
0x13df   : > { %v7175_v46 = vpop.f32.mrb[47].mxu0 }
0x13e0   : > { %v7615_v46 = vld [vmem:[%s11932_s30] sm:$0xff]  }
0x144f   : > { %v3978_v49 = vpop.permute.xlu1 %3977 }
0x1450   : > { %v3981_v11 = vsel %vm2847_vm3, %v3980_v48, %v3978_v49 }
0x1451   : > { %v3982_v12 = vpack.c.bf16 %v3981_v11, %v3981_v11 }
0x1453   : > { %7181 = vmatmul.mubr.msk.bf16.vlgmr.msra.gmra.mrb[48].mxu0 %vm4002_vm8, %v3982_v12 }
0x1454   : > { %7188 = vmatprep.mubr.msk.bf16.mxu0 %vm9176_vm1, %v9175_v15  ;;  %7185 = vmatpush3.bf16.msra.mxu0 %v7606_v39 }
0x1455   : > { %7186 = vmatprep.subr.bf16.mxu0 %v9175_v15 }
0x1526   : > { %v4043_v16 = vpop.f32.mrb[48].mxu0 }
0x1527   : > { %v4044_v23 = vadd.f32 %v6731_v14, %v4043_v16  ;;  %v7182_v24 = vpop.f32.mrb[49].mxu0  ;;  %v6748_v14 = vld [vmem:[%s2294_s9] ss:$0 sm:$0xff]  ;;  %s11937_s9 = scalar_lea.vmem [#allocation42], %s10556_s17 }
0x1528   : > { %v4046_v50 = vpop.f32.mrb[50].mxu0 }
0x1529   : > { %v7183_v43 = vpop.f32.mrb[51].mxu0  ;;  %v4049_v51 = vadd.f32 %v4044_v23, %v10915_v29  ;;  %v7607_v29 = vld [vmem:[%s11924_s28 + $0x8] sm:$0xff]   ;;  %s11931_s28 = scalar_lea.vmem [#allocation40], %s10559_s8  ;;  %s11936_s8 = scalar_lea.vmem [#allocation36], %s10556_s17 }
0x152a   : > { %7187 = vmatpush3.bf16.msra.mxu0 %v7607_v29  ;;  %v7614_v45 = vld [vmem:[%s11931_s28] sm:$0xff]   ;;  %s11933_s0 = smov %s11931_s28 }
0x152b   : > { %v4050_v62 = vsel %vm2670_vm2, %v4049_v51, 0.0  ;;  %7204 = vmatprep.subr.bf16.mxu0 %v7612_v31  ;;  %v6749_v43 = vld [vmem:[%s11936_s8] ss:$0 sm:$0xff] }
0x152c   : > { %4051 = vadd.xlane.f32.xlu0 %v4050_v62 }
0x15b9   : > { %v4052_v10 = vpop.xlane.xlu0 %4051 }
0x15ba   : > { %v4053_v42 = vmul.f32 0.03125, %v4052_v10 }
0x15bc   : > { %v4054_v52 = vsub.f32 %v4049_v51, %v4053_v42 }
0x15be   : > { %v4055_v53 = vmul.f32 %v4054_v52, %v4054_v52 }
0x15c0   : > { %v4056_v54 = vsel %vm2670_vm2, %v4055_v53, 0.0 }
0x15c1   : > { %4057 = vadd.xlane.f32.xlu1 %v4056_v54 }
0x164e   : > { %v4058_v61 = vpop.xlane.xlu1 %4057 }
0x164f   : > { %v4059_v8 = vmul.f32 0.03125, %v4058_v61 }
0x1651   : > { %v4060_v56 = vadd.f32 1e-05, %v4059_v8 }
0x1653   : > { %7646 = vrsqrt.f32 %v4060_v56 }
0x165d   : > { %v7647_v57 = vpop.eup %7646 }
0x165e   : > { %v4062_v60 = vmul.f32 %v7647_v57, %v4054_v52 }
0x1660   : > { %v4070_v0 = vmul.f32 %v6735_v59, %v4062_v60 }
0x1662   : > { %v4078_v1 = vadd.f32 %v6736_v63, %v4070_v0 }
0x1664   : > { %v4079_v2 = vpack.c.bf16 %v4078_v1, %v4078_v1 }
0x1666   : > { %7189 = vmatmul.mubr.msk.bf16.vlgmr.msra.gmra.mrb[52].mxu0 %vm2670_vm2, %v4079_v2 }
0x1667   : > { %7208 = vmatprep.mubr.msk.bf16.mxu0 %vm2670_vm2, %v10850_v34  ;;  %v6741_v34 = vld [vmem:[%s11928_s15] ss:$0 sm:$0xff]  ;;  %7205 = vmatpush3.bf16.msra.mxu0 %v7612_v31  ;;  %s11935_s15 = scalar_lea.vmem [#allocation58], %s10556_s17 }
0x1668   : > { %7206 = vmatprep.subr.bf16.mxu0 %v7613_v37  ;;  %v6747_v11 = vld [vmem:[%s11935_s15] ss:$0 sm:$0xff] }
0x166b   : > { %7207 = vmatpush3.bf16.msra.mxu0 %v7613_v37 }
0x166c   : > { %7224 = vmatprep.subr.bf16.mxu0 %v9175_v15 }
0x166e   : > { %7209 = vmatmul.mubr.msk.bf16.vlgmr.msra.gmra.mrb[56].mxu0 %vm2670_vm2, %v10854_v38  ;;  %v7616_v38 = vld [vmem:[%s11933_s0 + $0x8] sm:$0xff]  }
0x166f   : > { %7212 = vmatprep.mubr.msk.bf16.mxu0 %vm2670_vm2, %v10862_v41  ;;  %7225 = vmatpush3.bf16.msra.mxu0 %v7614_v45  ;;  %v7617_v41 = vld [vmem:[%s11934_s10 + $0x8] sm:$0xff]  }
0x1670   : > { %7226 = vmatprep.subr.bf16.mxu0 %v9175_v15 }
0x1673   : > { %7227 = vmatpush3.bf16.msra.mxu0 %v7616_v38 }
0x1676   : > { %7213 = vmatmul.mubr.msk.bf16.gmra.mrb[60].mxu0 %vm2670_vm2, %v10871_v44 }
0x1677   : > { %7228 = vmatprep.mubr.msk.bf16.mxu0 %vm9176_vm1, %v9175_v15 }
0x1739   : > { %v4140_v9 = vpop.f32.mrb[52].mxu0 }
0x173a   : > { %v4141_v19 = vadd.f32 %v6737_v7, %v4140_v9  ;;  %v7190_v20 = vpop.f32.mrb[53].mxu0 }
0x173b   : > { %v4143_v13 = vpop.f32.mrb[54].mxu0 }
0x173c   : > { %v4146_v17 = vmax.f32 %v4141_v19, 0.0  ;;  %v7191_v21 = vpop.f32.mrb[55].mxu0 }
0x173e   : > { %v4147_v22 = vpack.c.bf16 %v4146_v17, %v4146_v17 }
0x1740   : > { %7201 = vmatmul.mubr.msk.bf16.vlgmr.msra.gmra.mrb[36].mxu1 %vm3643_vm7, %v4147_v22 }
0x1741   : > { %7220 = vmatprep.mubr.msk.bf16.mxu1 %vm9176_vm1, %v9175_v15  ;;  %7217 = vmatpush3.bf16.msra.mxu1 %v7615_v46  ;;  %v7210_v51 = vpop.f32.mrb[56].mxu0 }
0x1742   : > { %7218 = vmatprep.subr.bf16.mxu1 %v9175_v15  ;;  %v4327_v62 = vadd.f32 %v7210_v51, %v6749_v43  ;;  %v4318_v10 = vpop.f32.mrb[57].mxu0 }
0x1743   : > { %v4319_v42 = vadd.f32 %v6749_v43, %v4318_v10  ;;  %v7211_v52 = vpop.f32.mrb[58].mxu0 }
0x1744   : > { %v4330_v53 = vadd.f32 %v7211_v52, %v6749_v43  ;;  %v4321_v54 = vpop.f32.mrb[59].mxu0 }
0x1745   : > { %7219 = vmatpush3.bf16.msra.mxu1 %v7617_v41  ;;  %v4322_v39 = vadd.f32 %v6749_v43, %v4321_v54 }
0x1746   : > { %v4350_v29 = vpack.c.bf16 %v4330_v53, %v4327_v62 }
0x1747   : > { %v4349_v40 = vpack.c.bf16 %v4322_v39, %v4319_v42 }
0x1813   : > { %v4224_v25 = vpop.f32.mrb[36].mxu1 }
0x1814   : > { %v4225_v26 = vadd.f32 %v6741_v34, %v4224_v25  ;;  %v7202_v58 = vpop.f32.mrb[37].mxu1 }
0x1815   : > { %v4227_v6 = vpop.f32.mrb[38].mxu1 }
0x1816   : > { %v7203_v27 = vpop.f32.mrb[39].mxu1  ;;  %v4230_v28 = vadd.f32 %v4225_v26, %v4078_v1  ;;  %v6760_v1 = vld [vmem:[%s11937_s9] ss:$0 sm:$0xff] }
0x1818   : > { %v4231_v30 = vsel %vm2670_vm2, %v4230_v28, 0.0 }
0x1819   : > { %4232 = vadd.xlane.f32.xlu0 %v4231_v30 }
0x18a6   : > { %v4233_v32 = vpop.xlane.xlu0 %4232 }
0x18a7   : > { %v4234_v33 = vmul.f32 0.03125, %v4233_v32 }
0x18a9   : > { %v4235_v35 = vsub.f32 %v4230_v28, %v4234_v33 }
0x18ab   : > { %v4236_v5 = vmul.f32 %v4235_v35, %v4235_v35 }
0x18ad   : > { %v4237_v36 = vsel %vm2670_vm2, %v4236_v5, 0.0 }
0x18ae   : > { %4238 = vadd.xlane.f32.xlu0 %v4237_v36 }
0x18c4   : > { %4745 = vrot.lane.b32.xlu0 %v4349_v40, %s9181_s19 }
0x193b   : > { %v4239_v44 = vpop.xlane.xlu0 %4238 }
0x193c   : > { %v4240_v47 = vmul.f32 0.03125, %v4239_v44 }
0x193e   : > { %v4241_v48 = vadd.f32 1e-05, %v4240_v47 }
0x193f   : > { %v4746_v6 = vpop.permute.xlu0 %4745 }
0x1940   : > { %7648 = vrsqrt.f32 %v4241_v48 }
0x194a   : > { %v7649_v49 = vpop.eup %7648 }
0x194b   : > { %v4243_v12 = vmul.f32 %v7649_v49, %v4235_v35 }
0x194d   : > { %v4251_v16 = vmul.f32 %v6747_v11, %v4243_v12 }
0x194f   : > { %v4259_v23 = vadd.f32 %v6748_v14, %v4251_v16 }
0x1951   : > { %5600 = vst.msk [vmem:[#allocation2] sm:$0xff] %vm2670_vm2, %v4259_v23  ;;  %v11117_v15 = vpack.c.bf16 %v4259_v23, %v4259_v23  ;;  %v4260_v24 = vadd.f32 %v4259_v23, %v10732_v18  ;;  %v7214_v18 = vpop.f32.mrb[60].mxu0 }
0x1952   : > { %v4343_v55 = vadd.f32 %v7214_v18, %v6749_v43  ;;  %v4334_v61 = vpop.f32.mrb[61].mxu0 }
0x1953   : > { %7229 = vmatmul.mubr.msk.bf16.vlgmr.msra.gmra.mrb[64].mxu0 %vm2670_vm2, %v11117_v15  ;;  %v4353_v50 = vpack.c.bf16 %v4260_v24, %v4260_v24  ;;  %v4335_v8 = vadd.f32 %v6749_v43, %v4334_v61  ;;  %v7215_v56 = vpop.f32.mrb[62].mxu0  ;;  %5614 = vst.msk [vmem:[%s10699_s12] sm:$0xf] (!%p6797_p4), %vm5613_vm9, %v11117_v15 }
0x1954   : > { %v4346_v57 = vadd.f32 %v7215_v56, %v6749_v43  ;;  %v4337_v59 = vpop.f32.mrb[63].mxu0 }
0x1955   : > { %7221 = vmatmul.mubr.msk.bf16.vlgmr.msra.gmra.mrb[40].mxu1 %vm2670_vm2, %v4353_v50  ;;  %v4338_v60 = vadd.f32 %v6749_v43, %v4337_v59 }
0x1956   : > { %7234 = vmatprep.mubr.msk.bf16.mxu1 %vm2894_vm4, %v4349_v40  ;;  %v4352_v63 = vpack.c.bf16 %v4346_v57, %v4343_v55 }
0x1957   : > { %v4351_v0 = vpack.c.bf16 %v4338_v60, %v4335_v8 }
0x1958   : > { %4751 = vrot.lane.b32.xlu0 %v4352_v63, %s9181_s19 }
0x195c   : > { %5011 = vrot.lane.b32.xlu0 %v4349_v40, %s9178_s26 }
0x1960   : > { %5015 = vrot.lane.b32.xlu0 %v4351_v0, %s9178_s26 }
0x19ca   : > { %v4752_v32 = vpop.permute.xlu0 %4751 }
0x19ce   : > { %v5012_v5 = vpop.permute.xlu0 %5011 }
0x19d2   : > { %v5016_v37 = vpop.permute.xlu0 %5015 }
0x1a26   : > { %v4482_v2 = vpop.f32.mrb[64].mxu0 }
0x1a27   : > { %v4483_v4 = vadd.f32 %v6760_v1, %v4482_v2  ;;  %v7230_v7 = vpop.f32.mrb[65].mxu0 }
0x1a28   : > { %v4414_v9 = vpop.f32.mrb[40].mxu1  ;;  %v4485_v19 = vpop.f32.mrb[66].mxu0 }
0x1a29   : > { %v11134_v20 = vpack.c.bf16 %v4483_v4, %v4483_v4  ;;  %v4415_v13 = vadd.f32 %v6756_v3, %v4414_v9  ;;  %v7222_v17 = vpop.f32.mrb[41].mxu1  ;;  %v7231_v21 = vpop.f32.mrb[67].mxu0 }
0x1a2a   : > { %v4417_v22 = vpop.f32.mrb[42].mxu1 }
0x1a2b   : > { %v4420_v34 = vpack.c.bf16 %v4415_v13, %v4415_v13  ;;  %v7223_v25 = vpop.f32.mrb[43].mxu1  ;;  %7305 = vmatprep.subr.msk.bf16.mxu0 %vm2910_vm5, %v11134_v20  ;;  %v4674_v26 = vsel %vm2910_vm5, %v11134_v20, 0 }
0x1a2c   : > { %7243 = vmatpush3.bf16.msra.mxu0 %v4674_v26 }
0x1a2d   : > { %4754 = vrot.lane.b32.xlu1 %v4420_v34, %s9181_s19  ;;  %7304 = vmatprep.subr.msk.bf16.mxu1 %vm2894_vm4, %v4420_v34  ;;  %v4502_v58 = vsel %vm2894_vm4, %v4420_v34, 0 }
0x1a2e   : > { %7233 = vmatpush3.bf16.xpose.msra.mxu1 %v4502_v58 }
0x1a31   : > { %4747 = vrot.lane.b32.xlu1 %v4350_v29, %s9181_s19 }
0x1a35   : > { %4749 = vrot.lane.b32.xlu1 %v4351_v0, %s9181_s19  ;;  %7235 = vmatmul.mubr.msk.bf16.vlgmr.msra.gmra.mrb[44].mxu1 %vm2894_vm4, %v4350_v29 }
0x1a36   : > { %7238 = vmatprep.mubr.msk.bf16.mxu1 %vm2894_vm4, %v4351_v0 }
0x1a39   : > { %5019 = vrot.lane.b32.xlu1 %v4420_v34, %s9178_s26 }
0x1a3d   : > { %5013 = vrot.lane.b32.xlu1 %v4350_v29, %s9178_s26  ;;  %7239 = vmatmul.mubr.msk.bf16.gmra.mrb[48].mxu1 %vm2894_vm4, %v4352_v63 }
0x1a3e   : > { %7254 = vmatprep.mubr.msk.bf16.mxu1 %vm2894_vm4, %v4746_v6 }
0x1a41   : > { %5017 = vrot.lane.b32.xlu1 %v4352_v63, %s9178_s26 }
0x1a9f   : > { %v4755_v27 = vpop.permute.xlu1 %4754 }
0x1aa0   : > { %v4769_v28 = vsel %vm2894_vm4, %v4755_v27, 0  ;;  %7306 = vmatprep.subr.msk.bf16.mxu1 %vm2894_vm4, %v4755_v27 }
0x1aa1   : > { %7253 = vmatpush3.bf16.xpose.msra.mxu1 %v4769_v28 }
0x1aa3   : > { %v4748_v30 = vpop.permute.xlu1 %4747 }
0x1aa7   : > { %v4750_v31 = vpop.permute.xlu1 %4749 }
0x1aa8   : > { %7255 = vmatmul.mubr.msk.bf16.vlgmr.msra.gmra.mrb[52].mxu1 %vm2894_vm4, %v4748_v30 }
0x1aa9   : > { %7258 = vmatprep.mubr.msk.bf16.mxu1 %vm2894_vm4, %v4750_v31 }
0x1aab   : > { %v5020_v33 = vpop.permute.xlu1 %5019 }
0x1aac   : > { %v5034_v35 = vsel %vm2894_vm4, %v5020_v33, 0  ;;  %7308 = vmatprep.subr.msk.bf16.mxu1 %vm2894_vm4, %v5020_v33 }
0x1aad   : > { %7273 = vmatpush3.bf16.xpose.msra.mxu1 %v5034_v35 }
0x1aaf   : > { %v5014_v36 = vpop.permute.xlu1 %5013 }
0x1ab0   : > { %7259 = vmatmul.mubr.msk.bf16.gmra.mrb[56].mxu1 %vm2894_vm4, %v4752_v32 }
0x1ab1   : > { %7274 = vmatprep.mubr.msk.bf16.mxu1 %vm2894_vm4, %v5012_v5 }
0x1ab3   : > { %v5018_v45 = vpop.permute.xlu1 %5017 }
0x1ab8   : > { %7275 = vmatmul.mubr.msk.bf16.vlgmr.msra.gmra.mrb[60].mxu1 %vm2894_vm4, %v5014_v36 }
0x1ab9   : > { %7278 = vmatprep.mubr.msk.bf16.mxu1 %vm2894_vm4, %v5016_v37 }
0x1ac0   : > { %7279 = vmatmul.mubr.msk.bf16.gmra.mrb[64].mxu1 %vm2894_vm4, %v5018_v45 }
0x1b08   : > { %v11163_v46 = vpop.f32.mrb[44].mxu1 }
0x1b09   : > { %v11165_v38 = vpop.f32.mrb[45].mxu1  ;;  %v4575_v49 = vsel %vm2894_vm4, %v11163_v46, -inf }
0x1b0a   : > { %v11167_v41 = vpop.f32.mrb[46].mxu1  ;;  %v4569_v44 = vsel %vm2894_vm4, %v11165_v38, -inf }
0x1b0b   : > { %4570 = vmax.xlane.f32.xlu0 %v4569_v44  ;;  %v11171_v47 = vpop.f32.mrb[47].mxu1  ;;  %v4578_v16 = vsel %vm2894_vm4, %v11167_v41, -inf }
0x1b0c   : > { %v4572_v48 = vsel %vm2894_vm4, %v11171_v47, -inf }
0x1b0d   : > { %4573 = vmax.xlane.f32.xlu1 %v4572_v48 }
0x1b0f   : > { %4576 = vmax.xlane.f32.xlu0 %v4575_v49 }
0x1b10   : > { %v11177_v11 = vpop.f32.mrb[48].mxu1 }
0x1b11   : > { %v11179_v12 = vpop.f32.mrb[49].mxu1  ;;  %v4587_v50 = vsel %vm2894_vm4, %v11177_v11, -inf }
0x1b12   : > { %v11181_v14 = vpop.f32.mrb[50].mxu1  ;;  %v4581_v23 = vsel %vm2894_vm4, %v11179_v12, -inf }
0x1b13   : > { %4579 = vmax.xlane.f32.xlu0 %v4578_v16  ;;  %4582 = vmax.xlane.f32.xlu1 %v4581_v23  ;;  %v11187_v24 = vpop.f32.mrb[51].mxu1  ;;  %v4590_v51 = vsel %vm2894_vm4, %v11181_v14, -inf }
0x1b14   : > { %v4584_v43 = vsel %vm2894_vm4, %v11187_v24, -inf }
0x1b17   : > { %4588 = vmax.xlane.f32.xlu1 %v4587_v50  ;;  %4585 = vmax.xlane.f32.xlu0 %v4584_v43 }
0x1b1b   : > { %4591 = vmax.xlane.f32.xlu0 %v4590_v51 }
0x1b7b   : > { %v11195_v62 = vpop.f32.mrb[52].mxu1 }
0x1b7c   : > { %v11197_v10 = vpop.f32.mrb[53].mxu1  ;;  %v4842_v39 = vsel %vm2894_vm4, %v11195_v62, -inf }
0x1b7d   : > { %v11199_v42 = vpop.f32.mrb[54].mxu1  ;;  %v4836_v52 = vsel %vm2894_vm4, %v11197_v10, -inf }
0x1b7e   : > { %4837 = vmax.xlane.f32.xlu1 %v4836_v52  ;;  %v11203_v53 = vpop.f32.mrb[55].mxu1  ;;  %v4845_v40 = vsel %vm2894_vm4, %v11199_v42, -inf }
0x1b7f   : > { %v4839_v54 = vsel %vm2894_vm4, %v11203_v53, -inf }
0x1b80   : > { %4840 = vmax.xlane.f32.xlu0 %v4839_v54 }
0x1b82   : > { %4843 = vmax.xlane.f32.xlu1 %v4842_v39 }
0x1b83   : > { %v11209_v29 = vpop.f32.mrb[56].mxu1 }
0x1b84   : > { %v11213_v18 = vpop.f32.mrb[57].mxu1  ;;  %4846 = vmax.xlane.f32.xlu0 %v4845_v40  ;;  %v4854_v57 = vsel %vm2894_vm4, %v11209_v29, -inf }
0x1b85   : > { %v11215_v55 = vpop.f32.mrb[58].mxu1  ;;  %v4848_v61 = vsel %vm2894_vm4, %v11213_v18, -inf }
0x1b86   : > { %4849 = vmax.xlane.f32.xlu1 %v4848_v61  ;;  %v11219_v8 = vpop.f32.mrb[59].mxu1  ;;  %v4857_v60 = vsel %vm2894_vm4, %v11215_v55, -inf }
0x1b87   : > { %v4851_v56 = vsel %vm2894_vm4, %v11219_v8, -inf }
0x1b88   : > { %4852 = vmax.xlane.f32.xlu0 %v4851_v56 }
0x1b8a   : > { %4855 = vmax.xlane.f32.xlu1 %v4854_v57 }
0x1b8b   : > { %v11225_v59 = vpop.f32.mrb[60].mxu1 }
0x1b8c   : > { %v11229_v63 = vpop.f32.mrb[61].mxu1  ;;  %4858 = vmax.xlane.f32.xlu0 %v4857_v60  ;;  %v5107_v4 = vsel %vm2894_vm4, %v11225_v59, -inf }
0x1b8d   : > { %v11231_v0 = vpop.f32.mrb[62].mxu1  ;;  %v5101_v1 = vsel %vm2894_vm4, %v11229_v63, -inf }
0x1b8e   : > { %5102 = vmax.xlane.f32.xlu1 %v5101_v1  ;;  %v11235_v2 = vpop.f32.mrb[63].mxu1  ;;  %v5110_v9 = vsel %vm2894_vm4, %v11231_v0, -inf }
0x1b8f   : > { %v5104_v3 = vsel %vm2894_vm4, %v11235_v2, -inf }
0x1b90   : > { %5105 = vmax.xlane.f32.xlu0 %v5104_v3 }
0x1b92   : > { %5108 = vmax.xlane.f32.xlu1 %v5107_v4 }
0x1b93   : > { %v11241_v7 = vpop.f32.mrb[64].mxu1 }
0x1b94   : > { %v11245_v19 = vpop.f32.mrb[65].mxu1  ;;  %5111 = vmax.xlane.f32.xlu0 %v5110_v9  ;;  %v5119_v25 = vsel %vm2894_vm4, %v11241_v7, -inf }
0x1b95   : > { %v11247_v13 = vpop.f32.mrb[66].mxu1  ;;  %v5113_v17 = vsel %vm2894_vm4, %v11245_v19, -inf }
0x1b96   : > { %5114 = vmax.xlane.f32.xlu1 %v5113_v17  ;;  %v11251_v21 = vpop.f32.mrb[67].mxu1  ;;  %v5122_v58 = vsel %vm2894_vm4, %v11247_v13, -inf }
0x1b97   : > { %v5116_v22 = vsel %vm2894_vm4, %v11251_v21, -inf }
0x1b98   : > { %v4571_v34 = vpop.xlane.xlu0 %4570  ;;  %5117 = vmax.xlane.f32.xlu0 %v5116_v22 }
0x1b99   : > { %v4593_v26 = vsub.f32 %v11165_v38, %v4571_v34 }
0x1b9a   : > { %5120 = vmax.xlane.f32.xlu1 %v5119_v25  ;;  %v4574_v6 = vpop.xlane.xlu1 %4573 }
0x1b9b   : > { %v4601_v30 = vmul.f32 1.442695, %v4593_v26  ;;  %v4594_v31 = vsub.f32 %v11171_v47, %v4574_v6 }
0x1b9c   : > { %v4577_v27 = vpop.xlane.xlu0 %4576  ;;  %5123 = vmax.xlane.f32.xlu0 %v5122_v58 }
0x1b9d   : > { %v4595_v28 = vsub.f32 %v11163_v46, %v4577_v27  ;;  %v4603_v36 = vmul.f32 1.442695, %v4594_v31 }
0x1b9f   : > { %v4605_v32 = vmul.f32 1.442695, %v4595_v28 }
0x1ba0   : > { %v4580_v33 = vpop.xlane.xlu0 %4579  ;;  %v4583_v35 = vpop.xlane.xlu1 %4582 }
0x1ba1   : > { %7650 = vpow2.f32 %v4605_v32  ;;  %v4596_v5 = vsub.f32 %v11167_v41, %v4580_v33  ;;  %v4597_v45 = vsub.f32 %v11179_v12, %v4583_v35 }
0x1ba2   : > { %7652 = vpow2.f32 %v4601_v30 }
0x1ba3   : > { %v4607_v37 = vmul.f32 1.442695, %v4596_v5  ;;  %v4609_v46 = vmul.f32 1.442695, %v4597_v45 }
0x1ba4   : > { %v4589_v38 = vpop.xlane.xlu1 %4588  ;;  %v4586_v44 = vpop.xlane.xlu0 %4585 }
0x1ba5   : > { %7654 = vpow2.f32 %v4607_v37  ;;  %v4599_v48 = vsub.f32 %v11177_v11, %v4589_v38  ;;  %v4598_v47 = vsub.f32 %v11187_v24, %v4586_v44 }
0x1ba6   : > { %7656 = vpow2.f32 %v4603_v36 }
0x1ba7   : > { %v4613_v49 = vmul.f32 1.442695, %v4599_v48  ;;  %v4611_v50 = vmul.f32 1.442695, %v4598_v47 }
0x1ba8   : > { %v4592_v16 = vpop.xlane.xlu0 %4591 }
0x1ba9   : > { %7658 = vpow2.f32 %v4613_v49  ;;  %v4600_v23 = vsub.f32 %v11181_v14, %v4592_v16 }
0x1baa   : > { %7660 = vpow2.f32 %v4609_v46 }
0x1bab   : > { %v11267_v41 = vpop.eup %7650  ;;  %v4615_v43 = vmul.f32 1.442695, %v4600_v23 }
0x1bac   : > { %v4623_v12 = vsel %vm2894_vm4, %v11267_v41, 0.0  ;;  %v11271_v51 = vpop.eup %7652 }
0x1bad   : > { %7662 = vpow2.f32 %v4615_v43  ;;  %4624 = vadd.xlane.f32.xlu1 %v4623_v12  ;;  %v4617_v24 = vsel %vm2894_vm4, %v11271_v51, 0.0 }
0x1bae   : > { %7664 = vpow2.f32 %v4611_v50 }
0x1baf   : > { %v11273_v11 = vpop.eup %7654 }
0x1bb0   : > { %v4626_v14 = vsel %vm2894_vm4, %v11273_v11, 0.0  ;;  %v11279_v52 = vpop.eup %7656 }
0x1bb1   : > { %4618 = vadd.xlane.f32.xlu1 %v4617_v24  ;;  %4627 = vadd.xlane.f32.xlu0 %v4626_v14  ;;  %v4620_v40 = vsel %vm2894_vm4, %v11279_v52, 0.0 }
0x1bb3   : > { %v11281_v54 = vpop.eup %7658 }
0x1bb4   : > { %v4635_v39 = vsel %vm2894_vm4, %v11281_v54, 0.0  ;;  %v11287_v61 = vpop.eup %7660 }
0x1bb5   : > { %4636 = vadd.xlane.f32.xlu1 %v4635_v39  ;;  %4621 = vadd.xlane.f32.xlu0 %v4620_v40  ;;  %v4629_v57 = vsel %vm2894_vm4, %v11287_v61, 0.0 }
0x1bb7   : > { %v11289_v56 = vpop.eup %7662 }
0x1bb8   : > { %v4638_v60 = vsel %vm2894_vm4, %v11289_v56, 0.0  ;;  %v11295_v1 = vpop.eup %7664 }
0x1bb9   : > { %4630 = vadd.xlane.f32.xlu1 %v4629_v57  ;;  %4639 = vadd.xlane.f32.xlu0 %v4638_v60  ;;  %v4632_v3 = vsel %vm2894_vm4, %v11295_v1, 0.0 }
0x1bbd   : > { %4633 = vadd.xlane.f32.xlu0 %v4632_v3 }
0x1c0b   : > { %v4838_v4 = vpop.xlane.xlu1 %4837 }
0x1c0c   : > { %v4860_v9 = vsub.f32 %v11197_v10, %v4838_v4 }
0x1c0d   : > { %v4841_v17 = vpop.xlane.xlu0 %4840 }
0x1c0e   : > { %v4861_v34 = vsub.f32 %v11203_v53, %v4841_v17  ;;  %v4868_v26 = vmul.f32 1.442695, %v4860_v9 }
0x1c0f   : > { %v4844_v22 = vpop.xlane.xlu1 %4843 }
0x1c10   : > { %v4862_v25 = vsub.f32 %v11195_v62, %v4844_v22  ;;  %v4870_v30 = vmul.f32 1.442695, %v4861_v34 }
0x1c11   : > { %v4847_v58 = vpop.xlane.xlu0 %4846 }
0x1c12   : > { %v4872_v6 = vmul.f32 1.442695, %v4862_v25  ;;  %v4863_v27 = vsub.f32 %v11199_v42, %v4847_v58 }
0x1c13   : > { %v4850_v28 = vpop.xlane.xlu1 %4849 }
0x1c14   : > { %7666 = vpow2.f32 %v4872_v6  ;;  %v4874_v31 = vmul.f32 1.442695, %v4863_v27  ;;  %v4864_v32 = vsub.f32 %v11213_v18, %v4850_v28 }
0x1c15   : > { %7668 = vpow2.f32 %v4868_v26  ;;  %v4853_v33 = vpop.xlane.xlu0 %4852 }
0x1c16   : > { %7670 = vpow2.f32 %v4874_v31  ;;  %v4865_v53 = vsub.f32 %v11219_v8, %v4853_v33  ;;  %v4876_v35 = vmul.f32 1.442695, %v4864_v32 }
0x1c17   : > { %v4856_v10 = vpop.xlane.xlu1 %4855  ;;  %7672 = vpow2.f32 %v4870_v30 }
0x1c18   : > { %v4866_v62 = vsub.f32 %v11209_v29, %v4856_v10  ;;  %v4878_v45 = vmul.f32 1.442695, %v4865_v53 }
0x1c19   : > { %v4859_v5 = vpop.xlane.xlu0 %4858 }
0x1c1a   : > { %v4880_v36 = vmul.f32 1.442695, %v4866_v62  ;;  %v4867_v42 = vsub.f32 %v11215_v55, %v4859_v5 }
0x1c1b   : > { %v5103_v37 = vpop.xlane.xlu1 %5102 }
0x1c1c   : > { %7674 = vpow2.f32 %v4880_v36  ;;  %v4882_v38 = vmul.f32 1.442695, %v4867_v42  ;;  %v5125_v18 = vsub.f32 %v11229_v63, %v5103_v37 }
0x1c1d   : > { %7676 = vpow2.f32 %v4876_v35  ;;  %v5106_v44 = vpop.xlane.xlu0 %5105 }
0x1c1e   : > { %v11308_v48 = vpop.eup %7666  ;;  %7678 = vpow2.f32 %v4882_v38  ;;  %v5126_v55 = vsub.f32 %v11235_v2, %v5106_v44  ;;  %v5133_v16 = vmul.f32 1.442695, %v5125_v18 }
0x1c1f   : > { %v11310_v46 = vpop.eup %7668  ;;  %v5109_v8 = vpop.xlane.xlu1 %5108  ;;  %v4890_v29 = vsel %vm2894_vm4, %v11308_v48, 0.0  ;;  %7680 = vpow2.f32 %v4878_v45 }
0x1c20   : > { %v11314_v49 = vpop.eup %7670  ;;  %v5127_v47 = vsub.f32 %v11225_v59, %v5109_v8  ;;  %4891 = vadd.xlane.f32.xlu1 %v4890_v29  ;;  %v4884_v14 = vsel %vm2894_vm4, %v11310_v46, 0.0  ;;  %v5135_v39 = vmul.f32 1.442695, %v5126_v55 }
0x1c21   : > { %v5112_v63 = vpop.xlane.xlu0 %5111  ;;  %v4893_v23 = vsel %vm2894_vm4, %v11314_v49, 0.0  ;;  %v11320_v50 = vpop.eup %7672 }
0x1c22   : > { %v5137_v43 = vmul.f32 1.442695, %v5127_v47  ;;  %v5128_v12 = vsub.f32 %v11231_v0, %v5112_v63  ;;  %4894 = vadd.xlane.f32.xlu0 %v4893_v23  ;;  %v4887_v57 = vsel %vm2894_vm4, %v11320_v50, 0.0 }
0x1c23   : > { %v5115_v24 = vpop.xlane.xlu1 %5114 }
0x1c24   : > { %7682 = vpow2.f32 %v5137_v43  ;;  %v5139_v2 = vmul.f32 1.442695, %v5128_v12  ;;  %4885 = vadd.xlane.f32.xlu1 %v4884_v14  ;;  %v5129_v59 = vsub.f32 %v11245_v19, %v5115_v24 }
0x1c25   : > { %7684 = vpow2.f32 %v5133_v16  ;;  %v5118_v40 = vpop.xlane.xlu0 %5117 }
0x1c26   : > { %v11328_v60 = vpop.eup %7674  ;;  %7686 = vpow2.f32 %v5139_v2  ;;  %4888 = vadd.xlane.f32.xlu0 %v4887_v57  ;;  %v5130_v17 = vsub.f32 %v11251_v21, %v5118_v40  ;;  %v5141_v22 = vmul.f32 1.442695, %v5129_v59 }
0x1c27   : > { %v11330_v0 = vpop.eup %7676  ;;  %v5121_v3 = vpop.xlane.xlu1 %5120  ;;  %v4902_v4 = vsel %vm2894_vm4, %v11328_v60, 0.0  ;;  %7688 = vpow2.f32 %v5135_v39 }
0x1c28   : > { %v11334_v9 = vpop.eup %7678  ;;  %v5131_v19 = vsub.f32 %v11241_v7, %v5121_v3  ;;  %4903 = vadd.xlane.f32.xlu1 %v4902_v4  ;;  %v4896_v27 = vsel %vm2894_vm4, %v11330_v0, 0.0  ;;  %v5143_v28 = vmul.f32 1.442695, %v5130_v17 }
0x1c29   : > { %v5124_v34 = vpop.xlane.xlu0 %5123  ;;  %v4905_v25 = vsel %vm2894_vm4, %v11334_v9, 0.0  ;;  %v11340_v26 = vpop.eup %7680 }
0x1c2a   : > { %v5145_v58 = vmul.f32 1.442695, %v5131_v19  ;;  %v5132_v6 = vsub.f32 %v11247_v13, %v5124_v34  ;;  %4906 = vadd.xlane.f32.xlu0 %v4905_v25  ;;  %v4899_v7 = vsel %vm2894_vm4, %v11340_v26, 0.0 }
0x1c2c   : > { %7690 = vpow2.f32 %v5145_v58  ;;  %v5147_v21 = vmul.f32 1.442695, %v5132_v6  ;;  %4897 = vadd.xlane.f32.xlu1 %v4896_v27 }
0x1c2d   : > { %7692 = vpow2.f32 %v5141_v22 }
0x1c2e   : > { %v11347_v30 = vpop.eup %7682  ;;  %7694 = vpow2.f32 %v5147_v21  ;;  %4900 = vadd.xlane.f32.xlu0 %v4899_v7 }
0x1c2f   : > { %v11349_v31 = vpop.eup %7684  ;;  %v5155_v13 = vsel %vm2894_vm4, %v11347_v30, 0.0  ;;  %7696 = vpow2.f32 %v5143_v28 }
0x1c30   : > { %v11353_v32 = vpop.eup %7686  ;;  %5156 = vadd.xlane.f32.xlu1 %v5155_v13  ;;  %v5149_v53 = vsel %vm2894_vm4, %v11349_v31, 0.0 }
0x1c31   : > { %v5158_v33 = vsel %vm2894_vm4, %v11353_v32, 0.0  ;;  %v11357_v10 = vpop.eup %7688 }
0x1c32   : > { %5159 = vadd.xlane.f32.xlu0 %v5158_v33  ;;  %v5152_v62 = vsel %vm2894_vm4, %v11357_v10, 0.0 }
0x1c34   : > { %5150 = vadd.xlane.f32.xlu1 %v5149_v53 }
0x1c36   : > { %v11363_v35 = vpop.eup %7690  ;;  %5153 = vadd.xlane.f32.xlu0 %v5152_v62 }
0x1c37   : > { %v11365_v5 = vpop.eup %7692  ;;  %v5167_v36 = vsel %vm2894_vm4, %v11363_v35, 0.0 }
0x1c38   : > { %v11369_v42 = vpop.eup %7694  ;;  %5168 = vadd.xlane.f32.xlu1 %v5167_v36  ;;  %v5161_v18 = vsel %vm2894_vm4, %v11365_v5, 0.0 }
0x1c39   : > { %v5170_v37 = vsel %vm2894_vm4, %v11369_v42, 0.0  ;;  %v11373_v45 = vpop.eup %7696 }
0x1c3a   : > { %v4625_v38 = vpop.xlane.xlu1 %4624  ;;  %5171 = vadd.xlane.f32.xlu0 %v5170_v37  ;;  %v5164_v44 = vsel %vm2894_vm4, %v11373_v45, 0.0 }
0x1c3c   : > { %5162 = vadd.xlane.f32.xlu1 %v5161_v18 }
0x1c3e   : > { %v4619_v8 = vpop.xlane.xlu1 %4618  ;;  %5165 = vadd.xlane.f32.xlu0 %v5164_v44  ;;  %v4628_v29 = vpop.xlane.xlu0 %4627 }
0x1c3f   : > { %7698 = vrcp.f32 %v4628_v29 }
0x1c40   : > { %7700 = vrcp.f32 %v4619_v8 }
0x1c41   : > { %7702 = vrcp.f32 %v4625_v38 }
0x1c42   : > { %v4637_v55 = vpop.xlane.xlu1 %4636  ;;  %v4622_v47 = vpop.xlane.xlu0 %4621 }
0x1c43   : > { %7704 = vrcp.f32 %v4622_v47 }
0x1c46   : > { %v4631_v16 = vpop.xlane.xlu1 %4630  ;;  %v4640_v63 = vpop.xlane.xlu0 %4639 }
0x1c47   : > { %7706 = vrcp.f32 %v4631_v16 }
0x1c48   : > { %7708 = vrcp.f32 %v4640_v63 }
0x1c49   : > { %7710 = vrcp.f32 %v4637_v55  ;;  %v7699_v43 = vpop.eup %7698 }
0x1c4a   : > { %v4634_v23 = vpop.xlane.xlu0 %4633  ;;  %v7701_v12 = vpop.eup %7700  ;;  %v4652_v39 = vmul.f32 %v7699_v43, %v11273_v11 }
0x1c4b   : > { %7712 = vrcp.f32 %v4634_v23  ;;  %v7703_v24 = vpop.eup %7702  ;;  %v4649_v2 = vmul.f32 %v7701_v12, %v11271_v51 }
0x1c4c   : > { %v4651_v40 = vmul.f32 %v7703_v24, %v11267_v41 }
0x1c4d   : > { %4929 = vrot.lane.b32.xlu1 %v11134_v20, %s9181_s19  ;;  %v7705_v14 = vpop.eup %7704 }
0x1c4e   : > { %v4650_v59 = vmul.f32 %v7705_v14, %v11279_v52  ;;  %v4658_v4 = vpack.c.bf16 %v4652_v39, %v4651_v40 }
0x1c50   : > { %v4657_v57 = vpack.c.bf16 %v4650_v59, %v4649_v2 }
0x1c51   : > { %v7707_v3 = vpop.eup %7706 }
0x1c52   : > { %v7709_v17 = vpop.eup %7708  ;;  %7244 = vmatprep.mubr.msk.bf16.mxu0 %vm2894_vm4, %v4657_v57  ;;  %v4653_v11 = vmul.f32 %v7707_v3, %v11287_v61 }
0x1c53   : > { %v7711_v19 = vpop.eup %7710  ;;  %7245 = vmatmul.mubr.msk.bf16.vlgmr.msra.gmra.mrb[68].mxu0 %vm2894_vm4, %v4658_v4  ;;  %v4656_v52 = vmul.f32 %v7709_v17, %v11289_v56 }
0x1c54   : > { %5193 = vrot.lane.b32.xlu0 %v11134_v20, %s9178_s26  ;;  %v4655_v34 = vmul.f32 %v7711_v19, %v11281_v54 }
0x1c55   : > { %v7713_v22 = vpop.eup %7712 }
0x1c56   : > { %v4654_v51 = vmul.f32 %v7713_v22, %v11295_v1  ;;  %v4660_v25 = vpack.c.bf16 %v4656_v52, %v4655_v34 }
0x1c58   : > { %v4659_v41 = vpack.c.bf16 %v4654_v51, %v4653_v11 }
0x1c5a   : > { %7248 = vmatprep.mubr.msk.bf16.mxu0 %vm2894_vm4, %v4659_v41 }
0x1c5b   : > { %7249 = vmatmul.mubr.msk.bf16.gmra.mrb[72].mxu0 %vm2894_vm4, %v4660_v25 }
0x1cad   : > { %v4892_v58 = vpop.xlane.xlu1 %4891 }
0x1caf   : > { %v4895_v6 = vpop.xlane.xlu0 %4894 }
0x1cb1   : > { %v4886_v27 = vpop.xlane.xlu1 %4885 }
0x1cb2   : > { %7714 = vrcp.f32 %v4886_v27 }
0x1cb3   : > { %v4889_v20 = vpop.xlane.xlu0 %4888 }
0x1cb4   : > { %7716 = vrcp.f32 %v4889_v20 }
0x1cb5   : > { %v4904_v28 = vpop.xlane.xlu1 %4903  ;;  %7718 = vrcp.f32 %v4895_v6 }
0x1cb7   : > { %v4907_v61 = vpop.xlane.xlu0 %4906 }
0x1cb9   : > { %v4898_v21 = vpop.xlane.xlu1 %4897 }
0x1cbb   : > { %v4901_v1 = vpop.xlane.xlu0 %4900 }
0x1cbc   : > { %v7715_v7 = vpop.eup %7714  ;;  %7720 = vrcp.f32 %v4901_v1  ;;  %v7618_v1 = vld [vmem:[%s10646_s14] sm:$0xff]  }
0x1cbd   : > { %v5157_v56 = vpop.xlane.xlu1 %5156  ;;  %v4916_v33 = vmul.f32 %v7715_v7, %v11310_v46  ;;  %7722 = vrcp.f32 %v4892_v58  ;;  %7292 = vmatprep.subr.bf16.mxu1 %v7618_v1 }
0x1cbe   : > { %v7717_v13 = vpop.eup %7716  ;;  %7724 = vrcp.f32 %v4898_v21  ;;  %7293 = vmatpush3.bf16.msra.mxu1 %v7618_v1 }
0x1cbf   : > { %v5160_v54 = vpop.xlane.xlu0 %5159  ;;  %v4917_v53 = vmul.f32 %v7717_v13, %v11320_v50  ;;  %7726 = vrcp.f32 %v4907_v61  ;;  %v7719_v44 = vpop.eup %7718 }
0x1cc0   : > { %v4919_v47 = vmul.f32 %v7719_v44, %v11314_v49 }
0x1cc1   : > { %v5151_v62 = vpop.xlane.xlu1 %5150  ;;  %v4924_v36 = vpack.c.bf16 %v4917_v53, %v4916_v33 }
0x1cc3   : > { %7264 = vmatprep.mubr.msk.bf16.mxu0 %vm2894_vm4, %v4924_v36  ;;  %v5154_v37 = vpop.xlane.xlu0 %5153  ;;  %v7619_v36 = vld [vmem:[%s10646_s14 + $0x8] ss:$0 sps:$4 sm:$0xff]   ;;  %s11939_s14 = scalar_lea.vmem [#allocation45], %s10556_s17 }
0x1cc4   : > { %7728 = vrcp.f32 %v5154_v37  ;;  %7310 = vmatprep.subr.msk.bf16.mxu1 %vm2910_vm5, %v7619_v36  ;;  %v5391_v44 = vsel %vm2910_vm5, %v7619_v36, 0 }
0x1cc5   : > { %v5169_v38 = vpop.xlane.xlu1 %5168  ;;  %7730 = vrcp.f32 %v4904_v28  ;;  %7295 = vmatpush3.bf16.msra.mxu1 %v5391_v44  ;;  %v7762_v44 = vld [vmem:[#allocation3 + $0x10] sm:$0xff] }
0x1cc6   : > { %v7721_v29 = vpop.eup %7720  ;;  %7732 = vrcp.f32 %v5151_v62 }
0x1cc7   : > { %v5172_v18 = vpop.xlane.xlu0 %5171  ;;  %v7723_v46 = vpop.eup %7722  ;;  %v4921_v63 = vmul.f32 %v7721_v29, %v11340_v26  ;;  %7734 = vrcp.f32 %v5160_v54 }
0x1cc8   : > { %v7725_v50 = vpop.eup %7724  ;;  %v4918_v23 = vmul.f32 %v7723_v46, %v11308_v48 }
0x1cc9   : > { %v5163_v8 = vpop.xlane.xlu1 %5162  ;;  %v4920_v24 = vmul.f32 %v7725_v50, %v11330_v0  ;;  %v7727_v39 = vpop.eup %7726 }
0x1cca   : > { %v4925_v14 = vpack.c.bf16 %v4919_v47, %v4918_v23  ;;  %v4923_v0 = vmul.f32 %v7727_v39, %v11334_v9 }
0x1ccb   : > { %v5166_v55 = vpop.xlane.xlu0 %5165  ;;  %v4926_v49 = vpack.c.bf16 %v4921_v63, %v4920_v24 }
0x1ccc   : > { %7736 = vrcp.f32 %v5166_v55 }
0x1ccd   : > { %v4930_v16 = vpop.permute.xlu1 %4929  ;;  %7738 = vrcp.f32 %v5157_v56 }
0x1cce   : > { %v4944_v43 = vsel %vm2910_vm5, %v4930_v16, 0  ;;  %7307 = vmatprep.subr.msk.bf16.mxu0 %vm2910_vm5, %v4930_v16  ;;  %v7729_v2 = vpop.eup %7728  ;;  %7740 = vrcp.f32 %v5163_v8 }
0x1ccf   : > { %7263 = vmatpush3.bf16.msra.mxu0 %v4944_v43  ;;  %v5194_v12 = vpop.permute.xlu0 %5193  ;;  %v7731_v26 = vpop.eup %7730  ;;  %v5182_v40 = vmul.f32 %v7729_v2, %v11357_v10  ;;  %7742 = vrcp.f32 %v5172_v18 }
0x1cd0   : > { %7309 = vmatprep.subr.msk.bf16.mxu0 %vm2910_vm5, %v5194_v12  ;;  %v5208_v48 = vsel %vm2910_vm5, %v5194_v12, 0  ;;  %v7733_v59 = vpop.eup %7732  ;;  %v4922_v57 = vmul.f32 %v7731_v26, %v11328_v60  ;;  %7744 = vrcp.f32 %v5169_v38 }
0x1cd1   : > { %v5181_v3 = vmul.f32 %v7733_v59, %v11349_v31  ;;  %v7735_v17 = vpop.eup %7734 }
0x1cd2   : > { %7265 = vmatmul.mubr.msk.bf16.vlgmr.msra.gmra.mrb[76].mxu0 %vm2894_vm4, %v4925_v14  ;;  %v4927_v4 = vpack.c.bf16 %v4923_v0, %v4922_v57  ;;  %v5184_v9 = vmul.f32 %v7735_v17, %v11353_v32 }
0x1cd3   : > { %7268 = vmatprep.mubr.msk.bf16.mxu0 %vm2894_vm4, %v4926_v49  ;;  %7283 = vmatpush3.bf16.msra.mxu0 %v5208_v48  ;;  %v5189_v19 = vpack.c.bf16 %v5182_v40, %v5181_v3 }
0x1cd6   : > { %v7737_v22 = vpop.eup %7736 }
0x1cd7   : > { %v7739_v11 = vpop.eup %7738  ;;  %v5186_v10 = vmul.f32 %v7737_v22, %v11373_v45 }
0x1cd8   : > { %v7741_v51 = vpop.eup %7740  ;;  %v5183_v60 = vmul.f32 %v7739_v11, %v11347_v30 }
0x1cd9   : > { %v5185_v52 = vmul.f32 %v7741_v51, %v11365_v5  ;;  %v7743_v41 = vpop.eup %7742 }
0x1cda   : > { %7269 = vmatmul.mubr.msk.bf16.gmra.mrb[80].mxu0 %vm2894_vm4, %v4927_v4  ;;  %v5190_v31 = vpack.c.bf16 %v5184_v9, %v5183_v60  ;;  %v7745_v25 = vpop.eup %7744  ;;  %v5188_v58 = vmul.f32 %v7743_v41, %v11369_v42 }
0x1cdb   : > { %7284 = vmatprep.mubr.msk.bf16.mxu0 %vm2894_vm4, %v5189_v19  ;;  %v5191_v34 = vpack.c.bf16 %v5186_v10, %v5185_v52  ;;  %v5187_v6 = vmul.f32 %v7745_v25, %v11363_v35 }
0x1cdd   : > { %v5192_v32 = vpack.c.bf16 %v5188_v58, %v5187_v6 }
0x1ce2   : > { %7285 = vmatmul.mubr.msk.bf16.vlgmr.msra.gmra.mrb[84].mxu0 %vm2894_vm4, %v5190_v31 }
0x1ce3   : > { %7288 = vmatprep.mubr.msk.bf16.mxu0 %vm2894_vm4, %v5191_v34 }
0x1cea   : > { %7289 = vmatmul.mubr.msk.bf16.gmra.mrb[88].mxu0 %vm2894_vm4, %v5192_v32 }
0x1d26   : > { %v7246_v45 = vpop.f32.mrb[68].mxu0 }
0x1d27   : > { %v4710_v30 = vpop.f32.mrb[69].mxu0 }
0x1d28   : > { %v7247_v27 = vpop.f32.mrb[70].mxu0 }
0x1d29   : > { %v4713_v5 = vpop.f32.mrb[71].mxu0 }
0x1d2e   : > { %v11423_v20 = vpop.f32.mrb[72].mxu0 }
0x1d2f   : > { %v11425_v28 = vpop.f32.mrb[73].mxu0 }
0x1d30   : > { %v11427_v61 = vpop.f32.mrb[74].mxu0 }
0x1d31   : > { %v11429_v21 = vpop.f32.mrb[75].mxu0 }
0x1da5   : > { %v7266_v42 = vpop.f32.mrb[76].mxu0 }
0x1da6   : > { %v4980_v35 = vpop.f32.mrb[77].mxu0 }
0x1da7   : > { %v7267_v7 = vpop.f32.mrb[78].mxu0 }
0x1da8   : > { %v7549_v56 = vpack.i.bf16 %v7267_v7, %v7266_v42  ;;  %v4983_v13 = vpop.f32.mrb[79].mxu0 }
0x1da9   : > { %v7554_v54 = vpack.i.bf16 %v4983_v13, %v4980_v35 }
0x1daa   : > { %7550 = vrot.lane.b32.xlu1 %v7549_v56, %s9182_s5 }
0x1dad   : > { %v7270_v33 = vpop.f32.mrb[80].mxu0 }
0x1dae   : > { %7555 = vrot.lane.b32.xlu1 %v7554_v54, %s9182_s5  ;;  %v4996_v53 = vpop.f32.mrb[81].mxu0 }
0x1daf   : > { %v7271_v62 = vpop.f32.mrb[82].mxu0 }
0x1db0   : > { %v7574_v37 = vpack.i.bf16 %v7271_v62, %v7270_v33  ;;  %v4999_v38 = vpop.f32.mrb[83].mxu0 }
0x1db1   : > { %v7569_v18 = vpack.i.bf16 %v4999_v38, %v4996_v53 }
0x1db5   : > { %v7286_v8 = vpop.f32.mrb[84].mxu0 }
0x1db6   : > { %v5244_v29 = vpop.f32.mrb[85].mxu0 }
0x1db7   : > { %v7287_v46 = vpop.f32.mrb[86].mxu0 }
0x1db8   : > { %v7559_v55 = vpack.i.bf16 %v7287_v46, %v7286_v8  ;;  %v5247_v50 = vpop.f32.mrb[87].mxu0 }
0x1db9   : > { %v7564_v47 = vpack.i.bf16 %v5247_v50, %v5244_v29 }
0x1dba   : > { %7560 = vrot.lane.b32.xlu1 %v7559_v55, %s9179_s1  ;;  %v7763_v55 = vld [vmem:[#allocation3] sm:$0xff] }
0x1dbb   : > { %7565 = vrot.lane.b32.xlu0 %v7564_v47, %s9179_s1 }
0x1dbd   : > { %v7290_v16 = vpop.f32.mrb[88].mxu0 }
0x1dbe   : > { %7575 = vrot.lane.b32.xlu1 %v7574_v37, %s9182_s5  ;;  %v5260_v63 = vpop.f32.mrb[89].mxu0 }
0x1dbf   : > { %7570 = vrot.lane.b32.xlu0 %v7569_v18, %s9182_s5  ;;  %v7291_v23 = vpop.f32.mrb[90].mxu0 }
0x1dc0   : > { %v7584_v43 = vpack.i.bf16 %v7291_v23, %v7290_v16  ;;  %v5263_v12 = vpop.f32.mrb[91].mxu0 }
0x1dc1   : > { %v7579_v24 = vpack.i.bf16 %v5263_v12, %v5260_v63  ;;  %v7764_v63 = vld [vmem:[#allocation3 + $0x8] sm:$0xff] }
0x1dc2   : > { %7585 = vrot.lane.b32.xlu1 %v7584_v43, %s9179_s1 }
0x1dc3   : > { %7580 = vrot.lane.b32.xlu0 %v7579_v24, %s9179_s1  ;;  %v7765_v24 = vld [vmem:[#allocation3 + $0x18] sm:$0xff] }
0x1e1c   : > { %v7551_v14 = vpop.permute.xlu1 %7550 }
0x1e1d   : > { %v7553_v49 = vunpack.i.h.bf16 %v7551_v14  ;;  %v7552_v2 = vunpack.i.l.bf16 %v7551_v14 }
0x1e1f   : > { %v5342_v3 = vsel %vm2894_vm4, %v7247_v27, %v7553_v49  ;;  %v5341_v4 = vsel %vm2894_vm4, %v7246_v45, %v7552_v2 }
0x1e20   : > { %v7556_v39 = vpop.permute.xlu1 %7555 }
0x1e21   : > { %v7558_v48 = vunpack.i.h.bf16 %v7556_v39  ;;  %v7557_v26 = vunpack.i.l.bf16 %v7556_v39 }
0x1e23   : > { %v5340_v22 = vsel %vm2894_vm4, %v4713_v5, %v7558_v48  ;;  %v5339_v11 = vsel %vm2894_vm4, %v4710_v30, %v7557_v26 }
0x1e2c   : > { %v7561_v59 = vpop.permute.xlu1 %7560 }
0x1e2d   : > { %v7563_v0 = vunpack.i.h.bf16 %v7561_v59  ;;  %v7562_v40 = vunpack.i.l.bf16 %v7561_v59  ;;  %v7566_v57 = vpop.permute.xlu0 %7565 }
0x1e2e   : > { %v7568_v17 = vunpack.i.h.bf16 %v7566_v57  ;;  %v7567_v19 = vunpack.i.l.bf16 %v7566_v57 }
0x1e2f   : > { %v5350_v51 = vsel %vm2847_vm3, %v5342_v3, %v7563_v0  ;;  %v5349_v9 = vsel %vm2847_vm3, %v5341_v4, %v7562_v40  ;;  %v7766_v0 = vld [vmem:[#allocation3 + $0x20] sm:$0xff] }
0x1e30   : > { %v5356_v10 = vpack.c.bf16 %v5350_v51, %v5349_v9  ;;  %v5348_v60 = vsel %vm2847_vm3, %v5340_v22, %v7568_v17  ;;  %v5347_v52 = vsel %vm2847_vm3, %v5339_v11, %v7567_v19  ;;  %v7576_v31 = vpop.permute.xlu1 %7575  ;;  %v7767_v17 = vld [vmem:[#allocation3 + $0x30] sm:$0xff]  ;;  %v7768_v22 = vld [vmem:[#allocation3 + $0x28] sm:$0xff] }
0x1e31   : > { %v5355_v41 = vpack.c.bf16 %v5348_v60, %v5347_v52  ;;  %v7571_v34 = vpop.permute.xlu0 %7570  ;;  %v7578_v25 = vunpack.i.h.bf16 %v7576_v31  ;;  %v7577_v58 = vunpack.i.l.bf16 %v7576_v31 }
0x1e32   : > { %v7573_v6 = vunpack.i.h.bf16 %v7571_v34  ;;  %v7572_v32 = vunpack.i.l.bf16 %v7571_v34 }
0x1e33   : > { %7296 = vmatprep.mubr.msk.bf16.mxu1 %vm4002_vm8, %v5355_v41  ;;  %v5346_v1 = vsel %vm2894_vm4, %v11427_v61, %v7578_v25  ;;  %v5345_v42 = vsel %vm2894_vm4, %v11423_v20, %v7577_v58  ;;  %v6788_v20 = vld [vmem:[%s11939_s14] ss:$0 sm:$0xff] }
0x1e34   : > { %7297 = vmatmul.mubr.msk.bf16.vlgmr.msra.gmra.mrb[68].mxu1 %vm4002_vm8, %v5356_v10  ;;  %v7586_v45 = vpop.permute.xlu1 %7585  ;;  %v5344_v56 = vsel %vm2894_vm4, %v11429_v21, %v7573_v6  ;;  %v5343_v13 = vsel %vm2894_vm4, %v11425_v28, %v7572_v32  ;;  %v7769_v10 = vld [vmem:[#allocation3 + $0x38] sm:$0xff] }
0x1e35   : > { %v7588_v30 = vunpack.i.h.bf16 %v7586_v45  ;;  %v7587_v27 = vunpack.i.l.bf16 %v7586_v45  ;;  %v7581_v5 = vpop.permute.xlu0 %7580 }
0x1e36   : > { %v7583_v35 = vunpack.i.h.bf16 %v7581_v5  ;;  %v7582_v7 = vunpack.i.l.bf16 %v7581_v5 }
0x1e37   : > { %v5354_v54 = vsel %vm2847_vm3, %v5346_v1, %v7588_v30  ;;  %v5353_v33 = vsel %vm2847_vm3, %v5345_v42, %v7587_v27 }
0x1e38   : > { %v5358_v53 = vpack.c.bf16 %v5354_v54, %v5353_v33  ;;  %v5352_v62 = vsel %vm2847_vm3, %v5344_v56, %v7583_v35  ;;  %v5351_v61 = vsel %vm2847_vm3, %v5343_v13, %v7582_v7 }
0x1e39   : > { %v5357_v36 = vpack.c.bf16 %v5352_v62, %v5351_v61 }
0x1e3b   : > { %7300 = vmatprep.mubr.msk.bf16.mxu1 %vm4002_vm8, %v5357_v36 }
0x1e3c   : > { %7301 = vmatmul.mubr.msk.bf16.gmra.mrb[72].mxu1 %vm4002_vm8, %v5358_v53 }
0x1f07   : > { %v7298_v21 = vpop.f32.mrb[68].mxu1 }
0x1f08   : > { %v5436_v37 = vadd.f32 %v7298_v21, %v6788_v20  ;;  %v5427_v38 = vpop.f32.mrb[69].mxu1 }
0x1f09   : > { %v5428_v28 = vadd.f32 %v6788_v20, %v5427_v38  ;;  %v7299_v18 = vpop.f32.mrb[70].mxu1 }
0x1f0a   : > { %v5460_v8 = vadd.f32 %v7762_v44, %v5436_v37  ;;  %v5430_v29 = vpop.f32.mrb[71].mxu1  ;;  %v5439_v47 = vadd.f32 %v7299_v18, %v6788_v20 }
0x1f0b   : > { %v5431_v46 = vadd.f32 %v6788_v20, %v5430_v29  ;;  %v5458_v50 = vadd.f32 %v7763_v55, %v5428_v28 }
0x1f0c   : > { %v5472_v16 = vsel %vm2670_vm2, %v5460_v8, 0.0  ;;  %v5461_v14 = vadd.f32 %v7765_v24, %v5439_v47 }
0x1f0d   : > { %v5459_v23 = vadd.f32 %v7764_v63, %v5431_v46  ;;  %5473 = vadd.xlane.f32.xlu0 %v5472_v16  ;;  %v5466_v49 = vsel %vm2670_vm2, %v5458_v50, 0.0 }
0x1f0e   : > { %v5475_v4 = vsel %vm2670_vm2, %v5461_v14, 0.0 }
0x1f0f   : > { %v7302_v43 = vpop.f32.mrb[72].mxu1  ;;  %v5469_v12 = vsel %vm2670_vm2, %v5459_v23, 0.0 }
0x1f10   : > { %5470 = vadd.xlane.f32.xlu1 %v5469_v12  ;;  %v5443_v39 = vpop.f32.mrb[73].mxu1  ;;  %v5452_v2 = vadd.f32 %v7302_v43, %v6788_v20 }
0x1f11   : > { %v5444_v48 = vadd.f32 %v6788_v20, %v5443_v39  ;;  %5467 = vadd.xlane.f32.xlu0 %v5466_v49  ;;  %v7303_v26 = vpop.f32.mrb[74].mxu1 }
0x1f12   : > { %v5446_v59 = vpop.f32.mrb[75].mxu1  ;;  %v5455_v3 = vadd.f32 %v7303_v26, %v6788_v20  ;;  %v5464_v19 = vadd.f32 %v7767_v17, %v5452_v2 }
0x1f13   : > { %v5462_v40 = vadd.f32 %v7766_v0, %v5444_v48  ;;  %v5447_v57 = vadd.f32 %v6788_v20, %v5446_v59 }
0x1f14   : > { %v5465_v60 = vadd.f32 %v7769_v10, %v5455_v3  ;;  %v5484_v52 = vsel %vm2670_vm2, %v5464_v19, 0.0 }
0x1f15   : > { %v5463_v11 = vadd.f32 %v7768_v22, %v5447_v57  ;;  %5476 = vadd.xlane.f32.xlu0 %v5475_v4  ;;  %v5478_v51 = vsel %vm2670_vm2, %v5462_v40, 0.0 }
0x1f16   : > { %5479 = vadd.xlane.f32.xlu1 %v5478_v51  ;;  %v5487_v31 = vsel %vm2670_vm2, %v5465_v60, 0.0  ;;  %v6795_v51 = vld [vmem:[%s2302_s4] ss:$0 sm:$0xff] }
0x1f17   : > { %v5481_v9 = vsel %vm2670_vm2, %v5463_v11, 0.0 }
0x1f19   : > { %5482 = vadd.xlane.f32.xlu0 %v5481_v9 }
0x1f1a   : > { %5485 = vadd.xlane.f32.xlu1 %v5484_v52 }
0x1f1d   : > { %5488 = vadd.xlane.f32.xlu0 %v5487_v31  ;;  %v6796_v31 = vld [vmem:[%s2310_s3] ss:$0 sm:$0xff] }
0x1f9a   : > { %v5474_v41 = vpop.xlane.xlu0 %5473 }
0x1f9b   : > { %v5492_v34 = vmul.f32 0.03125, %v5474_v41 }
0x1f9d   : > { %v11477_v25 = vsub.f32 %v5460_v8, %v5492_v34  ;;  %v5471_v58 = vpop.xlane.xlu1 %5470 }
0x1f9e   : > { %v5468_v6 = vpop.xlane.xlu0 %5467  ;;  %v5491_v30 = vmul.f32 0.03125, %v5471_v58 }
0x1f9f   : > { %v5490_v32 = vmul.f32 0.03125, %v5468_v6  ;;  %v5508_v45 = vmul.f32 %v11477_v25, %v11477_v25 }
0x1fa0   : > { %v11486_v13 = vsub.f32 %v5459_v23, %v5491_v30 }
0x1fa1   : > { %v11481_v27 = vsub.f32 %v5458_v50, %v5490_v32  ;;  %v5520_v5 = vsel %vm2670_vm2, %v5508_v45, 0.0 }
0x1fa2   : > { %v5477_v1 = vpop.xlane.xlu0 %5476  ;;  %5521 = vadd.xlane.f32.xlu1 %v5520_v5  ;;  %v5507_v18 = vmul.f32 %v11486_v13, %v11486_v13 }
0x1fa3   : > { %v5493_v42 = vmul.f32 0.03125, %v5477_v1  ;;  %v5480_v35 = vpop.xlane.xlu1 %5479  ;;  %v5506_v7 = vmul.f32 %v11481_v27, %v11481_v27 }
0x1fa4   : > { %v5494_v56 = vmul.f32 0.03125, %v5480_v35  ;;  %v5517_v47 = vsel %vm2670_vm2, %v5507_v18, 0.0 }
0x1fa5   : > { %v11488_v54 = vsub.f32 %v5461_v14, %v5493_v42  ;;  %v5514_v33 = vsel %vm2670_vm2, %v5506_v7, 0.0 }
0x1fa6   : > { %v11491_v53 = vsub.f32 %v5462_v40, %v5494_v56  ;;  %v5483_v62 = vpop.xlane.xlu0 %5482  ;;  %5515 = vadd.xlane.f32.xlu1 %v5514_v33 }
0x1fa7   : > { %v5495_v61 = vmul.f32 0.03125, %v5483_v62  ;;  %v5486_v36 = vpop.xlane.xlu1 %5485  ;;  %v5509_v20 = vmul.f32 %v11488_v54, %v11488_v54 }
0x1fa8   : > { %v5496_v21 = vmul.f32 0.03125, %v5486_v36  ;;  %v5510_v37 = vmul.f32 %v11491_v53, %v11491_v53 }
0x1fa9   : > { %v11497_v38 = vsub.f32 %v5463_v11, %v5495_v61  ;;  %v5523_v28 = vsel %vm2670_vm2, %v5509_v20, 0.0 }
0x1faa   : > { %v11502_v44 = vsub.f32 %v5464_v19, %v5496_v21  ;;  %5524 = vadd.xlane.f32.xlu0 %v5523_v28  ;;  %v5489_v8 = vpop.xlane.xlu0 %5488  ;;  %v5526_v29 = vsel %vm2670_vm2, %v5510_v37, 0.0 }
0x1fab   : > { %v5497_v46 = vmul.f32 0.03125, %v5489_v8  ;;  %5527 = vadd.xlane.f32.xlu1 %v5526_v29  ;;  %v5511_v16 = vmul.f32 %v11497_v38, %v11497_v38 }
0x1fac   : > { %v5512_v55 = vmul.f32 %v11502_v44, %v11502_v44 }
0x1fad   : > { %v11507_v50 = vsub.f32 %v5465_v60, %v5497_v46  ;;  %v5529_v23 = vsel %vm2670_vm2, %v5511_v16, 0.0 }
0x1fae   : > { %5518 = vadd.xlane.f32.xlu0 %v5517_v47  ;;  %v5532_v63 = vsel %vm2670_vm2, %v5512_v55, 0.0 }
0x1faf   : > { %5533 = vadd.xlane.f32.xlu1 %v5532_v63  ;;  %v5513_v43 = vmul.f32 %v11507_v50, %v11507_v50 }
0x1fb1   : > { %v5535_v12 = vsel %vm2670_vm2, %v5513_v43, 0.0 }
0x1fb2   : > { %5530 = vadd.xlane.f32.xlu0 %v5529_v23 }
0x1fb6   : > { %5536 = vadd.xlane.f32.xlu0 %v5535_v12 }
0x202f   : > { %v5522_v24 = vpop.xlane.xlu1 %5521 }
0x2030   : > { %v5540_v14 = vmul.f32 0.03125, %v5522_v24 }
0x2032   : > { %v5548_v39 = vadd.f32 1e-05, %v5540_v14 }
0x2033   : > { %v5516_v49 = vpop.xlane.xlu1 %5515 }
0x2034   : > { %7746 = vrsqrt.f32 %v5548_v39  ;;  %v5538_v2 = vmul.f32 0.03125, %v5516_v49 }
0x2036   : > { %v5546_v48 = vadd.f32 1e-05, %v5538_v2 }
0x2037   : > { %v5525_v26 = vpop.xlane.xlu0 %5524 }
0x2038   : > { %7748 = vrsqrt.f32 %v5546_v48  ;;  %v5541_v59 = vmul.f32 0.03125, %v5525_v26  ;;  %v5528_v0 = vpop.xlane.xlu1 %5527 }
0x2039   : > { %v5542_v40 = vmul.f32 0.03125, %v5528_v0 }
0x203a   : > { %v5549_v57 = vadd.f32 1e-05, %v5541_v59 }
0x203b   : > { %v5550_v3 = vadd.f32 1e-05, %v5542_v40  ;;  %v5519_v4 = vpop.xlane.xlu0 %5518 }
0x203c   : > { %7750 = vrsqrt.f32 %v5549_v57  ;;  %v5539_v17 = vmul.f32 0.03125, %v5519_v4  ;;  %v5534_v19 = vpop.xlane.xlu1 %5533 }
0x203d   : > { %7752 = vrsqrt.f32 %v5550_v3  ;;  %v5544_v22 = vmul.f32 0.03125, %v5534_v19 }
0x203e   : > { %v7747_v11 = vpop.eup %7746  ;;  %v5547_v9 = vadd.f32 1e-05, %v5539_v17 }
0x203f   : > { %v5564_v10 = vmul.f32 %v7747_v11, %v11477_v25  ;;  %v5552_v60 = vadd.f32 1e-05, %v5544_v22  ;;  %v5531_v52 = vpop.xlane.xlu0 %5530 }
0x2040   : > { %7754 = vrsqrt.f32 %v5547_v9  ;;  %v5543_v41 = vmul.f32 0.03125, %v5531_v52 }
0x2041   : > { %v5579_v34 = vmul.f32 %v6795_v51, %v5564_v10  ;;  %7756 = vrsqrt.f32 %v5552_v60 }
0x2042   : > { %v7749_v58 = vpop.eup %7748  ;;  %v5551_v6 = vadd.f32 1e-05, %v5543_v41 }
0x2043   : > { %v5594_v32 = vadd.f32 %v6796_v31, %v5579_v34  ;;  %v5562_v45 = vmul.f32 %v7749_v58, %v11481_v27  ;;  %v5537_v30 = vpop.xlane.xlu0 %5536 }
0x2044   : > { %7758 = vrsqrt.f32 %v5551_v6  ;;  %v5545_v5 = vmul.f32 0.03125, %v5537_v30 }
0x2045   : > { %5603 = vst.msk [vmem:[#allocation3 + $0x10] sm:$0xff] %vm2670_vm2, %v5594_v32  ;;  %v5577_v1 = vmul.f32 %v6795_v51, %v5562_v45  ;;  %v6828_v23 = vpack.c.bf16 (!%p6797_p4), %v5594_v32, %v5594_v32 }
0x2046   : > { %v7751_v25 = vpop.eup %7750  ;;  %v5553_v42 = vadd.f32 1e-05, %v5545_v5 }
0x2047   : > { %v7753_v35 = vpop.eup %7752  ;;  %v5592_v7 = vadd.f32 %v6796_v31, %v5577_v1  ;;  %v5565_v56 = vmul.f32 %v7751_v25, %v11488_v54  ;;  %5649 = vst.msk [vmem:[%s10702_s13 + $0x8] sm:$0xf] (!%p6797_p4), %vm5613_vm9, %v6828_v23 }
0x2048   : > { %v5566_v33 = vmul.f32 %v7753_v35, %v11491_v53  ;;  %7760 = vrsqrt.f32 %v5553_v42 }
0x2049   : > { %5601 = vst.msk [vmem:[#allocation3] sm:$0xff] %vm2670_vm2, %v5592_v7  ;;  %v5580_v62 = vmul.f32 %v6795_v51, %v5565_v56 }
0x204a   : > { %v7755_v61 = vpop.eup %7754  ;;  %v5581_v27 = vmul.f32 %v6795_v51, %v5566_v33 }
0x204b   : > { %v7757_v36 = vpop.eup %7756  ;;  %v5595_v20 = vadd.f32 %v6796_v31, %v5580_v62  ;;  %v5563_v21 = vmul.f32 %v7755_v61, %v11486_v13 }
0x204c   : > { %v5596_v37 = vadd.f32 %v6796_v31, %v5581_v27  ;;  %v5568_v28 = vmul.f32 %v7757_v36, %v11502_v44 }
0x204d   : > { %5604 = vst.msk [vmem:[#allocation3 + $0x18] sm:$0xff] %vm2670_vm2, %v5595_v20  ;;  %v5578_v18 = vmul.f32 %v6795_v51, %v5563_v21  ;;  %v6829_v43 = vpack.c.bf16 (!%p6797_p4), %v5595_v20, %v5595_v20 }
0x204e   : > { %v7759_v8 = vpop.eup %7758  ;;  %5605 = vst.msk [vmem:[#allocation3 + $0x20] sm:$0xff] %vm2670_vm2, %v5596_v37  ;;  %v5583_v54 = vmul.f32 %v6795_v51, %v5568_v28  ;;  %v6830_v12 = vpack.c.bf16 (!%p6797_p4), %v5596_v37, %v5596_v37 }
0x204f   : > { %v5593_v53 = vadd.f32 %v6796_v31, %v5578_v18  ;;  %v5567_v29 = vmul.f32 %v7759_v8, %v11497_v38  ;;  %v6826_v38 = vpack.c.bf16 (!%p6797_p4), %v5592_v7, %v5592_v7  ;;  %5650 = vst.msk [vmem:[%s10702_s13 + $0xc] sm:$0xf] (!%p6797_p4), %vm5613_vm9, %v6829_v43 }
0x2050   : > { %v5598_v46 = vadd.f32 %v6796_v31, %v5583_v54  ;;  %5651 = vst.msk [vmem:[%s10702_s13 + $0x10] sm:$0xf] (!%p6797_p4), %vm5613_vm9, %v6830_v12 }
0x2051   : > { %5602 = vst.msk [vmem:[#allocation3 + $0x8] sm:$0xff] %vm2670_vm2, %v5593_v53  ;;  %v5582_v55 = vmul.f32 %v6795_v51, %v5567_v29 }
0x2052   : > { %v7761_v47 = vpop.eup %7760  ;;  %5607 = vst.msk [vmem:[#allocation3 + $0x30] sm:$0xff] %vm2670_vm2, %v5598_v46  ;;  %v6832_v14 = vpack.c.bf16 (!%p6797_p4), %v5598_v46, %v5598_v46 }
0x2053   : > { %v5597_v13 = vadd.f32 %v6796_v31, %v5582_v55  ;;  %v5569_v44 = vmul.f32 %v7761_v47, %v11507_v50  ;;  %5612 = sbr.rel (%p6797_p4) target bundleno = 8284 (0x205c), region = 340  ;;  %v6827_v50 = vpack.c.bf16 (!%p6797_p4), %v5593_v53, %v5593_v53  ;;  %5647 = vst.msk [vmem:[%s10702_s13] sm:$0xf] (!%p6797_p4), %vm5613_vm9, %v6826_v38 }
0x2054   : > { %5653 = vst.msk [vmem:[%s10702_s13 + $0x18] sm:$0xf] (!%p6797_p4), %vm5613_vm9, %v6832_v14 }
0x2055   : > { %5606 = vst.msk [vmem:[#allocation3 + $0x28] sm:$0xff] %vm2670_vm2, %v5597_v13  ;;  %v5584_v16 = vmul.f32 %v6795_v51, %v5569_v44  ;;  %v6831_v24 = vpack.c.bf16 (!%p6797_p4), %v5597_v13, %v5597_v13 }
0x2056   : > { %5648 = vst.msk [vmem:[%s10702_s13 + $0x4] sm:$0xf] (!%p6797_p4), %vm5613_vm9, %v6827_v50 }
0x2057   : > { %v5599_v63 = vadd.f32 %v6796_v31, %v5584_v16  ;;  %5652 = vst.msk [vmem:[%s10702_s13 + $0x14] sm:$0xf] (!%p6797_p4), %vm5613_vm9, %v6831_v24 }
0x2059   : > { %5608 = vst.msk [vmem:[#allocation3 + $0x38] sm:$0xff] %vm2670_vm2, %v5599_v63  ;;  %v6833_v39 = vpack.c.bf16 (!%p6797_p4), %v5599_v63, %v5599_v63 }
0x205b   : > { %5654 = vst.msk [vmem:[%s10702_s13 + $0x1c] sm:$0xf] %vm5613_vm9, %v6833_v39 }
0x205c PF: > { %s11940_s17 = sld [smem:[#allocation134_spill]]  ;;  %s11941_s4 = sld [smem:[#allocation127_spill]] }
0x205d   : > { %s11942_s3 = sld [smem:[#allocation142_spill]]  ;;  %s5674_s1 = sshll.u32 %s10699_s12, 4  ;;  %s5675_s1 = int_to_ptr.vmem [resolvable:$true] %s5674_s1 }
0x205e   : > { %s5656_s19 = scalar_lea.sflag [#allocation6], %s10529_s2  ;;  %s8862_s5 = scalar_lea.vmem %s5675_s1, 64 }
0x205f   : > { %p8863_p6 = scmp.ne.s32.totalorder %s5675_s1, %s8862_s5  ;;  %s9183_s6 = smov [#allocation64]  }
0x2060   : > { %s8866_s28 = sshll.u32 %s9183_s6, 4  ;;  %s8867_s28 = int_to_ptr.vmem [resolvable:$false] %s8866_s28 }
0x2061   : > { %s8868_s30 = scalar_lea.vmem %s8867_s28, 128  ;;  %p8869_p9 = scmp.lt.s32.totalorder %s5675_s1, %s8867_s28 }
0x2062   : > { %s6808_s20 = sshll.u32 %s11940_s17, 6  ;;  %p8870_p2 = scmp.lt.s32.totalorder %s8868_s30, %s8862_s5 }
0x2063   : > { %s11559_s26 = scalar_lea.hbm %s11941_s4, %s6808_s20  ;;  %p11943_p5 = scmp.ne.s32.totalorder %s11942_s3, 0 }
0x2064   : > { %p8871_p11 = por %p8870_p2, %p8869_p9 }
0x2065   : > { %p8864_p1 = pnand %p8863_p6, %p11943_p5 }
0x2067   : > { %p8865_p7 = pneg %p8864_p1 }
0x2069   : > { %p8872_p13 = pnand %p8871_p11, %p8865_p7 }
0x206b   : > { %8875 = shalt.err (!%p8872_p13)
}
0x206c   : > { %s8876_s12 = scalar_lea.hbm %s11559_s26, 64  ;;  %s8880_s0 = scalar_lea.hbm %s11941_s4, 128 }
0x206d   : > { %p8877_p10 = scmp.ne.s32.totalorder %s11559_s26, %s8876_s12  ;;  %p8881_p8 = scmp.lt.u32.totalorder %s11559_s26, %s11941_s4 }
0x206e   : > { %p8882_p3 = scmp.lt.u32.totalorder %s8880_s0, %s8876_s12  ;;  %p8884_p6 = scmp.lt.u32.totalorder %s8876_s12, %s11559_s26 }
0x206f   : > { %p8878_p12 = pnand %p8877_p10, %p11943_p5 }
0x2070   : > { %p8883_p4 = por %p8882_p3, %p8881_p8 }
0x2071   : > { %p8879_p0 = pneg %p8878_p12 }
0x2072   : > { %p8885_p1 = por %p8884_p6, %p8883_p4 }
0x2074   : > { %p8886_p7 = pnand %p8885_p1, %p8879_p0 }
0x2076   : > { %8889 = shalt.err (!%p8886_p7)
}
0x2077   : > { %s11944_s10 = sld [smem:[#allocation128_spill]]  ;;  %s6834_s15 = sshll.u32 %s11940_s17, 9 }
0x2078   : > { %7397 = dma.vmem_to_hbm [thread:$0]  (%p11943_p5), %s5675_s1, 64, %s11559_s26, %s5656_s19  }
0x2079   : > { %s5687_s9 = sshll.u32 %s10702_s13, 4  ;;  %s5661_s14 = scalar_lea.sflag [#allocation66], %s10529_s2  ;;  %s11581_s9 = int_to_ptr.vmem [resolvable:$true] %s5687_s9 }
0x207a   : > { %s8890_s20 = scalar_lea.vmem %s11581_s9, 512  ;;  %s9184_s5 = smov [#allocation65]  }
0x207b   : > { %p8891_p9 = scmp.ne.s32.totalorder %s11581_s9, %s8890_s20  ;;  %s8894_s6 = sshll.u32 %s9184_s5, 4  ;;  %s8895_s6 = int_to_ptr.vmem [resolvable:$false] %s8894_s6 }
0x207c   : > { %s8896_s28 = scalar_lea.vmem %s8895_s6, 1024  ;;  %p8897_p13 = scmp.lt.s32.totalorder %s11581_s9, %s8895_s6 }
0x207d   : > { %s11945_s8 = smov %s11944_s10  ;;  %s11579_s11 = scalar_lea.hbm %s11944_s10, %s6834_s15 }
0x207e   : > { %p8892_p2 = pnand %p8891_p9, %p11943_p5  ;;  %p8898_p10 = scmp.lt.s32.totalorder %s8896_s28, %s8890_s20 }
0x2080   : > { %p8893_p11 = pneg %p8892_p2  ;;  %p8899_p12 = por %p8898_p10, %p8897_p13 }
0x2082   : > { %p8900_p0 = pnand %p8899_p12, %p8893_p11 }
0x2084   : > { %8903 = shalt.err (!%p8900_p0)
}
0x2085   : > { %s8904_s13 = scalar_lea.hbm %s11579_s11, 512  ;;  %s8908_s17 = scalar_lea.hbm %s11945_s8, 1024 }
0x2086   : > { %p8905_p8 = scmp.ne.s32.totalorder %s11579_s11, %s8904_s13  ;;  %p8909_p6 = scmp.lt.u32.totalorder %s11579_s11, %s11945_s8 }
0x2087   : > { %p8910_p1 = scmp.lt.u32.totalorder %s8908_s17, %s8904_s13  ;;  %p8912_p9 = scmp.lt.u32.totalorder %s8904_s13, %s11579_s11 }
0x2088   : > { %p8906_p3 = pnand %p8905_p8, %p11943_p5 }
0x2089   : > { %p8911_p7 = por %p8910_p1, %p8909_p6 }
0x208a   : > { %p8907_p4 = pneg %p8906_p3 }
0x208b   : > { %p8913_p2 = por %p8912_p9, %p8911_p7 }
0x208d   : > { %p8914_p11 = pnand %p8913_p2, %p8907_p4 }
0x208f   : > { %8917 = shalt.err (!%p8914_p11)
}
0x2090   : > { %s9185_s26 = smov 64   ;;  %s9186_s1 = smov 4  }
0x2091   : > { %7398 = dma.vmem_to_hbm [thread:$0]  (%p11943_p5), %s11581_s9, 512, %s11579_s11, %s5661_s14, %s9185_s26, %s9185_s26, %s9186_s1  }
0x2092 PF: > { %s11946_s19 = sld [smem:[#allocation131_spill]]  ;;  %s11947_s30 = sld [smem:[#allocation143_spill]] }
0x2093   : > { %p7408_p13 = scmp.ge.s32.totalorder %s9092_s22, 2 }
0x2098   : > { %s5702_s12 = sand.u32 1, %s11946_s19   ;;  %p11948_p10 = scmp.ne.s32.totalorder %s11947_s30, 0 }
0x2099   : > { %s5703_s0 = scalar_lea.sflag [#allocation6], %s5702_s12 }
0x209a   : > { %p7402_p12 = pnand %p7408_p13, %p11948_p10 }
0x209c   : > { %9043 = dma.done.wait (!%p7402_p12), %s5703_s0, 64  }
0x209d   : > { %9045 = vsyncadd (!%p7402_p12), %s5703_s0, 4294967232  ;;  %s5712_s10 = scalar_lea.sflag [#allocation66], %s5702_s12 }
0x209e   : > { %9047 = dma.done.wait (!%p7402_p12), %s5712_s10, 512  }
0x209f   : > { %9049 = vsyncadd (!%p7402_p12), %s5712_s10, 4294966784  ;;  %s158_s22 = sadd.s32 1, %s9092_s22   ;;  %s11949_s0 = sld [smem:[#allocation129_spill]] }
0x20a0   : > { %p155_p0 = scmp.ge.s32.totalorder %s158_s22, 6   ;;  %s11950_s28 = sld [smem:[#allocation130_spill]] }
0x20a1   : > { %s11951_s1 = sld [smem:[#allocation139_spill]]  ;;  %s11952_s3 = sld [smem:[#allocation132_spill]] }
0x20a2   : > { %s11953_s10 = sld [smem:[#allocation140_spill]]  ;;  %s11954_s9 = sld [smem:[#allocation136_spill]] }
0x20a3   : > { %s11955_s14 = sld [smem:[#allocation137_spill]]  ;;  %s11956_s2 = smov %s9068_s7 }
0x20a4   : > { %s11958_s11 = smov %s9084_s16  ;;  %s11959_s15 = smov %s9088_s18 }
0x20a5   :  { %157 = sbr.rel (!%p155_p0) target bundleno = 133 (0x85), region = 742 }
0x20a7   : > { %s11957_s7 = smov %s11952_s3 }
0x20a8   : > { %s11960_s16 = smov %s11954_s9 }
0x20a9   : > { %s11961_s18 = smov %s11955_s14 }
0x20ac   :  { %5717 = vsyncpa [#allocation5], 1 }
0x20ad   :  { %5719 = vsyncpa [#allocation5 + $0x1], 1 }
0x20ae   :  { %5720 = vsyncpa [#allocation8], 1 }
0x20af   :  { %5722 = vsyncpa [#allocation8 + $0x1], 1 }
0x20b0   :  { %5723 = vsyncpa [#allocation11], 1 }
0x20b1   :  { %5725 = vsyncpa [#allocation11 + $0x1], 1 }
0x20b2   :  { %5726 = vsyncpa [#allocation14], 1 }
0x20b3   :  { %5728 = vsyncpa [#allocation14 + $0x1], 1 }
0x20b4   :  { %5729 = vsyncpa [#allocation17], 1 }
0x20b5   :  { %5731 = vsyncpa [#allocation17 + $0x1], 1 }
0x20b6   :  { %5732 = vsyncpa [#allocation20], 1 }
0x20b7   :  { %5734 = vsyncpa [#allocation20 + $0x1], 1 }
0x20b8   :  { %5735 = vsyncpa [#allocation23], 1 }
0x20b9   :  { %5737 = vsyncpa [#allocation23 + $0x1], 1 }
0x20ba   :  { %5738 = vsyncpa [#allocation26], 1 }
0x20bb   :  { %5740 = vsyncpa [#allocation26 + $0x1], 1 }
0x20bc   :  { %5741 = vsyncpa [#allocation29], 1 }
0x20bd   :  { %5743 = vsyncpa [#allocation29 + $0x1], 1 }
0x20be   :  { %5744 = vsyncpa [#allocation32], 1 }
0x20bf   :  { %5746 = vsyncpa [#allocation32 + $0x1], 1 }
0x20c0   :  { %5747 = vsyncpa [#allocation35], 1 }
0x20c1   :  { %5749 = vsyncpa [#allocation35 + $0x1], 1 }
0x20c2   :  { %5750 = vsyncpa [#allocation38], 1 }
0x20c3   :  { %5752 = vsyncpa [#allocation38 + $0x1], 1 }
0x20c4   :  { %5753 = vsyncpa [#allocation41], 1 }
0x20c5   :  { %5755 = vsyncpa [#allocation41 + $0x1], 1 }
0x20c6   :  { %5756 = vsyncpa [#allocation44], 1 }
0x20c7   :  { %5758 = vsyncpa [#allocation44 + $0x1], 1 }
0x20c8   :  { %5759 = vsyncpa [#allocation47], 1 }
0x20c9   :  { %5761 = vsyncpa [#allocation47 + $0x1], 1 }
0x20ca   :  { %5762 = vsyncpa [#allocation50], 1 }
0x20cb   :  { %5764 = vsyncpa [#allocation50 + $0x1], 1 }
0x20cc   :  { %5765 = vsyncpa [#allocation53], 1 }
0x20cd   :  { %5767 = vsyncpa [#allocation53 + $0x1], 1 }
0x20ce   :  { %5768 = vsyncpa [#allocation56], 1 }
0x20cf   :  { %5770 = vsyncpa [#allocation56 + $0x1], 1 }
0x20d0   :  { %5771 = vsyncpa [#allocation59], 1 }
0x20d1   :  { %5773 = vsyncpa [#allocation59 + $0x1], 1 }
0x20d2   :  { %5774 = vsyncpa [#allocation62], 1 }
0x20d3   :  { %5776 = vsyncpa [#allocation62 + $0x1], 1 }
0x20d4   :  { %5777 = vsyncpa [#allocation6], 1 }
0x20d5   :  { %5779 = vsyncpa [#allocation6 + $0x1], 1 }
0x20d6   :  { %5780 = vsyncpa [#allocation66], 1 }
0x20d7   :  { %5782 = vsyncpa [#allocation66 + $0x1], 1 }

</bundles_post_ra>
